<compile_context>
chip_gen: v7x
topology: tpu7x:2x2x1
jax: 0.10.0
libtpu: 0.0.40
codegen_flags: <defaults>
</compile_context>

<pallas_src>
import functools

import jax
import jax.numpy as jnp
from jax.experimental import pallas as pl
from jax.experimental.pallas import tpu as pltpu

_NEG_INF = -1e30


def _flash_dual_kernel(gamma_ref,            # SMEM (2,): [gamma_pam, gamma_cam]
                       xq_ref,               # (1, C,  tq) bf16  input tile (residual + CAM rhs)
                       q_ref,                # (1, Cq, tq) bf16  query projection tile
                       kT_ref,               # (1, tk, Cq) bf16  key projection tile (pre-transposed)
                       v_ref,                # (1, C,  tk) bf16  value projection tile
                       ac_ref,               # (1, C,  C)  bf16  CAM channel attention
                       o_ref,                # (1, C,  tq)
                       m_scr, l_scr,         # (1, tq) f32  online-softmax stats
                       acc_scr,              # (C, tq) f32  PAM accumulator
                       *, n_valid):
    ki = pl.program_id(2)
    last = ki == pl.num_programs(2) - 1

    # per-(batch, query-tile) init
    @pl.when(ki == 0)
    def _():
        m_scr[...] = jnp.full_like(m_scr, _NEG_INF)
        l_scr[...] = jnp.zeros_like(l_scr)
        acc_scr[...] = jnp.zeros_like(acc_scr)

    kT = kT_ref[0]                                    # (tk, Cq)
    tk = kT.shape[0]

    # Energy tile: keys on sublanes, queries on lanes -> softmax stats
    # broadcast with no transposes; canonical MXU operand order.
    e = jnp.dot(kT, q_ref[0], preferred_element_type=jnp.float32)    # (tk, tq)

    # PAM: flash-style online softmax over key tiles.
    m_prev = m_scr[...]
    m_new = jnp.maximum(m_prev, jnp.max(e, axis=0, keepdims=True))
    alpha = jnp.exp(m_prev - m_new)
    p = jnp.exp(e - m_new)                                            # (tk, tq) f32
    if n_valid is not None:
        # Zero padded-key probabilities with a (tk,1) column mask.  The
        # running max may include padded (bias-only) energies, which is
        # numerically safe: it only has to be an upper bound for stability.
        key_pos = ki * tk + jax.lax.broadcasted_iota(jnp.int32, (tk, 1), 0)
        p = p * (key_pos < n_valid).astype(p.dtype)
    l_scr[...] = alpha * l_scr[...] + jnp.sum(p, axis=0, keepdims=True)
    acc_scr[...] = alpha * acc_scr[...] + jnp.dot(
        v_ref[0], p.astype(jnp.bfloat16), preferred_element_type=jnp.float32)
    m_scr[...] = m_new

    # finalize this (batch, query-tile) output
    @pl.when(last)
    def _():
        gp = gamma_ref[0]
        gc = gamma_ref[1]
        x_q = xq_ref[0]                                               # (C, tq) bf16
        out_pam = acc_scr[...] * pl.reciprocal(l_scr[...], approx=True)
        out_cam = jnp.dot(ac_ref[0], x_q, preferred_element_type=jnp.float32)
        o_ref[0] = (gp * out_pam + gc * out_cam
                    + 2.0 * x_q.astype(jnp.float32)).astype(o_ref.dtype)


def dual_module(x, params):
    """x: (B, C, H, W).  params: see init_params."""
    B, C, H, W = x.shape
    N = H * W
    Cq = params["wq"].shape[0]
    f32, bf16 = jnp.float32, jnp.bfloat16

    # ---- tiling: pad N up to a multiple of 512; lane-dense output tiles ----
    tk = 512
    n_pad = pl.cdiv(N, tk) * tk
    tq = 1024 if n_pad % 1024 == 0 else tk            # bigger query tiles when possible
    n_q = n_pad // tq
    n_k = n_pad // tk

    x_flat = x.reshape(B, C, N)
    if n_pad != N:
        x_flat = jnp.pad(x_flat, ((0, 0), (0, 0), (0, n_pad - N)))
    xb = x_flat.astype(bf16)

    # ---- one-shot prep (plain XLA, once per image): 1x1-conv projections and
    # the (C,C) CAM channel attention.  Hoisting these removes the per-query-
    # tile V/K recompute from the flash kernel and removes the cross-tile
    # gram dependency, so the query-tile grid axis can be megacore-parallel.
    wq = params["wq"].astype(bf16)
    wk = params["wk"].astype(bf16)
    wv = params["wv"].astype(bf16)
    q = (jnp.einsum("oc,bcn->bon", wq, xb, preferred_element_type=f32)
         + params["bq"][None]).astype(bf16)                      # (B, Cq, n_pad)
    k = (jnp.einsum("oc,bcn->bon", wk, xb, preferred_element_type=f32)
         + params["bk"][None]).astype(bf16)                      # (B, Cq, n_pad)
    v = (jnp.einsum("oc,bcn->bon", wv, xb, preferred_element_type=f32)
         + params["bv"][None]).astype(bf16)                      # (B, C,  n_pad)
    kT = jnp.swapaxes(k, 1, 2)                                   # (B, n_pad, Cq)

    # CAM: gram on zero-padded x equals gram on the valid positions.
    ec = jnp.einsum("bcn,bdn->bcd", xb, xb, preferred_element_type=f32)
    en = jnp.max(ec, axis=-1, keepdims=True) - ec
    p2 = jnp.exp(en - jnp.max(en, axis=-1, keepdims=True))
    ac = (p2 / jnp.sum(p2, axis=-1, keepdims=True)).astype(bf16)  # (B, C, C)

    gammas = jnp.stack([params["gp"].reshape(()),
                        params["gc"].reshape(())]).astype(f32)

    # ---- generation-aware VMEM budget (64 MiB on v7x, 128 MiB on v5e/v6e) ----
    try:
        vmem_cap = int(pltpu.get_tpu_info().vmem_capacity_bytes)
    except Exception:
        vmem_cap = 64 * 1024 * 1024
    vmem_limit = max(min(vmem_cap - 8 * 1024 * 1024, 100 * 1024 * 1024),
                     32 * 1024 * 1024)

    kernel = functools.partial(_flash_dual_kernel,
                               n_valid=None if n_pad == N else N)

    out = pl.pallas_call(
        kernel,
        out_shape=jax.ShapeDtypeStruct((B, C, n_pad), x.dtype),
        grid_spec=pltpu.PrefetchScalarGridSpec(
            num_scalar_prefetch=0,
            grid=(B, n_q, n_k),
            in_specs=[
                pl.BlockSpec(memory_space=pltpu.MemorySpace.SMEM),          # gammas
                pl.BlockSpec((1, C, tq), lambda b, qi, ki: (b, 0, qi)),     # x    (query tile)
                pl.BlockSpec((1, Cq, tq), lambda b, qi, ki: (b, 0, qi)),    # q    (query tile)
                pl.BlockSpec((1, tk, Cq), lambda b, qi, ki: (b, ki, 0)),    # k^T  (key tile)
                pl.BlockSpec((1, C, tk), lambda b, qi, ki: (b, 0, ki)),     # v    (key tile)
                pl.BlockSpec((1, C, C), lambda b, qi, ki: (b, 0, 0)),       # CAM attention
            ],
            out_specs=pl.BlockSpec((1, C, tq), lambda b, qi, ki: (b, 0, qi)),
            scratch_shapes=[
                pltpu.VMEM((1, tq), jnp.float32),   # running max
                pltpu.VMEM((1, tq), jnp.float32),   # running sum
                pltpu.VMEM((C, tq), jnp.float32),   # PAM accumulator
            ]),
        compiler_params=pltpu.CompilerParams(
            dimension_semantics=("parallel", "parallel", "arbitrary"),
            vmem_limit_bytes=vmem_limit),
    )(gammas, xb, q, kT, v, ac)

    if n_pad != N:
        out = out[:, :, :N]
    return out.reshape(B, C, H, W)


def dual_module_ref_f32(x, p):
    """Pure-f32 JAX reference matching the PyTorch forward semantics."""
    B, C, H, W = x.shape
    N = H * W
    xf = x.reshape(B, C, N).astype(jnp.float32)
    q = jnp.einsum("oc,bcn->bon", p["wq"], xf) + p["bq"][None]
    k = jnp.einsum("oc,bcn->bon", p["wk"], xf) + p["bk"][None]
    v = jnp.einsum("oc,bcn->bon", p["wv"], xf) + p["bv"][None]
    attn = jax.nn.softmax(jnp.einsum("bcn,bcm->bnm", q, k), axis=-1)
    out_pam = jnp.einsum("bcm,bnm->bcn", v, attn)
    e = jnp.einsum("bcn,bdn->bcd", xf, xf)
    attn_c = jax.nn.softmax(jnp.max(e, axis=-1, keepdims=True) - e, axis=-1)
    out_cam = jnp.einsum("bcd,bdn->bcn", attn_c, xf)
    out = p["gp"][0, 0] * out_pam + p["gc"][0, 0] * out_cam + 2.0 * xf
    return out.reshape(B, C, H, W)


def dual_module_ref_bf16(x, p):
    """Reference with the same bf16 MXU-operand casts the kernel/prep perform
    (f32 accumulation / softmax statistics) for a tight numerical check."""
    f32, bf16 = jnp.float32, jnp.bfloat16
    B, C, H, W = x.shape
    N = H * W
    xb = x.reshape(B, C, N).astype(bf16)
    wq, wk, wv = (p[n].astype(bf16) for n in ("wq", "wk", "wv"))
    q = (jnp.einsum("oc,bcn->bon", wq, xb, preferred_element_type=f32) + p["bq"][None]).astype(bf16)
    k = (jnp.einsum("oc,bcn->bon", wk, xb, preferred_element_type=f32) + p["bk"][None]).astype(bf16)
    v = (jnp.einsum("oc,bcn->bon", wv, xb, preferred_element_type=f32) + p["bv"][None]).astype(bf16)
    e = jnp.einsum("bcn,bcm->bnm", q, k, preferred_element_type=f32)
    pe = jnp.exp(e - jnp.max(e, axis=-1, keepdims=True))
    l = jnp.sum(pe, axis=-1, keepdims=True)                         # (B, N, 1)
    out_pam = jnp.einsum("bcm,bnm->bcn", v, pe.astype(bf16),
                         preferred_element_type=f32) / jnp.swapaxes(l, 1, 2)
    ec = jnp.einsum("bcn,bdn->bcd", xb, xb, preferred_element_type=f32)
    en = jnp.max(ec, axis=-1, keepdims=True) - ec
    p2 = jnp.exp(en - jnp.max(en, axis=-1, keepdims=True))
    attn_c = (p2 / jnp.sum(p2, axis=-1, keepdims=True)).astype(bf16)
    out_cam = jnp.einsum("bcd,bdn->bcn", attn_c, xb, preferred_element_type=f32)
    out = (p["gp"][0, 0] * out_pam + p["gc"][0, 0] * out_cam + 2.0 * xb.astype(f32))
    return out.reshape(B, C, H, W)


def init_params(key, in_dim):
    """Deterministic synthetic params.  Conv2d 1x1 weights (out,in,1,1) kept as
    (out,in); biases as (out,1) for lane-broadcast.  NOTE: the PyTorch module
    initializes gamma to 0 (which reduces the forward to 2*x); nonzero gammas
    are used so both attention paths are exercised."""
    cq = in_dim // 8
    k = jax.random.split(key, 6)
    s = 0.1
    return {
        "wq": s * jax.random.normal(k[0], (cq, in_dim), jnp.float32),
        "bq": s * jax.random.normal(k[1], (cq, 1), jnp.float32),
        "wk": s * jax.random.normal(k[2], (cq, in_dim), jnp.float32),
        "bk": s * jax.random.normal(k[3], (cq, 1), jnp.float32),
        "wv": s * jax.random.normal(k[4], (in_dim, in_dim), jnp.float32),
        "bv": s * jax.random.normal(k[5], (in_dim, 1), jnp.float32),
        "gp": jnp.full((1, 1), 0.7, jnp.float32),
        "gc": jnp.full((1, 1), 0.3, jnp.float32),
    }


if __name__ == "__main__":
    B, C, H, W = 2, 16, 8, 8          # in_dim = 16 -> query/key channels = 2
    key = jax.random.PRNGKey(0)
    kx, kp = jax.random.split(key)
    x = jax.random.normal(kx, (B, C, H, W), jnp.float32)
    params = init_params(kp, C)

    out = jax.block_until_ready(dual_module(x, params))
    assert out.shape == (B, C, H, W)

    ref_m = dual_module_ref_bf16(x, params)   # numerics-matched (bf16 MXU) reference
    ref_f = dual_module_ref_f32(x, params)    # pure-f32 PyTorch-semantics reference
    err_m = float(jnp.max(jnp.abs(out - ref_m)))
    err_f = float(jnp.max(jnp.abs(out - ref_f)))
    assert jnp.allclose(out, ref_m, rtol=1e-2, atol=1e-2), f"matched-ref max err {err_m}"
    assert jnp.allclose(out, ref_f, rtol=5e-2, atol=5e-2), f"f32-ref max err {err_f}"
    print("KERNEL_OK")
</pallas_src>

<mosaic_0001>
module attributes {stable_mosaic.version = 11 : i64} {
  func.func @_flash_dual_kernel(%arg0: i32, %arg1: i32, %arg2: i32, %arg3: memref<2xf32, #tpu.memory_space<smem>>, %arg4: memref<1x16x512xbf16, #tpu.memory_space<vmem>>, %arg5: memref<1x2x512xbf16, #tpu.memory_space<vmem>>, %arg6: memref<1x512x2xbf16, #tpu.memory_space<vmem>>, %arg7: memref<1x16x512xbf16, #tpu.memory_space<vmem>>, %arg8: memref<1x16x16xbf16, #tpu.memory_space<vmem>>, %arg9: memref<1x16x512xf32, #tpu.memory_space<vmem>>, %arg10: memref<1x512xf32, #tpu.memory_space<vmem>>, %arg11: memref<1x512xf32, #tpu.memory_space<vmem>>, %arg12: memref<16x512xf32, #tpu.memory_space<vmem>>) attributes {dimension_semantics = [#tpu.dimension_semantics<parallel>, #tpu.dimension_semantics<parallel>, #tpu.dimension_semantics<arbitrary>], iteration_bounds = array<i64: 2, 1, 1>, scalar_prefetch = 0 : i64, scratch_operands = 3 : i64, tpu.core_type = #tpu.core_type<tc>, window_params = [{transform_indices = @transform_0, window_bounds = array<i64: 2>}, {transform_indices = @transform_1, window_bounds = array<i64: 1, 16, 512>}, {transform_indices = @transform_2, window_bounds = array<i64: 1, 2, 512>}, {transform_indices = @transform_3, window_bounds = array<i64: 1, 512, 2>}, {transform_indices = @transform_4, window_bounds = array<i64: 1, 16, 512>}, {transform_indices = @transform_5, window_bounds = array<i64: 1, 16, 16>}, {transform_indices = @transform_6, window_bounds = array<i64: 1, 16, 512>}]} {
    %c0_i32 = arith.constant 0 : i32
    %0 = arith.cmpi eq, %arg2, %c0_i32 : i32
    %c0_i32_0 = arith.constant 0 : i32
    %1 = arith.cmpi eq, %arg2, %c0_i32_0 : i32
    %2 = arith.extui %1 : i1 to i32
    %c0_i32_1 = arith.constant 0 : i32
    %3 = arith.cmpi ne, %2, %c0_i32_1 : i32
    scf.if %3 {
      %cst_26 = arith.constant -1.000000e+30 : f32
      %46 = vector.broadcast %cst_26 : f32 to vector<1x512xf32>
      %c0_27 = arith.constant 0 : index
      %c0_28 = arith.constant 0 : index
      %47 = vector.load %arg10[%c0_27, %c0_28] : memref<1x512xf32, #tpu.memory_space<vmem>>, vector<1x512xf32>
      tpu.vector_store %arg10[%c0_27, %c0_28], %46 {strides = array<i32>} : memref<1x512xf32, #tpu.memory_space<vmem>>, vector<1x512xf32>,
      %cst_29 = arith.constant 0.000000e+00 : f32
      %48 = vector.broadcast %cst_29 : f32 to vector<1x512xf32>
      %c0_30 = arith.constant 0 : index
      %c0_31 = arith.constant 0 : index
      %49 = vector.load %arg11[%c0_30, %c0_31] : memref<1x512xf32, #tpu.memory_space<vmem>>, vector<1x512xf32>
      tpu.vector_store %arg11[%c0_30, %c0_31], %48 {strides = array<i32>} : memref<1x512xf32, #tpu.memory_space<vmem>>, vector<1x512xf32>,
      %cst_32 = arith.constant 0.000000e+00 : f32
      %50 = vector.broadcast %cst_32 : f32 to vector<16x512xf32>
      %c0_33 = arith.constant 0 : index
      %c0_34 = arith.constant 0 : index
      %51 = vector.load %arg12[%c0_33, %c0_34] : memref<16x512xf32, #tpu.memory_space<vmem>>, vector<16x512xf32>
      tpu.vector_store %arg12[%c0_33, %c0_34], %50 {strides = array<i32>} : memref<16x512xf32, #tpu.memory_space<vmem>>, vector<16x512xf32>,
    } else {
    }
    %c0 = arith.constant 0 : index
    %c0_2 = arith.constant 0 : index
    %c0_3 = arith.constant 0 : index
    %4 = vector.load %arg6[%c0, %c0_2, %c0_3] : memref<1x512x2xbf16, #tpu.memory_space<vmem>>, vector<1x512x2xbf16>
    %5 = vector.shape_cast %4 : vector<1x512x2xbf16> to vector<512x2xbf16>
    %c0_4 = arith.constant 0 : index
    %c0_5 = arith.constant 0 : index
    %c0_6 = arith.constant 0 : index
    %6 = vector.load %arg5[%c0_4, %c0_5, %c0_6] : memref<1x2x512xbf16, #tpu.memory_space<vmem>>, vector<1x2x512xbf16>
    %7 = vector.shape_cast %6 : vector<1x2x512xbf16> to vector<2x512xbf16>
    %cst = arith.constant dense<0.000000e+00> : vector<512x512xf32>
    %8 = tpu.matmul %5, %7, %cst {dimension_numbers = #tpu.dot_dimension_numbers<[1], [0], [0], [1], [0, 0, 1, 1], [], []>} : vector<512x2xbf16>, vector<2x512xbf16>, vector<512x512xf32> -> vector<512x512xf32>
    %c0_7 = arith.constant 0 : index
    %c0_8 = arith.constant 0 : index
    %9 = vector.load %arg10[%c0_7, %c0_8] : memref<1x512xf32, #tpu.memory_space<vmem>>, vector<1x512xf32>
    %cst_9 = arith.constant dense<0xFF800000> : vector<512xf32>
    %10 = vector.multi_reduction <maximumf>, %8, %cst_9 [0] : vector<512x512xf32> to vector<512xf32>
    %11 = vector.shape_cast %10 : vector<512xf32> to vector<1x512xf32>
    %12 = arith.maximumf %9, %11 : vector<1x512xf32>
    %13 = arith.subf %9, %12 : vector<1x512xf32>
    %14 = math.exp %13 : vector<1x512xf32>
    %15 = vector.broadcast %12 : vector<1x512xf32> to vector<512x512xf32>
    %16 = arith.subf %8, %15 : vector<512x512xf32>
    %17 = math.exp %16 : vector<512x512xf32>
    %c512_i32 = arith.constant 512 : i32
    %18 = arith.muli %arg2, %c512_i32 : i32
    %19 = tpu.iota {dimensions = array<i32: 0>} : vector<512x1xi32>
    %20 = vector.broadcast %18 : i32 to vector<512x1xi32>
    %21 = arith.addi %20, %19 : vector<512x1xi32>
    %c64_i32 = arith.constant 64 : i32
    %22 = vector.broadcast %c64_i32 : i32 to vector<512x1xi32>
    %23 = arith.cmpi slt, %21, %22 : vector<512x1xi32>
    %24 = arith.extui %23 : vector<512x1xi1> to vector<512x1xi32>
    %25 = arith.sitofp %24 : vector<512x1xi32> to vector<512x1xf32>
    %26 = vector.broadcast %25 : vector<512x1xf32> to vector<512x512xf32>
    %27 = arith.mulf %17, %26 : vector<512x512xf32>
    %c0_10 = arith.constant 0 : index
    %c0_11 = arith.constant 0 : index
    %28 = vector.load %arg11[%c0_10, %c0_11] : memref<1x512xf32, #tpu.memory_space<vmem>>, vector<1x512xf32>
    %29 = arith.mulf %14, %28 : vector<1x512xf32>
    %cst_12 = arith.constant dense<0.000000e+00> : vector<512xf32>
    %30 = vector.multi_reduction <add>, %27, %cst_12 [0] : vector<512x512xf32> to vector<512xf32>
    %31 = vector.shape_cast %30 : vector<512xf32> to vector<1x512xf32>
    %32 = arith.addf %29, %31 : vector<1x512xf32>
    %c0_13 = arith.constant 0 : index
    %c0_14 = arith.constant 0 : index
    %33 = vector.load %arg11[%c0_13, %c0_14] : memref<1x512xf32, #tpu.memory_space<vmem>>, vector<1x512xf32>
    tpu.vector_store %arg11[%c0_13, %c0_14], %32 {strides = array<i32>} : memref<1x512xf32, #tpu.memory_space<vmem>>, vector<1x512xf32>,
    %c0_15 = arith.constant 0 : index
    %c0_16 = arith.constant 0 : index
    %34 = vector.load %arg12[%c0_15, %c0_16] : memref<16x512xf32, #tpu.memory_space<vmem>>, vector<16x512xf32>
    %35 = vector.broadcast %14 : vector<1x512xf32> to vector<16x512xf32>
    %36 = arith.mulf %35, %34 : vector<16x512xf32>
    %c0_17 = arith.constant 0 : index
    %c0_18 = arith.constant 0 : index
    %c0_19 = arith.constant 0 : index
    %37 = vector.load %arg7[%c0_17, %c0_18, %c0_19] : memref<1x16x512xbf16, #tpu.memory_space<vmem>>, vector<1x16x512xbf16>
    %38 = vector.shape_cast %37 : vector<1x16x512xbf16> to vector<16x512xbf16>
    %39 = arith.truncf %27 : vector<512x512xf32> to vector<512x512xbf16>
    %cst_20 = arith.constant dense<0.000000e+00> : vector<16x512xf32>
    %40 = tpu.matmul %38, %39, %cst_20 {dimension_numbers = #tpu.dot_dimension_numbers<[1], [0], [0], [1], [0, 0, 1, 1], [], []>} : vector<16x512xbf16>, vector<512x512xbf16>, vector<16x512xf32> -> vector<16x512xf32>
    %41 = arith.addf %36, %40 : vector<16x512xf32>
    %c0_21 = arith.constant 0 : index
    %c0_22 = arith.constant 0 : index
    %42 = vector.load %arg12[%c0_21, %c0_22] : memref<16x512xf32, #tpu.memory_space<vmem>>, vector<16x512xf32>
    tpu.vector_store %arg12[%c0_21, %c0_22], %41 {strides = array<i32>} : memref<16x512xf32, #tpu.memory_space<vmem>>, vector<16x512xf32>,
    %c0_23 = arith.constant 0 : index
    %c0_24 = arith.constant 0 : index
    %43 = vector.load %arg10[%c0_23, %c0_24] : memref<1x512xf32, #tpu.memory_space<vmem>>, vector<1x512xf32>
    tpu.vector_store %arg10[%c0_23, %c0_24], %12 {strides = array<i32>} : memref<1x512xf32, #tpu.memory_space<vmem>>, vector<1x512xf32>,
    %44 = arith.extui %0 : i1 to i32
    %c0_i32_25 = arith.constant 0 : i32
    %45 = arith.cmpi ne, %44, %c0_i32_25 : i32
    scf.if %45 {
      %c0_26 = arith.constant 0 : index
      %46 = memref.load %arg3[%c0_26] : memref<2xf32, #tpu.memory_space<smem>>
      %c1 = arith.constant 1 : index
      %47 = memref.load %arg3[%c1] : memref<2xf32, #tpu.memory_space<smem>>
      %c0_27 = arith.constant 0 : index
      %c0_28 = arith.constant 0 : index
      %c0_29 = arith.constant 0 : index
      %48 = vector.load %arg4[%c0_27, %c0_28, %c0_29] : memref<1x16x512xbf16, #tpu.memory_space<vmem>>, vector<1x16x512xbf16>
      %49 = vector.shape_cast %48 : vector<1x16x512xbf16> to vector<16x512xbf16>
      %c0_30 = arith.constant 0 : index
      %c0_31 = arith.constant 0 : index
      %50 = vector.load %arg12[%c0_30, %c0_31] : memref<16x512xf32, #tpu.memory_space<vmem>>, vector<16x512xf32>
      %c0_32 = arith.constant 0 : index
      %c0_33 = arith.constant 0 : index
      %51 = vector.load %arg11[%c0_32, %c0_33] : memref<1x512xf32, #tpu.memory_space<vmem>>, vector<1x512xf32>
      %52 = tpu.reciprocal %51 {approx = true} : vector<1x512xf32> -> vector<1x512xf32>
      %53 = vector.broadcast %52 : vector<1x512xf32> to vector<16x512xf32>
      %54 = arith.mulf %50, %53 : vector<16x512xf32>
      %c0_34 = arith.constant 0 : index
      %c0_35 = arith.constant 0 : index
      %c0_36 = arith.constant 0 : index
      %55 = vector.load %arg8[%c0_34, %c0_35, %c0_36] : memref<1x16x16xbf16, #tpu.memory_space<vmem>>, vector<1x16x16xbf16>
      %56 = vector.shape_cast %55 : vector<1x16x16xbf16> to vector<16x16xbf16>
      %cst_37 = arith.constant dense<0.000000e+00> : vector<16x512xf32>
      %57 = tpu.matmul %56, %49, %cst_37 {dimension_numbers = #tpu.dot_dimension_numbers<[1], [0], [0], [1], [0, 0, 1, 1], [], []>} : vector<16x16xbf16>, vector<16x512xbf16>, vector<16x512xf32> -> vector<16x512xf32>
      %58 = vector.broadcast %46 : f32 to vector<16x512xf32>
      %59 = arith.mulf %58, %54 : vector<16x512xf32>
      %60 = vector.broadcast %47 : f32 to vector<16x512xf32>
      %61 = arith.mulf %60, %57 : vector<16x512xf32>
      %62 = arith.addf %59, %61 : vector<16x512xf32>
      %63 = arith.extf %49 : vector<16x512xbf16> to vector<16x512xf32>
      %cst_38 = arith.constant 2.000000e+00 : f32
      %64 = vector.broadcast %cst_38 : f32 to vector<16x512xf32>
      %65 = arith.mulf %64, %63 : vector<16x512xf32>
      %66 = arith.addf %62, %65 : vector<16x512xf32>
      %c0_39 = arith.constant 0 : index
      %c0_40 = arith.constant 0 : index
      %c0_41 = arith.constant 0 : index
      %67 = vector.load %arg9[%c0_39, %c0_40, %c0_41] : memref<1x16x512xf32, #tpu.memory_space<vmem>>, vector<1x16x512xf32>
      %68 = vector.shape_cast %67 : vector<1x16x512xf32> to vector<16x512xf32>
      %69 = vector.shape_cast %66 : vector<16x512xf32> to vector<1x16x512xf32>
      tpu.vector_store %arg9[%c0_39, %c0_40, %c0_41], %69 {strides = array<i32>} : memref<1x16x512xf32, #tpu.memory_space<vmem>>, vector<1x16x512xf32>,
    } else {
    }
    return
  }
  func.func @transform_0(%arg0: i32, %arg1: i32, %arg2: i32) -> i32 {
    %c0_i32 = arith.constant 0 : i32
    %c0_i32_0 = arith.constant 0 : i32
    return %c0_i32 : i32
  }
  func.func @transform_1(%arg0: i32, %arg1: i32, %arg2: i32) -> (i32, i32, i32) {
    %c0_i32 = arith.constant 0 : i32
    %c0_i32_0 = arith.constant 0 : i32
    return %arg0, %c0_i32, %arg1 : i32, i32, i32
  }
  func.func @transform_2(%arg0: i32, %arg1: i32, %arg2: i32) -> (i32, i32, i32) {
    %c0_i32 = arith.constant 0 : i32
    %c0_i32_0 = arith.constant 0 : i32
    return %arg0, %c0_i32, %arg1 : i32, i32, i32
  }
  func.func @transform_3(%arg0: i32, %arg1: i32, %arg2: i32) -> (i32, i32, i32) {
    %c0_i32 = arith.constant 0 : i32
    %c0_i32_0 = arith.constant 0 : i32
    return %arg0, %arg2, %c0_i32 : i32, i32, i32
  }
  func.func @transform_4(%arg0: i32, %arg1: i32, %arg2: i32) -> (i32, i32, i32) {
    %c0_i32 = arith.constant 0 : i32
    %c0_i32_0 = arith.constant 0 : i32
    return %arg0, %c0_i32, %arg2 : i32, i32, i32
  }
  func.func @transform_5(%arg0: i32, %arg1: i32, %arg2: i32) -> (i32, i32, i32) {
    %c0_i32 = arith.constant 0 : i32
    %c0_i32_0 = arith.constant 0 : i32
    %c0_i32_1 = arith.constant 0 : i32
    return %arg0, %c0_i32, %c0_i32_0 : i32, i32, i32
  }
  func.func @transform_6(%arg0: i32, %arg1: i32, %arg2: i32) -> (i32, i32, i32) {
    %c0_i32 = arith.constant 0 : i32
    %c0_i32_0 = arith.constant 0 : i32
    return %arg0, %c0_i32, %arg1 : i32, i32, i32
  }
}

</mosaic_0001>

<bundles_post_ra>
// kernel: tpu_custom_call.1
= control target key start
LH: loop header
LB: loop body
LE: loop exit
PB: predicated region body
PF: predicated region fallthrough
CT: control target
= control target key end

     0   :  { %11 = vsyncpa [#allocation7], 0  ;;  %s9822_s0 = inlined_call_operand.vmem [shape: f32[2], index: 0, kind: input, shape index: {}]   ;;  %s9823_s1 = inlined_call_operand.vmem [shape: bf16[2,16,512], index: 1, kind: input, shape index: {}]   ;;  %s9824_s2 = inlined_call_operand.vmem [shape: bf16[2,2,512], index: 2, kind: input, shape index: {}]   ;;  %s9825_s3 = inlined_call_operand.vmem [shape: bf16[2,512,2], index: 3, kind: input, shape index: {}]   ;;  %s9826_s4 = inlined_call_operand.vmem [shape: bf16[2,16,512], index: 4, kind: input, shape index: {}]   ;;  %s9827_s5 = inlined_call_operand.vmem [shape: bf16[2,16,16], index: 5, kind: input, shape index: {}]   ;;  %s9828_s6 = inlined_call_operand.hbm [shape: f32[2,16,512], index: 6, kind: output, shape index: {}]  }
   0x1   :  { %12 = vsyncpa [#allocation6], 0 }
   0x2   :  { %14 = vsyncpa [#allocation6 + $0x1], 0  ;;  %s5196_s21 = smov 0   ;;  %s5198_s22 = smov 0  }
   0x3   :  { %s5200_s23 = smov 0   ;;  %s5202_s24 = smov 0  }
   0x4   :  { %s5204_s25 = smov 0   ;;  %s5206_s26 = smov 0  }
   0x5 LB: > { %s4277_s27 = sadd.s32 4294967295, %s5151_s26   ;;  %s4278_s28 = sadd.s32 4294967294, %s5151_s26   ;;  %s5151_s26 = sphi %s5206_s26, %s20_s26   ;;  %s5147_s25 = sphi %s5204_s25, %s12730_s25   ;;  %s5143_s24 = sphi %s5202_s24, %s12729_s24   ;;  %s5139_s23 = sphi %s5200_s23, %s12728_s23   ;;  %s5135_s22 = sphi %s5198_s22, %s12727_s22   ;;  %s5131_s21 = sphi %s5196_s21, %s12726_s21  }
   0x6   : > { %s39_s29 = sadd.s32 1, %s5147_s25  ;;  %s207_s30 = sadd.s32 1, %s5139_s23 }
   0x7   : > { %p41_p0 = scmp.ge.s32.totalorder %s39_s29, 2  ;;  %p217_p1 = scmp.ne.s32.totalorder %s5139_s23, %s5135_s22 }
   0x8   : > { %p218_p2 = scmp.eq.s32.totalorder %s4277_s27, 1  ;;  %p223_p3 = scmp.ne.s32.totalorder %s5135_s22, %s5131_s21 }
   0x9   : > { %s12732_s29 = smov (%p41_p0, %s39_s29), 0  ;;  %p224_p5 = scmp.eq.s32.totalorder %s4278_s28, 1 }
   0xa   : > { %p5236_p4 = por %p218_p2, %p217_p1  ;;  %s202_s8 = ssub.s32 %s5147_s25, %s12732_s29 }
   0xb   : > { %p4279_p6 = scmp.ge.s32.totalorder %s5151_s26, 1  ;;  %p205_p7 = scmp.eq.s32.totalorder %s202_s8, 0 }
   0xc   : > { %p5243_p8 = por %p224_p5, %p223_p3  ;;  %p231_p9 = scmp.lt.s32.totalorder %s5151_s26, 3 }
   0xd   : > { %s5249_s10 = scalar_select %p205_p7, %s5139_s23, %s207_s30  }
   0xe   : > { %p5251_p10 = pnand %p4279_p6, %p231_p9  ;;  %p5255_p11 = scmp.eq.s32.totalorder %s4277_s27, 0 }
   0xf   : > { %s244_s15 = sshll.u32 %s9822_s0, 4  ;;  %s245_s15 = int_to_ptr.vmem [resolvable:$true] %s244_s15 }
  0x10   : > { %p4429_p12 = pneg %p5251_p10  ;;  %s5054_s16 = scalar_lea.vmem %s245_s15, 16 }
  0x11   : > { %p5055_p0 = scmp.ne.s32.totalorder %s245_s15, %s5054_s16  ;;  %p5062_p5 = scmp.lt.s32.totalorder %s245_s15, %s245_s15 }
  0x12   : > { %p4430_p13 = pnand %p5255_p11, %p4429_p12  ;;  %p5063_p6 = scmp.lt.s32.totalorder %s5054_s16, %s5054_s16 }
  0x14   : > { %p5056_p1 = pneg %p4430_p13  ;;  %p5064_p7 = por %p5063_p6, %p5062_p5 }
  0x16   : > { %p5057_p2 = pnand %p5056_p1, %p5055_p0 }
  0x18   : > { %p5058_p3 = pneg %p5057_p2 }
  0x1a   : > { %p5065_p9 = pnand %p5064_p7, %p5058_p3 }
  0x1c   : > { %5068 = shalt.err (!%p5065_p9)
}
  0x1d   : > { %s5153_s17 = smov [#allocation5]   ;;  %316 = sbr.rel (%p5251_p10) target bundleno = 1307 (0x51b), region = 44 }
  0x1e   : > { %4432 = dma.vmem_to_smem (!%p4430_p13), %s245_s15, 16, %s5153_s17, [#allocation7]  }
  0x24   : > { %5122 = dma.done.wait (%p5255_p11), [#allocation7], 16  }
  0x25   : > { %5124 = vsyncadd (%p5255_p11), [#allocation7], 4294967280 }
  0x26   : > { %322 = sfence }
  0x27   : > { %p383_p12 = scmp.lt.s32.totalorder %s5143_s24, 1  ;;  %v9831_v0 = vlaneseq  ;;  %v5154_v1 = vmov 1966171168   ;;  %v9829_v3 = vmov 0   ;;  %vm793_vm0 = vcmask 1040384   ;;  %s4397_s11 = sld [smem:[#allocation5 + $0x1]] }
  0x28   : > { %v681_v2 = vunpack.c.l.s4 %v5154_v1  ;;  %838 = vmatprep.mubr.bf16.mxu0 %v9829_v3  ;;  %1191 = vmatprep.mubr.bf16.mxu1 %v9829_v3  ;;  %vm696_vm1 = vcmask 15360   ;;  %vm3956_vm3 = vcmask 130048   ;;  %s4414_s14 = sshll.u32 %s5143_s24, 10  ;;  %s5158_s28 = smov [#allocation8]  }
  0x29   : > { %s5276_s18 = scalar_select %p383_p12, %s5143_s24, 1  ;;  %v5279_v4 = vshrl.u32 %v9831_v0, 7 }
  0x2a   : > { %v682_v5 = vunpack.c.0.s8 %v681_v2  ;;  %s9770_s24 = scalar_lea.hbm %s9828_s6, %s4414_s14 }
  0x2b   : > { %s4287_s19 = sshll.u32 %s5276_s18, 2  ;;  %s4411_s20 = sshll.u32 %s5276_s18, 8 }
  0x2c   : > { %s399_s30 = scalar_lea.vmem %s9824_s2, %s4287_s19  ;;  %s5289_s12 = scalar_lea.vmem %s9825_s3, %s4411_s20  ;;  %v5292_v6 = vsub.s32 %v682_v5, %v5279_v4 }
  0x2d   : > { %v4326_v7 = vld.sshfl [vmem:[%s399_s30] sm:$0x33 pattern:$0x75316420]  ;;  %v4496_v16 = vld [vmem:[%s5289_s12 + $0x8] sm:$0xff]   ;;  %v4497_v17 = vld [vmem:[%s5289_s12 + $0x10] sm:$0xff]  }
  0x2e   : > { %10618 = vst [vmem:[#allocation11_spill] sm:$0xff] %v5292_v6  ;;  %v679_v8 = vcombine.high %v4326_v7, %v4326_v7  ;;  %v686_v9 = vrot.slane %v4326_v7, %v5292_v6  ;;  %v4495_v15 = vld [vmem:[%s5289_s12] sm:$0xff]   ;;  %v4498_v18 = vld [vmem:[%s5289_s12 + $0x18] sm:$0xff]   ;;  %v4500_v20 = vld [vmem:[%s5289_s12 + $0x28] sm:$0xff]   ;;  %s4410_s13 = sshll.u32 %s5276_s18, 5  ;;  %s4413_s17 = sshll.u32 %s5276_s18, 3 }
  0x2f   : > { %v4499_v19 = vld [vmem:[%s5289_s12 + $0x20] sm:$0xff]   ;;  %v4501_v21 = vld [vmem:[%s5289_s12 + $0x30] sm:$0xff]   ;;  %v4502_v22 = vld [vmem:[%s5289_s12 + $0x38] sm:$0xff]   ;;  %s8753_s16 = scalar_lea.vmem %s9826_s4, %s4410_s13  ;;  %s9106_s27 = scalar_lea.vmem %s9827_s5, %s4413_s17 }
  0x30   : > { %v693_v10 = vrot.slane %v679_v8, %v5292_v6  ;;  %v795_v11 = vsel %vm793_vm0, %v686_v9, 0  ;;  %v694_v12 = vcombine.high %v686_v9, %v686_v9  ;;  %v4503_v23 = vld [vmem:[%s5289_s12 + $0x40] sm:$0xff]   ;;  %v4504_v24 = vld [vmem:[%s5289_s12 + $0x48] sm:$0xff]   ;;  %v4505_v25 = vld [vmem:[%s5289_s12 + $0x50] sm:$0xff]   ;;  %s390_s8 = scalar_lea.vmem %s9823_s1, %s4410_s13  ;;  %s3884_s18 = sld [smem:[#allocation5]] }
  0x31   : > { %v4506_v26 = vld [vmem:[%s5289_s12 + $0x58] sm:$0xff]   ;;  %v4507_v27 = vld [vmem:[%s5289_s12 + $0x60] sm:$0xff]   ;;  %v4508_v28 = vld [vmem:[%s5289_s12 + $0x68] sm:$0xff]   ;;  %s5073_s30 = sshll.u32 %s5158_s28, 4  ;;  %s5074_s30 = int_to_ptr.vmem [resolvable:$false] %s5073_s30 }
  0x32   : > { %4327 = vmatprep.subr.msk.bf16.mxu0 %vm793_vm0, %v693_v10  ;;  %v695_v13 = vcombine.high %v693_v10, %v693_v10  ;;  %v801_v14 = vsel %vm793_vm0, %v694_v12, 0  ;;  %v4509_v29 = vld [vmem:[%s5289_s12 + $0x70] sm:$0xff]   ;;  %v4510_v30 = vld [vmem:[%s5289_s12 + $0x78] sm:$0xff]   ;;  %v4511_v31 = vld [vmem:[%s5289_s12 + $0x80] sm:$0xff]  }
  0x33   : > { %807 = vmatpush1.bf16.msra.mxu0 %v795_v11  ;;  %v4512_v32 = vld [vmem:[%s5289_s12 + $0x88] sm:$0xff]   ;;  %v4513_v33 = vld [vmem:[%s5289_s12 + $0x90] sm:$0xff]   ;;  %v4514_v34 = vld [vmem:[%s5289_s12 + $0x98] sm:$0xff]  }
  0x34   : > { %4360 = vmatprep.subr.msk.bf16.mxu1 %vm793_vm0, %v695_v13  ;;  %v4515_v35 = vld [vmem:[%s5289_s12 + $0xa0] sm:$0xff]   ;;  %v4516_v36 = vld [vmem:[%s5289_s12 + $0xa8] sm:$0xff]   ;;  %v4517_v37 = vld [vmem:[%s5289_s12 + $0xb0] sm:$0xff]  }
  0x35   : > { %1160 = vmatpush1.bf16.msra.mxu1 %v801_v14  ;;  %v4518_v38 = vld [vmem:[%s5289_s12 + $0xb8] sm:$0xff]   ;;  %v4519_v39 = vld [vmem:[%s5289_s12 + $0xc0] sm:$0xff]   ;;  %v4520_v40 = vld [vmem:[%s5289_s12 + $0xc8] sm:$0xff]  }
  0x36   : > { %4328 = vmatmul.mubr.msk.bf16.vlgmr.msra.gmra.mrb[0].mxu0 %vm696_vm1, %v4495_v15  ;;  %v4521_v41 = vld [vmem:[%s5289_s12 + $0xd0] sm:$0xff]   ;;  %v4522_v44 = vld [vmem:[%s5289_s12 + $0xd8] sm:$0xff]   ;;  %v4523_v58 = vld [vmem:[%s5289_s12 + $0xe0] sm:$0xff]  }
  0x37   : > { %848 = vmatprep.mubr.bf16.mxu0 %v9829_v3 }
  0x38   : > { %4361 = vmatmul.mubr.msk.bf16.vlgmr.msra.gmra.mrb[0].mxu1 %vm696_vm1, %v4495_v15  ;;  %v4524_v15 = vld [vmem:[%s5289_s12 + $0xe8] sm:$0xff]  }
  0x39   : > { %1201 = vmatprep.mubr.bf16.mxu1 %v9829_v3 }
  0x3e   : > { %4329 = vmatmul.mubr.msk.bf16.gmra.mrb[4].mxu0 %vm696_vm1, %v4496_v16 }
  0x3f   : > { %858 = vmatprep.mubr.bf16.mxu0 %v9829_v3 }
  0x40   : > { %4362 = vmatmul.mubr.msk.bf16.gmra.mrb[4].mxu1 %vm696_vm1, %v4496_v16 }
  0x41   : > { %1211 = vmatprep.mubr.bf16.mxu1 %v9829_v3 }
  0x46   : > { %4330 = vmatmul.mubr.msk.bf16.gmra.mrb[8].mxu0 %vm696_vm1, %v4497_v17 }
  0x47   : > { %868 = vmatprep.mubr.bf16.mxu0 %v9829_v3 }
  0x48   : > { %4363 = vmatmul.mubr.msk.bf16.gmra.mrb[8].mxu1 %vm696_vm1, %v4497_v17 }
  0x49   : > { %1221 = vmatprep.mubr.bf16.mxu1 %v9829_v3 }
  0x4e   : > { %4331 = vmatmul.mubr.msk.bf16.gmra.mrb[12].mxu0 %vm696_vm1, %v4498_v18 }
  0x4f   : > { %878 = vmatprep.mubr.bf16.mxu0 %v9829_v3 }
  0x50   : > { %4364 = vmatmul.mubr.msk.bf16.gmra.mrb[12].mxu1 %vm696_vm1, %v4498_v18 }
  0x51   : > { %1231 = vmatprep.mubr.bf16.mxu1 %v9829_v3 }
  0x56   : > { %4332 = vmatmul.mubr.msk.bf16.gmra.mrb[16].mxu0 %vm696_vm1, %v4499_v19 }
  0x57   : > { %888 = vmatprep.mubr.bf16.mxu0 %v9829_v3 }
  0x58   : > { %4365 = vmatmul.mubr.msk.bf16.gmra.mrb[16].mxu1 %vm696_vm1, %v4499_v19 }
  0x59   : > { %1241 = vmatprep.mubr.bf16.mxu1 %v9829_v3 }
  0x5e   : > { %4333 = vmatmul.mubr.msk.bf16.gmra.mrb[20].mxu0 %vm696_vm1, %v4500_v20 }
  0x5f   : > { %898 = vmatprep.mubr.bf16.mxu0 %v9829_v3 }
  0x60   : > { %4366 = vmatmul.mubr.msk.bf16.gmra.mrb[20].mxu1 %vm696_vm1, %v4500_v20 }
  0x61   : > { %1251 = vmatprep.mubr.bf16.mxu1 %v9829_v3 }
  0x66   : > { %4334 = vmatmul.mubr.msk.bf16.gmra.mrb[24].mxu0 %vm696_vm1, %v4501_v21 }
  0x67   : > { %908 = vmatprep.mubr.bf16.mxu0 %v9829_v3 }
  0x68   : > { %4367 = vmatmul.mubr.msk.bf16.gmra.mrb[24].mxu1 %vm696_vm1, %v4501_v21 }
  0x69   : > { %1261 = vmatprep.mubr.bf16.mxu1 %v9829_v3 }
  0x6e   : > { %4335 = vmatmul.mubr.msk.bf16.gmra.mrb[28].mxu0 %vm696_vm1, %v4502_v22 }
  0x6f   : > { %918 = vmatprep.mubr.bf16.mxu0 %v9829_v3 }
  0x70   : > { %4368 = vmatmul.mubr.msk.bf16.gmra.mrb[28].mxu1 %vm696_vm1, %v4502_v22 }
  0x71   : > { %1271 = vmatprep.mubr.bf16.mxu1 %v9829_v3 }
  0x76   : > { %4336 = vmatmul.mubr.msk.bf16.gmra.mrb[32].mxu0 %vm696_vm1, %v4503_v23 }
  0x77   : > { %928 = vmatprep.mubr.bf16.mxu0 %v9829_v3 }
  0x78   : > { %4369 = vmatmul.mubr.msk.bf16.gmra.mrb[32].mxu1 %vm696_vm1, %v4503_v23 }
  0x79   : > { %1281 = vmatprep.mubr.bf16.mxu1 %v9829_v3 }
  0x7e   : > { %4337 = vmatmul.mubr.msk.bf16.gmra.mrb[36].mxu0 %vm696_vm1, %v4504_v24 }
  0x7f   : > { %938 = vmatprep.mubr.bf16.mxu0 %v9829_v3 }
  0x80   : > { %4370 = vmatmul.mubr.msk.bf16.gmra.mrb[36].mxu1 %vm696_vm1, %v4504_v24 }
  0x81   : > { %1291 = vmatprep.mubr.bf16.mxu1 %v9829_v3 }
  0x86   : > { %4338 = vmatmul.mubr.msk.bf16.gmra.mrb[40].mxu0 %vm696_vm1, %v4505_v25 }
  0x87   : > { %948 = vmatprep.mubr.bf16.mxu0 %v9829_v3 }
  0x88   : > { %4371 = vmatmul.mubr.msk.bf16.gmra.mrb[40].mxu1 %vm696_vm1, %v4505_v25 }
  0x89   : > { %1301 = vmatprep.mubr.bf16.mxu1 %v9829_v3 }
  0x8e   : > { %4339 = vmatmul.mubr.msk.bf16.gmra.mrb[44].mxu0 %vm696_vm1, %v4506_v26 }
  0x8f   : > { %958 = vmatprep.mubr.bf16.mxu0 %v9829_v3 }
  0x90   : > { %4372 = vmatmul.mubr.msk.bf16.gmra.mrb[44].mxu1 %vm696_vm1, %v4506_v26 }
  0x91   : > { %1311 = vmatprep.mubr.bf16.mxu1 %v9829_v3 }
  0x96   : > { %4340 = vmatmul.mubr.msk.bf16.gmra.mrb[48].mxu0 %vm696_vm1, %v4507_v27 }
  0x97   : > { %968 = vmatprep.mubr.bf16.mxu0 %v9829_v3 }
  0x98   : > { %4373 = vmatmul.mubr.msk.bf16.gmra.mrb[48].mxu1 %vm696_vm1, %v4507_v27 }
  0x99   : > { %1321 = vmatprep.mubr.bf16.mxu1 %v9829_v3 }
  0x9e   : > { %4341 = vmatmul.mubr.msk.bf16.gmra.mrb[52].mxu0 %vm696_vm1, %v4508_v28 }
  0x9f   : > { %978 = vmatprep.mubr.bf16.mxu0 %v9829_v3 }
  0xa0   : > { %4374 = vmatmul.mubr.msk.bf16.gmra.mrb[52].mxu1 %vm696_vm1, %v4508_v28 }
  0xa1   : > { %1331 = vmatprep.mubr.bf16.mxu1 %v9829_v3 }
  0xa6   : > { %4342 = vmatmul.mubr.msk.bf16.gmra.mrb[56].mxu0 %vm696_vm1, %v4509_v29 }
  0xa7   : > { %988 = vmatprep.mubr.bf16.mxu0 %v9829_v3 }
  0xa8   : > { %4375 = vmatmul.mubr.msk.bf16.gmra.mrb[56].mxu1 %vm696_vm1, %v4509_v29 }
  0xa9   : > { %1341 = vmatprep.mubr.bf16.mxu1 %v9829_v3 }
  0xae   : > { %4343 = vmatmul.mubr.msk.bf16.gmra.mrb[60].mxu0 %vm696_vm1, %v4510_v30 }
  0xaf   : > { %998 = vmatprep.mubr.bf16.mxu0 %v9829_v3 }
  0xb0   : > { %4376 = vmatmul.mubr.msk.bf16.gmra.mrb[60].mxu1 %vm696_vm1, %v4510_v30 }
  0xb1   : > { %1351 = vmatprep.mubr.bf16.mxu1 %v9829_v3 }
  0xb6   : > { %4344 = vmatmul.mubr.msk.bf16.gmra.mrb[64].mxu0 %vm696_vm1, %v4511_v31 }
  0xb7   : > { %1008 = vmatprep.mubr.bf16.mxu0 %v9829_v3 }
  0xb8   : > { %4377 = vmatmul.mubr.msk.bf16.gmra.mrb[64].mxu1 %vm696_vm1, %v4511_v31 }
  0xb9   : > { %1361 = vmatprep.mubr.bf16.mxu1 %v9829_v3 }
  0xbe   : > { %4345 = vmatmul.mubr.msk.bf16.gmra.mrb[68].mxu0 %vm696_vm1, %v4512_v32 }
  0xbf   : > { %1018 = vmatprep.mubr.bf16.mxu0 %v9829_v3 }
  0xc0   : > { %4378 = vmatmul.mubr.msk.bf16.gmra.mrb[68].mxu1 %vm696_vm1, %v4512_v32  ;;  %v4525_v32 = vld [vmem:[%s5289_s12 + $0xf0] sm:$0xff]  }
  0xc1   : > { %1371 = vmatprep.mubr.bf16.mxu1 %v9829_v3 }
  0xc6   : > { %4346 = vmatmul.mubr.msk.bf16.gmra.mrb[72].mxu0 %vm696_vm1, %v4513_v33 }
  0xc7   : > { %1028 = vmatprep.mubr.bf16.mxu0 %v9829_v3 }
  0xc8   : > { %4379 = vmatmul.mubr.msk.bf16.gmra.mrb[72].mxu1 %vm696_vm1, %v4513_v33 }
  0xc9   : > { %1381 = vmatprep.mubr.bf16.mxu1 %v9829_v3 }
  0xce   : > { %4347 = vmatmul.mubr.msk.bf16.gmra.mrb[76].mxu0 %vm696_vm1, %v4514_v34 }
  0xcf   : > { %1038 = vmatprep.mubr.bf16.mxu0 %v9829_v3 }
  0xd0   : > { %4380 = vmatmul.mubr.msk.bf16.gmra.mrb[76].mxu1 %vm696_vm1, %v4514_v34 }
  0xd1   : > { %1391 = vmatprep.mubr.bf16.mxu1 %v9829_v3 }
  0xd6   : > { %4348 = vmatmul.mubr.msk.bf16.gmra.mrb[80].mxu0 %vm696_vm1, %v4515_v35 }
  0xd7   : > { %1048 = vmatprep.mubr.bf16.mxu0 %v9829_v3 }
  0xd8   : > { %4381 = vmatmul.mubr.msk.bf16.gmra.mrb[80].mxu1 %vm696_vm1, %v4515_v35 }
  0xd9   : > { %1401 = vmatprep.mubr.bf16.mxu1 %v9829_v3 }
  0xde   : > { %4349 = vmatmul.mubr.msk.bf16.gmra.mrb[84].mxu0 %vm696_vm1, %v4516_v36 }
  0xdf   : > { %1058 = vmatprep.mubr.bf16.mxu0 %v9829_v3 }
  0xe0   : > { %4382 = vmatmul.mubr.msk.bf16.gmra.mrb[84].mxu1 %vm696_vm1, %v4516_v36 }
  0xe1   : > { %1411 = vmatprep.mubr.bf16.mxu1 %v9829_v3 }
  0xe6   : > { %4350 = vmatmul.mubr.msk.bf16.gmra.mrb[88].mxu0 %vm696_vm1, %v4517_v37 }
  0xe7   : > { %1068 = vmatprep.mubr.bf16.mxu0 %v9829_v3 }
  0xe8   : > { %4383 = vmatmul.mubr.msk.bf16.gmra.mrb[88].mxu1 %vm696_vm1, %v4517_v37 }
  0xe9   : > { %1421 = vmatprep.mubr.bf16.mxu1 %v9829_v3 }
  0xee   : > { %4351 = vmatmul.mubr.msk.bf16.gmra.mrb[92].mxu0 %vm696_vm1, %v4518_v38 }
  0xef   : > { %1078 = vmatprep.mubr.bf16.mxu0 %v9829_v3 }
  0xf0   : > { %4384 = vmatmul.mubr.msk.bf16.gmra.mrb[92].mxu1 %vm696_vm1, %v4518_v38 }
  0xf1   : > { %1431 = vmatprep.mubr.bf16.mxu1 %v9829_v3 }
  0xf6   : > { %4352 = vmatmul.mubr.msk.bf16.gmra.mrb[96].mxu0 %vm696_vm1, %v4519_v39 }
  0xf7   : > { %1088 = vmatprep.mubr.bf16.mxu0 %v9829_v3 }
  0xf8   : > { %4385 = vmatmul.mubr.msk.bf16.gmra.mrb[96].mxu1 %vm696_vm1, %v4519_v39 }
  0xf9   : > { %1441 = vmatprep.mubr.bf16.mxu1 %v9829_v3 }
  0xfe   : > { %4353 = vmatmul.mubr.msk.bf16.gmra.mrb[100].mxu0 %vm696_vm1, %v4520_v40 }
  0xff   : > { %1098 = vmatprep.mubr.bf16.mxu0 %v9829_v3 }
 0x100   : > { %4386 = vmatmul.mubr.msk.bf16.gmra.mrb[100].mxu1 %vm696_vm1, %v4520_v40 }
 0x101   : > { %1451 = vmatprep.mubr.bf16.mxu1 %v9829_v3 }
 0x106   : > { %4354 = vmatmul.mubr.msk.bf16.gmra.mrb[104].mxu0 %vm696_vm1, %v4521_v41 }
 0x107   : > { %1108 = vmatprep.mubr.bf16.mxu0 %v9829_v3 }
 0x108   : > { %4387 = vmatmul.mubr.msk.bf16.gmra.mrb[104].mxu1 %vm696_vm1, %v4521_v41 }
 0x109   : > { %v5430_v42 = vpop.f32.mrb[0].mxu0  ;;  %1461 = vmatprep.mubr.bf16.mxu1 %v9829_v3 }
 0x10a   : > { %v5433_v43 = vpop.f32.mrb[1].mxu0 }
 0x10b   : > { %v5436_v45 = vpop.f32.mrb[2].mxu0  ;;  %v5438_v46 = vpop.f32.mrb[0].mxu1 }
 0x10c   : > { %v1513_v47 = vmax.f32 %v5430_v42, %v5436_v45  ;;  %v5442_v48 = vpop.f32.mrb[3].mxu0  ;;  %v5444_v49 = vpop.f32.mrb[1].mxu1 }
 0x10d   : > { %v1582_v50 = vmax.f32 %v5433_v43, %v5442_v48  ;;  %v5448_v51 = vpop.f32.mrb[2].mxu1 }
 0x10e   : > { %v1651_v52 = vmax.f32 %v5438_v46, %v5448_v51  ;;  %4355 = vmatmul.mubr.msk.bf16.gmra.mrb[108].mxu0 %vm696_vm1, %v4522_v44  ;;  %v5453_v53 = vpop.f32.mrb[3].mxu1 }
 0x10f   : > { %v1720_v54 = vmax.f32 %v5444_v49, %v5453_v53  ;;  %1118 = vmatprep.mubr.bf16.mxu0 %v9829_v3 }
 0x110   : > { %4388 = vmatmul.mubr.msk.bf16.gmra.mrb[108].mxu1 %vm696_vm1, %v4522_v44 }
 0x111   : > { %v5459_v55 = vpop.f32.mrb[4].mxu0  ;;  %1471 = vmatprep.mubr.bf16.mxu1 %v9829_v3 }
 0x112   : > { %v1514_v56 = vmax.f32 %v1513_v47, %v5459_v55  ;;  %v5463_v57 = vpop.f32.mrb[5].mxu0 }
 0x113   : > { %v1583_v59 = vmax.f32 %v1582_v50, %v5463_v57  ;;  %v5467_v60 = vpop.f32.mrb[6].mxu0  ;;  %v5469_v61 = vpop.f32.mrb[4].mxu1 }
 0x114   : > { %v1515_v62 = vmax.f32 %v1514_v56, %v5467_v60  ;;  %v1652_v63 = vmax.f32 %v1651_v52, %v5469_v61  ;;  %v5473_v1 = vpop.f32.mrb[7].mxu0  ;;  %v5475_v2 = vpop.f32.mrb[5].mxu1 }
 0x115   : > { %v1584_v5 = vmax.f32 %v1583_v59, %v5473_v1  ;;  %v1721_v7 = vmax.f32 %v1720_v54, %v5475_v2  ;;  %v5479_v8 = vpop.f32.mrb[6].mxu1  ;;  %v4526_v59 = vld [vmem:[%s5289_s12 + $0xf8] sm:$0xff]   ;;  %s379_s12 = sand.u32 1, %s5135_s22  }
 0x116   : > { %v1653_v9 = vmax.f32 %v1652_v63, %v5479_v8  ;;  %4356 = vmatmul.mubr.msk.bf16.gmra.mrb[112].mxu0 %vm696_vm1, %v4523_v58  ;;  %v5483_v10 = vpop.f32.mrb[7].mxu1  ;;  %s4284_s13 = sshll.u32 %s379_s12, 6  ;;  %s9776_s20 = scalar_lea.sflag [#allocation6], %s379_s12 }
 0x117   : > { %v1722_v11 = vmax.f32 %v1721_v7, %v5483_v10  ;;  %1128 = vmatprep.mubr.bf16.mxu0 %v9829_v3  ;;  %s381_s15 = scalar_lea.vmem [#allocation8], %s4284_s13 }
 0x118   : > { %4389 = vmatmul.mubr.msk.bf16.gmra.mrb[112].mxu1 %vm696_vm1, %v4523_v58 }
 0x119   : > { %v5488_v12 = vpop.f32.mrb[8].mxu0  ;;  %1481 = vmatprep.mubr.bf16.mxu1 %v9829_v3 }
 0x11a   : > { %v1516_v13 = vmax.f32 %v1515_v62, %v5488_v12  ;;  %v5492_v14 = vpop.f32.mrb[9].mxu0 }
 0x11b   : > { %v1585_v16 = vmax.f32 %v1584_v5, %v5492_v14  ;;  %v5496_v17 = vpop.f32.mrb[10].mxu0  ;;  %v5498_v18 = vpop.f32.mrb[8].mxu1 }
 0x11c   : > { %v1517_v19 = vmax.f32 %v1516_v13, %v5496_v17  ;;  %v1654_v20 = vmax.f32 %v1653_v9, %v5498_v18  ;;  %v5502_v21 = vpop.f32.mrb[11].mxu0  ;;  %v5504_v22 = vpop.f32.mrb[9].mxu1 }
 0x11d   : > { %v1586_v23 = vmax.f32 %v1585_v16, %v5502_v21  ;;  %v1723_v24 = vmax.f32 %v1722_v11, %v5504_v22  ;;  %v5508_v25 = vpop.f32.mrb[10].mxu1 }
 0x11e   : > { %v1655_v26 = vmax.f32 %v1654_v20, %v5508_v25  ;;  %4357 = vmatmul.mubr.msk.bf16.gmra.mrb[116].mxu0 %vm696_vm1, %v4524_v15  ;;  %v5512_v27 = vpop.f32.mrb[11].mxu1 }
 0x11f   : > { %v1724_v28 = vmax.f32 %v1723_v24, %v5512_v27  ;;  %1138 = vmatprep.mubr.bf16.mxu0 %v9829_v3 }
 0x120   : > { %4390 = vmatmul.mubr.msk.bf16.gmra.mrb[116].mxu1 %vm696_vm1, %v4524_v15 }
 0x121   : > { %v5517_v29 = vpop.f32.mrb[12].mxu0  ;;  %1491 = vmatprep.mubr.bf16.mxu1 %v9829_v3 }
 0x122   : > { %v1518_v30 = vmax.f32 %v1517_v19, %v5517_v29  ;;  %v5521_v31 = vpop.f32.mrb[13].mxu0 }
 0x123   : > { %v1587_v33 = vmax.f32 %v1586_v23, %v5521_v31  ;;  %v5525_v34 = vpop.f32.mrb[14].mxu0  ;;  %v5527_v35 = vpop.f32.mrb[12].mxu1 }
 0x124   : > { %v1519_v36 = vmax.f32 %v1518_v30, %v5525_v34  ;;  %v1656_v37 = vmax.f32 %v1655_v26, %v5527_v35  ;;  %v5531_v38 = vpop.f32.mrb[15].mxu0  ;;  %v5533_v39 = vpop.f32.mrb[13].mxu1 }
 0x125   : > { %v1588_v40 = vmax.f32 %v1587_v33, %v5531_v38  ;;  %v1725_v41 = vmax.f32 %v1724_v28, %v5533_v39  ;;  %v5537_v44 = vpop.f32.mrb[14].mxu1 }
 0x126   : > { %v1657_v47 = vmax.f32 %v1656_v37, %v5537_v44  ;;  %4358 = vmatmul.mubr.msk.bf16.gmra.mrb[120].mxu0 %vm696_vm1, %v4525_v32  ;;  %v5541_v50 = vpop.f32.mrb[15].mxu1 }
 0x127   : > { %v1726_v52 = vmax.f32 %v1725_v41, %v5541_v50  ;;  %1148 = vmatprep.mubr.bf16.mxu0 %v9829_v3 }
 0x128   : > { %4391 = vmatmul.mubr.msk.bf16.gmra.mrb[120].mxu1 %vm696_vm1, %v4525_v32 }
 0x129   : > { %v5546_v54 = vpop.f32.mrb[16].mxu0  ;;  %1501 = vmatprep.mubr.bf16.mxu1 %v9829_v3 }
 0x12a   : > { %v1520_v56 = vmax.f32 %v1519_v36, %v5546_v54  ;;  %v5550_v58 = vpop.f32.mrb[17].mxu0 }
 0x12b   : > { %v1589_v62 = vmax.f32 %v1588_v40, %v5550_v58  ;;  %v5554_v63 = vpop.f32.mrb[18].mxu0  ;;  %v5556_v5 = vpop.f32.mrb[16].mxu1 }
 0x12c   : > { %10619 = vst [vmem:[#allocation12_spill] sm:$0xff] %v5554_v63  ;;  %10620 = vst [vmem:[#allocation13_spill] sm:$0xff] %v5556_v5  ;;  %v1521_v7 = vmax.f32 %v1520_v56, %v5554_v63  ;;  %v1658_v9 = vmax.f32 %v1657_v47, %v5556_v5  ;;  %v5560_v11 = vpop.f32.mrb[19].mxu0  ;;  %v5562_v13 = vpop.f32.mrb[17].mxu1 }
 0x12d   : > { %10621 = vst [vmem:[#allocation14_spill] sm:$0xff] %v5560_v11  ;;  %10622 = vst [vmem:[#allocation15_spill] sm:$0xff] %v5562_v13  ;;  %v1590_v15 = vmax.f32 %v1589_v62, %v5560_v11  ;;  %v1727_v16 = vmax.f32 %v1726_v52, %v5562_v13  ;;  %v5566_v19 = vpop.f32.mrb[18].mxu1 }
 0x12e   : > { %10623 = vst [vmem:[#allocation16_spill] sm:$0xff] %v5566_v19  ;;  %v1659_v20 = vmax.f32 %v1658_v9, %v5566_v19  ;;  %4359 = vmatmul.mubr.msk.bf16.gmra.mrb[124].mxu0 %vm696_vm1, %v4526_v59  ;;  %v5570_v23 = vpop.f32.mrb[19].mxu1 }
 0x12f   : > { %10624 = vst [vmem:[#allocation17_spill] sm:$0xff] %v5570_v23  ;;  %v1728_v24 = vmax.f32 %v1727_v16, %v5570_v23 }
 0x130   : > { %4392 = vmatmul.mubr.msk.bf16.gmra.mrb[124].mxu1 %vm696_vm1, %v4526_v59 }
 0x131   : > { %v5574_v26 = vpop.f32.mrb[20].mxu0 }
 0x132   : > { %10625 = vst [vmem:[#allocation18_spill] sm:$0xff] %v5574_v26  ;;  %v1522_v28 = vmax.f32 %v1521_v7, %v5574_v26  ;;  %v5577_v30 = vpop.f32.mrb[21].mxu0 }
 0x133   : > { %10626 = vst [vmem:[#allocation19_spill] sm:$0xff] %v5577_v30  ;;  %v1591_v32 = vmax.f32 %v1590_v15, %v5577_v30  ;;  %v5580_v33 = vpop.f32.mrb[22].mxu0  ;;  %v5582_v36 = vpop.f32.mrb[20].mxu1 }
 0x134   : > { %10627 = vst [vmem:[#allocation20_spill] sm:$0xff] %v5580_v33  ;;  %10628 = vst [vmem:[#allocation21_spill] sm:$0xff] %v5582_v36  ;;  %v1523_v37 = vmax.f32 %v1522_v28, %v5580_v33  ;;  %v1660_v40 = vmax.f32 %v1659_v20, %v5582_v36  ;;  %v5586_v41 = vpop.f32.mrb[23].mxu0  ;;  %v5588_v47 = vpop.f32.mrb[21].mxu1 }
 0x135   : > { %10629 = vst [vmem:[#allocation22_spill] sm:$0xff] %v5586_v41  ;;  %10630 = vst [vmem:[#allocation23_spill] sm:$0xff] %v5588_v47  ;;  %v1592_v52 = vmax.f32 %v1591_v32, %v5586_v41  ;;  %v1729_v56 = vmax.f32 %v1728_v24, %v5588_v47  ;;  %v5592_v59 = vpop.f32.mrb[22].mxu1 }
 0x136   : > { %10631 = vst [vmem:[#allocation24_spill] sm:$0xff] %v5592_v59  ;;  %v1661_v62 = vmax.f32 %v1660_v40, %v5592_v59  ;;  %v5595_v7 = vpop.f32.mrb[23].mxu1 }
 0x137   : > { %10632 = vst [vmem:[#allocation25_spill] sm:$0xff] %v5595_v7  ;;  %v1730_v9 = vmax.f32 %v1729_v56, %v5595_v7 }
 0x139   : > { %v5598_v15 = vpop.f32.mrb[24].mxu0 }
 0x13a   : > { %10633 = vst [vmem:[#allocation26_spill] sm:$0xff] %v5598_v15  ;;  %v1524_v16 = vmax.f32 %v1523_v37, %v5598_v15  ;;  %v5601_v20 = vpop.f32.mrb[25].mxu0 }
 0x13b   : > { %10634 = vst [vmem:[#allocation27_spill] sm:$0xff] %v5601_v20  ;;  %v1593_v28 = vmax.f32 %v1592_v52, %v5601_v20  ;;  %v5604_v3 = vpop.f32.mrb[26].mxu0  ;;  %v5606_v32 = vpop.f32.mrb[24].mxu1 }
 0x13c   : > { %10635 = vst [vmem:[#allocation28_spill] sm:$0xff] %v5604_v3  ;;  %10636 = vst [vmem:[#allocation29_spill] sm:$0xff] %v5606_v32  ;;  %v1525_v24 = vmax.f32 %v1524_v16, %v5604_v3  ;;  %v1662_v40 = vmax.f32 %v1661_v62, %v5606_v32  ;;  %v5610_v0 = vpop.f32.mrb[27].mxu0  ;;  %v5612_v59 = vpop.f32.mrb[25].mxu1 }
 0x13d   : > { %10637 = vst [vmem:[#allocation30_spill] sm:$0xff] %v5610_v0  ;;  %10638 = vst [vmem:[#allocation31_spill] sm:$0xff] %v5612_v59  ;;  %v1594_v56 = vmax.f32 %v1593_v28, %v5610_v0  ;;  %v1731_v37 = vmax.f32 %v1730_v9, %v5612_v59  ;;  %v5616_v15 = vpop.f32.mrb[26].mxu1 }
 0x13e   : > { %10639 = vst [vmem:[#allocation32_spill] sm:$0xff] %v5616_v15  ;;  %v1663_v52 = vmax.f32 %v1662_v40, %v5616_v15  ;;  %v5619_v20 = vpop.f32.mrb[27].mxu1 }
 0x13f   : > { %10640 = vst [vmem:[#allocation33_spill] sm:$0xff] %v5619_v20  ;;  %v1732_v7 = vmax.f32 %v1731_v37, %v5619_v20 }
 0x141   : > { %v5622_v41 = vpop.f32.mrb[28].mxu0 }
 0x142   : > { %10641 = vst [vmem:[#allocation34_spill] sm:$0xff] %v5622_v41  ;;  %v1526_v62 = vmax.f32 %v1525_v24, %v5622_v41  ;;  %v5625_v16 = vpop.f32.mrb[29].mxu0 }
 0x143   : > { %10642 = vst [vmem:[#allocation35_spill] sm:$0xff] %v5625_v16  ;;  %v1595_v3 = vmax.f32 %v1594_v56, %v5625_v16  ;;  %v5628_v32 = vpop.f32.mrb[30].mxu0  ;;  %v5630_v28 = vpop.f32.mrb[28].mxu1 }
 0x144   : > { %10643 = vst [vmem:[#allocation36_spill] sm:$0xff] %v5628_v32  ;;  %10644 = vst [vmem:[#allocation37_spill] sm:$0xff] %v5630_v28  ;;  %v1527_v9 = vmax.f32 %v1526_v62, %v5628_v32  ;;  %v1664_v40 = vmax.f32 %v1663_v52, %v5630_v28  ;;  %v5634_v15 = vpop.f32.mrb[31].mxu0  ;;  %v5636_v0 = vpop.f32.mrb[29].mxu1 }
 0x145   : > { %10645 = vst [vmem:[#allocation38_spill] sm:$0xff] %v5634_v15  ;;  %10646 = vst [vmem:[#allocation39_spill] sm:$0xff] %v5636_v0  ;;  %v1596_v37 = vmax.f32 %v1595_v3, %v5634_v15  ;;  %v1733_v24 = vmax.f32 %v1732_v7, %v5636_v0  ;;  %v5640_v41 = vpop.f32.mrb[30].mxu1 }
 0x146   : > { %10647 = vst [vmem:[#allocation40_spill] sm:$0xff] %v5640_v41  ;;  %v1665_v56 = vmax.f32 %v1664_v40, %v5640_v41  ;;  %v5643_v16 = vpop.f32.mrb[31].mxu1 }
 0x147   : > { %10648 = vst [vmem:[#allocation41_spill] sm:$0xff] %v5643_v16  ;;  %v1734_v20 = vmax.f32 %v1733_v24, %v5643_v16 }
 0x149   : > { %v5646_v59 = vpop.f32.mrb[32].mxu0 }
 0x14a   : > { %10649 = vst [vmem:[#allocation42_spill] sm:$0xff] %v5646_v59  ;;  %v1528_v52 = vmax.f32 %v1527_v9, %v5646_v59  ;;  %v5649_v62 = vpop.f32.mrb[33].mxu0 }
 0x14b   : > { %10650 = vst [vmem:[#allocation43_spill] sm:$0xff] %v5649_v62  ;;  %v1597_v32 = vmax.f32 %v1596_v37, %v5649_v62  ;;  %v5652_v28 = vpop.f32.mrb[34].mxu0  ;;  %v5654_v3 = vpop.f32.mrb[32].mxu1 }
 0x14c   : > { %10651 = vst [vmem:[#allocation44_spill] sm:$0xff] %v5652_v28  ;;  %10652 = vst [vmem:[#allocation45_spill] sm:$0xff] %v5654_v3  ;;  %v1529_v7 = vmax.f32 %v1528_v52, %v5652_v28  ;;  %v1666_v40 = vmax.f32 %v1665_v56, %v5654_v3  ;;  %v5658_v41 = vpop.f32.mrb[35].mxu0  ;;  %v5660_v15 = vpop.f32.mrb[33].mxu1 }
 0x14d   : > { %10653 = vst [vmem:[#allocation46_spill] sm:$0xff] %v5658_v41  ;;  %10654 = vst [vmem:[#allocation47_spill] sm:$0xff] %v5660_v15  ;;  %v1598_v24 = vmax.f32 %v1597_v32, %v5658_v41  ;;  %v1735_v9 = vmax.f32 %v1734_v20, %v5660_v15  ;;  %v5664_v59 = vpop.f32.mrb[34].mxu1 }
 0x14e   : > { %10655 = vst [vmem:[#allocation48_spill] sm:$0xff] %v5664_v59  ;;  %v1667_v37 = vmax.f32 %v1666_v40, %v5664_v59  ;;  %v5667_v62 = vpop.f32.mrb[35].mxu1 }
 0x14f   : > { %10656 = vst [vmem:[#allocation49_spill] sm:$0xff] %v5667_v62  ;;  %v1736_v16 = vmax.f32 %v1735_v9, %v5667_v62 }
 0x151   : > { %v5670_v0 = vpop.f32.mrb[36].mxu0 }
 0x152   : > { %10657 = vst [vmem:[#allocation50_spill] sm:$0xff] %v5670_v0  ;;  %v1530_v56 = vmax.f32 %v1529_v7, %v5670_v0  ;;  %v5673_v52 = vpop.f32.mrb[37].mxu0 }
 0x153   : > { %10658 = vst [vmem:[#allocation51_spill] sm:$0xff] %v5673_v52  ;;  %v1599_v28 = vmax.f32 %v1598_v24, %v5673_v52  ;;  %v5676_v3 = vpop.f32.mrb[38].mxu0  ;;  %v5678_v32 = vpop.f32.mrb[36].mxu1 }
 0x154   : > { %10659 = vst [vmem:[#allocation52_spill] sm:$0xff] %v5676_v3  ;;  %10660 = vst [vmem:[#allocation53_spill] sm:$0xff] %v5678_v32  ;;  %v1531_v20 = vmax.f32 %v1530_v56, %v5676_v3  ;;  %v1668_v40 = vmax.f32 %v1667_v37, %v5678_v32  ;;  %v5682_v59 = vpop.f32.mrb[39].mxu0  ;;  %v5684_v41 = vpop.f32.mrb[37].mxu1 }
 0x155   : > { %10661 = vst [vmem:[#allocation54_spill] sm:$0xff] %v5682_v59  ;;  %10662 = vst [vmem:[#allocation55_spill] sm:$0xff] %v5684_v41  ;;  %v1600_v9 = vmax.f32 %v1599_v28, %v5682_v59  ;;  %v1737_v7 = vmax.f32 %v1736_v16, %v5684_v41  ;;  %v5688_v0 = vpop.f32.mrb[38].mxu1 }
 0x156   : > { %10663 = vst [vmem:[#allocation56_spill] sm:$0xff] %v5688_v0  ;;  %v1669_v24 = vmax.f32 %v1668_v40, %v5688_v0  ;;  %v5691_v52 = vpop.f32.mrb[39].mxu1 }
 0x157   : > { %10664 = vst [vmem:[#allocation57_spill] sm:$0xff] %v5691_v52  ;;  %v1738_v62 = vmax.f32 %v1737_v7, %v5691_v52 }
 0x159   : > { %v5694_v15 = vpop.f32.mrb[40].mxu0 }
 0x15a   : > { %10665 = vst [vmem:[#allocation58_spill] sm:$0xff] %v5694_v15  ;;  %v1532_v37 = vmax.f32 %v1531_v20, %v5694_v15  ;;  %v5697_v56 = vpop.f32.mrb[41].mxu0 }
 0x15b   : > { %10666 = vst [vmem:[#allocation59_spill] sm:$0xff] %v5697_v56  ;;  %v1601_v3 = vmax.f32 %v1600_v9, %v5697_v56  ;;  %v5700_v32 = vpop.f32.mrb[42].mxu0  ;;  %v5702_v28 = vpop.f32.mrb[40].mxu1 }
 0x15c   : > { %10667 = vst [vmem:[#allocation60_spill] sm:$0xff] %v5700_v32  ;;  %10668 = vst [vmem:[#allocation61_spill] sm:$0xff] %v5702_v28  ;;  %v1533_v16 = vmax.f32 %v1532_v37, %v5700_v32  ;;  %v1670_v40 = vmax.f32 %v1669_v24, %v5702_v28  ;;  %v5706_v0 = vpop.f32.mrb[43].mxu0  ;;  %v5708_v59 = vpop.f32.mrb[41].mxu1 }
 0x15d   : > { %10669 = vst [vmem:[#allocation62_spill] sm:$0xff] %v5706_v0  ;;  %10670 = vst [vmem:[#allocation63_spill] sm:$0xff] %v5708_v59  ;;  %v1602_v7 = vmax.f32 %v1601_v3, %v5706_v0  ;;  %v1739_v20 = vmax.f32 %v1738_v62, %v5708_v59  ;;  %v5712_v15 = vpop.f32.mrb[42].mxu1 }
 0x15e   : > { %10671 = vst [vmem:[#allocation64_spill] sm:$0xff] %v5712_v15  ;;  %v1671_v9 = vmax.f32 %v1670_v40, %v5712_v15  ;;  %v5715_v56 = vpop.f32.mrb[43].mxu1 }
 0x15f   : > { %10672 = vst [vmem:[#allocation65_spill] sm:$0xff] %v5715_v56  ;;  %v1740_v52 = vmax.f32 %v1739_v20, %v5715_v56 }
 0x161   : > { %v5718_v41 = vpop.f32.mrb[44].mxu0 }
 0x162   : > { %10673 = vst [vmem:[#allocation66_spill] sm:$0xff] %v5718_v41  ;;  %v1534_v24 = vmax.f32 %v1533_v16, %v5718_v41  ;;  %v5721_v37 = vpop.f32.mrb[45].mxu0 }
 0x163   : > { %10674 = vst [vmem:[#allocation67_spill] sm:$0xff] %v5721_v37  ;;  %v1603_v32 = vmax.f32 %v1602_v7, %v5721_v37  ;;  %v5724_v28 = vpop.f32.mrb[46].mxu0  ;;  %v5726_v3 = vpop.f32.mrb[44].mxu1 }
 0x164   : > { %10675 = vst [vmem:[#allocation68_spill] sm:$0xff] %v5724_v28  ;;  %10676 = vst [vmem:[#allocation69_spill] sm:$0xff] %v5726_v3  ;;  %v1535_v62 = vmax.f32 %v1534_v24, %v5724_v28  ;;  %v1672_v40 = vmax.f32 %v1671_v9, %v5726_v3  ;;  %v5730_v15 = vpop.f32.mrb[47].mxu0  ;;  %v5732_v0 = vpop.f32.mrb[45].mxu1 }
 0x165   : > { %10677 = vst [vmem:[#allocation70_spill] sm:$0xff] %v5730_v15  ;;  %10678 = vst [vmem:[#allocation71_spill] sm:$0xff] %v5732_v0  ;;  %v1604_v20 = vmax.f32 %v1603_v32, %v5730_v15  ;;  %v1741_v16 = vmax.f32 %v1740_v52, %v5732_v0  ;;  %v5736_v41 = vpop.f32.mrb[46].mxu1 }
 0x166   : > { %10679 = vst [vmem:[#allocation72_spill] sm:$0xff] %v5736_v41  ;;  %v1673_v7 = vmax.f32 %v1672_v40, %v5736_v41  ;;  %v5739_v37 = vpop.f32.mrb[47].mxu1 }
 0x167   : > { %10680 = vst [vmem:[#allocation73_spill] sm:$0xff] %v5739_v37  ;;  %v1742_v56 = vmax.f32 %v1741_v16, %v5739_v37 }
 0x169   : > { %v5742_v59 = vpop.f32.mrb[48].mxu0 }
 0x16a   : > { %10681 = vst [vmem:[#allocation74_spill] sm:$0xff] %v5742_v59  ;;  %v1536_v9 = vmax.f32 %v1535_v62, %v5742_v59  ;;  %v5745_v24 = vpop.f32.mrb[49].mxu0 }
 0x16b   : > { %10682 = vst [vmem:[#allocation75_spill] sm:$0xff] %v5745_v24  ;;  %v1605_v28 = vmax.f32 %v1604_v20, %v5745_v24  ;;  %v5748_v3 = vpop.f32.mrb[50].mxu0  ;;  %v5750_v32 = vpop.f32.mrb[48].mxu1 }
 0x16c   : > { %10683 = vst [vmem:[#allocation76_spill] sm:$0xff] %v5748_v3  ;;  %10684 = vst [vmem:[#allocation77_spill] sm:$0xff] %v5750_v32  ;;  %v1537_v52 = vmax.f32 %v1536_v9, %v5748_v3  ;;  %v1674_v40 = vmax.f32 %v1673_v7, %v5750_v32  ;;  %v5754_v41 = vpop.f32.mrb[51].mxu0  ;;  %v5756_v15 = vpop.f32.mrb[49].mxu1 }
 0x16d   : > { %10685 = vst [vmem:[#allocation78_spill] sm:$0xff] %v5754_v41  ;;  %10686 = vst [vmem:[#allocation79_spill] sm:$0xff] %v5756_v15  ;;  %v1606_v16 = vmax.f32 %v1605_v28, %v5754_v41  ;;  %v1743_v62 = vmax.f32 %v1742_v56, %v5756_v15  ;;  %v5760_v59 = vpop.f32.mrb[50].mxu1 }
 0x16e   : > { %10687 = vst [vmem:[#allocation80_spill] sm:$0xff] %v5760_v59  ;;  %v1675_v20 = vmax.f32 %v1674_v40, %v5760_v59  ;;  %v5763_v24 = vpop.f32.mrb[51].mxu1 }
 0x16f   : > { %10688 = vst [vmem:[#allocation81_spill] sm:$0xff] %v5763_v24  ;;  %v1744_v37 = vmax.f32 %v1743_v62, %v5763_v24 }
 0x171   : > { %v5766_v0 = vpop.f32.mrb[52].mxu0 }
 0x172   : > { %10689 = vst [vmem:[#allocation82_spill] sm:$0xff] %v5766_v0  ;;  %v1538_v7 = vmax.f32 %v1537_v52, %v5766_v0  ;;  %v5769_v9 = vpop.f32.mrb[53].mxu0 }
 0x173   : > { %10690 = vst [vmem:[#allocation83_spill] sm:$0xff] %v5769_v9  ;;  %v1607_v3 = vmax.f32 %v1606_v16, %v5769_v9  ;;  %v5772_v32 = vpop.f32.mrb[54].mxu0  ;;  %v5774_v28 = vpop.f32.mrb[52].mxu1 }
 0x174   : > { %10691 = vst [vmem:[#allocation84_spill] sm:$0xff] %v5772_v32  ;;  %10692 = vst [vmem:[#allocation85_spill] sm:$0xff] %v5774_v28  ;;  %v1539_v56 = vmax.f32 %v1538_v7, %v5772_v32  ;;  %v1676_v40 = vmax.f32 %v1675_v20, %v5774_v28  ;;  %v5778_v59 = vpop.f32.mrb[55].mxu0  ;;  %v5780_v41 = vpop.f32.mrb[53].mxu1 }
 0x175   : > { %10693 = vst [vmem:[#allocation86_spill] sm:$0xff] %v5778_v59  ;;  %10694 = vst [vmem:[#allocation87_spill] sm:$0xff] %v5780_v41  ;;  %v1608_v62 = vmax.f32 %v1607_v3, %v5778_v59  ;;  %v1745_v52 = vmax.f32 %v1744_v37, %v5780_v41  ;;  %v5784_v0 = vpop.f32.mrb[54].mxu1 }
 0x176   : > { %10695 = vst [vmem:[#allocation88_spill] sm:$0xff] %v5784_v0  ;;  %v1677_v16 = vmax.f32 %v1676_v40, %v5784_v0  ;;  %v5787_v9 = vpop.f32.mrb[55].mxu1 }
 0x177   : > { %10696 = vst [vmem:[#allocation89_spill] sm:$0xff] %v5787_v9  ;;  %v1746_v24 = vmax.f32 %v1745_v52, %v5787_v9 }
 0x179   : > { %v5790_v15 = vpop.f32.mrb[56].mxu0 }
 0x17a   : > { %10697 = vst [vmem:[#allocation90_spill] sm:$0xff] %v5790_v15  ;;  %v1540_v20 = vmax.f32 %v1539_v56, %v5790_v15  ;;  %v5793_v7 = vpop.f32.mrb[57].mxu0 }
 0x17b   : > { %10698 = vst [vmem:[#allocation91_spill] sm:$0xff] %v5793_v7  ;;  %v1609_v32 = vmax.f32 %v1608_v62, %v5793_v7  ;;  %v5796_v28 = vpop.f32.mrb[58].mxu0  ;;  %v5798_v3 = vpop.f32.mrb[56].mxu1 }
 0x17c   : > { %10699 = vst [vmem:[#allocation92_spill] sm:$0xff] %v5796_v28  ;;  %10700 = vst [vmem:[#allocation93_spill] sm:$0xff] %v5798_v3  ;;  %v1541_v37 = vmax.f32 %v1540_v20, %v5796_v28  ;;  %v1678_v40 = vmax.f32 %v1677_v16, %v5798_v3  ;;  %v5802_v0 = vpop.f32.mrb[59].mxu0  ;;  %v5804_v59 = vpop.f32.mrb[57].mxu1 }
 0x17d   : > { %10701 = vst [vmem:[#allocation94_spill] sm:$0xff] %v5802_v0  ;;  %10702 = vst [vmem:[#allocation95_spill] sm:$0xff] %v5804_v59  ;;  %v1610_v52 = vmax.f32 %v1609_v32, %v5802_v0  ;;  %v1747_v56 = vmax.f32 %v1746_v24, %v5804_v59  ;;  %v5808_v15 = vpop.f32.mrb[58].mxu1 }
 0x17e   : > { %10703 = vst [vmem:[#allocation96_spill] sm:$0xff] %v5808_v15  ;;  %v1679_v62 = vmax.f32 %v1678_v40, %v5808_v15  ;;  %v5811_v7 = vpop.f32.mrb[59].mxu1 }
 0x17f   : > { %10704 = vst [vmem:[#allocation97_spill] sm:$0xff] %v5811_v7  ;;  %v1748_v9 = vmax.f32 %v1747_v56, %v5811_v7 }
 0x181   : > { %v5814_v41 = vpop.f32.mrb[60].mxu0 }
 0x182   : > { %10705 = vst [vmem:[#allocation98_spill] sm:$0xff] %v5814_v41  ;;  %v1542_v16 = vmax.f32 %v1541_v37, %v5814_v41  ;;  %v5817_v20 = vpop.f32.mrb[61].mxu0 }
 0x183   : > { %10706 = vst [vmem:[#allocation99_spill] sm:$0xff] %v5817_v20  ;;  %v1611_v28 = vmax.f32 %v1610_v52, %v5817_v20  ;;  %v5820_v3 = vpop.f32.mrb[62].mxu0  ;;  %v5822_v32 = vpop.f32.mrb[60].mxu1 }
 0x184   : > { %10707 = vst [vmem:[#allocation100_spill] sm:$0xff] %v5820_v3  ;;  %10708 = vst [vmem:[#allocation101_spill] sm:$0xff] %v5822_v32  ;;  %v1543_v24 = vmax.f32 %v1542_v16, %v5820_v3  ;;  %v1680_v40 = vmax.f32 %v1679_v62, %v5822_v32  ;;  %v5826_v15 = vpop.f32.mrb[63].mxu0  ;;  %v5828_v0 = vpop.f32.mrb[61].mxu1 }
 0x185   : > { %10709 = vst [vmem:[#allocation102_spill] sm:$0xff] %v5826_v15  ;;  %10710 = vst [vmem:[#allocation103_spill] sm:$0xff] %v5828_v0  ;;  %v1612_v56 = vmax.f32 %v1611_v28, %v5826_v15  ;;  %v1749_v37 = vmax.f32 %v1748_v9, %v5828_v0  ;;  %v5832_v41 = vpop.f32.mrb[62].mxu1 }
 0x186   : > { %10711 = vst [vmem:[#allocation104_spill] sm:$0xff] %v5832_v41  ;;  %v1681_v52 = vmax.f32 %v1680_v40, %v5832_v41  ;;  %v5835_v20 = vpop.f32.mrb[63].mxu1 }
 0x187   : > { %10712 = vst [vmem:[#allocation105_spill] sm:$0xff] %v5835_v20  ;;  %v1750_v7 = vmax.f32 %v1749_v37, %v5835_v20 }
 0x189   : > { %v5838_v59 = vpop.f32.mrb[64].mxu0 }
 0x18a   : > { %10713 = vst [vmem:[#allocation106_spill] sm:$0xff] %v5838_v59  ;;  %v1544_v62 = vmax.f32 %v1543_v24, %v5838_v59  ;;  %v5841_v16 = vpop.f32.mrb[65].mxu0 }
 0x18b   : > { %10714 = vst [vmem:[#allocation107_spill] sm:$0xff] %v5841_v16  ;;  %v1613_v3 = vmax.f32 %v1612_v56, %v5841_v16  ;;  %v5844_v32 = vpop.f32.mrb[66].mxu0  ;;  %v5846_v28 = vpop.f32.mrb[64].mxu1 }
 0x18c   : > { %10715 = vst [vmem:[#allocation108_spill] sm:$0xff] %v5844_v32  ;;  %10716 = vst [vmem:[#allocation109_spill] sm:$0xff] %v5846_v28  ;;  %v1545_v9 = vmax.f32 %v1544_v62, %v5844_v32  ;;  %v1682_v40 = vmax.f32 %v1681_v52, %v5846_v28  ;;  %v5850_v41 = vpop.f32.mrb[67].mxu0  ;;  %v5852_v15 = vpop.f32.mrb[65].mxu1 }
 0x18d   : > { %10717 = vst [vmem:[#allocation110_spill] sm:$0xff] %v5850_v41  ;;  %10718 = vst [vmem:[#allocation111_spill] sm:$0xff] %v5852_v15  ;;  %v1614_v37 = vmax.f32 %v1613_v3, %v5850_v41  ;;  %v1751_v24 = vmax.f32 %v1750_v7, %v5852_v15  ;;  %v5856_v59 = vpop.f32.mrb[66].mxu1 }
 0x18e   : > { %10719 = vst [vmem:[#allocation112_spill] sm:$0xff] %v5856_v59  ;;  %v1683_v56 = vmax.f32 %v1682_v40, %v5856_v59  ;;  %v5859_v16 = vpop.f32.mrb[67].mxu1 }
 0x18f   : > { %10720 = vst [vmem:[#allocation113_spill] sm:$0xff] %v5859_v16  ;;  %v1752_v20 = vmax.f32 %v1751_v24, %v5859_v16  ;;  %v10727_v24 = vlaneseq  ;;  %v10728_v16 = vmov 0 }
 0x191   : > { %v5862_v0 = vpop.f32.mrb[68].mxu0  ;;  %vm5879_vm2 = vcmp.lt.s32.totalorder %v10727_v24, 512 }
 0x192   : > { %10721 = vst [vmem:[#allocation114_spill] sm:$0xff] %v5862_v0  ;;  %v1546_v52 = vmax.f32 %v1545_v9, %v5862_v0  ;;  %v5865_v62 = vpop.f32.mrb[69].mxu0  ;;  %v10729_v16 = vsel %vm5879_vm2, 4294967295, %v10728_v16  ;;  %v5156_v0 = vmov -1e+30  }
 0x193   : > { %10722 = vst [vmem:[#allocation115_spill] sm:$0xff] %v5865_v62  ;;  %v1615_v32 = vmax.f32 %v1614_v37, %v5865_v62  ;;  %v5868_v28 = vpop.f32.mrb[70].mxu0  ;;  %v5870_v3 = vpop.f32.mrb[68].mxu1  ;;  %10730 = vst [vmem:[#allocation120_spill] sm:$0xff] %v10729_v16 }
 0x194   : > { %10723 = vst [vmem:[#allocation116_spill] sm:$0xff] %v5868_v28  ;;  %10724 = vst [vmem:[#allocation117_spill] sm:$0xff] %v5870_v3  ;;  %v1547_v7 = vmax.f32 %v1546_v52, %v5868_v28  ;;  %v1684_v40 = vmax.f32 %v1683_v56, %v5870_v3  ;;  %v5874_v59 = vpop.f32.mrb[71].mxu0  ;;  %v5876_v41 = vpop.f32.mrb[69].mxu1  ;;  %v5157_v28 = vmov 0.0  }
 0x195   : > { %10725 = vst [vmem:[#allocation118_spill] sm:$0xff] %v5874_v59  ;;  %10726 = vst [vmem:[#allocation119_spill] sm:$0xff] %v5876_v41  ;;  %v1616_v9 = vmax.f32 %v1615_v32, %v5874_v59  ;;  %v1753_v37 = vmax.f32 %v1752_v20, %v5876_v41  ;;  %v5885_v62 = vpop.f32.mrb[70].mxu1 }
 0x196   : > { %10731 = vst [vmem:[#allocation121_spill] sm:$0xff] %v5885_v62  ;;  %436 = vst.msk [vmem:[#allocation2] sm:$0xf] %vm5879_vm2, %v5156_v0  ;;  %v1685_v56 = vmax.f32 %v1684_v40, %v5885_v62  ;;  %v5890_v52 = vpop.f32.mrb[71].mxu1 }
 0x197   : > { %10732 = vst [vmem:[#allocation122_spill] sm:$0xff] %v5890_v52  ;;  %437 = vst.msk [vmem:[#allocation3] sm:$0xf] %vm5879_vm2, %v5157_v28  ;;  %v1754_v24 = vmax.f32 %v1753_v37, %v5890_v52 }
 0x199   : > { %v5895_v3 = vpop.f32.mrb[72].mxu0 }
 0x19a   : > { %10733 = vst [vmem:[#allocation123_spill] sm:$0xff] %v5895_v3  ;;  %v1548_v20 = vmax.f32 %v1547_v7, %v5895_v3  ;;  %v5898_v32 = vpop.f32.mrb[73].mxu0 }
 0x19b   : > { %10734 = vst [vmem:[#allocation124_spill] sm:$0xff] %v5898_v32  ;;  %v1617_v59 = vmax.f32 %v1616_v9, %v5898_v32  ;;  %v5901_v41 = vpop.f32.mrb[74].mxu0  ;;  %v5903_v0 = vpop.f32.mrb[72].mxu1 }
 0x19c   : > { %10735 = vst [vmem:[#allocation125_spill] sm:$0xff] %v5901_v41  ;;  %10736 = vst [vmem:[#allocation126_spill] sm:$0xff] %v5903_v0  ;;  %v1549_v40 = vmax.f32 %v1548_v20, %v5901_v41  ;;  %v1686_v62 = vmax.f32 %v1685_v56, %v5903_v0  ;;  %v5907_v15 = vpop.f32.mrb[75].mxu0  ;;  %v5909_v28 = vpop.f32.mrb[73].mxu1 }
 0x19d   : > { %10737 = vst [vmem:[#allocation127_spill] sm:$0xff] %v5907_v15  ;;  %10738 = vst [vmem:[#allocation128_spill] sm:$0xff] %v5909_v28  ;;  %v1618_v37 = vmax.f32 %v1617_v59, %v5907_v15  ;;  %v1755_v7 = vmax.f32 %v1754_v24, %v5909_v28  ;;  %v5913_v3 = vpop.f32.mrb[74].mxu1 }
 0x19e   : > { %10739 = vst [vmem:[#allocation129_spill] sm:$0xff] %v5913_v3  ;;  %v1687_v9 = vmax.f32 %v1686_v62, %v5913_v3  ;;  %v5916_v32 = vpop.f32.mrb[75].mxu1 }
 0x19f   : > { %10740 = vst [vmem:[#allocation130_spill] sm:$0xff] %v5916_v32  ;;  %v1756_v52 = vmax.f32 %v1755_v7, %v5916_v32 }
 0x1a1   : > { %v5919_v33 = vpop.f32.mrb[76].mxu0 }
 0x1a2   : > { %10741 = vst [vmem:[#allocation131_spill] sm:$0xff] %v5919_v33  ;;  %v1550_v56 = vmax.f32 %v1549_v40, %v5919_v33  ;;  %v5922_v20 = vpop.f32.mrb[77].mxu0 }
 0x1a3   : > { %10742 = vst [vmem:[#allocation132_spill] sm:$0xff] %v5922_v20  ;;  %v1619_v41 = vmax.f32 %v1618_v37, %v5922_v20  ;;  %v5925_v0 = vpop.f32.mrb[78].mxu0  ;;  %v5927_v59 = vpop.f32.mrb[76].mxu1 }
 0x1a4   : > { %10743 = vst [vmem:[#allocation133_spill] sm:$0xff] %v5925_v0  ;;  %10744 = vst [vmem:[#allocation134_spill] sm:$0xff] %v5927_v59  ;;  %v1551_v24 = vmax.f32 %v1550_v56, %v5925_v0  ;;  %v1688_v62 = vmax.f32 %v1687_v9, %v5927_v59  ;;  %v5931_v3 = vpop.f32.mrb[79].mxu0  ;;  %v5933_v15 = vpop.f32.mrb[77].mxu1 }
 0x1a5   : > { %10745 = vst [vmem:[#allocation135_spill] sm:$0xff] %v5931_v3  ;;  %10746 = vst [vmem:[#allocation136_spill] sm:$0xff] %v5933_v15  ;;  %v1620_v7 = vmax.f32 %v1619_v41, %v5931_v3  ;;  %v1757_v40 = vmax.f32 %v1756_v52, %v5933_v15  ;;  %v5937_v33 = vpop.f32.mrb[78].mxu1 }
 0x1a6   : > { %10747 = vst [vmem:[#allocation137_spill] sm:$0xff] %v5937_v33  ;;  %v1689_v37 = vmax.f32 %v1688_v62, %v5937_v33  ;;  %v5940_v20 = vpop.f32.mrb[79].mxu1 }
 0x1a7   : > { %10748 = vst [vmem:[#allocation138_spill] sm:$0xff] %v5940_v20  ;;  %v1758_v32 = vmax.f32 %v1757_v40, %v5940_v20 }
 0x1a9   : > { %v5943_v28 = vpop.f32.mrb[80].mxu0 }
 0x1aa   : > { %10749 = vst [vmem:[#allocation139_spill] sm:$0xff] %v5943_v28  ;;  %v1552_v9 = vmax.f32 %v1551_v24, %v5943_v28  ;;  %v5946_v56 = vpop.f32.mrb[81].mxu0 }
 0x1ab   : > { %10750 = vst [vmem:[#allocation140_spill] sm:$0xff] %v5946_v56  ;;  %v1621_v0 = vmax.f32 %v1620_v7, %v5946_v56  ;;  %v5949_v59 = vpop.f32.mrb[82].mxu0  ;;  %v5951_v41 = vpop.f32.mrb[80].mxu1 }
 0x1ac   : > { %10751 = vst [vmem:[#allocation141_spill] sm:$0xff] %v5949_v59  ;;  %10752 = vst [vmem:[#allocation142_spill] sm:$0xff] %v5951_v41  ;;  %v1553_v52 = vmax.f32 %v1552_v9, %v5949_v59  ;;  %v1690_v62 = vmax.f32 %v1689_v37, %v5951_v41  ;;  %v5955_v33 = vpop.f32.mrb[83].mxu0  ;;  %v5957_v3 = vpop.f32.mrb[81].mxu1 }
 0x1ad   : > { %10753 = vst [vmem:[#allocation143_spill] sm:$0xff] %v5955_v33  ;;  %10754 = vst [vmem:[#allocation144_spill] sm:$0xff] %v5957_v3  ;;  %v1622_v40 = vmax.f32 %v1621_v0, %v5955_v33  ;;  %v1759_v24 = vmax.f32 %v1758_v32, %v5957_v3  ;;  %v5961_v28 = vpop.f32.mrb[82].mxu1 }
 0x1ae   : > { %10755 = vst [vmem:[#allocation145_spill] sm:$0xff] %v5961_v28  ;;  %v1691_v7 = vmax.f32 %v1690_v62, %v5961_v28  ;;  %v5964_v56 = vpop.f32.mrb[83].mxu1 }
 0x1af   : > { %10756 = vst [vmem:[#allocation146_spill] sm:$0xff] %v5964_v56  ;;  %v1760_v20 = vmax.f32 %v1759_v24, %v5964_v56 }
 0x1b1   : > { %v5967_v15 = vpop.f32.mrb[84].mxu0 }
 0x1b2   : > { %10757 = vst [vmem:[#allocation147_spill] sm:$0xff] %v5967_v15  ;;  %v1554_v37 = vmax.f32 %v1553_v52, %v5967_v15  ;;  %v5970_v9 = vpop.f32.mrb[85].mxu0 }
 0x1b3   : > { %10758 = vst [vmem:[#allocation148_spill] sm:$0xff] %v5970_v9  ;;  %v1623_v59 = vmax.f32 %v1622_v40, %v5970_v9  ;;  %v5973_v41 = vpop.f32.mrb[86].mxu0  ;;  %v5975_v0 = vpop.f32.mrb[84].mxu1 }
 0x1b4   : > { %10759 = vst [vmem:[#allocation149_spill] sm:$0xff] %v5973_v41  ;;  %10760 = vst [vmem:[#allocation150_spill] sm:$0xff] %v5975_v0  ;;  %v1555_v32 = vmax.f32 %v1554_v37, %v5973_v41  ;;  %v1692_v62 = vmax.f32 %v1691_v7, %v5975_v0  ;;  %v5979_v28 = vpop.f32.mrb[87].mxu0  ;;  %v5981_v33 = vpop.f32.mrb[85].mxu1 }
 0x1b5   : > { %10761 = vst [vmem:[#allocation151_spill] sm:$0xff] %v5979_v28  ;;  %10762 = vst [vmem:[#allocation152_spill] sm:$0xff] %v5981_v33  ;;  %v1624_v24 = vmax.f32 %v1623_v59, %v5979_v28  ;;  %v1761_v52 = vmax.f32 %v1760_v20, %v5981_v33  ;;  %v5985_v15 = vpop.f32.mrb[86].mxu1 }
 0x1b6   : > { %10763 = vst [vmem:[#allocation153_spill] sm:$0xff] %v5985_v15  ;;  %v1693_v40 = vmax.f32 %v1692_v62, %v5985_v15  ;;  %v5988_v9 = vpop.f32.mrb[87].mxu1 }
 0x1b7   : > { %10764 = vst [vmem:[#allocation154_spill] sm:$0xff] %v5988_v9  ;;  %v1762_v56 = vmax.f32 %v1761_v52, %v5988_v9 }
 0x1b9   : > { %v5991_v3 = vpop.f32.mrb[88].mxu0 }
 0x1ba   : > { %10765 = vst [vmem:[#allocation155_spill] sm:$0xff] %v5991_v3  ;;  %v1556_v7 = vmax.f32 %v1555_v32, %v5991_v3  ;;  %v5994_v37 = vpop.f32.mrb[89].mxu0 }
 0x1bb   : > { %10766 = vst [vmem:[#allocation156_spill] sm:$0xff] %v5994_v37  ;;  %v1625_v41 = vmax.f32 %v1624_v24, %v5994_v37  ;;  %v5997_v0 = vpop.f32.mrb[90].mxu0  ;;  %v5999_v59 = vpop.f32.mrb[88].mxu1 }
 0x1bc   : > { %10767 = vst [vmem:[#allocation157_spill] sm:$0xff] %v5997_v0  ;;  %10768 = vst [vmem:[#allocation158_spill] sm:$0xff] %v5999_v59  ;;  %v1557_v20 = vmax.f32 %v1556_v7, %v5997_v0  ;;  %v1694_v62 = vmax.f32 %v1693_v40, %v5999_v59  ;;  %v6003_v15 = vpop.f32.mrb[91].mxu0  ;;  %v6005_v28 = vpop.f32.mrb[89].mxu1 }
 0x1bd   : > { %10769 = vst [vmem:[#allocation159_spill] sm:$0xff] %v6003_v15  ;;  %10770 = vst [vmem:[#allocation160_spill] sm:$0xff] %v6005_v28  ;;  %v1626_v52 = vmax.f32 %v1625_v41, %v6003_v15  ;;  %v1763_v32 = vmax.f32 %v1762_v56, %v6005_v28  ;;  %v6009_v3 = vpop.f32.mrb[90].mxu1 }
 0x1be   : > { %10771 = vst [vmem:[#allocation161_spill] sm:$0xff] %v6009_v3  ;;  %v1695_v24 = vmax.f32 %v1694_v62, %v6009_v3  ;;  %v6012_v37 = vpop.f32.mrb[91].mxu1 }
 0x1bf   : > { %10772 = vst [vmem:[#allocation162_spill] sm:$0xff] %v6012_v37  ;;  %v1764_v9 = vmax.f32 %v1763_v32, %v6012_v37 }
 0x1c1   : > { %v6015_v33 = vpop.f32.mrb[92].mxu0 }
 0x1c2   : > { %10773 = vst [vmem:[#allocation163_spill] sm:$0xff] %v6015_v33  ;;  %v1558_v40 = vmax.f32 %v1557_v20, %v6015_v33  ;;  %v6018_v7 = vpop.f32.mrb[93].mxu0 }
 0x1c3   : > { %10774 = vst [vmem:[#allocation164_spill] sm:$0xff] %v6018_v7  ;;  %v1627_v0 = vmax.f32 %v1626_v52, %v6018_v7  ;;  %v6021_v59 = vpop.f32.mrb[94].mxu0  ;;  %v6023_v41 = vpop.f32.mrb[92].mxu1 }
 0x1c4   : > { %10775 = vst [vmem:[#allocation165_spill] sm:$0xff] %v6021_v59  ;;  %10776 = vst [vmem:[#allocation166_spill] sm:$0xff] %v6023_v41  ;;  %v1559_v56 = vmax.f32 %v1558_v40, %v6021_v59  ;;  %v1696_v62 = vmax.f32 %v1695_v24, %v6023_v41  ;;  %v6027_v3 = vpop.f32.mrb[95].mxu0  ;;  %v6029_v15 = vpop.f32.mrb[93].mxu1 }
 0x1c5   : > { %10777 = vst [vmem:[#allocation167_spill] sm:$0xff] %v6027_v3  ;;  %10778 = vst [vmem:[#allocation168_spill] sm:$0xff] %v6029_v15  ;;  %v1628_v32 = vmax.f32 %v1627_v0, %v6027_v3  ;;  %v1765_v20 = vmax.f32 %v1764_v9, %v6029_v15  ;;  %v6033_v33 = vpop.f32.mrb[94].mxu1 }
 0x1c6   : > { %10779 = vst [vmem:[#allocation169_spill] sm:$0xff] %v6033_v33  ;;  %v1697_v52 = vmax.f32 %v1696_v62, %v6033_v33  ;;  %v6036_v7 = vpop.f32.mrb[95].mxu1 }
 0x1c7   : > { %10780 = vst [vmem:[#allocation170_spill] sm:$0xff] %v6036_v7  ;;  %v1766_v37 = vmax.f32 %v1765_v20, %v6036_v7 }
 0x1c9   : > { %v6039_v28 = vpop.f32.mrb[96].mxu0 }
 0x1ca   : > { %10781 = vst [vmem:[#allocation171_spill] sm:$0xff] %v6039_v28  ;;  %v1560_v24 = vmax.f32 %v1559_v56, %v6039_v28  ;;  %v6042_v40 = vpop.f32.mrb[97].mxu0 }
 0x1cb   : > { %10782 = vst [vmem:[#allocation172_spill] sm:$0xff] %v6042_v40  ;;  %v1629_v59 = vmax.f32 %v1628_v32, %v6042_v40  ;;  %v6045_v41 = vpop.f32.mrb[98].mxu0  ;;  %v6047_v0 = vpop.f32.mrb[96].mxu1 }
 0x1cc   : > { %10783 = vst [vmem:[#allocation173_spill] sm:$0xff] %v6045_v41  ;;  %10784 = vst [vmem:[#allocation174_spill] sm:$0xff] %v6047_v0  ;;  %v1561_v9 = vmax.f32 %v1560_v24, %v6045_v41  ;;  %v1698_v62 = vmax.f32 %v1697_v52, %v6047_v0  ;;  %v6051_v33 = vpop.f32.mrb[99].mxu0  ;;  %v6053_v3 = vpop.f32.mrb[97].mxu1 }
 0x1cd   : > { %10785 = vst [vmem:[#allocation175_spill] sm:$0xff] %v6051_v33  ;;  %10786 = vst [vmem:[#allocation176_spill] sm:$0xff] %v6053_v3  ;;  %v1630_v20 = vmax.f32 %v1629_v59, %v6051_v33  ;;  %v1767_v56 = vmax.f32 %v1766_v37, %v6053_v3  ;;  %v6057_v28 = vpop.f32.mrb[98].mxu1 }
 0x1ce   : > { %10787 = vst [vmem:[#allocation177_spill] sm:$0xff] %v6057_v28  ;;  %v1699_v32 = vmax.f32 %v1698_v62, %v6057_v28  ;;  %v6060_v40 = vpop.f32.mrb[99].mxu1 }
 0x1cf   : > { %10788 = vst [vmem:[#allocation178_spill] sm:$0xff] %v6060_v40  ;;  %v1768_v7 = vmax.f32 %v1767_v56, %v6060_v40 }
 0x1d1   : > { %v6063_v15 = vpop.f32.mrb[100].mxu0 }
 0x1d2   : > { %10789 = vst [vmem:[#allocation179_spill] sm:$0xff] %v6063_v15  ;;  %v1562_v52 = vmax.f32 %v1561_v9, %v6063_v15  ;;  %v6066_v24 = vpop.f32.mrb[101].mxu0 }
 0x1d3   : > { %10790 = vst [vmem:[#allocation180_spill] sm:$0xff] %v6066_v24  ;;  %v1631_v41 = vmax.f32 %v1630_v20, %v6066_v24  ;;  %v6069_v0 = vpop.f32.mrb[102].mxu0  ;;  %v6071_v59 = vpop.f32.mrb[100].mxu1 }
 0x1d4   : > { %10791 = vst [vmem:[#allocation181_spill] sm:$0xff] %v6069_v0  ;;  %10792 = vst [vmem:[#allocation182_spill] sm:$0xff] %v6071_v59  ;;  %v1563_v37 = vmax.f32 %v1562_v52, %v6069_v0  ;;  %v1700_v62 = vmax.f32 %v1699_v32, %v6071_v59  ;;  %v6075_v28 = vpop.f32.mrb[103].mxu0  ;;  %v6077_v33 = vpop.f32.mrb[101].mxu1 }
 0x1d5   : > { %10793 = vst [vmem:[#allocation183_spill] sm:$0xff] %v6075_v28  ;;  %10794 = vst [vmem:[#allocation184_spill] sm:$0xff] %v6077_v33  ;;  %v1632_v56 = vmax.f32 %v1631_v41, %v6075_v28  ;;  %v1769_v9 = vmax.f32 %v1768_v7, %v6077_v33  ;;  %v6081_v15 = vpop.f32.mrb[102].mxu1 }
 0x1d6   : > { %10795 = vst [vmem:[#allocation185_spill] sm:$0xff] %v6081_v15  ;;  %v1701_v20 = vmax.f32 %v1700_v62, %v6081_v15  ;;  %v6084_v24 = vpop.f32.mrb[103].mxu1 }
 0x1d7   : > { %10796 = vst [vmem:[#allocation186_spill] sm:$0xff] %v6084_v24  ;;  %v1770_v40 = vmax.f32 %v1769_v9, %v6084_v24 }
 0x1d9   : > { %v6087_v3 = vpop.f32.mrb[104].mxu0 }
 0x1da   : > { %10797 = vst [vmem:[#allocation187_spill] sm:$0xff] %v6087_v3  ;;  %v1564_v32 = vmax.f32 %v1563_v37, %v6087_v3  ;;  %v6090_v52 = vpop.f32.mrb[105].mxu0 }
 0x1db   : > { %10798 = vst [vmem:[#allocation188_spill] sm:$0xff] %v6090_v52  ;;  %v1633_v0 = vmax.f32 %v1632_v56, %v6090_v52  ;;  %v6093_v59 = vpop.f32.mrb[106].mxu0  ;;  %v6095_v41 = vpop.f32.mrb[104].mxu1 }
 0x1dc   : > { %10799 = vst [vmem:[#allocation189_spill] sm:$0xff] %v6093_v59  ;;  %10800 = vst [vmem:[#allocation190_spill] sm:$0xff] %v6095_v41  ;;  %v1565_v7 = vmax.f32 %v1564_v32, %v6093_v59  ;;  %v1702_v62 = vmax.f32 %v1701_v20, %v6095_v41  ;;  %v6099_v15 = vpop.f32.mrb[107].mxu0  ;;  %v6101_v28 = vpop.f32.mrb[105].mxu1 }
 0x1dd   : > { %10801 = vst [vmem:[#allocation191_spill] sm:$0xff] %v6099_v15  ;;  %10802 = vst [vmem:[#allocation192_spill] sm:$0xff] %v6101_v28  ;;  %v1634_v9 = vmax.f32 %v1633_v0, %v6099_v15  ;;  %v1771_v37 = vmax.f32 %v1770_v40, %v6101_v28  ;;  %v6105_v3 = vpop.f32.mrb[106].mxu1 }
 0x1de   : > { %10803 = vst [vmem:[#allocation193_spill] sm:$0xff] %v6105_v3  ;;  %v1703_v56 = vmax.f32 %v1702_v62, %v6105_v3  ;;  %v6108_v52 = vpop.f32.mrb[107].mxu1 }
 0x1df   : > { %10804 = vst [vmem:[#allocation194_spill] sm:$0xff] %v6108_v52  ;;  %v1772_v24 = vmax.f32 %v1771_v37, %v6108_v52 }
 0x1e1   : > { %v6111_v33 = vpop.f32.mrb[108].mxu0 }
 0x1e2   : > { %10805 = vst [vmem:[#allocation195_spill] sm:$0xff] %v6111_v33  ;;  %v1566_v20 = vmax.f32 %v1565_v7, %v6111_v33  ;;  %v6114_v32 = vpop.f32.mrb[109].mxu0 }
 0x1e3   : > { %10806 = vst [vmem:[#allocation196_spill] sm:$0xff] %v6114_v32  ;;  %v1635_v59 = vmax.f32 %v1634_v9, %v6114_v32  ;;  %v6117_v41 = vpop.f32.mrb[110].mxu0  ;;  %v6119_v0 = vpop.f32.mrb[108].mxu1 }
 0x1e4   : > { %10807 = vst [vmem:[#allocation197_spill] sm:$0xff] %v6117_v41  ;;  %10808 = vst [vmem:[#allocation198_spill] sm:$0xff] %v6119_v0  ;;  %v1567_v40 = vmax.f32 %v1566_v20, %v6117_v41  ;;  %v1704_v62 = vmax.f32 %v1703_v56, %v6119_v0  ;;  %v6123_v3 = vpop.f32.mrb[111].mxu0  ;;  %v6125_v15 = vpop.f32.mrb[109].mxu1 }
 0x1e5   : > { %10809 = vst [vmem:[#allocation199_spill] sm:$0xff] %v6123_v3  ;;  %10810 = vst [vmem:[#allocation200_spill] sm:$0xff] %v6125_v15  ;;  %v1636_v37 = vmax.f32 %v1635_v59, %v6123_v3  ;;  %v1773_v7 = vmax.f32 %v1772_v24, %v6125_v15  ;;  %v6129_v33 = vpop.f32.mrb[110].mxu1 }
 0x1e6   : > { %10811 = vst [vmem:[#allocation201_spill] sm:$0xff] %v6129_v33  ;;  %v1705_v9 = vmax.f32 %v1704_v62, %v6129_v33  ;;  %v6132_v32 = vpop.f32.mrb[111].mxu1 }
 0x1e7   : > { %10812 = vst [vmem:[#allocation202_spill] sm:$0xff] %v6132_v32  ;;  %v1774_v52 = vmax.f32 %v1773_v7, %v6132_v32 }
 0x1e9   : > { %v6135_v28 = vpop.f32.mrb[112].mxu0 }
 0x1ea   : > { %10813 = vst [vmem:[#allocation203_spill] sm:$0xff] %v6135_v28  ;;  %v1568_v56 = vmax.f32 %v1567_v40, %v6135_v28  ;;  %v6138_v20 = vpop.f32.mrb[113].mxu0 }
 0x1eb   : > { %10814 = vst [vmem:[#allocation204_spill] sm:$0xff] %v6138_v20  ;;  %v1637_v41 = vmax.f32 %v1636_v37, %v6138_v20  ;;  %v6141_v0 = vpop.f32.mrb[114].mxu0  ;;  %v6143_v59 = vpop.f32.mrb[112].mxu1 }
 0x1ec   : > { %10815 = vst [vmem:[#allocation205_spill] sm:$0xff] %v6141_v0  ;;  %10816 = vst [vmem:[#allocation206_spill] sm:$0xff] %v6143_v59  ;;  %v1569_v24 = vmax.f32 %v1568_v56, %v6141_v0  ;;  %v1706_v62 = vmax.f32 %v1705_v9, %v6143_v59  ;;  %v6147_v33 = vpop.f32.mrb[115].mxu0  ;;  %v6149_v3 = vpop.f32.mrb[113].mxu1 }
 0x1ed   : > { %10817 = vst [vmem:[#allocation207_spill] sm:$0xff] %v6147_v33  ;;  %10818 = vst [vmem:[#allocation208_spill] sm:$0xff] %v6149_v3  ;;  %v1638_v7 = vmax.f32 %v1637_v41, %v6147_v33  ;;  %v1775_v40 = vmax.f32 %v1774_v52, %v6149_v3  ;;  %v6153_v28 = vpop.f32.mrb[114].mxu1 }
 0x1ee   : > { %10819 = vst [vmem:[#allocation209_spill] sm:$0xff] %v6153_v28  ;;  %v1707_v37 = vmax.f32 %v1706_v62, %v6153_v28  ;;  %v6156_v20 = vpop.f32.mrb[115].mxu1 }
 0x1ef   : > { %10820 = vst [vmem:[#allocation210_spill] sm:$0xff] %v6156_v20  ;;  %v1776_v32 = vmax.f32 %v1775_v40, %v6156_v20 }
 0x1f1   : > { %v6159_v15 = vpop.f32.mrb[116].mxu0 }
 0x1f2   : > { %10821 = vst [vmem:[#allocation211_spill] sm:$0xff] %v6159_v15  ;;  %v1570_v9 = vmax.f32 %v1569_v24, %v6159_v15  ;;  %v6162_v56 = vpop.f32.mrb[117].mxu0 }
 0x1f3   : > { %10822 = vst [vmem:[#allocation212_spill] sm:$0xff] %v6162_v56  ;;  %v1639_v0 = vmax.f32 %v1638_v7, %v6162_v56  ;;  %v6165_v59 = vpop.f32.mrb[118].mxu0  ;;  %v6167_v41 = vpop.f32.mrb[116].mxu1 }
 0x1f4   : > { %10823 = vst [vmem:[#allocation213_spill] sm:$0xff] %v6165_v59  ;;  %10824 = vst [vmem:[#allocation214_spill] sm:$0xff] %v6167_v41  ;;  %v1571_v52 = vmax.f32 %v1570_v9, %v6165_v59  ;;  %v1708_v62 = vmax.f32 %v1707_v37, %v6167_v41  ;;  %v6171_v28 = vpop.f32.mrb[119].mxu0  ;;  %v6173_v33 = vpop.f32.mrb[117].mxu1 }
 0x1f5   : > { %10825 = vst [vmem:[#allocation215_spill] sm:$0xff] %v6171_v28  ;;  %10826 = vst [vmem:[#allocation216_spill] sm:$0xff] %v6173_v33  ;;  %v1640_v40 = vmax.f32 %v1639_v0, %v6171_v28  ;;  %v1777_v24 = vmax.f32 %v1776_v32, %v6173_v33  ;;  %v6177_v15 = vpop.f32.mrb[118].mxu1 }
 0x1f6   : > { %10827 = vst [vmem:[#allocation217_spill] sm:$0xff] %v6177_v15  ;;  %v1709_v7 = vmax.f32 %v1708_v62, %v6177_v15  ;;  %v6180_v56 = vpop.f32.mrb[119].mxu1 }
 0x1f7   : > { %10828 = vst [vmem:[#allocation218_spill] sm:$0xff] %v6180_v56  ;;  %v1778_v20 = vmax.f32 %v1777_v24, %v6180_v56 }
 0x1f9   : > { %v6183_v3 = vpop.f32.mrb[120].mxu0 }
 0x1fa   : > { %10829 = vst [vmem:[#allocation219_spill] sm:$0xff] %v6183_v3  ;;  %v1572_v37 = vmax.f32 %v1571_v52, %v6183_v3  ;;  %v6186_v9 = vpop.f32.mrb[121].mxu0 }
 0x1fb   : > { %10830 = vst [vmem:[#allocation220_spill] sm:$0xff] %v6186_v9  ;;  %v1641_v59 = vmax.f32 %v1640_v40, %v6186_v9  ;;  %v6189_v41 = vpop.f32.mrb[122].mxu0  ;;  %v6191_v0 = vpop.f32.mrb[120].mxu1 }
 0x1fc   : > { %10831 = vst [vmem:[#allocation221_spill] sm:$0xff] %v6189_v41  ;;  %10832 = vst [vmem:[#allocation222_spill] sm:$0xff] %v6191_v0  ;;  %v1573_v32 = vmax.f32 %v1572_v37, %v6189_v41  ;;  %v1710_v62 = vmax.f32 %v1709_v7, %v6191_v0  ;;  %v6195_v15 = vpop.f32.mrb[123].mxu0  ;;  %v6197_v28 = vpop.f32.mrb[121].mxu1 }
 0x1fd   : > { %10833 = vst [vmem:[#allocation223_spill] sm:$0xff] %v6195_v15  ;;  %10834 = vst [vmem:[#allocation224_spill] sm:$0xff] %v6197_v28  ;;  %v1642_v24 = vmax.f32 %v1641_v59, %v6195_v15  ;;  %v1779_v52 = vmax.f32 %v1778_v20, %v6197_v28  ;;  %v6201_v3 = vpop.f32.mrb[122].mxu1 }
 0x1fe   : > { %10835 = vst [vmem:[#allocation225_spill] sm:$0xff] %v6201_v3  ;;  %v1711_v40 = vmax.f32 %v1710_v62, %v6201_v3  ;;  %v6204_v9 = vpop.f32.mrb[123].mxu1 }
 0x1ff   : > { %10836 = vst [vmem:[#allocation226_spill] sm:$0xff] %v6204_v9  ;;  %v1780_v56 = vmax.f32 %v1779_v52, %v6204_v9 }
 0x201   : > { %v6207_v33 = vpop.f32.mrb[124].mxu0 }
 0x202   : > { %10837 = vst [vmem:[#allocation227_spill] sm:$0xff] %v6207_v33  ;;  %v1574_v7 = vmax.f32 %v1573_v32, %v6207_v33  ;;  %v6210_v37 = vpop.f32.mrb[125].mxu0 }
 0x203   : > { %10838 = vst [vmem:[#allocation228_spill] sm:$0xff] %v6210_v37  ;;  %v1643_v41 = vmax.f32 %v1642_v24, %v6210_v37  ;;  %v6213_v0 = vpop.f32.mrb[126].mxu0  ;;  %v6215_v59 = vpop.f32.mrb[124].mxu1 }
 0x204   : > { %10839 = vst [vmem:[#allocation229_spill] sm:$0xff] %v6213_v0  ;;  %10840 = vst [vmem:[#allocation230_spill] sm:$0xff] %v6215_v59  ;;  %v1575_v20 = vmax.f32 %v1574_v7, %v6213_v0  ;;  %v1712_v62 = vmax.f32 %v1711_v40, %v6215_v59  ;;  %v6219_v3 = vpop.f32.mrb[127].mxu0  ;;  %v6221_v15 = vpop.f32.mrb[125].mxu1 }
 0x205   : > { %10841 = vst [vmem:[#allocation231_spill] sm:$0xff] %v6219_v3  ;;  %10842 = vst [vmem:[#allocation232_spill] sm:$0xff] %v6221_v15  ;;  %v1644_v52 = vmax.f32 %v1643_v41, %v6219_v3  ;;  %v1781_v32 = vmax.f32 %v1780_v56, %v6221_v15  ;;  %v6225_v33 = vpop.f32.mrb[126].mxu1 }
 0x206   : > { %10843 = vst [vmem:[#allocation233_spill] sm:$0xff] %v6225_v33  ;;  %v1576_v9 = vrot.slane %v1575_v20, 4  ;;  %v1713_v24 = vmax.f32 %v1712_v62, %v6225_v33  ;;  %v6228_v37 = vpop.f32.mrb[127].mxu1 }
 0x207   : > { %v1645_v28 = vrot.slane %v1644_v52, 4  ;;  %v1782_v7 = vmax.f32 %v1781_v32, %v6228_v37 }
 0x208   : > { %v1577_v0 = vmax.f32 %v1575_v20, %v1576_v9  ;;  %v1714_v40 = vrot.slane %v1713_v24, 4 }
 0x209   : > { %v1646_v59 = vmax.f32 %v1644_v52, %v1645_v28  ;;  %v1783_v47 = vrot.slane %v1782_v7, 4 }
 0x20a   : > { %v1578_v36 = vrot.slane %v1577_v0, 2  ;;  %v1715_v30 = vmax.f32 %v1713_v24, %v1714_v40 }
 0x20b   : > { %v1647_v26 = vrot.slane %v1646_v59, 2  ;;  %v1784_v41 = vmax.f32 %v1782_v7, %v1783_v47 }
 0x20c   : > { %v1579_v3 = vmax.f32 %v1577_v0, %v1578_v36  ;;  %v1716_v56 = vrot.slane %v1715_v30, 2  ;;  %v1512_v0 = vld [vmem:[#allocation2] sm:$0xf] }
 0x20d   : > { %v1648_v15 = vmax.f32 %v1646_v59, %v1647_v26  ;;  %v1785_v23 = vrot.slane %v1784_v41, 2  ;;  %v6234_v26 = vsub.s32 0, %v5279_v4 }
 0x20e   : > { %v1580_v19 = vrot.slane %v1579_v3, 1  ;;  %v1717_v11 = vmax.f32 %v1715_v30, %v1716_v56  ;;  %v6237_v30 = vsub.s32 1, %v5279_v4 }
 0x20f   : > { %v1649_v62 = vrot.slane %v1648_v15, 1  ;;  %v1786_v33 = vmax.f32 %v1784_v41, %v1785_v23  ;;  %10844 = vst [vmem:[#allocation234_spill] sm:$0xff] %v6234_v26 }
 0x210   : > { %v1581_v63 = vmax.f32 %v1579_v3, %v1580_v19  ;;  %v1718_v13 = vrot.slane %v1717_v11, 1  ;;  %10845 = vst [vmem:[#allocation235_spill] sm:$0xff] %v6237_v30  ;;  %v6240_v19 = vsub.s32 2, %v5279_v4 }
 0x211   : > { %v1650_v5 = vmax.f32 %v1648_v15, %v1649_v62  ;;  %v1787_v32 = vrot.slane %v1786_v33, 1 }
 0x212   : > { %v1719_v9 = vmax.f32 %v1717_v11, %v1718_v13  ;;  %10846 = vst [vmem:[#allocation236_spill] sm:$0xff] %v6240_v19 }
 0x213   : > { %v1793_v20 = vcombine.low %v1581_v63, %v1650_v5  ;;  %v1788_v28 = vmax.f32 %v1786_v33, %v1787_v32  ;;  %v6244_v63 = vsub.s32 3, %v5279_v4 }
 0x215   : > { %v1794_v52 = vcombine.low %v1719_v9, %v1788_v28  ;;  %v1801_v24 = vrot.slane %v1793_v20, %v5292_v6  ;;  %10847 = vst [vmem:[#allocation237_spill] sm:$0xff] %v6244_v63  ;;  %v10856_v28 = vld [vmem:[#allocation21_spill] sm:$0xff]  ;;  %v10857_v20 = vld [vmem:[#allocation23_spill] sm:$0xff] }
 0x216   : > { %v11068_v9 = vld [vmem:[#allocation233_spill] sm:$0xff] }
 0x217   : > { %v1808_v47 = vrot.slane %v1794_v52, %v5292_v6  ;;  %v10855_v52 = vld [vmem:[#allocation19_spill] sm:$0xff] }
 0x219   : > { %v1809_v36 = vcombine.low %v1801_v24, %v1808_v47  ;;  %v10853_v24 = vld [vmem:[#allocation17_spill] sm:$0xff]  ;;  %v10854_v47 = vld [vmem:[#allocation18_spill] sm:$0xff] }
 0x21b   : > { %v1816_v11 = vrot.slane %v1809_v36, %v5292_v6  ;;  %v10848_v36 = vld [vmem:[#allocation13_spill] sm:$0xff]  ;;  %v11067_v6 = vld [vmem:[#allocation231_spill] sm:$0xff] }
 0x21d   : > { %v1818_v5 = vmax.f32 %v1512_v0, %v1816_v11  ;;  %v10850_v11 = vld [vmem:[#allocation12_spill] sm:$0xff] }
 0x21f   : > { %v1819_v13 = vsub.f32 %v1512_v0, %v1818_v5  ;;  %v6247_v23 = vrot.slane %v1818_v5, %v6234_v26  ;;  %v6250_v33 = vrot.slane %v1818_v5, %v6237_v30  ;;  %v6253_v15 = vrot.slane %v1818_v5, %v6240_v19  ;;  %3880 = vst.msk [vmem:[#allocation2] sm:$0xf] %vm5879_vm2, %v1818_v5  ;;  %v10849_v0 = vld [vmem:[#allocation15_spill] sm:$0xff]  ;;  %v11064_v19 = vld [vmem:[#allocation230_spill] sm:$0xff]  ;;  %v11065_v26 = vld [vmem:[#allocation232_spill] sm:$0xff] }
 0x220   : > { %v6258_v3 = vrot.slane %v1818_v5, %v6244_v63  ;;  %v10851_v5 = vld [vmem:[#allocation14_spill] sm:$0xff]  ;;  %v11062_v63 = vld [vmem:[#allocation227_spill] sm:$0xff] }
 0x221   : > { %v6274_v32 = vmul.f32 1.442695, %v1819_v13  ;;  %v10852_v13 = vld [vmem:[#allocation16_spill] sm:$0xff]  ;;  %v11069_v56 = vsub.f32 %v5430_v42, %v6247_v23  ;;  %v11070_v41 = vsub.f32 %v5433_v43, %v6250_v33  ;;  %v11071_v7 = vsub.f32 %v5438_v46, %v6253_v15 }
 0x222   : > { %v11072_v4 = vsub.f32 %v5444_v49, %v6258_v3  ;;  %v11073_v62 = vsub.f32 %v5436_v45, %v6247_v23  ;;  %v11074_v43 = vsub.f32 %v5442_v48, %v6250_v33  ;;  %v11075_v46 = vsub.f32 %v5448_v51, %v6253_v15 }
 0x223   : > { %v2099_v30 = vmul.f32 1.442695, %v11069_v56  ;;  %v2101_v40 = vmul.f32 1.442695, %v11070_v41  ;;  %v2103_v16 = vmul.f32 1.442695, %v11071_v7  ;;  %4538 = vpow2.f32 %v6274_v32 }
 0x224   : > { %v2105_v59 = vmul.f32 1.442695, %v11072_v4  ;;  %v2107_v42 = vmul.f32 1.442695, %v11073_v62  ;;  %v2109_v41 = vmul.f32 1.442695, %v11074_v43  ;;  %v11076_v49 = vsub.f32 %v5453_v53, %v6258_v3 }
 0x225   : > { %4540 = vpow2.f32 %v2099_v30  ;;  %v2111_v7 = vmul.f32 1.442695, %v11075_v46  ;;  %v11077_v45 = vsub.f32 %v5459_v55, %v6247_v23  ;;  %v11078_v48 = vsub.f32 %v5463_v57, %v6250_v33 }
 0x226   : > { %4542 = vpow2.f32 %v2101_v40  ;;  %v2113_v4 = vmul.f32 1.442695, %v11076_v49  ;;  %v11079_v51 = vsub.f32 %v5469_v61, %v6253_v15  ;;  %v11080_v53 = vsub.f32 %v5475_v2, %v6258_v3 }
 0x227   : > { %4544 = vpow2.f32 %v2103_v16  ;;  %v2115_v30 = vmul.f32 1.442695, %v11077_v45  ;;  %v2117_v40 = vmul.f32 1.442695, %v11078_v48  ;;  %v11081_v55 = vsub.f32 %v5467_v60, %v6247_v23 }
 0x228   : > { %4546 = vpow2.f32 %v2105_v59  ;;  %v2119_v16 = vmul.f32 1.442695, %v11079_v51  ;;  %v2121_v59 = vmul.f32 1.442695, %v11080_v53  ;;  %v11083_v57 = vsub.f32 %v5473_v1, %v6250_v33 }
 0x229   : > { %4548 = vpow2.f32 %v2107_v42  ;;  %v2123_v56 = vmul.f32 1.442695, %v11081_v55  ;;  %v11085_v61 = vsub.f32 %v5479_v8, %v6253_v15  ;;  %v11087_v60 = vsub.f32 %v5483_v10, %v6258_v3 }
 0x22a   : > { %4550 = vpow2.f32 %v2109_v41  ;;  %v2125_v32 = vmul.f32 1.442695, %v11083_v57  ;;  %v11089_v1 = vsub.f32 %v5488_v12, %v6247_v23  ;;  %v11091_v8 = vsub.f32 %v5492_v14, %v6250_v33 }
 0x22b   : > { %4552 = vpow2.f32 %v2111_v7  ;;  %v2127_v2 = vmul.f32 1.442695, %v11085_v61  ;;  %v2129_v41 = vmul.f32 1.442695, %v11087_v60  ;;  %v11093_v10 = vsub.f32 %v5498_v18, %v6253_v15 }
 0x22c   : > { %4554 = vpow2.f32 %v2113_v4  ;;  %v2131_v7 = vmul.f32 1.442695, %v11089_v1  ;;  %v2133_v4 = vmul.f32 1.442695, %v11091_v8  ;;  %v11095_v12 = vsub.f32 %v5504_v22, %v6258_v3 }
 0x22d   : > { %4556 = vpow2.f32 %v2115_v30  ;;  %v6814_v62 = vpop.eup %4538  ;;  %v2135_v30 = vmul.f32 1.442695, %v11093_v10  ;;  %v11097_v14 = vsub.f32 %v5496_v17, %v6247_v23  ;;  %v11099_v18 = vsub.f32 %v5502_v21, %v6250_v33 }
 0x22e   : > { %11082 = vst [vmem:[#allocation13_spill] sm:$0xff] %v6814_v62  ;;  %4558 = vpow2.f32 %v2117_v40  ;;  %v2137_v40 = vmul.f32 1.442695, %v11095_v12  ;;  %v11101_v22 = vsub.f32 %v5508_v25, %v6253_v15  ;;  %v11103_v17 = vsub.f32 %v5512_v27, %v6258_v3 }
 0x22f   : > { %v6819_v42 = vpop.eup %4540  ;;  %4560 = vpow2.f32 %v2119_v16  ;;  %v2139_v16 = vmul.f32 1.442695, %v11097_v14  ;;  %v11105_v21 = vsub.f32 %v5517_v29, %v6247_v23  ;;  %v11107_v25 = vsub.f32 %v5521_v31, %v6250_v33 }
 0x230   : > { %11084 = vst [vmem:[#allocation15_spill] sm:$0xff] %v6819_v42  ;;  %v6824_v43 = vpop.eup %4542  ;;  %4562 = vpow2.f32 %v2121_v59  ;;  %v2141_v59 = vmul.f32 1.442695, %v11099_v18  ;;  %v11109_v27 = vsub.f32 %v5527_v35, %v6253_v15  ;;  %v11111_v29 = vsub.f32 %v5533_v39, %v6258_v3 }
 0x231   : > { %11086 = vst [vmem:[#allocation12_spill] sm:$0xff] %v6824_v43  ;;  %v6829_v46 = vpop.eup %4544  ;;  %4564 = vpow2.f32 %v2123_v56  ;;  %v2143_v56 = vmul.f32 1.442695, %v11101_v22  ;;  %v11113_v31 = vsub.f32 %v5525_v34, %v6247_v23  ;;  %v11115_v35 = vsub.f32 %v5531_v38, %v6250_v33 }
 0x232   : > { %11088 = vst [vmem:[#allocation14_spill] sm:$0xff] %v6829_v46  ;;  %v6834_v49 = vpop.eup %4546  ;;  %4566 = vpow2.f32 %v2125_v32  ;;  %v2145_v32 = vmul.f32 1.442695, %v11103_v17  ;;  %v11117_v39 = vsub.f32 %v5537_v44, %v6253_v15  ;;  %v11119_v34 = vsub.f32 %v5541_v50, %v6258_v3 }
 0x233   : > { %11090 = vst [vmem:[#allocation16_spill] sm:$0xff] %v6834_v49  ;;  %v6839_v45 = vpop.eup %4548  ;;  %4568 = vpow2.f32 %v2127_v2  ;;  %v2147_v2 = vmul.f32 1.442695, %v11105_v21  ;;  %v11121_v38 = vsub.f32 %v5546_v54, %v6247_v23  ;;  %v11123_v44 = vsub.f32 %v5550_v58, %v6250_v33 }
 0x234   : > { %11092 = vst [vmem:[#allocation17_spill] sm:$0xff] %v6839_v45  ;;  %v6844_v48 = vpop.eup %4550  ;;  %4570 = vpow2.f32 %v2129_v41  ;;  %v2149_v41 = vmul.f32 1.442695, %v11107_v25  ;;  %v11125_v50 = vsub.f32 %v10848_v36, %v6253_v15  ;;  %v11127_v54 = vsub.f32 %v10849_v0, %v6258_v3  ;;  %v11257_v45 = vld [vmem:[#allocation62_spill] sm:$0xff] }
 0x235   : > { %11094 = vst [vmem:[#allocation18_spill] sm:$0xff] %v6844_v48  ;;  %v6849_v51 = vpop.eup %4552  ;;  %4572 = vpow2.f32 %v2131_v7  ;;  %v2151_v7 = vmul.f32 1.442695, %v11109_v27  ;;  %v11129_v58 = vsub.f32 %v10850_v11, %v6247_v23  ;;  %v11131_v36 = vsub.f32 %v10851_v5, %v6250_v33 }
 0x236   : > { %11096 = vst [vmem:[#allocation19_spill] sm:$0xff] %v6849_v51  ;;  %v6854_v53 = vpop.eup %4554  ;;  %4574 = vpow2.f32 %v2133_v4  ;;  %v2153_v4 = vmul.f32 1.442695, %v11111_v29  ;;  %v11133_v0 = vsub.f32 %v10852_v13, %v6253_v15  ;;  %v11135_v11 = vsub.f32 %v10853_v24, %v6258_v3 }
 0x237   : > { %11098 = vst [vmem:[#allocation21_spill] sm:$0xff] %v6854_v53  ;;  %v6859_v55 = vpop.eup %4556  ;;  %4576 = vpow2.f32 %v2135_v30  ;;  %v2155_v30 = vmul.f32 1.442695, %v11113_v31  ;;  %v11137_v5 = vsub.f32 %v10854_v47, %v6247_v23  ;;  %v11139_v13 = vsub.f32 %v10855_v52, %v6250_v33 }
 0x238   : > { %11100 = vst [vmem:[#allocation23_spill] sm:$0xff] %v6859_v55  ;;  %v6864_v57 = vpop.eup %4558  ;;  %4578 = vpow2.f32 %v2137_v40  ;;  %v2157_v40 = vmul.f32 1.442695, %v11115_v35  ;;  %v11141_v24 = vsub.f32 %v10856_v28, %v6253_v15  ;;  %v11143_v47 = vsub.f32 %v10857_v20, %v6258_v3 }
 0x239   : > { %11102 = vst [vmem:[#allocation227_spill] sm:$0xff] %v6864_v57  ;;  %v6869_v61 = vpop.eup %4560  ;;  %4580 = vpow2.f32 %v2139_v16  ;;  %v2159_v16 = vmul.f32 1.442695, %v11117_v39 }
 0x23a   : > { %11104 = vst [vmem:[#allocation230_spill] sm:$0xff] %v6869_v61  ;;  %v6874_v60 = vpop.eup %4562  ;;  %4582 = vpow2.f32 %v2141_v59  ;;  %v2161_v59 = vmul.f32 1.442695, %v11119_v34 }
 0x23b   : > { %11106 = vst [vmem:[#allocation232_spill] sm:$0xff] %v6874_v60  ;;  %v6879_v1 = vpop.eup %4564  ;;  %4584 = vpow2.f32 %v2143_v56  ;;  %v2163_v56 = vmul.f32 1.442695, %v11121_v38 }
 0x23c   : > { %11108 = vst [vmem:[#allocation231_spill] sm:$0xff] %v6879_v1  ;;  %v6884_v8 = vpop.eup %4566  ;;  %4586 = vpow2.f32 %v2145_v32  ;;  %v2165_v32 = vmul.f32 1.442695, %v11123_v44 }
 0x23d   : > { %11110 = vst [vmem:[#allocation233_spill] sm:$0xff] %v6884_v8  ;;  %v6889_v10 = vpop.eup %4568  ;;  %4588 = vpow2.f32 %v2147_v2  ;;  %v2167_v2 = vmul.f32 1.442695, %v11125_v50 }
 0x23e   : > { %11112 = vst [vmem:[#allocation238_spill] sm:$0xff] %v6889_v10  ;;  %v6894_v12 = vpop.eup %4570  ;;  %4590 = vpow2.f32 %v2149_v41  ;;  %v2169_v41 = vmul.f32 1.442695, %v11127_v54 }
 0x23f   : > { %11114 = vst [vmem:[#allocation239_spill] sm:$0xff] %v6894_v12  ;;  %v6899_v14 = vpop.eup %4572  ;;  %4592 = vpow2.f32 %v2151_v7  ;;  %v2171_v7 = vmul.f32 1.442695, %v11129_v58  ;;  %v11148_v58 = vld [vmem:[#allocation22_spill] sm:$0xff]  ;;  %v11222_v12 = vld [vmem:[#allocation48_spill] sm:$0xff] }
 0x240   : > { %11116 = vst [vmem:[#allocation240_spill] sm:$0xff] %v6899_v14  ;;  %v6904_v18 = vpop.eup %4574  ;;  %4594 = vpow2.f32 %v2153_v4  ;;  %v2173_v4 = vmul.f32 1.442695, %v11131_v36  ;;  %v11149_v28 = vsub.f32 %v11148_v58, %v6250_v33 }
 0x241   : > { %11118 = vst [vmem:[#allocation241_spill] sm:$0xff] %v6904_v18  ;;  %v6909_v22 = vpop.eup %4576  ;;  %4596 = vpow2.f32 %v2155_v30  ;;  %v2175_v30 = vmul.f32 1.442695, %v11133_v0 }
 0x242   : > { %11120 = vst [vmem:[#allocation242_spill] sm:$0xff] %v6909_v22  ;;  %v6914_v17 = vpop.eup %4578  ;;  %4598 = vpow2.f32 %v2157_v40  ;;  %v2177_v40 = vmul.f32 1.442695, %v11135_v11  ;;  %v11154_v11 = vld [vmem:[#allocation25_spill] sm:$0xff] }
 0x243   : > { %11122 = vst [vmem:[#allocation243_spill] sm:$0xff] %v6914_v17  ;;  %v6919_v21 = vpop.eup %4580  ;;  %4600 = vpow2.f32 %v2159_v16  ;;  %v2179_v16 = vmul.f32 1.442695, %v11137_v5 }
 0x244   : > { %11124 = vst [vmem:[#allocation244_spill] sm:$0xff] %v6919_v21  ;;  %v6924_v25 = vpop.eup %4582  ;;  %4602 = vpow2.f32 %v2161_v59  ;;  %v2181_v59 = vmul.f32 1.442695, %v11139_v13  ;;  %v11157_v13 = vld [vmem:[#allocation26_spill] sm:$0xff] }
 0x245   : > { %11126 = vst [vmem:[#allocation245_spill] sm:$0xff] %v6924_v25  ;;  %v6929_v27 = vpop.eup %4584  ;;  %4604 = vpow2.f32 %v2163_v56  ;;  %v2183_v56 = vmul.f32 1.442695, %v11141_v24 }
 0x246   : > { %11128 = vst [vmem:[#allocation246_spill] sm:$0xff] %v6929_v27  ;;  %v6934_v29 = vpop.eup %4586  ;;  %4606 = vpow2.f32 %v2165_v32  ;;  %v2185_v32 = vmul.f32 1.442695, %v11143_v47 }
 0x247   : > { %11130 = vst [vmem:[#allocation247_spill] sm:$0xff] %v6934_v29  ;;  %v6939_v31 = vpop.eup %4588  ;;  %4608 = vpow2.f32 %v2167_v2  ;;  %v11145_v2 = vld [vmem:[#allocation20_spill] sm:$0xff] }
 0x248   : > { %11132 = vst [vmem:[#allocation248_spill] sm:$0xff] %v6939_v31  ;;  %v6944_v35 = vpop.eup %4590  ;;  %4610 = vpow2.f32 %v2169_v41  ;;  %v11146_v52 = vsub.f32 %v11145_v2, %v6247_v23 }
 0x249   : > { %11134 = vst [vmem:[#allocation249_spill] sm:$0xff] %v6944_v35  ;;  %v6949_v39 = vpop.eup %4592  ;;  %4612 = vpow2.f32 %v2171_v7  ;;  %v2189_v7 = vmul.f32 1.442695, %v11149_v28 }
 0x24a   : > { %11136 = vst [vmem:[#allocation250_spill] sm:$0xff] %v6949_v39  ;;  %v6954_v34 = vpop.eup %4594  ;;  %4614 = vpow2.f32 %v2173_v4  ;;  %v2187_v54 = vmul.f32 1.442695, %v11146_v52  ;;  %v11151_v4 = vld [vmem:[#allocation24_spill] sm:$0xff] }
 0x24b   : > { %11138 = vst [vmem:[#allocation251_spill] sm:$0xff] %v6954_v34  ;;  %v6959_v38 = vpop.eup %4596  ;;  %4616 = vpow2.f32 %v2175_v30  ;;  %v11152_v20 = vsub.f32 %v11151_v4, %v6253_v15 }
 0x24c   : > { %11140 = vst [vmem:[#allocation252_spill] sm:$0xff] %v6959_v38  ;;  %v6964_v44 = vpop.eup %4598  ;;  %4618 = vpow2.f32 %v2177_v40  ;;  %v11155_v40 = vsub.f32 %v11154_v11, %v6258_v3 }
 0x24d   : > { %11142 = vst [vmem:[#allocation253_spill] sm:$0xff] %v6964_v44  ;;  %v6969_v50 = vpop.eup %4600  ;;  %4620 = vpow2.f32 %v2179_v16  ;;  %v2191_v0 = vmul.f32 1.442695, %v11152_v20 }
 0x24e   : > { %11144 = vst [vmem:[#allocation254_spill] sm:$0xff] %v6969_v50  ;;  %v6974_v41 = vpop.eup %4602  ;;  %4622 = vpow2.f32 %v2181_v59  ;;  %v2193_v5 = vmul.f32 1.442695, %v11155_v40  ;;  %v11158_v59 = vsub.f32 %v11157_v13, %v6247_v23 }
 0x24f   : > { %11147 = vst [vmem:[#allocation20_spill] sm:$0xff] %v6974_v41  ;;  %v6979_v36 = vpop.eup %4604  ;;  %4624 = vpow2.f32 %v2183_v56  ;;  %v11160_v56 = vld [vmem:[#allocation27_spill] sm:$0xff] }
 0x250   : > { %11150 = vst [vmem:[#allocation22_spill] sm:$0xff] %v6979_v36  ;;  %v6984_v30 = vpop.eup %4606  ;;  %4626 = vpow2.f32 %v2185_v32  ;;  %v2195_v24 = vmul.f32 1.442695, %v11158_v59  ;;  %v11161_v2 = vsub.f32 %v11160_v56, %v6250_v33  ;;  %v11163_v32 = vld [vmem:[#allocation29_spill] sm:$0xff] }
 0x251   : > { %11153 = vst [vmem:[#allocation24_spill] sm:$0xff] %v6984_v30  ;;  %v6989_v16 = vpop.eup %4608  ;;  %4628 = vpow2.f32 %v2187_v54  ;;  %v11164_v28 = vsub.f32 %v11163_v32, %v6253_v15  ;;  %v11166_v54 = vld [vmem:[#allocation31_spill] sm:$0xff] }
 0x252   : > { %11156 = vst [vmem:[#allocation25_spill] sm:$0xff] %v6989_v16  ;;  %v6994_v47 = vpop.eup %4610  ;;  %4630 = vpow2.f32 %v2189_v7  ;;  %v2197_v52 = vmul.f32 1.442695, %v11161_v2  ;;  %v11167_v11 = vsub.f32 %v11166_v54, %v6258_v3  ;;  %v11169_v7 = vld [vmem:[#allocation28_spill] sm:$0xff] }
 0x253   : > { %11159 = vst [vmem:[#allocation26_spill] sm:$0xff] %v6994_v47  ;;  %v6999_v58 = vpop.eup %4612  ;;  %4632 = vpow2.f32 %v2191_v0  ;;  %v2199_v4 = vmul.f32 1.442695, %v11164_v28  ;;  %v11170_v59 = vsub.f32 %v11169_v7, %v6247_v23  ;;  %v11172_v0 = vld [vmem:[#allocation30_spill] sm:$0xff] }
 0x254   : > { %11162 = vst [vmem:[#allocation27_spill] sm:$0xff] %v6999_v58  ;;  %v7004_v20 = vpop.eup %4614  ;;  %4634 = vpow2.f32 %v2193_v5  ;;  %v2201_v40 = vmul.f32 1.442695, %v11167_v11  ;;  %v11173_v32 = vsub.f32 %v11172_v0, %v6250_v33  ;;  %v11175_v5 = vld [vmem:[#allocation32_spill] sm:$0xff] }
 0x255   : > { %11165 = vst [vmem:[#allocation29_spill] sm:$0xff] %v7004_v20  ;;  %v7009_v13 = vpop.eup %4616  ;;  %4636 = vpow2.f32 %v2195_v24  ;;  %v2203_v56 = vmul.f32 1.442695, %v11170_v59  ;;  %v11176_v54 = vsub.f32 %v11175_v5, %v6253_v15  ;;  %v11178_v24 = vld [vmem:[#allocation33_spill] sm:$0xff] }
 0x256   : > { %11168 = vst [vmem:[#allocation31_spill] sm:$0xff] %v7009_v13  ;;  %v7014_v2 = vpop.eup %4618  ;;  %4638 = vpow2.f32 %v2197_v52  ;;  %v2205_v28 = vmul.f32 1.442695, %v11173_v32  ;;  %v11179_v7 = vsub.f32 %v11178_v24, %v6258_v3  ;;  %v11181_v52 = vld [vmem:[#allocation34_spill] sm:$0xff] }
 0x257   : > { %11171 = vst [vmem:[#allocation28_spill] sm:$0xff] %v7014_v2  ;;  %v7019_v41 = vpop.eup %4620  ;;  %4640 = vpow2.f32 %v2199_v4  ;;  %v2207_v11 = vmul.f32 1.442695, %v11176_v54  ;;  %v11182_v0 = vsub.f32 %v11181_v52, %v6247_v23  ;;  %v11184_v4 = vld [vmem:[#allocation35_spill] sm:$0xff] }
 0x258   : > { %11174 = vst [vmem:[#allocation30_spill] sm:$0xff] %v7019_v41  ;;  %v7024_v50 = vpop.eup %4622  ;;  %4642 = vpow2.f32 %v2201_v40  ;;  %v2209_v59 = vmul.f32 1.442695, %v11179_v7  ;;  %v11185_v5 = vsub.f32 %v11184_v4, %v6250_v33  ;;  %v11187_v40 = vld [vmem:[#allocation37_spill] sm:$0xff] }
 0x259   : > { %11177 = vst [vmem:[#allocation32_spill] sm:$0xff] %v7024_v50  ;;  %v7029_v44 = vpop.eup %4624  ;;  %4644 = vpow2.f32 %v2203_v56  ;;  %v2211_v32 = vmul.f32 1.442695, %v11182_v0  ;;  %v11188_v24 = vsub.f32 %v11187_v40, %v6253_v15  ;;  %v11190_v56 = vld [vmem:[#allocation39_spill] sm:$0xff] }
 0x25a   : > { %11180 = vst [vmem:[#allocation33_spill] sm:$0xff] %v7029_v44  ;;  %v7034_v34 = vpop.eup %4626  ;;  %4646 = vpow2.f32 %v2205_v28  ;;  %v2213_v54 = vmul.f32 1.442695, %v11185_v5  ;;  %v11191_v52 = vsub.f32 %v11190_v56, %v6258_v3  ;;  %v11193_v28 = vld [vmem:[#allocation36_spill] sm:$0xff] }
 0x25b   : > { %11183 = vst [vmem:[#allocation34_spill] sm:$0xff] %v7034_v34  ;;  %v7039_v38 = vpop.eup %4628  ;;  %4648 = vpow2.f32 %v2207_v11  ;;  %v2215_v7 = vmul.f32 1.442695, %v11188_v24  ;;  %v11194_v4 = vsub.f32 %v11193_v28, %v6247_v23  ;;  %v11196_v11 = vld [vmem:[#allocation38_spill] sm:$0xff] }
 0x25c   : > { %11186 = vst [vmem:[#allocation35_spill] sm:$0xff] %v7039_v38  ;;  %v7044_v39 = vpop.eup %4630  ;;  %4650 = vpow2.f32 %v2209_v59  ;;  %v2217_v0 = vmul.f32 1.442695, %v11191_v52  ;;  %v11197_v40 = vsub.f32 %v11196_v11, %v6250_v33  ;;  %v11199_v59 = vld [vmem:[#allocation40_spill] sm:$0xff] }
 0x25d   : > { %11189 = vst [vmem:[#allocation37_spill] sm:$0xff] %v7044_v39  ;;  %v7049_v35 = vpop.eup %4632  ;;  %4652 = vpow2.f32 %v2211_v32  ;;  %v2219_v5 = vmul.f32 1.442695, %v11194_v4  ;;  %v11200_v56 = vsub.f32 %v11199_v59, %v6253_v15  ;;  %v11202_v32 = vld [vmem:[#allocation41_spill] sm:$0xff] }
 0x25e   : > { %11192 = vst [vmem:[#allocation39_spill] sm:$0xff] %v7049_v35  ;;  %v7054_v29 = vpop.eup %4634  ;;  %4654 = vpow2.f32 %v2213_v54  ;;  %v2221_v24 = vmul.f32 1.442695, %v11197_v40  ;;  %v11203_v28 = vsub.f32 %v11202_v32, %v6258_v3  ;;  %v11205_v54 = vld [vmem:[#allocation42_spill] sm:$0xff] }
 0x25f   : > { %11195 = vst [vmem:[#allocation36_spill] sm:$0xff] %v7054_v29  ;;  %v7059_v31 = vpop.eup %4636  ;;  %4656 = vpow2.f32 %v2215_v7  ;;  %v2223_v52 = vmul.f32 1.442695, %v11200_v56  ;;  %v11206_v11 = vsub.f32 %v11205_v54, %v6247_v23  ;;  %v11208_v7 = vld [vmem:[#allocation43_spill] sm:$0xff] }
 0x260   : > { %11198 = vst [vmem:[#allocation38_spill] sm:$0xff] %v7059_v31  ;;  %v7064_v27 = vpop.eup %4638  ;;  %4658 = vpow2.f32 %v2217_v0  ;;  %v2225_v4 = vmul.f32 1.442695, %v11203_v28  ;;  %v11209_v59 = vsub.f32 %v11208_v7, %v6250_v33  ;;  %v11211_v0 = vld [vmem:[#allocation45_spill] sm:$0xff] }
 0x261   : > { %11201 = vst [vmem:[#allocation40_spill] sm:$0xff] %v7064_v27  ;;  %v7069_v25 = vpop.eup %4640  ;;  %4660 = vpow2.f32 %v2219_v5  ;;  %v2227_v40 = vmul.f32 1.442695, %v11206_v11  ;;  %v11212_v32 = vsub.f32 %v11211_v0, %v6253_v15  ;;  %v11214_v5 = vld [vmem:[#allocation47_spill] sm:$0xff] }
 0x262   : > { %11204 = vst [vmem:[#allocation41_spill] sm:$0xff] %v7069_v25  ;;  %v7074_v17 = vpop.eup %4642  ;;  %4662 = vpow2.f32 %v2221_v24  ;;  %v2229_v56 = vmul.f32 1.442695, %v11209_v59  ;;  %v11215_v54 = vsub.f32 %v11214_v5, %v6258_v3  ;;  %v11217_v24 = vld [vmem:[#allocation44_spill] sm:$0xff] }
 0x263   : > { %11207 = vst [vmem:[#allocation42_spill] sm:$0xff] %v7074_v17  ;;  %v7079_v21 = vpop.eup %4644  ;;  %4664 = vpow2.f32 %v2223_v52  ;;  %v2231_v28 = vmul.f32 1.442695, %v11212_v32  ;;  %v11218_v7 = vsub.f32 %v11217_v24, %v6247_v23  ;;  %v11220_v52 = vld [vmem:[#allocation46_spill] sm:$0xff] }
 0x264   : > { %11210 = vst [vmem:[#allocation43_spill] sm:$0xff] %v7079_v21  ;;  %v7084_v22 = vpop.eup %4646  ;;  %4666 = vpow2.f32 %v2225_v4  ;;  %v2233_v11 = vmul.f32 1.442695, %v11215_v54  ;;  %v11221_v0 = vsub.f32 %v11220_v52, %v6250_v33  ;;  %v11223_v4 = vsub.f32 %v11222_v12, %v6253_v15  ;;  %v11225_v54 = vld [vmem:[#allocation49_spill] sm:$0xff]  ;;  %v11227_v24 = vld [vmem:[#allocation50_spill] sm:$0xff] }
 0x265   : > { %11213 = vst [vmem:[#allocation45_spill] sm:$0xff] %v7084_v22  ;;  %v7089_v18 = vpop.eup %4648  ;;  %4668 = vpow2.f32 %v2227_v40  ;;  %v2235_v59 = vmul.f32 1.442695, %v11218_v7  ;;  %v11226_v40 = vsub.f32 %v11225_v54, %v6258_v3  ;;  %v11228_v7 = vsub.f32 %v11227_v24, %v6247_v23  ;;  %v11232_v12 = vld [vmem:[#allocation53_spill] sm:$0xff] }
 0x266   : > { %11216 = vst [vmem:[#allocation47_spill] sm:$0xff] %v7089_v18  ;;  %v7094_v62 = vpop.eup %4650  ;;  %4670 = vpow2.f32 %v2229_v56  ;;  %v2237_v32 = vmul.f32 1.442695, %v11221_v0  ;;  %v2239_v14 = vmul.f32 1.442695, %v11223_v4  ;;  %v11229_v56 = vld [vmem:[#allocation51_spill] sm:$0xff]  ;;  %v11233_v4 = vsub.f32 %v11232_v12, %v6253_v15 }
 0x267   : > { %11219 = vst [vmem:[#allocation44_spill] sm:$0xff] %v7094_v62  ;;  %v7102_v5 = vpop.eup %4652  ;;  %4672 = vpow2.f32 %v2231_v28  ;;  %v2241_v10 = vmul.f32 1.442695, %v11226_v40  ;;  %v2243_v8 = vmul.f32 1.442695, %v11228_v7  ;;  %v11230_v60 = vsub.f32 %v11229_v56, %v6250_v33  ;;  %v11234_v28 = vld [vmem:[#allocation55_spill] sm:$0xff] }
 0x268   : > { %11224 = vst [vmem:[#allocation46_spill] sm:$0xff] %v7102_v5  ;;  %v7113_v0 = vpop.eup %4654  ;;  %4674 = vpow2.f32 %v2233_v11  ;;  %v2247_v1 = vmul.f32 1.442695, %v11233_v4  ;;  %v11235_v61 = vsub.f32 %v11234_v28, %v6258_v3  ;;  %v11236_v40 = vld [vmem:[#allocation52_spill] sm:$0xff]  ;;  %v11239_v56 = vld [vmem:[#allocation54_spill] sm:$0xff]  ;;  %v11243_v4 = vld [vmem:[#allocation57_spill] sm:$0xff] }
 0x269   : > { %v2245_v52 = vmul.f32 1.442695, %v11230_v60  ;;  %11231 = vst [vmem:[#allocation48_spill] sm:$0xff] %v7113_v0  ;;  %v11237_v57 = vsub.f32 %v11236_v40, %v6247_v23  ;;  %v7124_v7 = vpop.eup %4656  ;;  %4676 = vpow2.f32 %v2235_v59  ;;  %v11240_v60 = vsub.f32 %v11239_v56, %v6250_v33  ;;  %v11241_v11 = vld [vmem:[#allocation56_spill] sm:$0xff]  ;;  %v11246_v40 = vld [vmem:[#allocation58_spill] sm:$0xff]  ;;  %v11248_v59 = vld [vmem:[#allocation59_spill] sm:$0xff] }
 0x26a   : > { %v2249_v54 = vmul.f32 1.442695, %v11235_v61  ;;  %11238 = vst [vmem:[#allocation49_spill] sm:$0xff] %v7124_v7  ;;  %v11242_v49 = vsub.f32 %v11241_v11, %v6253_v15  ;;  %v11244_v55 = vsub.f32 %v11243_v4, %v6258_v3  ;;  %v7135_v61 = vpop.eup %4658  ;;  %4678 = vpow2.f32 %v2237_v32  ;;  %v11253_v4 = vld [vmem:[#allocation63_spill] sm:$0xff]  ;;  %v11255_v32 = vld [vmem:[#allocation60_spill] sm:$0xff] }
 0x26b   : > { %v2251_v24 = vmul.f32 1.442695, %v11237_v57  ;;  %v2253_v53 = vmul.f32 1.442695, %v11240_v60  ;;  %11245 = vst [vmem:[#allocation50_spill] sm:$0xff] %v7135_v61  ;;  %v11247_v57 = vsub.f32 %v11246_v40, %v6247_v23  ;;  %v11249_v46 = vsub.f32 %v11248_v59, %v6250_v33  ;;  %v11250_v60 = vld [vmem:[#allocation61_spill] sm:$0xff] }
 0x26c   : > { %v2255_v12 = vmul.f32 1.442695, %v11242_v49  ;;  %v2257_v28 = vmul.f32 1.442695, %v11244_v55  ;;  %v11251_v48 = vsub.f32 %v11250_v60, %v6253_v15  ;;  %v7146_v49 = vpop.eup %4660  ;;  %4680 = vpow2.f32 %v2239_v14 }
 0x26d   : > { %v2259_v51 = vmul.f32 1.442695, %v11247_v57  ;;  %v2261_v56 = vmul.f32 1.442695, %v11249_v46  ;;  %11252 = vst [vmem:[#allocation51_spill] sm:$0xff] %v7146_v49  ;;  %v11254_v55 = vsub.f32 %v11253_v4, %v6258_v3  ;;  %v11256_v40 = vsub.f32 %v11255_v32, %v6247_v23  ;;  %v7163_v60 = vpop.eup %4662  ;;  %v11262_v4 = vld [vmem:[#allocation65_spill] sm:$0xff] }
 0x26e   : > { %v2263_v11 = vmul.f32 1.442695, %v11251_v48  ;;  %v11258_v46 = vsub.f32 %v11257_v45, %v6250_v33  ;;  %11259 = vst [vmem:[#allocation53_spill] sm:$0xff] %v7163_v60  ;;  %4682 = vpow2.f32 %v2241_v10  ;;  %v11260_v48 = vld [vmem:[#allocation64_spill] sm:$0xff]  ;;  %v11264_v32 = vld [vmem:[#allocation66_spill] sm:$0xff]  ;;  %v7180_v45 = vpop.eup %4664 }
 0x26f   : > { %v7151_v43 = vmul.f32 1.442695, %v11254_v55  ;;  %v7156_v57 = vmul.f32 1.442695, %v11256_v40  ;;  %v11261_v14 = vsub.f32 %v11260_v48, %v6253_v15  ;;  %v11263_v55 = vsub.f32 %v11262_v4, %v6258_v3  ;;  %11266 = vst [vmem:[#allocation55_spill] sm:$0xff] %v7180_v45  ;;  %v11269_v48 = vld [vmem:[#allocation69_spill] sm:$0xff] }
 0x270   : > { %v7161_v59 = vmul.f32 1.442695, %v11258_v46  ;;  %v11265_v40 = vsub.f32 %v11264_v32, %v6247_v23  ;;  %4684 = vpow2.f32 %v2243_v8  ;;  %v11267_v46 = vld [vmem:[#allocation67_spill] sm:$0xff]  ;;  %v7197_v32 = vpop.eup %4666 }
 0x271   : > { %v7168_v42 = vmul.f32 1.442695, %v11261_v14  ;;  %v7173_v49 = vmul.f32 1.442695, %v11263_v55  ;;  %v11268_v10 = vsub.f32 %v11267_v46, %v6250_v33  ;;  %v11270_v14 = vsub.f32 %v11269_v48, %v6253_v15  ;;  %v11271_v4 = vld [vmem:[#allocation71_spill] sm:$0xff]  ;;  %11273 = vst [vmem:[#allocation52_spill] sm:$0xff] %v7197_v32 }
 0x272   : > { %v7178_v61 = vmul.f32 1.442695, %v11265_v40  ;;  %v11272_v55 = vsub.f32 %v11271_v4, %v6258_v3  ;;  %4686 = vpow2.f32 %v2245_v52  ;;  %v11274_v40 = vld [vmem:[#allocation68_spill] sm:$0xff]  ;;  %v11276_v46 = vld [vmem:[#allocation70_spill] sm:$0xff]  ;;  %v7214_v4 = vpop.eup %4668 }
 0x273   : > { %v7185_v60 = vmul.f32 1.442695, %v11268_v10  ;;  %v7190_v7 = vmul.f32 1.442695, %v11270_v14  ;;  %v11275_v8 = vsub.f32 %v11274_v40, %v6247_v23  ;;  %v11277_v10 = vsub.f32 %v11276_v46, %v6250_v33  ;;  %v11278_v48 = vld [vmem:[#allocation72_spill] sm:$0xff]  ;;  %11280 = vst [vmem:[#allocation54_spill] sm:$0xff] %v7214_v4 }
 0x274   : > { %v7195_v0 = vmul.f32 1.442695, %v11272_v55  ;;  %v11279_v14 = vsub.f32 %v11278_v48, %v6253_v15  ;;  %4688 = vpow2.f32 %v2247_v1  ;;  %v11281_v55 = vld [vmem:[#allocation73_spill] sm:$0xff]  ;;  %v11283_v40 = vld [vmem:[#allocation74_spill] sm:$0xff]  ;;  %v11285_v46 = vld [vmem:[#allocation75_spill] sm:$0xff]  ;;  %v7231_v48 = vpop.eup %4670 }
 0x275   : > { %v7202_v45 = vmul.f32 1.442695, %v11275_v8  ;;  %v7207_v5 = vmul.f32 1.442695, %v11277_v10  ;;  %v11282_v52 = vsub.f32 %v11281_v55, %v6258_v3  ;;  %v11284_v8 = vsub.f32 %v11283_v40, %v6247_v23  ;;  %11287 = vst [vmem:[#allocation56_spill] sm:$0xff] %v7231_v48  ;;  %v11290_v55 = vld [vmem:[#allocation79_spill] sm:$0xff] }
 0x276   : > { %v7212_v62 = vmul.f32 1.442695, %v11279_v14  ;;  %v11286_v10 = vsub.f32 %v11285_v46, %v6250_v33  ;;  %4690 = vpow2.f32 %v2249_v54  ;;  %v11288_v14 = vld [vmem:[#allocation77_spill] sm:$0xff]  ;;  %v11292_v40 = vld [vmem:[#allocation76_spill] sm:$0xff]  ;;  %v7248_v46 = vpop.eup %4672 }
 0x277   : > { %v7219_v32 = vmul.f32 1.442695, %v11282_v52  ;;  %v7224_v18 = vmul.f32 1.442695, %v11284_v8  ;;  %v11289_v1 = vsub.f32 %v11288_v14, %v6253_v15  ;;  %v11291_v52 = vsub.f32 %v11290_v55, %v6258_v3  ;;  %11294 = vst [vmem:[#allocation57_spill] sm:$0xff] %v7248_v46  ;;  %v11297_v14 = vld [vmem:[#allocation80_spill] sm:$0xff] }
 0x278   : > { %v7229_v22 = vmul.f32 1.442695, %v11286_v10  ;;  %v11293_v8 = vsub.f32 %v11292_v40, %v6247_v23  ;;  %4692 = vpow2.f32 %v2251_v24  ;;  %v11295_v10 = vld [vmem:[#allocation78_spill] sm:$0xff]  ;;  %v11299_v55 = vld [vmem:[#allocation81_spill] sm:$0xff]  ;;  %v7265_v40 = vpop.eup %4674 }
 0x279   : > { %v7236_v4 = vmul.f32 1.442695, %v11289_v1  ;;  %v7241_v21 = vmul.f32 1.442695, %v11291_v52  ;;  %v11296_v54 = vsub.f32 %v11295_v10, %v6250_v33  ;;  %v11298_v1 = vsub.f32 %v11297_v14, %v6253_v15  ;;  %11301 = vst [vmem:[#allocation58_spill] sm:$0xff] %v7265_v40  ;;  %v11304_v10 = vld [vmem:[#allocation83_spill] sm:$0xff] }
 0x27a   : > { %v7246_v17 = vmul.f32 1.442695, %v11293_v8  ;;  %v11300_v52 = vsub.f32 %v11299_v55, %v6258_v3  ;;  %4694 = vpow2.f32 %v2253_v53  ;;  %v11302_v8 = vld [vmem:[#allocation82_spill] sm:$0xff]  ;;  %v11306_v14 = vld [vmem:[#allocation85_spill] sm:$0xff]  ;;  %v7282_v55 = vpop.eup %4676 }
 0x27b   : > { %v7253_v48 = vmul.f32 1.442695, %v11296_v54  ;;  %v7258_v25 = vmul.f32 1.442695, %v11298_v1  ;;  %v11303_v24 = vsub.f32 %v11302_v8, %v6247_v23  ;;  %v11305_v54 = vsub.f32 %v11304_v10, %v6250_v33  ;;  %11308 = vst [vmem:[#allocation59_spill] sm:$0xff] %v7282_v55  ;;  %v11311_v8 = vld [vmem:[#allocation84_spill] sm:$0xff] }
 0x27c   : > { %v7263_v27 = vmul.f32 1.442695, %v11300_v52  ;;  %v11307_v1 = vsub.f32 %v11306_v14, %v6253_v15  ;;  %4696 = vpow2.f32 %v2255_v12  ;;  %v11309_v52 = vld [vmem:[#allocation87_spill] sm:$0xff]  ;;  %v11313_v10 = vld [vmem:[#allocation86_spill] sm:$0xff]  ;;  %v7299_v14 = vpop.eup %4678 }
 0x27d   : > { %v7270_v46 = vmul.f32 1.442695, %v11303_v24  ;;  %v7275_v31 = vmul.f32 1.442695, %v11305_v54  ;;  %v11310_v53 = vsub.f32 %v11309_v52, %v6258_v3  ;;  %v11312_v24 = vsub.f32 %v11311_v8, %v6247_v23  ;;  %11315 = vst [vmem:[#allocation61_spill] sm:$0xff] %v7299_v14  ;;  %v11318_v52 = vld [vmem:[#allocation89_spill] sm:$0xff] }
 0x27e   : > { %v7280_v29 = vmul.f32 1.442695, %v11307_v1  ;;  %v11314_v54 = vsub.f32 %v11313_v10, %v6250_v33  ;;  %4698 = vpow2.f32 %v2257_v28  ;;  %v11316_v1 = vld [vmem:[#allocation88_spill] sm:$0xff]  ;;  %v11320_v8 = vld [vmem:[#allocation90_spill] sm:$0xff]  ;;  %v7316_v10 = vpop.eup %4680 }
 0x27f   : > { %v7287_v40 = vmul.f32 1.442695, %v11310_v53  ;;  %v7292_v35 = vmul.f32 1.442695, %v11312_v24  ;;  %v11317_v12 = vsub.f32 %v11316_v1, %v6253_v15  ;;  %v11319_v53 = vsub.f32 %v11318_v52, %v6258_v3  ;;  %11322 = vst [vmem:[#allocation63_spill] sm:$0xff] %v7316_v10  ;;  %v11325_v1 = vld [vmem:[#allocation93_spill] sm:$0xff] }
 0x280   : > { %v7297_v39 = vmul.f32 1.442695, %v11314_v54  ;;  %v11321_v24 = vsub.f32 %v11320_v8, %v6247_v23  ;;  %4700 = vpow2.f32 %v2259_v51  ;;  %v11323_v54 = vld [vmem:[#allocation91_spill] sm:$0xff]  ;;  %v7333_v8 = vpop.eup %4682 }
 0x281   : > { %v7304_v55 = vmul.f32 1.442695, %v11317_v12  ;;  %v7309_v38 = vmul.f32 1.442695, %v11319_v53  ;;  %v11324_v28 = vsub.f32 %v11323_v54, %v6250_v33  ;;  %v11326_v12 = vsub.f32 %v11325_v1, %v6253_v15  ;;  %v11327_v52 = vld [vmem:[#allocation95_spill] sm:$0xff]  ;;  %11329 = vst [vmem:[#allocation60_spill] sm:$0xff] %v7333_v8 }
 0x282   : > { %v7314_v34 = vmul.f32 1.442695, %v11321_v24  ;;  %v11328_v53 = vsub.f32 %v11327_v52, %v6258_v3  ;;  %4702 = vpow2.f32 %v2261_v56  ;;  %v11330_v24 = vld [vmem:[#allocation92_spill] sm:$0xff]  ;;  %v11332_v54 = vld [vmem:[#allocation94_spill] sm:$0xff]  ;;  %v7350_v52 = vpop.eup %4684 }
 0x283   : > { %v7321_v14 = vmul.f32 1.442695, %v11324_v28  ;;  %v7326_v44 = vmul.f32 1.442695, %v11326_v12  ;;  %v11331_v51 = vsub.f32 %v11330_v24, %v6247_v23  ;;  %v11333_v28 = vsub.f32 %v11332_v54, %v6250_v33  ;;  %v11334_v1 = vld [vmem:[#allocation96_spill] sm:$0xff]  ;;  %11336 = vst [vmem:[#allocation62_spill] sm:$0xff] %v7350_v52 }
 0x284   : > { %v7331_v50 = vmul.f32 1.442695, %v11328_v53  ;;  %v11335_v12 = vsub.f32 %v11334_v1, %v6253_v15  ;;  %4704 = vpow2.f32 %v2263_v11  ;;  %v11337_v53 = vld [vmem:[#allocation97_spill] sm:$0xff]  ;;  %v11339_v24 = vld [vmem:[#allocation98_spill] sm:$0xff]  ;;  %v11341_v54 = vld [vmem:[#allocation99_spill] sm:$0xff]  ;;  %v7367_v1 = vpop.eup %4686 }
 0x285   : > { %v7338_v10 = vmul.f32 1.442695, %v11331_v51  ;;  %v7343_v41 = vmul.f32 1.442695, %v11333_v28  ;;  %v11338_v56 = vsub.f32 %v11337_v53, %v6258_v3  ;;  %v11340_v51 = vsub.f32 %v11339_v24, %v6247_v23  ;;  %11343 = vst [vmem:[#allocation64_spill] sm:$0xff] %v7367_v1  ;;  %v11344_v11 = vld [vmem:[#allocation101_spill] sm:$0xff] }
 0x286   : > { %v7348_v2 = vmul.f32 1.442695, %v11335_v12  ;;  %v11342_v28 = vsub.f32 %v11341_v54, %v6250_v33  ;;  %4706 = vpow2.f32 %v7151_v43  ;;  %v11345_v12 = vsub.f32 %v11344_v11, %v6253_v15  ;;  %v11351_v43 = vld [vmem:[#allocation102_spill] sm:$0xff] }
 0x287   : > { %v7355_v8 = vmul.f32 1.442695, %v11338_v56  ;;  %v7360_v13 = vmul.f32 1.442695, %v11340_v51  ;;  %v11346_v56 = vld [vmem:[#allocation103_spill] sm:$0xff]  ;;  %v11348_v51 = vld [vmem:[#allocation100_spill] sm:$0xff]  ;;  %4708 = vpow2.f32 %v7156_v57  ;;  %v11352_v1 = vsub.f32 %v11351_v43, %v6250_v33 }
 0x288   : > { %v7365_v20 = vmul.f32 1.442695, %v11342_v28  ;;  %v7373_v53 = vmul.f32 1.442695, %v11345_v12  ;;  %v11347_v52 = vsub.f32 %v11346_v56, %v6258_v3  ;;  %v11349_v58 = vsub.f32 %v11348_v51, %v6247_v23  ;;  %v7385_v28 = vpop.eup %4688  ;;  %v11353_v12 = vld [vmem:[#allocation104_spill] sm:$0xff]  ;;  %v11358_v57 = vld [vmem:[#allocation106_spill] sm:$0xff] }
 0x289   : > { %11350 = vst [vmem:[#allocation65_spill] sm:$0xff] %v7385_v28  ;;  %v7391_v11 = vmul.f32 1.442695, %v11352_v1  ;;  %v11354_v47 = vsub.f32 %v11353_v12, %v6253_v15  ;;  %4710 = vpow2.f32 %v7161_v59  ;;  %v11359_v28 = vsub.f32 %v11358_v57, %v6247_v23  ;;  %v11361_v1 = vld [vmem:[#allocation107_spill] sm:$0xff] }
 0x28a   : > { %v7378_v24 = vmul.f32 1.442695, %v11347_v52  ;;  %v7383_v54 = vmul.f32 1.442695, %v11349_v58  ;;  %v11355_v52 = vld [vmem:[#allocation105_spill] sm:$0xff]  ;;  %v7403_v58 = vpop.eup %4690  ;;  %v11362_v30 = vsub.f32 %v11361_v1, %v6250_v33  ;;  %4712 = vpow2.f32 %v7168_v42  ;;  %v11367_v59 = vld [vmem:[#allocation111_spill] sm:$0xff] }
 0x28b   : > { %v7396_v56 = vmul.f32 1.442695, %v11354_v47  ;;  %v11356_v16 = vsub.f32 %v11355_v52, %v6258_v3  ;;  %11357 = vst [vmem:[#allocation66_spill] sm:$0xff] %v7403_v58  ;;  %v7409_v43 = vmul.f32 1.442695, %v11359_v28  ;;  %v11364_v47 = vld [vmem:[#allocation109_spill] sm:$0xff]  ;;  %v11368_v58 = vsub.f32 %v11367_v59, %v6258_v3 }
 0x28c   : > { %v7414_v12 = vmul.f32 1.442695, %v11362_v30  ;;  %v11365_v36 = vsub.f32 %v11364_v47, %v6253_v15  ;;  %v11370_v28 = vld [vmem:[#allocation108_spill] sm:$0xff]  ;;  %v11373_v30 = vld [vmem:[#allocation110_spill] sm:$0xff]  ;;  %4714 = vpow2.f32 %v7173_v49  ;;  %v11385_v49 = vld [vmem:[#allocation115_spill] sm:$0xff] }
 0x28d   : > { %v7401_v51 = vmul.f32 1.442695, %v11356_v16  ;;  %11360 = vst [vmem:[#allocation67_spill] sm:$0xff] %v7409_v43  ;;  %v7421_v16 = vpop.eup %4692  ;;  %v7427_v57 = vmul.f32 1.442695, %v11368_v58  ;;  %v11371_v43 = vsub.f32 %v11370_v28, %v6247_v23  ;;  %v11376_v42 = vld [vmem:[#allocation112_spill] sm:$0xff]  ;;  %4716 = vpow2.f32 %v7178_v61 }
 0x28e   : > { %11363 = vst [vmem:[#allocation69_spill] sm:$0xff] %v7414_v12  ;;  %v7419_v52 = vmul.f32 1.442695, %v11365_v36  ;;  %11366 = vst [vmem:[#allocation71_spill] sm:$0xff] %v7421_v16  ;;  %v11374_v12 = vsub.f32 %v11373_v30, %v6250_v33  ;;  %v7439_v36 = vpop.eup %4694  ;;  %v11377_v16 = vsub.f32 %v11376_v42, %v6253_v15  ;;  %v11379_v58 = vld [vmem:[#allocation113_spill] sm:$0xff]  ;;  %4718 = vpow2.f32 %v7185_v60  ;;  %v11394_v61 = vld [vmem:[#allocation116_spill] sm:$0xff] }
 0x28f   : > { %11369 = vst [vmem:[#allocation68_spill] sm:$0xff] %v7427_v57  ;;  %v7432_v1 = vmul.f32 1.442695, %v11371_v43  ;;  %11375 = vst [vmem:[#allocation72_spill] sm:$0xff] %v7439_v36  ;;  %v11380_v57 = vsub.f32 %v11379_v58, %v6258_v3  ;;  %v11382_v43 = vld [vmem:[#allocation114_spill] sm:$0xff]  ;;  %v11386_v36 = vsub.f32 %v11385_v49, %v6250_v33  ;;  %4720 = vpow2.f32 %v7190_v7 }
 0x290   : > { %v7437_v47 = vmul.f32 1.442695, %v11374_v12  ;;  %v7445_v59 = vmul.f32 1.442695, %v11377_v16  ;;  %v7457_v12 = vpop.eup %4696  ;;  %v11388_v16 = vld [vmem:[#allocation117_spill] sm:$0xff]  ;;  %v11403_v60 = vld [vmem:[#allocation122_spill] sm:$0xff]  ;;  %4722 = vpow2.f32 %v7195_v0 }
 0x291   : > { %11372 = vst [vmem:[#allocation70_spill] sm:$0xff] %v7432_v1  ;;  %v7450_v28 = vmul.f32 1.442695, %v11380_v57  ;;  %v11383_v1 = vsub.f32 %v11382_v43, %v6247_v23  ;;  %11384 = vst [vmem:[#allocation75_spill] sm:$0xff] %v7457_v12  ;;  %v7463_v42 = vmul.f32 1.442695, %v11386_v36  ;;  %v11395_v12 = vsub.f32 %v11394_v61, %v6247_v23 }
 0x292   : > { %11378 = vst [vmem:[#allocation73_spill] sm:$0xff] %v7445_v59  ;;  %v11389_v59 = vsub.f32 %v11388_v16, %v6253_v15  ;;  %v11391_v57 = vld [vmem:[#allocation119_spill] sm:$0xff]  ;;  %v11397_v36 = vld [vmem:[#allocation118_spill] sm:$0xff]  ;;  %4724 = vpow2.f32 %v7202_v45 }
 0x293   : > { %11381 = vst [vmem:[#allocation74_spill] sm:$0xff] %v7450_v28  ;;  %v7455_v30 = vmul.f32 1.442695, %v11383_v1  ;;  %11387 = vst [vmem:[#allocation77_spill] sm:$0xff] %v7463_v42  ;;  %v11392_v28 = vsub.f32 %v11391_v57, %v6258_v3  ;;  %v7475_v1 = vpop.eup %4698  ;;  %v7481_v49 = vmul.f32 1.442695, %v11395_v12  ;;  %v11398_v42 = vsub.f32 %v11397_v36, %v6250_v33 }
 0x294   : > { %v7468_v58 = vmul.f32 1.442695, %v11389_v59  ;;  %11393 = vst [vmem:[#allocation76_spill] sm:$0xff] %v7475_v1  ;;  %v11400_v59 = vld [vmem:[#allocation121_spill] sm:$0xff]  ;;  %v11404_v1 = vsub.f32 %v11403_v60, %v6258_v3  ;;  %v11406_v12 = vld [vmem:[#allocation123_spill] sm:$0xff]  ;;  %v11412_v7 = vld [vmem:[#allocation126_spill] sm:$0xff]  ;;  %4726 = vpow2.f32 %v7207_v5 }
 0x295   : > { %v7473_v43 = vmul.f32 1.442695, %v11392_v28  ;;  %11396 = vst [vmem:[#allocation78_spill] sm:$0xff] %v7481_v49  ;;  %v7486_v16 = vmul.f32 1.442695, %v11398_v42  ;;  %v7493_v28 = vpop.eup %4700  ;;  %v11407_v49 = vsub.f32 %v11406_v12, %v6247_v23  ;;  %v11409_v42 = vld [vmem:[#allocation124_spill] sm:$0xff]  ;;  %4728 = vpow2.f32 %v7212_v62 }
 0x296   : > { %11390 = vst [vmem:[#allocation79_spill] sm:$0xff] %v7468_v58  ;;  %v11401_v58 = vsub.f32 %v11400_v59, %v6253_v15  ;;  %11402 = vst [vmem:[#allocation81_spill] sm:$0xff] %v7493_v28  ;;  %v7499_v61 = vmul.f32 1.442695, %v11404_v1  ;;  %v11413_v28 = vsub.f32 %v11412_v7, %v6253_v15  ;;  %v11415_v1 = vld [vmem:[#allocation128_spill] sm:$0xff]  ;;  %v11421_v0 = vld [vmem:[#allocation127_spill] sm:$0xff]  ;;  %4730 = vpow2.f32 %v7219_v32 }
 0x297   : > { %11399 = vst [vmem:[#allocation80_spill] sm:$0xff] %v7486_v16  ;;  %v7504_v36 = vmul.f32 1.442695, %v11407_v49  ;;  %v11410_v16 = vsub.f32 %v11409_v42, %v6250_v33  ;;  %v11418_v49 = vld [vmem:[#allocation125_spill] sm:$0xff]  ;;  %v11430_v45 = vld [vmem:[#allocation131_spill] sm:$0xff]  ;;  %v11439_v5 = vld [vmem:[#allocation136_spill] sm:$0xff]  ;;  %4732 = vpow2.f32 %v7224_v18 }
 0x298   : > { %v7491_v57 = vmul.f32 1.442695, %v11401_v58  ;;  %11405 = vst [vmem:[#allocation82_spill] sm:$0xff] %v7499_v61  ;;  %v7511_v58 = vpop.eup %4702  ;;  %v7517_v60 = vmul.f32 1.442695, %v11413_v28  ;;  %v11416_v61 = vsub.f32 %v11415_v1, %v6258_v3  ;;  %v11424_v28 = vld [vmem:[#allocation129_spill] sm:$0xff]  ;;  %4734 = vpow2.f32 %v7229_v22 }
 0x299   : > { %11408 = vst [vmem:[#allocation83_spill] sm:$0xff] %v7504_v36  ;;  %v7509_v59 = vmul.f32 1.442695, %v11410_v16  ;;  %v11419_v36 = vsub.f32 %v11418_v49, %v6247_v23  ;;  %v7529_v16 = vpop.eup %4704  ;;  %v11448_v62 = vld [vmem:[#allocation137_spill] sm:$0xff]  ;;  %v11457_v32 = vld [vmem:[#allocation140_spill] sm:$0xff]  ;;  %4736 = vpow2.f32 %v7236_v4  ;;  %v11475_v22 = vld [vmem:[#allocation146_spill] sm:$0xff] }
 0x29a   : > { %11414 = vst [vmem:[#allocation87_spill] sm:$0xff] %v7517_v60  ;;  %v7522_v12 = vmul.f32 1.442695, %v11416_v61  ;;  %v11425_v60 = vsub.f32 %v11424_v28, %v6253_v15  ;;  %v11427_v61 = vld [vmem:[#allocation130_spill] sm:$0xff]  ;;  %v11466_v18 = vld [vmem:[#allocation141_spill] sm:$0xff] }
 0x29b   : > { %11411 = vst [vmem:[#allocation85_spill] sm:$0xff] %v7509_v59  ;;  %v7527_v42 = vmul.f32 1.442695, %v11419_v36  ;;  %v11422_v59 = vsub.f32 %v11421_v0, %v6250_v33  ;;  %v7547_v36 = vpop.eup %4706  ;;  %4738 = vpow2.f32 %v7241_v21  ;;  %v11484_v4 = vld [vmem:[#allocation150_spill] sm:$0xff]  ;;  %v11493_v21 = vld [vmem:[#allocation151_spill] sm:$0xff] }
 0x29c   : > { %11417 = vst [vmem:[#allocation84_spill] sm:$0xff] %v7522_v12  ;;  %v7540_v1 = vmul.f32 1.442695, %v11425_v60  ;;  %v11428_v12 = vsub.f32 %v11427_v61, %v6258_v3  ;;  %v11436_v60 = vld [vmem:[#allocation134_spill] sm:$0xff] }
 0x29d   : > { %11420 = vst [vmem:[#allocation86_spill] sm:$0xff] %v7527_v42  ;;  %v7535_v7 = vmul.f32 1.442695, %v11422_v59  ;;  %v11431_v42 = vsub.f32 %v11430_v45, %v6247_v23  ;;  %v11433_v59 = vld [vmem:[#allocation132_spill] sm:$0xff] }
 0x29e   : > { %11426 = vst [vmem:[#allocation89_spill] sm:$0xff] %v7540_v1  ;;  %v7545_v49 = vmul.f32 1.442695, %v11428_v12  ;;  %v11437_v1 = vsub.f32 %v11436_v60, %v6253_v15  ;;  %v7565_v12 = vpop.eup %4708  ;;  %4740 = vpow2.f32 %v7246_v17  ;;  %v11502_v17 = vld [vmem:[#allocation155_spill] sm:$0xff] }
 0x29f   : > { %11423 = vst [vmem:[#allocation88_spill] sm:$0xff] %v7535_v7  ;;  %v7553_v0 = vmul.f32 1.442695, %v11431_v42  ;;  %v11434_v7 = vsub.f32 %v11433_v59, %v6250_v33  ;;  %v11442_v42 = vld [vmem:[#allocation133_spill] sm:$0xff] }
 0x2a0   : > { %11429 = vst [vmem:[#allocation90_spill] sm:$0xff] %v7545_v49  ;;  %v7563_v61 = vmul.f32 1.442695, %v11437_v1  ;;  %v11440_v49 = vsub.f32 %v11439_v5, %v6258_v3  ;;  %v7583_v1 = vpop.eup %4710  ;;  %4742 = vpow2.f32 %v7253_v48  ;;  %v11511_v48 = vld [vmem:[#allocation160_spill] sm:$0xff] }
 0x2a1   : > { %11432 = vst [vmem:[#allocation91_spill] sm:$0xff] %v7553_v0  ;;  %v7558_v28 = vmul.f32 1.442695, %v11434_v7  ;;  %v11443_v0 = vsub.f32 %v11442_v42, %v6247_v23  ;;  %v11445_v7 = vld [vmem:[#allocation135_spill] sm:$0xff] }
 0x2a2   : > { %11438 = vst [vmem:[#allocation95_spill] sm:$0xff] %v7563_v61  ;;  %v7571_v45 = vmul.f32 1.442695, %v11440_v49  ;;  %v11449_v61 = vsub.f32 %v11448_v62, %v6253_v15  ;;  %v11451_v49 = vld [vmem:[#allocation138_spill] sm:$0xff] }
 0x2a3   : > { %11435 = vst [vmem:[#allocation93_spill] sm:$0xff] %v7558_v28  ;;  %v7576_v59 = vmul.f32 1.442695, %v11443_v0  ;;  %v11446_v28 = vsub.f32 %v11445_v7, %v6250_v33  ;;  %v11454_v0 = vld [vmem:[#allocation139_spill] sm:$0xff] }
 0x2a4   : > { %11441 = vst [vmem:[#allocation92_spill] sm:$0xff] %v7571_v45  ;;  %v7589_v5 = vmul.f32 1.442695, %v11449_v61  ;;  %v11452_v45 = vsub.f32 %v11451_v49, %v6258_v3  ;;  %v11460_v61 = vld [vmem:[#allocation142_spill] sm:$0xff] }
 0x2a5   : > { %11444 = vst [vmem:[#allocation94_spill] sm:$0xff] %v7576_v59  ;;  %v7581_v60 = vmul.f32 1.442695, %v11446_v28  ;;  %v11455_v59 = vsub.f32 %v11454_v0, %v6247_v23  ;;  %v7601_v28 = vpop.eup %4712  ;;  %4744 = vpow2.f32 %v7258_v25  ;;  %v11520_v25 = vld [vmem:[#allocation161_spill] sm:$0xff] }
 0x2a6   : > { %11450 = vst [vmem:[#allocation97_spill] sm:$0xff] %v7589_v5  ;;  %v7594_v42 = vmul.f32 1.442695, %v11452_v45  ;;  %v11461_v5 = vsub.f32 %v11460_v61, %v6253_v15  ;;  %v11463_v45 = vld [vmem:[#allocation144_spill] sm:$0xff] }
 0x2a7   : > { %11447 = vst [vmem:[#allocation96_spill] sm:$0xff] %v7581_v60  ;;  %v7599_v7 = vmul.f32 1.442695, %v11455_v59  ;;  %v11458_v60 = vsub.f32 %v11457_v32, %v6250_v33  ;;  %v7619_v59 = vpop.eup %4714  ;;  %4746 = vpow2.f32 %v7263_v27  ;;  %v11529_v27 = vld [vmem:[#allocation164_spill] sm:$0xff] }
 0x2a8   : > { %11453 = vst [vmem:[#allocation98_spill] sm:$0xff] %v7594_v42  ;;  %v7612_v49 = vmul.f32 1.442695, %v11461_v5  ;;  %v11464_v42 = vsub.f32 %v11463_v45, %v6258_v3  ;;  %v11472_v5 = vld [vmem:[#allocation145_spill] sm:$0xff] }
 0x2a9   : > { %11456 = vst [vmem:[#allocation99_spill] sm:$0xff] %v7599_v7  ;;  %v7607_v62 = vmul.f32 1.442695, %v11458_v60  ;;  %v11467_v7 = vsub.f32 %v11466_v18, %v6247_v23  ;;  %v11469_v60 = vld [vmem:[#allocation143_spill] sm:$0xff] }
 0x2aa   : > { %11462 = vst [vmem:[#allocation103_spill] sm:$0xff] %v7612_v49  ;;  %v7617_v0 = vmul.f32 1.442695, %v11464_v42  ;;  %v11473_v49 = vsub.f32 %v11472_v5, %v6253_v15  ;;  %v7637_v42 = vpop.eup %4716  ;;  %4748 = vpow2.f32 %v7270_v46  ;;  %v11538_v46 = vld [vmem:[#allocation165_spill] sm:$0xff] }
 0x2ab   : > { %11459 = vst [vmem:[#allocation101_spill] sm:$0xff] %v7607_v62  ;;  %v7625_v32 = vmul.f32 1.442695, %v11467_v7  ;;  %v11470_v62 = vsub.f32 %v11469_v60, %v6250_v33  ;;  %v11478_v7 = vld [vmem:[#allocation147_spill] sm:$0xff] }
 0x2ac   : > { %11465 = vst [vmem:[#allocation100_spill] sm:$0xff] %v7617_v0  ;;  %v7635_v45 = vmul.f32 1.442695, %v11473_v49  ;;  %v11476_v0 = vsub.f32 %v11475_v22, %v6258_v3  ;;  %v7655_v49 = vpop.eup %4718  ;;  %4750 = vpow2.f32 %v7275_v31  ;;  %v11547_v31 = vld [vmem:[#allocation170_spill] sm:$0xff] }
 0x2ad   : > { %11468 = vst [vmem:[#allocation102_spill] sm:$0xff] %v7625_v32  ;;  %v7630_v61 = vmul.f32 1.442695, %v11470_v62  ;;  %v11479_v32 = vsub.f32 %v11478_v7, %v6247_v23  ;;  %v11481_v62 = vld [vmem:[#allocation148_spill] sm:$0xff] }
 0x2ae   : > { %11474 = vst [vmem:[#allocation105_spill] sm:$0xff] %v7635_v45  ;;  %v7643_v18 = vmul.f32 1.442695, %v11476_v0  ;;  %v11485_v45 = vsub.f32 %v11484_v4, %v6253_v15  ;;  %v11487_v0 = vld [vmem:[#allocation152_spill] sm:$0xff] }
 0x2af   : > { %11471 = vst [vmem:[#allocation104_spill] sm:$0xff] %v7630_v61  ;;  %v7648_v60 = vmul.f32 1.442695, %v11479_v32  ;;  %v11482_v61 = vsub.f32 %v11481_v62, %v6250_v33  ;;  %v11490_v32 = vld [vmem:[#allocation149_spill] sm:$0xff] }
 0x2b0   : > { %11477 = vst [vmem:[#allocation106_spill] sm:$0xff] %v7643_v18  ;;  %v7661_v22 = vmul.f32 1.442695, %v11485_v45  ;;  %v11488_v18 = vsub.f32 %v11487_v0, %v6258_v3  ;;  %v11496_v45 = vld [vmem:[#allocation153_spill] sm:$0xff] }
 0x2b1   : > { %11480 = vst [vmem:[#allocation107_spill] sm:$0xff] %v7648_v60  ;;  %v7653_v5 = vmul.f32 1.442695, %v11482_v61  ;;  %v11491_v60 = vsub.f32 %v11490_v32, %v6247_v23  ;;  %v7673_v61 = vpop.eup %4720  ;;  %4752 = vpow2.f32 %v7280_v29  ;;  %v11556_v29 = vld [vmem:[#allocation174_spill] sm:$0xff] }
 0x2b2   : > { %11486 = vst [vmem:[#allocation111_spill] sm:$0xff] %v7661_v22  ;;  %v7666_v7 = vmul.f32 1.442695, %v11488_v18  ;;  %v11497_v22 = vsub.f32 %v11496_v45, %v6253_v15  ;;  %v11499_v18 = vld [vmem:[#allocation154_spill] sm:$0xff] }
 0x2b3   : > { %11483 = vst [vmem:[#allocation109_spill] sm:$0xff] %v7653_v5  ;;  %v7671_v62 = vmul.f32 1.442695, %v11491_v60  ;;  %v11494_v5 = vsub.f32 %v11493_v21, %v6250_v33  ;;  %v7691_v60 = vpop.eup %4722  ;;  %4754 = vpow2.f32 %v7287_v40  ;;  %v11565_v40 = vld [vmem:[#allocation175_spill] sm:$0xff] }
 0x2b4   : > { %11489 = vst [vmem:[#allocation108_spill] sm:$0xff] %v7666_v7  ;;  %v7684_v0 = vmul.f32 1.442695, %v11497_v22  ;;  %v11500_v7 = vsub.f32 %v11499_v18, %v6258_v3  ;;  %v11508_v22 = vld [vmem:[#allocation158_spill] sm:$0xff] }
 0x2b5   : > { %11492 = vst [vmem:[#allocation110_spill] sm:$0xff] %v7671_v62  ;;  %v7679_v4 = vmul.f32 1.442695, %v11494_v5  ;;  %v11503_v62 = vsub.f32 %v11502_v17, %v6247_v23  ;;  %v11505_v5 = vld [vmem:[#allocation156_spill] sm:$0xff] }
 0x2b6   : > { %11498 = vst [vmem:[#allocation113_spill] sm:$0xff] %v7684_v0  ;;  %v7689_v32 = vmul.f32 1.442695, %v11500_v7  ;;  %v11509_v0 = vsub.f32 %v11508_v22, %v6253_v15  ;;  %v7709_v7 = vpop.eup %4724  ;;  %4756 = vpow2.f32 %v7292_v35  ;;  %v11574_v35 = vld [vmem:[#allocation179_spill] sm:$0xff] }
 0x2b7   : > { %11495 = vst [vmem:[#allocation112_spill] sm:$0xff] %v7679_v4  ;;  %v7697_v21 = vmul.f32 1.442695, %v11503_v62  ;;  %v11506_v4 = vsub.f32 %v11505_v5, %v6250_v33  ;;  %v11514_v62 = vld [vmem:[#allocation157_spill] sm:$0xff] }
 0x2b8   : > { %11501 = vst [vmem:[#allocation114_spill] sm:$0xff] %v7689_v32  ;;  %v7707_v18 = vmul.f32 1.442695, %v11509_v0  ;;  %v11512_v32 = vsub.f32 %v11511_v48, %v6258_v3  ;;  %v7727_v0 = vpop.eup %4726  ;;  %4758 = vpow2.f32 %v7297_v39  ;;  %v11583_v39 = vld [vmem:[#allocation184_spill] sm:$0xff] }
 0x2b9   : > { %11504 = vst [vmem:[#allocation115_spill] sm:$0xff] %v7697_v21  ;;  %v7702_v45 = vmul.f32 1.442695, %v11506_v4  ;;  %v11515_v21 = vsub.f32 %v11514_v62, %v6247_v23  ;;  %v11517_v4 = vld [vmem:[#allocation159_spill] sm:$0xff] }
 0x2ba   : > { %11510 = vst [vmem:[#allocation119_spill] sm:$0xff] %v7707_v18  ;;  %v7715_v17 = vmul.f32 1.442695, %v11512_v32  ;;  %v11521_v18 = vsub.f32 %v11520_v25, %v6253_v15  ;;  %v11523_v32 = vld [vmem:[#allocation162_spill] sm:$0xff] }
 0x2bb   : > { %11507 = vst [vmem:[#allocation117_spill] sm:$0xff] %v7702_v45  ;;  %v7720_v5 = vmul.f32 1.442695, %v11515_v21  ;;  %v11518_v45 = vsub.f32 %v11517_v4, %v6250_v33  ;;  %v11526_v21 = vld [vmem:[#allocation163_spill] sm:$0xff] }
 0x2bc   : > { %11513 = vst [vmem:[#allocation116_spill] sm:$0xff] %v7715_v17  ;;  %v7733_v48 = vmul.f32 1.442695, %v11521_v18  ;;  %v11524_v17 = vsub.f32 %v11523_v32, %v6258_v3  ;;  %v11532_v18 = vld [vmem:[#allocation166_spill] sm:$0xff] }
 0x2bd   : > { %11516 = vst [vmem:[#allocation118_spill] sm:$0xff] %v7720_v5  ;;  %v7725_v22 = vmul.f32 1.442695, %v11518_v45  ;;  %v11527_v5 = vsub.f32 %v11526_v21, %v6247_v23  ;;  %v7745_v45 = vpop.eup %4728  ;;  %4760 = vpow2.f32 %v7304_v55  ;;  %v11592_v55 = vld [vmem:[#allocation185_spill] sm:$0xff] }
 0x2be   : > { %11522 = vst [vmem:[#allocation122_spill] sm:$0xff] %v7733_v48  ;;  %v7738_v62 = vmul.f32 1.442695, %v11524_v17  ;;  %v11533_v48 = vsub.f32 %v11532_v18, %v6253_v15  ;;  %v11535_v17 = vld [vmem:[#allocation168_spill] sm:$0xff] }
 0x2bf   : > { %11519 = vst [vmem:[#allocation121_spill] sm:$0xff] %v7725_v22  ;;  %v7743_v4 = vmul.f32 1.442695, %v11527_v5  ;;  %v11530_v22 = vsub.f32 %v11529_v27, %v6250_v33  ;;  %v7763_v5 = vpop.eup %4730  ;;  %4762 = vpow2.f32 %v7309_v38  ;;  %v11601_v38 = vld [vmem:[#allocation188_spill] sm:$0xff] }
 0x2c0   : > { %11525 = vst [vmem:[#allocation123_spill] sm:$0xff] %v7738_v62  ;;  %v7756_v32 = vmul.f32 1.442695, %v11533_v48  ;;  %v11536_v62 = vsub.f32 %v11535_v17, %v6258_v3  ;;  %v11544_v48 = vld [vmem:[#allocation169_spill] sm:$0xff] }
 0x2c1   : > { %11528 = vst [vmem:[#allocation124_spill] sm:$0xff] %v7743_v4  ;;  %v7751_v25 = vmul.f32 1.442695, %v11530_v22  ;;  %v11539_v4 = vsub.f32 %v11538_v46, %v6247_v23  ;;  %v11541_v22 = vld [vmem:[#allocation167_spill] sm:$0xff] }
 0x2c2   : > { %11534 = vst [vmem:[#allocation128_spill] sm:$0xff] %v7756_v32  ;;  %v7761_v21 = vmul.f32 1.442695, %v11536_v62  ;;  %v11545_v32 = vsub.f32 %v11544_v48, %v6253_v15  ;;  %v7781_v62 = vpop.eup %4732  ;;  %4764 = vpow2.f32 %v7314_v34  ;;  %v11610_v34 = vld [vmem:[#allocation189_spill] sm:$0xff] }
 0x2c3   : > { %11531 = vst [vmem:[#allocation126_spill] sm:$0xff] %v7751_v25  ;;  %v7769_v27 = vmul.f32 1.442695, %v11539_v4  ;;  %v11542_v25 = vsub.f32 %v11541_v22, %v6250_v33  ;;  %v11550_v4 = vld [vmem:[#allocation171_spill] sm:$0xff] }
 0x2c4   : > { %11537 = vst [vmem:[#allocation125_spill] sm:$0xff] %v7761_v21  ;;  %v7779_v17 = vmul.f32 1.442695, %v11545_v32  ;;  %v11548_v21 = vsub.f32 %v11547_v31, %v6258_v3  ;;  %v7799_v32 = vpop.eup %4734  ;;  %4766 = vpow2.f32 %v7321_v14  ;;  %v11619_v14 = vld [vmem:[#allocation194_spill] sm:$0xff] }
 0x2c5   : > { %11540 = vst [vmem:[#allocation127_spill] sm:$0xff] %v7769_v27  ;;  %v7774_v18 = vmul.f32 1.442695, %v11542_v25  ;;  %v11551_v27 = vsub.f32 %v11550_v4, %v6247_v23  ;;  %v11553_v25 = vld [vmem:[#allocation172_spill] sm:$0xff] }
 0x2c6   : > { %11546 = vst [vmem:[#allocation130_spill] sm:$0xff] %v7779_v17  ;;  %v7787_v46 = vmul.f32 1.442695, %v11548_v21  ;;  %v11557_v17 = vsub.f32 %v11556_v29, %v6253_v15  ;;  %v11559_v21 = vld [vmem:[#allocation176_spill] sm:$0xff] }
 0x2c7   : > { %11543 = vst [vmem:[#allocation129_spill] sm:$0xff] %v7774_v18  ;;  %v7792_v22 = vmul.f32 1.442695, %v11551_v27  ;;  %v11554_v18 = vsub.f32 %v11553_v25, %v6250_v33  ;;  %v11562_v27 = vld [vmem:[#allocation173_spill] sm:$0xff] }
 0x2c8   : > { %11549 = vst [vmem:[#allocation131_spill] sm:$0xff] %v7787_v46  ;;  %v7805_v31 = vmul.f32 1.442695, %v11557_v17  ;;  %v11560_v46 = vsub.f32 %v11559_v21, %v6258_v3  ;;  %v11568_v17 = vld [vmem:[#allocation177_spill] sm:$0xff] }
 0x2c9   : > { %11552 = vst [vmem:[#allocation132_spill] sm:$0xff] %v7792_v22  ;;  %v7797_v48 = vmul.f32 1.442695, %v11554_v18  ;;  %v11563_v22 = vsub.f32 %v11562_v27, %v6247_v23  ;;  %v7817_v18 = vpop.eup %4736  ;;  %4768 = vpow2.f32 %v7326_v44  ;;  %v11628_v44 = vld [vmem:[#allocation198_spill] sm:$0xff] }
 0x2ca   : > { %11558 = vst [vmem:[#allocation136_spill] sm:$0xff] %v7805_v31  ;;  %v7810_v4 = vmul.f32 1.442695, %v11560_v46  ;;  %v11569_v31 = vsub.f32 %v11568_v17, %v6253_v15  ;;  %v11571_v46 = vld [vmem:[#allocation178_spill] sm:$0xff] }
 0x2cb   : > { %11555 = vst [vmem:[#allocation134_spill] sm:$0xff] %v7797_v48  ;;  %v7815_v25 = vmul.f32 1.442695, %v11563_v22  ;;  %v11566_v48 = vsub.f32 %v11565_v40, %v6250_v33  ;;  %v7835_v22 = vpop.eup %4738  ;;  %4770 = vpow2.f32 %v7331_v50  ;;  %v11637_v50 = vld [vmem:[#allocation199_spill] sm:$0xff] }
 0x2cc   : > { %11561 = vst [vmem:[#allocation133_spill] sm:$0xff] %v7810_v4  ;;  %v7828_v21 = vmul.f32 1.442695, %v11569_v31  ;;  %v11572_v4 = vsub.f32 %v11571_v46, %v6258_v3  ;;  %v11580_v31 = vld [vmem:[#allocation182_spill] sm:$0xff] }
 0x2cd   : > { %11564 = vst [vmem:[#allocation135_spill] sm:$0xff] %v7815_v25  ;;  %v7823_v29 = vmul.f32 1.442695, %v11566_v48  ;;  %v11575_v25 = vsub.f32 %v11574_v35, %v6247_v23  ;;  %v11577_v48 = vld [vmem:[#allocation180_spill] sm:$0xff] }
 0x2ce   : > { %11570 = vst [vmem:[#allocation138_spill] sm:$0xff] %v7828_v21  ;;  %v7833_v27 = vmul.f32 1.442695, %v11572_v4  ;;  %v11581_v21 = vsub.f32 %v11580_v31, %v6253_v15  ;;  %v7853_v4 = vpop.eup %4740  ;;  %4772 = vpow2.f32 %v7338_v10  ;;  %v11646_v10 = vld [vmem:[#allocation203_spill] sm:$0xff] }
 0x2cf   : > { %11567 = vst [vmem:[#allocation137_spill] sm:$0xff] %v7823_v29  ;;  %v7841_v40 = vmul.f32 1.442695, %v11575_v25  ;;  %v11578_v29 = vsub.f32 %v11577_v48, %v6250_v33  ;;  %v11586_v25 = vld [vmem:[#allocation181_spill] sm:$0xff] }
 0x2d0   : > { %11573 = vst [vmem:[#allocation139_spill] sm:$0xff] %v7833_v27  ;;  %v7851_v46 = vmul.f32 1.442695, %v11581_v21  ;;  %v11584_v27 = vsub.f32 %v11583_v39, %v6258_v3  ;;  %v7871_v21 = vpop.eup %4742  ;;  %4774 = vpow2.f32 %v7343_v41  ;;  %v11655_v41 = vld [vmem:[#allocation208_spill] sm:$0xff] }
 0x2d1   : > { %11576 = vst [vmem:[#allocation140_spill] sm:$0xff] %v7841_v40  ;;  %v7846_v17 = vmul.f32 1.442695, %v11578_v29  ;;  %v11587_v40 = vsub.f32 %v11586_v25, %v6247_v23  ;;  %v11589_v29 = vld [vmem:[#allocation183_spill] sm:$0xff] }
 0x2d2   : > { %11582 = vst [vmem:[#allocation144_spill] sm:$0xff] %v7851_v46  ;;  %v7859_v35 = vmul.f32 1.442695, %v11584_v27  ;;  %v11593_v46 = vsub.f32 %v11592_v55, %v6253_v15  ;;  %v11595_v27 = vld [vmem:[#allocation186_spill] sm:$0xff] }
 0x2d3   : > { %11579 = vst [vmem:[#allocation142_spill] sm:$0xff] %v7846_v17  ;;  %v7864_v48 = vmul.f32 1.442695, %v11587_v40  ;;  %v11590_v17 = vsub.f32 %v11589_v29, %v6250_v33  ;;  %v11598_v40 = vld [vmem:[#allocation187_spill] sm:$0xff] }
 0x2d4   : > { %11585 = vst [vmem:[#allocation141_spill] sm:$0xff] %v7859_v35  ;;  %v7877_v39 = vmul.f32 1.442695, %v11593_v46  ;;  %v11596_v35 = vsub.f32 %v11595_v27, %v6258_v3  ;;  %v11604_v46 = vld [vmem:[#allocation190_spill] sm:$0xff] }
 0x2d5   : > { %11588 = vst [vmem:[#allocation143_spill] sm:$0xff] %v7864_v48  ;;  %v7869_v31 = vmul.f32 1.442695, %v11590_v17  ;;  %v11599_v48 = vsub.f32 %v11598_v40, %v6247_v23  ;;  %v7889_v17 = vpop.eup %4744  ;;  %4776 = vpow2.f32 %v7348_v2  ;;  %v11664_v2 = vld [vmem:[#allocation209_spill] sm:$0xff] }
 0x2d6   : > { %11594 = vst [vmem:[#allocation146_spill] sm:$0xff] %v7877_v39  ;;  %v7882_v25 = vmul.f32 1.442695, %v11596_v35  ;;  %v11605_v39 = vsub.f32 %v11604_v46, %v6253_v15  ;;  %v11607_v35 = vld [vmem:[#allocation192_spill] sm:$0xff] }
 0x2d7   : > { %11591 = vst [vmem:[#allocation145_spill] sm:$0xff] %v7869_v31  ;;  %v7887_v29 = vmul.f32 1.442695, %v11599_v48  ;;  %v11602_v31 = vsub.f32 %v11601_v38, %v6250_v33  ;;  %v7907_v48 = vpop.eup %4746  ;;  %4778 = vpow2.f32 %v7355_v8  ;;  %v11673_v8 = vld [vmem:[#allocation212_spill] sm:$0xff] }
 0x2d8   : > { %11597 = vst [vmem:[#allocation147_spill] sm:$0xff] %v7882_v25  ;;  %v7900_v27 = vmul.f32 1.442695, %v11605_v39  ;;  %v11608_v25 = vsub.f32 %v11607_v35, %v6258_v3  ;;  %v11616_v39 = vld [vmem:[#allocation193_spill] sm:$0xff] }
 0x2d9   : > { %11600 = vst [vmem:[#allocation148_spill] sm:$0xff] %v7887_v29  ;;  %v7895_v55 = vmul.f32 1.442695, %v11602_v31  ;;  %v11611_v29 = vsub.f32 %v11610_v34, %v6247_v23  ;;  %v11613_v31 = vld [vmem:[#allocation191_spill] sm:$0xff] }
 0x2da   : > { %11606 = vst [vmem:[#allocation152_spill] sm:$0xff] %v7900_v27  ;;  %v7905_v40 = vmul.f32 1.442695, %v11608_v25  ;;  %v11617_v27 = vsub.f32 %v11616_v39, %v6253_v15  ;;  %v7925_v25 = vpop.eup %4748  ;;  %4780 = vpow2.f32 %v7360_v13  ;;  %v11682_v13 = vld [vmem:[#allocation213_spill] sm:$0xff] }
 0x2db   : > { %11603 = vst [vmem:[#allocation150_spill] sm:$0xff] %v7895_v55  ;;  %v7913_v38 = vmul.f32 1.442695, %v11611_v29  ;;  %v11614_v55 = vsub.f32 %v11613_v31, %v6250_v33  ;;  %v11622_v29 = vld [vmem:[#allocation195_spill] sm:$0xff] }
 0x2dc   : > { %11609 = vst [vmem:[#allocation149_spill] sm:$0xff] %v7905_v40  ;;  %v7923_v35 = vmul.f32 1.442695, %v11617_v27  ;;  %v11620_v40 = vsub.f32 %v11619_v14, %v6258_v3  ;;  %v7943_v27 = vpop.eup %4750  ;;  %4782 = vpow2.f32 %v7365_v20  ;;  %v11691_v20 = vld [vmem:[#allocation218_spill] sm:$0xff] }
 0x2dd   : > { %11612 = vst [vmem:[#allocation151_spill] sm:$0xff] %v7913_v38  ;;  %v7918_v46 = vmul.f32 1.442695, %v11614_v55  ;;  %v11623_v38 = vsub.f32 %v11622_v29, %v6247_v23  ;;  %v11625_v55 = vld [vmem:[#allocation196_spill] sm:$0xff] }
 0x2de   : > { %11618 = vst [vmem:[#allocation154_spill] sm:$0xff] %v7923_v35  ;;  %v7931_v34 = vmul.f32 1.442695, %v11620_v40  ;;  %v11629_v35 = vsub.f32 %v11628_v44, %v6253_v15  ;;  %v11631_v40 = vld [vmem:[#allocation200_spill] sm:$0xff] }
 0x2df   : > { %11615 = vst [vmem:[#allocation153_spill] sm:$0xff] %v7918_v46  ;;  %v7936_v31 = vmul.f32 1.442695, %v11623_v38  ;;  %v11626_v46 = vsub.f32 %v11625_v55, %v6250_v33  ;;  %v11634_v38 = vld [vmem:[#allocation197_spill] sm:$0xff] }
 0x2e0   : > { %11621 = vst [vmem:[#allocation155_spill] sm:$0xff] %v7931_v34  ;;  %v7949_v14 = vmul.f32 1.442695, %v11629_v35  ;;  %v11632_v34 = vsub.f32 %v11631_v40, %v6258_v3  ;;  %v11640_v35 = vld [vmem:[#allocation201_spill] sm:$0xff] }
 0x2e1   : > { %11624 = vst [vmem:[#allocation156_spill] sm:$0xff] %v7936_v31  ;;  %v7941_v39 = vmul.f32 1.442695, %v11626_v46  ;;  %v11635_v31 = vsub.f32 %v11634_v38, %v6247_v23  ;;  %v7961_v46 = vpop.eup %4752  ;;  %4784 = vpow2.f32 %v7373_v53  ;;  %v11700_v53 = vld [vmem:[#allocation222_spill] sm:$0xff] }
 0x2e2   : > { %11630 = vst [vmem:[#allocation160_spill] sm:$0xff] %v7949_v14  ;;  %v7954_v29 = vmul.f32 1.442695, %v11632_v34  ;;  %v11641_v14 = vsub.f32 %v11640_v35, %v6253_v15  ;;  %v11643_v34 = vld [vmem:[#allocation202_spill] sm:$0xff] }
 0x2e3   : > { %11627 = vst [vmem:[#allocation158_spill] sm:$0xff] %v7941_v39  ;;  %v7959_v55 = vmul.f32 1.442695, %v11635_v31  ;;  %v11638_v39 = vsub.f32 %v11637_v50, %v6250_v33  ;;  %v7979_v31 = vpop.eup %4754  ;;  %4786 = vpow2.f32 %v7378_v24  ;;  %v11709_v24 = vld [vmem:[#allocation223_spill] sm:$0xff] }
 0x2e4   : > { %11633 = vst [vmem:[#allocation157_spill] sm:$0xff] %v7954_v29  ;;  %v7972_v40 = vmul.f32 1.442695, %v11641_v14  ;;  %v11644_v29 = vsub.f32 %v11643_v34, %v6258_v3  ;;  %v11652_v14 = vld [vmem:[#allocation206_spill] sm:$0xff] }
 0x2e5   : > { %11636 = vst [vmem:[#allocation159_spill] sm:$0xff] %v7959_v55  ;;  %v7967_v44 = vmul.f32 1.442695, %v11638_v39  ;;  %v11647_v55 = vsub.f32 %v11646_v10, %v6247_v23  ;;  %v11649_v39 = vld [vmem:[#allocation204_spill] sm:$0xff] }
 0x2e6   : > { %11642 = vst [vmem:[#allocation162_spill] sm:$0xff] %v7972_v40  ;;  %v7977_v38 = vmul.f32 1.442695, %v11644_v29  ;;  %v11653_v40 = vsub.f32 %v11652_v14, %v6253_v15  ;;  %v7997_v29 = vpop.eup %4756  ;;  %4788 = vpow2.f32 %v7383_v54  ;;  %v11718_v54 = vsub.f32 %v11062_v63, %v6247_v23 }
 0x2e7   : > { %11639 = vst [vmem:[#allocation161_spill] sm:$0xff] %v7967_v44  ;;  %v7985_v50 = vmul.f32 1.442695, %v11647_v55  ;;  %v11650_v44 = vsub.f32 %v11649_v39, %v6250_v33  ;;  %v11658_v55 = vld [vmem:[#allocation205_spill] sm:$0xff] }
 0x2e8   : > { %11645 = vst [vmem:[#allocation163_spill] sm:$0xff] %v7977_v38  ;;  %v7995_v34 = vmul.f32 1.442695, %v11653_v40  ;;  %v11656_v38 = vsub.f32 %v11655_v41, %v6258_v3  ;;  %v8015_v40 = vpop.eup %4758  ;;  %4790 = vpow2.f32 %v7391_v11  ;;  %v11725_v11 = vsub.f32 %v11065_v26, %v6258_v3 }
 0x2e9   : > { %11648 = vst [vmem:[#allocation164_spill] sm:$0xff] %v7985_v50  ;;  %v7990_v35 = vmul.f32 1.442695, %v11650_v44  ;;  %v11659_v50 = vsub.f32 %v11658_v55, %v6247_v23  ;;  %v11661_v44 = vld [vmem:[#allocation207_spill] sm:$0xff] }
 0x2ea   : > { %11654 = vst [vmem:[#allocation168_spill] sm:$0xff] %v7995_v34  ;;  %v8003_v10 = vmul.f32 1.442695, %v11656_v38  ;;  %v11665_v34 = vsub.f32 %v11664_v2, %v6253_v15  ;;  %v11667_v38 = vld [vmem:[#allocation210_spill] sm:$0xff]  ;;  %v8147_v63 = vmul.f32 1.442695, %v11725_v11  ;;  %v11734_v11 = vsub.f32 %v6228_v37, %v6258_v3 }
 0x2eb   : > { %11651 = vst [vmem:[#allocation166_spill] sm:$0xff] %v7990_v35  ;;  %v8008_v39 = vmul.f32 1.442695, %v11659_v50  ;;  %v11662_v35 = vsub.f32 %v11661_v44, %v6250_v33  ;;  %v11670_v50 = vld [vmem:[#allocation211_spill] sm:$0xff]  ;;  %v11745_v37 = vld [vmem:[#allocation69_spill] sm:$0xff] }
 0x2ec   : > { %11657 = vst [vmem:[#allocation165_spill] sm:$0xff] %v8003_v10  ;;  %v8021_v41 = vmul.f32 1.442695, %v11665_v34  ;;  %v11668_v10 = vsub.f32 %v11667_v38, %v6258_v3  ;;  %v11676_v34 = vld [vmem:[#allocation214_spill] sm:$0xff]  ;;  %11726 = vst [vmem:[#allocation189_spill] sm:$0xff] %v8147_v63 }
 0x2ed   : > { %11660 = vst [vmem:[#allocation167_spill] sm:$0xff] %v8008_v39  ;;  %v8013_v14 = vmul.f32 1.442695, %v11662_v35  ;;  %v11671_v39 = vsub.f32 %v11670_v50, %v6247_v23  ;;  %v8033_v35 = vpop.eup %4760  ;;  %4792 = vpow2.f32 %v7396_v56  ;;  %v11732_v56 = vsub.f32 %v11068_v9, %v6253_v15  ;;  %v11754_v63 = vld [vmem:[#allocation30_spill] sm:$0xff] }
 0x2ee   : > { %11666 = vst [vmem:[#allocation170_spill] sm:$0xff] %v8021_v41  ;;  %v8026_v55 = vmul.f32 1.442695, %v11668_v10  ;;  %v11677_v41 = vsub.f32 %v11676_v34, %v6253_v15  ;;  %v11679_v10 = vld [vmem:[#allocation216_spill] sm:$0xff] }
 0x2ef   : > { %11663 = vst [vmem:[#allocation169_spill] sm:$0xff] %v8013_v14  ;;  %v8031_v44 = vmul.f32 1.442695, %v11671_v39  ;;  %v11674_v14 = vsub.f32 %v11673_v8, %v6250_v33  ;;  %v8051_v39 = vpop.eup %4762  ;;  %4794 = vpow2.f32 %v7401_v51  ;;  %v8165_v26 = vmul.f32 1.442695, %v11732_v56  ;;  %v11741_v51 = vld [vmem:[#allocation25_spill] sm:$0xff] }
 0x2f0   : > { %11669 = vst [vmem:[#allocation171_spill] sm:$0xff] %v8026_v55  ;;  %v8044_v38 = vmul.f32 1.442695, %v11677_v41  ;;  %v11680_v55 = vsub.f32 %v11679_v10, %v6258_v3  ;;  %v11688_v41 = vld [vmem:[#allocation217_spill] sm:$0xff] }
 0x2f1   : > { %11672 = vst [vmem:[#allocation172_spill] sm:$0xff] %v8031_v44  ;;  %v8039_v2 = vmul.f32 1.442695, %v11674_v14  ;;  %v11683_v44 = vsub.f32 %v11682_v13, %v6247_v23  ;;  %v11685_v14 = vld [vmem:[#allocation215_spill] sm:$0xff]  ;;  %11733 = vst [vmem:[#allocation194_spill] sm:$0xff] %v8165_v26 }
 0x2f2   : > { %11678 = vst [vmem:[#allocation176_spill] sm:$0xff] %v8044_v38  ;;  %v8049_v50 = vmul.f32 1.442695, %v11680_v55  ;;  %v11689_v38 = vsub.f32 %v11688_v41, %v6253_v15  ;;  %v8069_v55 = vpop.eup %4764 }
 0x2f3   : > { %11675 = vst [vmem:[#allocation174_spill] sm:$0xff] %v8039_v2  ;;  %v8057_v8 = vmul.f32 1.442695, %v11683_v44  ;;  %v11686_v2 = vsub.f32 %v11685_v14, %v6250_v33  ;;  %v11694_v44 = vld [vmem:[#allocation219_spill] sm:$0xff] }
 0x2f4   : > { %11681 = vst [vmem:[#allocation173_spill] sm:$0xff] %v8049_v50  ;;  %v8067_v10 = vmul.f32 1.442695, %v11689_v38  ;;  %v11692_v50 = vsub.f32 %v11691_v20, %v6258_v3  ;;  %v8087_v38 = vpop.eup %4766 }
 0x2f5   : > { %11684 = vst [vmem:[#allocation175_spill] sm:$0xff] %v8057_v8  ;;  %v8062_v34 = vmul.f32 1.442695, %v11686_v2  ;;  %v11695_v8 = vsub.f32 %v11694_v44, %v6247_v23  ;;  %v11697_v2 = vld [vmem:[#allocation220_spill] sm:$0xff] }
 0x2f6   : > { %11690 = vst [vmem:[#allocation178_spill] sm:$0xff] %v8067_v10  ;;  %v8075_v13 = vmul.f32 1.442695, %v11692_v50  ;;  %v11701_v10 = vsub.f32 %v11700_v53, %v6253_v15  ;;  %v11703_v50 = vld [vmem:[#allocation224_spill] sm:$0xff] }
 0x2f7   : > { %11687 = vst [vmem:[#allocation177_spill] sm:$0xff] %v8062_v34  ;;  %v8080_v14 = vmul.f32 1.442695, %v11695_v8  ;;  %v11698_v34 = vsub.f32 %v11697_v2, %v6250_v33  ;;  %v11706_v8 = vld [vmem:[#allocation221_spill] sm:$0xff] }
 0x2f8   : > { %11693 = vst [vmem:[#allocation179_spill] sm:$0xff] %v8075_v13  ;;  %v8093_v20 = vmul.f32 1.442695, %v11701_v10  ;;  %v11704_v13 = vsub.f32 %v11703_v50, %v6258_v3  ;;  %v11712_v10 = vld [vmem:[#allocation225_spill] sm:$0xff] }
 0x2f9   : > { %11696 = vst [vmem:[#allocation180_spill] sm:$0xff] %v8080_v14  ;;  %v8085_v41 = vmul.f32 1.442695, %v11698_v34  ;;  %v11707_v14 = vsub.f32 %v11706_v8, %v6247_v23  ;;  %v8105_v34 = vpop.eup %4768 }
 0x2fa   : > { %11702 = vst [vmem:[#allocation184_spill] sm:$0xff] %v8093_v20  ;;  %v8098_v44 = vmul.f32 1.442695, %v11704_v13  ;;  %v11713_v20 = vsub.f32 %v11712_v10, %v6253_v15  ;;  %v11715_v13 = vld [vmem:[#allocation226_spill] sm:$0xff] }
 0x2fb   : > { %11699 = vst [vmem:[#allocation182_spill] sm:$0xff] %v8085_v41  ;;  %v8103_v2 = vmul.f32 1.442695, %v11707_v14  ;;  %v11710_v41 = vsub.f32 %v11709_v24, %v6250_v33  ;;  %v8123_v14 = vpop.eup %4770  ;;  %v8129_v24 = vmul.f32 1.442695, %v11718_v54  ;;  %v11727_v54 = vld [vmem:[#allocation229_spill] sm:$0xff] }
 0x2fc   : > { %11705 = vst [vmem:[#allocation181_spill] sm:$0xff] %v8098_v44  ;;  %v8116_v50 = vmul.f32 1.442695, %v11713_v20  ;;  %v11716_v44 = vsub.f32 %v11715_v13, %v6258_v3  ;;  %v11723_v20 = vsub.f32 %v11064_v19, %v6253_v15  ;;  %v11743_v15 = vld [vmem:[#allocation26_spill] sm:$0xff]  ;;  %v11746_v3 = vld [vmem:[#allocation27_spill] sm:$0xff] }
 0x2fd   : > { %11708 = vst [vmem:[#allocation183_spill] sm:$0xff] %v8103_v2  ;;  %v8111_v53 = vmul.f32 1.442695, %v11710_v41  ;;  %11719 = vst [vmem:[#allocation188_spill] sm:$0xff] %v8129_v24  ;;  %v11720_v41 = vld [vmem:[#allocation228_spill] sm:$0xff]  ;;  %v11728_v24 = vsub.f32 %v11727_v54, %v6247_v23  ;;  %v8185_v9 = vmul.f32 0.0, %v11743_v15 }
 0x2fe   : > { %11714 = vst [vmem:[#allocation186_spill] sm:$0xff] %v8116_v50  ;;  %v8121_v8 = vmul.f32 1.442695, %v11716_v44  ;;  %v8139_v13 = vmul.f32 1.442695, %v11723_v20  ;;  %v8141_v44 = vpop.eup %4772  ;;  %v11761_v50 = vld [vmem:[#allocation34_spill] sm:$0xff] }
 0x2ff   : > { %11711 = vst [vmem:[#allocation185_spill] sm:$0xff] %v8111_v53  ;;  %v11721_v53 = vsub.f32 %v11720_v41, %v6250_v33  ;;  %v8152_v41 = vmul.f32 1.442695, %v11728_v24  ;;  %v8159_v20 = vpop.eup %4774  ;;  %v8170_v23 = vmul.f32 1.442695, %v11734_v11  ;;  %v11736_v24 = vld [vmem:[#allocation22_spill] sm:$0xff] }
 0x300   : > { %11717 = vst [vmem:[#allocation187_spill] sm:$0xff] %v8121_v8  ;;  %11724 = vst [vmem:[#allocation192_spill] sm:$0xff] %v8139_v13  ;;  %v8173_v54 = vmul.f32 0.0, %v11736_v24  ;;  %v8191_v11 = vmul.f32 0.0, %v11746_v3  ;;  %v11748_v24 = vld [vmem:[#allocation29_spill] sm:$0xff]  ;;  %v8206_v13 = vmul.f32 0.0, %v11754_v63 }
 0x301   : > { %v8134_v10 = vmul.f32 1.442695, %v11721_v53  ;;  %11729 = vst [vmem:[#allocation191_spill] sm:$0xff] %v8152_v41  ;;  %v11730_v53 = vsub.f32 %v11067_v6, %v6250_v33  ;;  %11735 = vst [vmem:[#allocation195_spill] sm:$0xff] %v8170_v23  ;;  %v8175_v6 = vpop.eup %4776  ;;  %v11738_v33 = vld [vmem:[#allocation67_spill] sm:$0xff]  ;;  %v8182_v41 = vmul.f32 0.0, %v11741_v51 }
 0x302   : > { %11737 = vst [vmem:[#allocation196_spill] sm:$0xff] %v8173_v54  ;;  %4796 = vpow2.f32 %v11738_v33  ;;  %11744 = vst [vmem:[#allocation197_spill] sm:$0xff] %v8185_v9  ;;  %v8187_v56 = vpop.eup %4778  ;;  %v8194_v23 = vmul.f32 0.0, %v11748_v24  ;;  %v11750_v33 = vld [vmem:[#allocation31_spill] sm:$0xff]  ;;  %v11752_v51 = vld [vmem:[#allocation28_spill] sm:$0xff]  ;;  %v8218_v2 = vmul.f32 0.0, %v11761_v50 }
 0x303   : > { %11722 = vst [vmem:[#allocation190_spill] sm:$0xff] %v8134_v10  ;;  %v8157_v19 = vmul.f32 1.442695, %v11730_v53  ;;  %v11739_v53 = vld [vmem:[#allocation24_spill] sm:$0xff]  ;;  %11742 = vst [vmem:[#allocation200_spill] sm:$0xff] %v8182_v41  ;;  %4798 = vpow2.f32 %v11745_v37  ;;  %v8197_v26 = vmul.f32 0.0, %v11750_v33 }
 0x304   : > { %11747 = vst [vmem:[#allocation199_spill] sm:$0xff] %v8191_v11  ;;  %11749 = vst [vmem:[#allocation201_spill] sm:$0xff] %v8194_v23  ;;  %4800 = vpow2.f32 %v7419_v52  ;;  %v8203_v15 = vmul.f32 0.0, %v11752_v51  ;;  %v11756_v37 = vld [vmem:[#allocation32_spill] sm:$0xff]  ;;  %v11759_v8 = vld [vmem:[#allocation33_spill] sm:$0xff] }
 0x305   : > { %11731 = vst [vmem:[#allocation193_spill] sm:$0xff] %v8157_v19  ;;  %v8179_v19 = vmul.f32 0.0, %v11739_v53  ;;  %11751 = vst [vmem:[#allocation202_spill] sm:$0xff] %v8197_v26  ;;  %v8199_v53 = vpop.eup %4780  ;;  %v8209_v10 = vmul.f32 0.0, %v11756_v37  ;;  %v11758_v24 = vld [vmem:[#allocation68_spill] sm:$0xff]  ;;  %v8215_v33 = vmul.f32 0.0, %v11759_v8 }
 0x306   : > { %11753 = vst [vmem:[#allocation203_spill] sm:$0xff] %v8203_v15  ;;  %11755 = vst [vmem:[#allocation204_spill] sm:$0xff] %v8206_v13  ;;  %v8211_v3 = vpop.eup %4782  ;;  %4802 = vpow2.f32 %v11758_v24  ;;  %v11763_v52 = vld [vmem:[#allocation35_spill] sm:$0xff]  ;;  %v11765_v63 = vld [vmem:[#allocation70_spill] sm:$0xff] }
 0x307   : > { %11740 = vst [vmem:[#allocation198_spill] sm:$0xff] %v8179_v19  ;;  %11757 = vst [vmem:[#allocation206_spill] sm:$0xff] %v8209_v10  ;;  %v8221_v26 = vmul.f32 0.0, %v11763_v52  ;;  %v8223_v51 = vpop.eup %4784  ;;  %4804 = vpow2.f32 %v11765_v63  ;;  %v11766_v15 = vld [vmem:[#allocation37_spill] sm:$0xff]  ;;  %v11768_v10 = vld [vmem:[#allocation39_spill] sm:$0xff] }
 0x308   : > { %11760 = vst [vmem:[#allocation208_spill] sm:$0xff] %v8215_v33  ;;  %11762 = vst [vmem:[#allocation205_spill] sm:$0xff] %v8218_v2  ;;  %v8227_v37 = vmul.f32 0.0, %v11766_v15  ;;  %v8230_v13 = vmul.f32 0.0, %v11768_v10  ;;  %v11770_v24 = vld [vmem:[#allocation36_spill] sm:$0xff]  ;;  %v8235_v8 = vpop.eup %4786  ;;  %4806 = vpow2.f32 %v7437_v47  ;;  %v11772_v50 = vld [vmem:[#allocation38_spill] sm:$0xff] }
 0x309   : > { %11764 = vst [vmem:[#allocation207_spill] sm:$0xff] %v8221_v26  ;;  %v8233_v23 = vmul.f32 0.0, %v11770_v24  ;;  %v8239_v52 = vmul.f32 0.0, %v11772_v50  ;;  %v11774_v2 = vld [vmem:[#allocation40_spill] sm:$0xff]  ;;  %v11776_v63 = vld [vmem:[#allocation41_spill] sm:$0xff]  ;;  %v8247_v15 = vpop.eup %4788 }
 0x30a   : > { %11767 = vst [vmem:[#allocation209_spill] sm:$0xff] %v8227_v37  ;;  %11769 = vst [vmem:[#allocation210_spill] sm:$0xff] %v8230_v13  ;;  %v8242_v26 = vmul.f32 0.0, %v11774_v2  ;;  %v8245_v33 = vmul.f32 0.0, %v11776_v63  ;;  %v11778_v10 = vld [vmem:[#allocation73_spill] sm:$0xff]  ;;  %v11779_v13 = vld [vmem:[#allocation42_spill] sm:$0xff]  ;;  %v8259_v50 = vpop.eup %4790 }
 0x30b   : > { %11771 = vst [vmem:[#allocation211_spill] sm:$0xff] %v8233_v23  ;;  %11773 = vst [vmem:[#allocation212_spill] sm:$0xff] %v8239_v52  ;;  %4808 = vpow2.f32 %v11778_v10  ;;  %v8251_v24 = vmul.f32 0.0, %v11779_v13  ;;  %v11781_v23 = vld [vmem:[#allocation43_spill] sm:$0xff]  ;;  %v11783_v47 = vld [vmem:[#allocation45_spill] sm:$0xff]  ;;  %v8271_v13 = vpop.eup %4792 }
 0x30c   : > { %11775 = vst [vmem:[#allocation214_spill] sm:$0xff] %v8242_v26  ;;  %11777 = vst [vmem:[#allocation216_spill] sm:$0xff] %v8245_v33  ;;  %v8254_v37 = vmul.f32 0.0, %v11781_v23  ;;  %v8257_v9 = vmul.f32 0.0, %v11783_v47  ;;  %v11785_v2 = vld [vmem:[#allocation74_spill] sm:$0xff]  ;;  %v11786_v26 = vld [vmem:[#allocation47_spill] sm:$0xff] }
 0x30d   : > { %11780 = vst [vmem:[#allocation213_spill] sm:$0xff] %v8251_v24  ;;  %4810 = vpow2.f32 %v11785_v2  ;;  %v8263_v63 = vmul.f32 0.0, %v11786_v26  ;;  %v11788_v33 = vld [vmem:[#allocation44_spill] sm:$0xff]  ;;  %v11790_v10 = vld [vmem:[#allocation46_spill] sm:$0xff]  ;;  %v8283_v26 = vpop.eup %4794 }
 0x30e   : > { %11782 = vst [vmem:[#allocation215_spill] sm:$0xff] %v8254_v37  ;;  %11784 = vst [vmem:[#allocation217_spill] sm:$0xff] %v8257_v9  ;;  %v8266_v52 = vmul.f32 0.0, %v11788_v33  ;;  %v8269_v11 = vmul.f32 0.0, %v11790_v10  ;;  %4812 = vpow2.f32 %v7455_v30  ;;  %v11792_v23 = vld [vmem:[#allocation48_spill] sm:$0xff]  ;;  %v11794_v9 = vld [vmem:[#allocation49_spill] sm:$0xff] }
 0x30f   : > { %11787 = vst [vmem:[#allocation218_spill] sm:$0xff] %v8263_v63  ;;  %v8275_v47 = vmul.f32 0.0, %v11792_v23  ;;  %v8278_v24 = vmul.f32 0.0, %v11794_v9  ;;  %v11796_v2 = vld [vmem:[#allocation50_spill] sm:$0xff]  ;;  %v11798_v33 = vld [vmem:[#allocation77_spill] sm:$0xff]  ;;  %v11803_v30 = vld [vmem:[#allocation55_spill] sm:$0xff]  ;;  %v8295_v23 = vpop.eup %4796 }
 0x310   : > { %11789 = vst [vmem:[#allocation219_spill] sm:$0xff] %v8266_v52  ;;  %11791 = vst [vmem:[#allocation220_spill] sm:$0xff] %v8269_v11  ;;  %v8281_v37 = vmul.f32 0.0, %v11796_v2  ;;  %4814 = vpow2.f32 %v11798_v33  ;;  %v11799_v52 = vld [vmem:[#allocation51_spill] sm:$0xff]  ;;  %v11801_v11 = vld [vmem:[#allocation53_spill] sm:$0xff]  ;;  %v8293_v41 = vmul.f32 0.0, %v11803_v30 }
 0x311   : > { %11793 = vst [vmem:[#allocation222_spill] sm:$0xff] %v8275_v47  ;;  %11795 = vst [vmem:[#allocation224_spill] sm:$0xff] %v8278_v24  ;;  %v8287_v10 = vmul.f32 0.0, %v11799_v52  ;;  %v8290_v63 = vmul.f32 0.0, %v11801_v11  ;;  %v11805_v9 = vld [vmem:[#allocation79_spill] sm:$0xff]  ;;  %v11806_v24 = vld [vmem:[#allocation52_spill] sm:$0xff]  ;;  %v8307_v52 = vpop.eup %4798 }
 0x312   : > { %11797 = vst [vmem:[#allocation221_spill] sm:$0xff] %v8281_v37  ;;  %11804 = vst [vmem:[#allocation226_spill] sm:$0xff] %v8293_v41  ;;  %4816 = vpow2.f32 %v11805_v9  ;;  %v8299_v2 = vmul.f32 0.0, %v11806_v24  ;;  %v11808_v37 = vld [vmem:[#allocation54_spill] sm:$0xff]  ;;  %v11810_v33 = vld [vmem:[#allocation56_spill] sm:$0xff]  ;;  %v8319_v24 = vpop.eup %4800 }
 0x313   : > { %11800 = vst [vmem:[#allocation223_spill] sm:$0xff] %v8287_v10  ;;  %11802 = vst [vmem:[#allocation225_spill] sm:$0xff] %v8290_v63  ;;  %v8302_v47 = vmul.f32 0.0, %v11808_v37  ;;  %v8305_v19 = vmul.f32 0.0, %v11810_v33  ;;  %4818 = vpow2.f32 %v7473_v43  ;;  %v11812_v11 = vld [vmem:[#allocation57_spill] sm:$0xff]  ;;  %v11814_v41 = vld [vmem:[#allocation58_spill] sm:$0xff] }
 0x314   : > { %11807 = vst [vmem:[#allocation228_spill] sm:$0xff] %v8299_v2  ;;  %v8311_v30 = vmul.f32 0.0, %v11812_v11  ;;  %v8314_v63 = vmul.f32 0.0, %v11814_v41  ;;  %v11816_v9 = vld [vmem:[#allocation59_spill] sm:$0xff]  ;;  %11818 = vst [vmem:[#allocation26_spill] sm:$0xff] %v8319_v24  ;;  %v11819_v37 = vld [vmem:[#allocation78_spill] sm:$0xff]  ;;  %v8331_v11 = vpop.eup %4802 }
 0x315   : > { %11809 = vst [vmem:[#allocation229_spill] sm:$0xff] %v8302_v47  ;;  %11811 = vst [vmem:[#allocation22_spill] sm:$0xff] %v8305_v19  ;;  %v8317_v10 = vmul.f32 0.0, %v11816_v9  ;;  %4820 = vpow2.f32 %v11819_v37  ;;  %v11820_v2 = vld [vmem:[#allocation61_spill] sm:$0xff]  ;;  %v11822_v19 = vld [vmem:[#allocation63_spill] sm:$0xff] }
 0x316   : > { %11813 = vst [vmem:[#allocation67_spill] sm:$0xff] %v8311_v30  ;;  %11815 = vst [vmem:[#allocation24_spill] sm:$0xff] %v8314_v63  ;;  %v8323_v33 = vmul.f32 0.0, %v11820_v2  ;;  %v8326_v47 = vmul.f32 0.0, %v11822_v19  ;;  %v11824_v43 = vld [vmem:[#allocation60_spill] sm:$0xff]  ;;  %v11827_v63 = vld [vmem:[#allocation62_spill] sm:$0xff]  ;;  %v8343_v2 = vpop.eup %4804 }
 0x317   : > { %11817 = vst [vmem:[#allocation25_spill] sm:$0xff] %v8317_v10  ;;  %v8329_v54 = vmul.f32 0.0, %v11824_v43  ;;  %v11826_v41 = vld [vmem:[#allocation80_spill] sm:$0xff]  ;;  %v8335_v9 = vmul.f32 0.0, %v11827_v63  ;;  %v11831_v37 = vld [vmem:[#allocation65_spill] sm:$0xff]  ;;  %11833 = vst [vmem:[#allocation32_spill] sm:$0xff] %v8343_v2  ;;  %v8355_v63 = vpop.eup %4806 }
 0x318   : > { %11821 = vst [vmem:[#allocation69_spill] sm:$0xff] %v8323_v33  ;;  %11823 = vst [vmem:[#allocation27_spill] sm:$0xff] %v8326_v47  ;;  %4822 = vpow2.f32 %v11826_v41  ;;  %v11829_v10 = vld [vmem:[#allocation64_spill] sm:$0xff]  ;;  %v8341_v24 = vmul.f32 0.0, %v11831_v37  ;;  %v11834_v19 = vld [vmem:[#allocation66_spill] sm:$0xff] }
 0x319   : > { %11825 = vst [vmem:[#allocation29_spill] sm:$0xff] %v8329_v54  ;;  %11828 = vst [vmem:[#allocation31_spill] sm:$0xff] %v8335_v9  ;;  %v8338_v30 = vmul.f32 0.0, %v11829_v10  ;;  %4824 = vpow2.f32 %v7491_v57  ;;  %v8347_v43 = vmul.f32 0.0, %v11834_v19  ;;  %v11836_v54 = vld [vmem:[#allocation71_spill] sm:$0xff]  ;;  %v11838_v41 = vld [vmem:[#allocation72_spill] sm:$0xff]  ;;  %v8367_v19 = vpop.eup %4808 }
 0x31a   : > { %11832 = vst [vmem:[#allocation30_spill] sm:$0xff] %v8341_v24  ;;  %v8350_v47 = vmul.f32 0.0, %v11836_v54  ;;  %v8353_v33 = vmul.f32 0.0, %v11838_v41  ;;  %v11840_v10 = vld [vmem:[#allocation82_spill] sm:$0xff]  ;;  %v11843_v24 = vld [vmem:[#allocation76_spill] sm:$0xff]  ;;  %v11845_v57 = vld [vmem:[#allocation81_spill] sm:$0xff] }
 0x31b   : > { %11830 = vst [vmem:[#allocation28_spill] sm:$0xff] %v8338_v30  ;;  %11835 = vst [vmem:[#allocation68_spill] sm:$0xff] %v8347_v43  ;;  %4826 = vpow2.f32 %v11840_v10  ;;  %v11841_v30 = vld [vmem:[#allocation75_spill] sm:$0xff]  ;;  %v8362_v9 = vmul.f32 0.0, %v11843_v24  ;;  %v8365_v2 = vmul.f32 0.0, %v11845_v57  ;;  %v8371_v41 = vmul.f32 0.0, %v7511_v58 }
 0x31c   : > { %11837 = vst [vmem:[#allocation33_spill] sm:$0xff] %v8350_v47  ;;  %11839 = vst [vmem:[#allocation34_spill] sm:$0xff] %v8353_v33  ;;  %v8359_v37 = vmul.f32 0.0, %v11841_v30  ;;  %v11847_v54 = vld [vmem:[#allocation83_spill] sm:$0xff]  ;;  %v8374_v33 = vmul.f32 0.0, %v7529_v16  ;;  %v8377_v10 = vmul.f32 0.0, %v7547_v36  ;;  %v8379_v30 = vpop.eup %4810 }
 0x31d   : > { %11844 = vst [vmem:[#allocation70_spill] sm:$0xff] %v8362_v9  ;;  %11846 = vst [vmem:[#allocation37_spill] sm:$0xff] %v8365_v2  ;;  %4828 = vpow2.f32 %v11847_v54  ;;  %v11851_v24 = vld [vmem:[#allocation85_spill] sm:$0xff]  ;;  %v8383_v57 = vmul.f32 0.0, %v7565_v12  ;;  %v8386_v9 = vmul.f32 0.0, %v7583_v1  ;;  %v8389_v54 = vmul.f32 0.0, %v7601_v28  ;;  %v8391_v58 = vpop.eup %4812 }
 0x31e   : > { %11842 = vst [vmem:[#allocation35_spill] sm:$0xff] %v8359_v37  ;;  %11848 = vst [vmem:[#allocation39_spill] sm:$0xff] %v8371_v41  ;;  %4830 = vpow2.f32 %v11851_v24  ;;  %v11855_v16 = vld [vmem:[#allocation87_spill] sm:$0xff]  ;;  %v8395_v36 = vmul.f32 0.0, %v7619_v59  ;;  %v8401_v24 = vmul.f32 0.0, %v7655_v49  ;;  %v8403_v12 = vpop.eup %4814  ;;  %v11859_v1 = vld [vmem:[#allocation84_spill] sm:$0xff] }
 0x31f   : > { %11849 = vst [vmem:[#allocation36_spill] sm:$0xff] %v8374_v33  ;;  %11850 = vst [vmem:[#allocation38_spill] sm:$0xff] %v8377_v10  ;;  %4832 = vpow2.f32 %v11855_v16  ;;  %v8398_v10 = vmul.f32 0.0, %v7637_v42  ;;  %v8407_v28 = vmul.f32 0.0, %v7673_v61  ;;  %v8413_v16 = vmul.f32 0.0, %v7709_v7  ;;  %v8415_v59 = vpop.eup %4816  ;;  %v11863_v42 = vld [vmem:[#allocation86_spill] sm:$0xff] }
 0x320   : > { %11852 = vst [vmem:[#allocation40_spill] sm:$0xff] %v8383_v57  ;;  %11853 = vst [vmem:[#allocation41_spill] sm:$0xff] %v8386_v9  ;;  %4834 = vpow2.f32 %v11859_v1  ;;  %v8419_v49 = vmul.f32 0.0, %v7727_v0  ;;  %v8425_v1 = vmul.f32 0.0, %v7763_v5  ;;  %v8427_v61 = vpop.eup %4818  ;;  %v8431_v7 = vmul.f32 0.0, %v7781_v62 }
 0x321   : > { %11854 = vst [vmem:[#allocation73_spill] sm:$0xff] %v8389_v54  ;;  %11856 = vst [vmem:[#allocation42_spill] sm:$0xff] %v8395_v36  ;;  %v8410_v54 = vmul.f32 0.0, %v7691_v60  ;;  %4836 = vpow2.f32 %v11863_v42  ;;  %v11867_v60 = vld [vmem:[#allocation88_spill] sm:$0xff]  ;;  %v8437_v42 = vmul.f32 0.0, %v7817_v18  ;;  %v8439_v0 = vpop.eup %4820  ;;  %v8443_v5 = vmul.f32 0.0, %v7835_v22 }
 0x322   : > { %11857 = vst [vmem:[#allocation43_spill] sm:$0xff] %v8398_v10  ;;  %11858 = vst [vmem:[#allocation45_spill] sm:$0xff] %v8401_v24  ;;  %v8422_v24 = vmul.f32 0.0, %v7745_v45  ;;  %4838 = vpow2.f32 %v11867_v60  ;;  %v11871_v45 = vld [vmem:[#allocation89_spill] sm:$0xff]  ;;  %v8449_v60 = vmul.f32 0.0, %v7871_v21  ;;  %v8451_v62 = vpop.eup %4822  ;;  %v8455_v18 = vmul.f32 0.0, %v7889_v17 }
 0x323   : > { %11860 = vst [vmem:[#allocation74_spill] sm:$0xff] %v8407_v28  ;;  %11861 = vst [vmem:[#allocation47_spill] sm:$0xff] %v8410_v54  ;;  %v8434_v54 = vmul.f32 0.0, %v7799_v32  ;;  %4840 = vpow2.f32 %v11871_v45  ;;  %v11875_v32 = vld [vmem:[#allocation90_spill] sm:$0xff]  ;;  %v8461_v45 = vmul.f32 0.0, %v7925_v25  ;;  %v4825_v22 = vpop.eup %4824  ;;  %v8468_v21 = vmul.f32 0.0, %v7961_v46 }
 0x324   : > { %11862 = vst [vmem:[#allocation44_spill] sm:$0xff] %v8413_v16  ;;  %11864 = vst [vmem:[#allocation46_spill] sm:$0xff] %v8419_v49  ;;  %4842 = vpow2.f32 %v11875_v32  ;;  %v8471_v32 = vmul.f32 0.0, %v7979_v31  ;;  %v8478_v25 = vmul.f32 0.0, %v8015_v40  ;;  %v8485_v46 = vmul.f32 0.0, %v8051_v39 }
 0x325   : > { %11865 = vst [vmem:[#allocation48_spill] sm:$0xff] %v8422_v24  ;;  %11866 = vst [vmem:[#allocation49_spill] sm:$0xff] %v8425_v1  ;;  %v8446_v1 = vmul.f32 0.0, %v7853_v4  ;;  %v8465_v4 = vmul.f32 0.0, %v7943_v27  ;;  %v4827_v17 = vpop.eup %4826  ;;  %v8488_v31 = vmul.f32 0.0, %v8069_v55  ;;  %v8495_v40 = vmul.f32 0.0, %v8105_v34 }
 0x326   : > { %11868 = vst [vmem:[#allocation50_spill] sm:$0xff] %v8431_v7  ;;  %11869 = vst [vmem:[#allocation77_spill] sm:$0xff] %v8434_v54  ;;  %v8505_v55 = vmul.f32 0.0, %v8159_v20 }
 0x327   : > { %11870 = vst [vmem:[#allocation51_spill] sm:$0xff] %v8437_v42  ;;  %11872 = vst [vmem:[#allocation53_spill] sm:$0xff] %v8443_v5  ;;  %v8458_v42 = vmul.f32 0.0, %v7907_v48  ;;  %v11879_v5 = vld [vmem:[#allocation91_spill] sm:$0xff]  ;;  %v8475_v48 = vmul.f32 0.0, %v7997_v29  ;;  %v4829_v27 = vpop.eup %4828 }
 0x328   : > { %11873 = vst [vmem:[#allocation55_spill] sm:$0xff] %v8446_v1  ;;  %11874 = vst [vmem:[#allocation79_spill] sm:$0xff] %v8449_v60  ;;  %4844 = vpow2.f32 %v11879_v5  ;;  %v8481_v5 = vmul.f32 0.0, %v8033_v35  ;;  %v4831_v29 = vpop.eup %4830  ;;  %v8498_v35 = vmul.f32 0.0, %v8123_v14  ;;  %v8515_v14 = vmul.f32 0.0, %v8199_v53 }
 0x329   : > { %11876 = vst [vmem:[#allocation52_spill] sm:$0xff] %v8455_v18  ;;  %11877 = vst [vmem:[#allocation54_spill] sm:$0xff] %v8458_v42  ;;  %v11883_v18 = vld [vmem:[#allocation93_spill] sm:$0xff]  ;;  %v4833_v39 = vpop.eup %4832 }
 0x32a   : > { %11878 = vst [vmem:[#allocation56_spill] sm:$0xff] %v8461_v45  ;;  %11880 = vst [vmem:[#allocation57_spill] sm:$0xff] %v8465_v4  ;;  %4846 = vpow2.f32 %v11883_v18  ;;  %v11887_v4 = vld [vmem:[#allocation95_spill] sm:$0xff]  ;;  %v8491_v18 = vmul.f32 0.0, %v8087_v38  ;;  %v8508_v38 = vmul.f32 0.0, %v8175_v6  ;;  %v4835_v34 = vpop.eup %4834  ;;  %v8525_v6 = vmul.f32 0.0, %v8235_v8 }
 0x32b   : > { %11881 = vst [vmem:[#allocation58_spill] sm:$0xff] %v8468_v21  ;;  %11882 = vst [vmem:[#allocation59_spill] sm:$0xff] %v8471_v32  ;;  %4848 = vpow2.f32 %v11887_v4  ;;  %v11891_v32 = vld [vmem:[#allocation92_spill] sm:$0xff]  ;;  %v8501_v4 = vmul.f32 0.0, %v8141_v44  ;;  %v8518_v44 = vmul.f32 0.0, %v8211_v3  ;;  %v4837_v20 = vpop.eup %4836  ;;  %v8535_v3 = vmul.f32 0.0, %v8271_v13 }
 0x32c   : > { %11884 = vst [vmem:[#allocation78_spill] sm:$0xff] %v8475_v48  ;;  %11885 = vst [vmem:[#allocation61_spill] sm:$0xff] %v8478_v25  ;;  %4850 = vpow2.f32 %v11891_v32  ;;  %v8511_v32 = vmul.f32 0.0, %v8187_v56  ;;  %v8528_v56 = vmul.f32 0.0, %v8247_v15  ;;  %v4839_v53 = vpop.eup %4838  ;;  %v8545_v15 = vmul.f32 0.0, %v8307_v52 }
 0x32d   : > { %11886 = vst [vmem:[#allocation63_spill] sm:$0xff] %v8481_v5  ;;  %11888 = vst [vmem:[#allocation60_spill] sm:$0xff] %v8485_v46  ;;  %v11895_v46 = vld [vmem:[#allocation94_spill] sm:$0xff]  ;;  %v4841_v8 = vpop.eup %4840 }
 0x32e   : > { %11889 = vst [vmem:[#allocation80_spill] sm:$0xff] %v8488_v31  ;;  %11890 = vst [vmem:[#allocation62_spill] sm:$0xff] %v8491_v18  ;;  %4852 = vpow2.f32 %v11895_v46  ;;  %v8521_v46 = vmul.f32 0.0, %v8223_v51  ;;  %v8538_v51 = vmul.f32 0.0, %v8283_v26  ;;  %v4843_v13 = vpop.eup %4842  ;;  %v11917_v26 = vld [vmem:[#allocation32_spill] sm:$0xff] }
 0x32f   : > { %11892 = vst [vmem:[#allocation64_spill] sm:$0xff] %v8495_v40  ;;  %11893 = vst [vmem:[#allocation65_spill] sm:$0xff] %v8498_v35  ;;  %v11899_v40 = vld [vmem:[#allocation96_spill] sm:$0xff] }
 0x330   : > { %11894 = vst [vmem:[#allocation66_spill] sm:$0xff] %v8501_v4  ;;  %11896 = vst [vmem:[#allocation71_spill] sm:$0xff] %v8505_v55  ;;  %4854 = vpow2.f32 %v11899_v40  ;;  %v11903_v55 = vld [vmem:[#allocation97_spill] sm:$0xff]  ;;  %v8531_v40 = vmul.f32 0.0, %v8259_v50  ;;  %v11913_v50 = vld [vmem:[#allocation26_spill] sm:$0xff] }
 0x331   : > { %11897 = vst [vmem:[#allocation72_spill] sm:$0xff] %v8508_v38  ;;  %11898 = vst [vmem:[#allocation82_spill] sm:$0xff] %v8511_v32  ;;  %4856 = vpow2.f32 %v11903_v55  ;;  %v11907_v32 = vld [vmem:[#allocation98_spill] sm:$0xff]  ;;  %v8541_v55 = vmul.f32 0.0, %v8295_v23  ;;  %v8558_v23 = vmul.f32 0.0, %v8355_v63  ;;  %v8575_v63 = vmul.f32 0.0, %v8415_v59 }
 0x332   : > { %11900 = vst [vmem:[#allocation75_spill] sm:$0xff] %v8515_v14  ;;  %11901 = vst [vmem:[#allocation76_spill] sm:$0xff] %v8518_v44  ;;  %4858 = vpow2.f32 %v11907_v32  ;;  %v8551_v32 = vmul.f32 0.0, %v8331_v11  ;;  %v4845_v52 = vpop.eup %4844  ;;  %v8568_v11 = vmul.f32 0.0, %v8391_v58  ;;  %v8585_v58 = vmul.f32 0.0, %v8451_v62 }
 0x333   : > { %11902 = vst [vmem:[#allocation81_spill] sm:$0xff] %v8521_v46  ;;  %11904 = vst [vmem:[#allocation83_spill] sm:$0xff] %v8525_v6  ;;  %v11911_v6 = vld [vmem:[#allocation99_spill] sm:$0xff]  ;;  %v8592_v59 = vmul.f32 0.0, %v4829_v27  ;;  %v8601_v62 = vmul.f32 0.0, %v4837_v20  ;;  %v8608_v27 = vmul.f32 0.0, %v4843_v13 }
 0x334   : > { %11905 = vst [vmem:[#allocation85_spill] sm:$0xff] %v8528_v56  ;;  %11906 = vst [vmem:[#allocation87_spill] sm:$0xff] %v8531_v40  ;;  %4860 = vpow2.f32 %v11911_v6  ;;  %v8548_v40 = vmul.f32 0.0, %v11913_v50  ;;  %v8561_v6 = vmul.f32 0.0, %v8367_v19  ;;  %v8565_v50 = vmul.f32 0.0, %v8379_v30  ;;  %v11949_v20 = vld [vmem:[#allocation18_spill] sm:$0xff] }
 0x335   : > { %11908 = vst [vmem:[#allocation84_spill] sm:$0xff] %v8535_v3  ;;  %11909 = vst [vmem:[#allocation86_spill] sm:$0xff] %v8538_v51  ;;  %v11916_v3 = vld [vmem:[#allocation101_spill] sm:$0xff]  ;;  %v8555_v51 = vmul.f32 0.0, %v11917_v26  ;;  %v4847_v26 = vpop.eup %4846  ;;  %v8578_v19 = vmul.f32 0.0, %v8427_v61  ;;  %v8594_v61 = vmul.f32 0.0, %v4831_v29 }
 0x336   : > { %11910 = vst [vmem:[#allocation88_spill] sm:$0xff] %v8541_v55  ;;  %11912 = vst [vmem:[#allocation89_spill] sm:$0xff] %v8545_v15  ;;  %4862 = vpow2.f32 %v11916_v3  ;;  %v11921_v15 = vld [vmem:[#allocation103_spill] sm:$0xff]  ;;  %v8571_v3 = vmul.f32 0.0, %v8403_v12  ;;  %v4849_v30 = vpop.eup %4848  ;;  %v8587_v12 = vmul.f32 0.0, %v4825_v22  ;;  %v8603_v22 = vmul.f32 0.0, %v4839_v53 }
 0x337   : > { %11914 = vst [vmem:[#allocation90_spill] sm:$0xff] %v8548_v40  ;;  %11915 = vst [vmem:[#allocation91_spill] sm:$0xff] %v8551_v32  ;;  %4864 = vpow2.f32 %v11921_v15  ;;  %v11925_v32 = vld [vmem:[#allocation100_spill] sm:$0xff]  ;;  %v8581_v15 = vmul.f32 0.0, %v8439_v0  ;;  %v11944_v29 = vld [vmem:[#allocation15_spill] sm:$0xff] }
 0x338   : > { %11918 = vst [vmem:[#allocation93_spill] sm:$0xff] %v8555_v51  ;;  %11919 = vst [vmem:[#allocation95_spill] sm:$0xff] %v8558_v23  ;;  %4866 = vpow2.f32 %v11925_v32  ;;  %v4851_v32 = vpop.eup %4850  ;;  %v11950_v53 = vld [vmem:[#allocation14_spill] sm:$0xff]  ;;  %v11954_v13 = vld [vmem:[#allocation23_spill] sm:$0xff] }
 0x339   : > { %11920 = vst [vmem:[#allocation92_spill] sm:$0xff] %v8561_v6  ;;  %11922 = vst [vmem:[#allocation94_spill] sm:$0xff] %v8565_v50  ;;  %v11929_v50 = vld [vmem:[#allocation102_spill] sm:$0xff]  ;;  %v4853_v0 = vpop.eup %4852  ;;  %v11972_v6 = vld [vmem:[#allocation239_spill] sm:$0xff] }
 0x33a   : > { %11923 = vst [vmem:[#allocation96_spill] sm:$0xff] %v8568_v11  ;;  %11924 = vst [vmem:[#allocation97_spill] sm:$0xff] %v8571_v3  ;;  %4868 = vpow2.f32 %v11929_v50  ;;  %v8589_v3 = vmul.f32 0.0, %v4827_v17  ;;  %v11933_v11 = vld [vmem:[#allocation104_spill] sm:$0xff]  ;;  %v8599_v50 = vmul.f32 0.0, %v4835_v34  ;;  %v4855_v17 = vpop.eup %4854 }
 0x33b   : > { %11926 = vst [vmem:[#allocation98_spill] sm:$0xff] %v8575_v63  ;;  %11927 = vst [vmem:[#allocation99_spill] sm:$0xff] %v8578_v19  ;;  %4870 = vpow2.f32 %v11933_v11  ;;  %v8596_v19 = vmul.f32 0.0, %v4833_v39  ;;  %v11945_v11 = vld [vmem:[#allocation17_spill] sm:$0xff]  ;;  %v11948_v34 = vld [vmem:[#allocation12_spill] sm:$0xff] }
 0x33c   : > { %11928 = vst [vmem:[#allocation26_spill] sm:$0xff] %v8581_v15  ;;  %11930 = vst [vmem:[#allocation101_spill] sm:$0xff] %v8585_v58  ;;  %v11937_v15 = vld [vmem:[#allocation105_spill] sm:$0xff]  ;;  %v3192_v39 = vadd.f32 %v11945_v11, %v11944_v29 }
 0x33d   : > { %11931 = vst [vmem:[#allocation32_spill] sm:$0xff] %v8587_v12  ;;  %11932 = vst [vmem:[#allocation103_spill] sm:$0xff] %v8589_v3  ;;  %4872 = vpow2.f32 %v11937_v15  ;;  %v11941_v3 = vld [vmem:[#allocation106_spill] sm:$0xff]  ;;  %v8606_v12 = vmul.f32 0.0, %v4841_v8  ;;  %v8614_v15 = vmul.f32 0.0, %v4847_v26  ;;  %v8621_v8 = vmul.f32 0.0, %v4849_v30 }
 0x33e   : > { %11934 = vst [vmem:[#allocation100_spill] sm:$0xff] %v8592_v59  ;;  %11935 = vst [vmem:[#allocation102_spill] sm:$0xff] %v8594_v61  ;;  %4874 = vpow2.f32 %v11941_v3  ;;  %v8612_v61 = vmul.f32 0.0, %v4845_v52  ;;  %v11952_v3 = vld [vmem:[#allocation107_spill] sm:$0xff]  ;;  %v11956_v11 = vld [vmem:[#allocation21_spill] sm:$0xff]  ;;  %v8627_v26 = vmul.f32 0.0, %v4851_v32 }
 0x33f   : > { %11936 = vst [vmem:[#allocation104_spill] sm:$0xff] %v8596_v19  ;;  %11938 = vst [vmem:[#allocation105_spill] sm:$0xff] %v8599_v50  ;;  %v4857_v19 = vpop.eup %4856  ;;  %v3261_v50 = vadd.f32 %v11949_v20, %v11948_v34  ;;  %4876 = vpow2.f32 %v11952_v3  ;;  %v11960_v34 = vld [vmem:[#allocation230_spill] sm:$0xff]  ;;  %v8632_v3 = vmul.f32 0.0, %v4853_v0  ;;  %v11967_v32 = vld [vmem:[#allocation233_spill] sm:$0xff] }
 0x340   : > { %11939 = vst [vmem:[#allocation255_spill] sm:$0xff] %v8601_v62  ;;  %11940 = vst [vmem:[#allocation256_spill] sm:$0xff] %v8603_v22  ;;  %v11951_v22 = vld [vmem:[#allocation19_spill] sm:$0xff]  ;;  %v4859_v59 = vpop.eup %4858  ;;  %v3190_v30 = vld [vmem:[#allocation3] sm:$0xf] }
 0x341   : > { %11942 = vst [vmem:[#allocation106_spill] sm:$0xff] %v8606_v12  ;;  %11943 = vst [vmem:[#allocation257_spill] sm:$0xff] %v8608_v27  ;;  %v3330_v62 = vadd.f32 %v11951_v22, %v11950_v53  ;;  %v3193_v27 = vadd.f32 %v11954_v13, %v3192_v39  ;;  %v11955_v12 = vld [vmem:[#allocation16_spill] sm:$0xff]  ;;  %v4861_v52 = vpop.eup %4860  ;;  %v11961_v53 = vld [vmem:[#allocation111_spill] sm:$0xff] }
 0x342   : > { %11946 = vst [vmem:[#allocation258_spill] sm:$0xff] %v8612_v61  ;;  %11947 = vst [vmem:[#allocation259_spill] sm:$0xff] %v8614_v15  ;;  %v3399_v29 = vadd.f32 %v11956_v11, %v11955_v12  ;;  %v11957_v61 = vld [vmem:[#allocation109_spill] sm:$0xff]  ;;  %v11959_v15 = vld [vmem:[#allocation227_spill] sm:$0xff]  ;;  %v4863_v22 = vpop.eup %4862 }
 0x343   : > { %11953 = vst [vmem:[#allocation107_spill] sm:$0xff] %v8621_v8  ;;  %4878 = vpow2.f32 %v11957_v61  ;;  %11958 = vst [vmem:[#allocation109_spill] sm:$0xff] %v8627_v26  ;;  %v3262_v20 = vadd.f32 %v11959_v15, %v3261_v50  ;;  %v3331_v58 = vadd.f32 %v11960_v34, %v3330_v62  ;;  %v11963_v8 = vld [vmem:[#allocation231_spill] sm:$0xff]  ;;  %v11964_v13 = vld [vmem:[#allocation232_spill] sm:$0xff]  ;;  %v4865_v11 = vpop.eup %4864  ;;  %v8637_v61 = vmul.f32 0.0, %v4855_v17 }
 0x344   : > { %4880 = vpow2.f32 %v11961_v53  ;;  %11962 = vst [vmem:[#allocation111_spill] sm:$0xff] %v8632_v3  ;;  %v3194_v39 = vadd.f32 %v11963_v8, %v3193_v27  ;;  %v3400_v63 = vadd.f32 %v11964_v13, %v3399_v29  ;;  %v11965_v12 = vld [vmem:[#allocation108_spill] sm:$0xff]  ;;  %v11968_v50 = vld [vmem:[#allocation238_spill] sm:$0xff]  ;;  %v4867_v62 = vpop.eup %4866  ;;  %v8642_v53 = vmul.f32 0.0, %v4857_v19  ;;  %v11974_v13 = vld [vmem:[#allocation13_spill] sm:$0xff] }
 0x345   : > { %4882 = vpow2.f32 %v11965_v12  ;;  %11966 = vst [vmem:[#allocation108_spill] sm:$0xff] %v8637_v61  ;;  %v3263_v26 = vadd.f32 %v11967_v32, %v3262_v20  ;;  %v3332_v15 = vadd.f32 %v11968_v50, %v3331_v58  ;;  %v11969_v34 = vld [vmem:[#allocation110_spill] sm:$0xff]  ;;  %v11971_v0 = vld [vmem:[#allocation240_spill] sm:$0xff]  ;;  %v4869_v8 = vpop.eup %4868  ;;  %v8648_v12 = vmul.f32 %v11974_v13, %v3190_v30  ;;  %v11976_v17 = vld [vmem:[#allocation241_spill] sm:$0xff] }
 0x346   : > { %4884 = vpow2.f32 %v11969_v34  ;;  %11970 = vst [vmem:[#allocation110_spill] sm:$0xff] %v8642_v53  ;;  %v3195_v3 = vadd.f32 %v11971_v0, %v3194_v39  ;;  %v3401_v27 = vadd.f32 %v11972_v6, %v3400_v63  ;;  %v11973_v29 = vld [vmem:[#allocation112_spill] sm:$0xff]  ;;  %v11977_v20 = vld [vmem:[#allocation242_spill] sm:$0xff]  ;;  %v4871_v58 = vpop.eup %4870  ;;  %v11978_v50 = vld [vmem:[#allocation113_spill] sm:$0xff]  ;;  %v8653_v34 = vmul.f32 0.0, %v4859_v59 }
 0x347   : > { %4886 = vpow2.f32 %v11973_v29  ;;  %11975 = vst [vmem:[#allocation112_spill] sm:$0xff] %v8648_v12  ;;  %v3264_v61 = vadd.f32 %v11976_v17, %v3263_v26  ;;  %v3333_v32 = vadd.f32 %v11977_v20, %v3332_v15  ;;  %v11980_v19 = vld [vmem:[#allocation244_spill] sm:$0xff]  ;;  %v11981_v39 = vld [vmem:[#allocation243_spill] sm:$0xff]  ;;  %v4873_v63 = vpop.eup %4872  ;;  %v11982_v6 = vld [vmem:[#allocation114_spill] sm:$0xff]  ;;  %v8658_v29 = vmul.f32 0.0, %v4861_v52 }
 0x348   : > { %4888 = vpow2.f32 %v11978_v50  ;;  %11979 = vst [vmem:[#allocation113_spill] sm:$0xff] %v8653_v34  ;;  %v3196_v53 = vadd.f32 %v11980_v19, %v3195_v3  ;;  %v3402_v0 = vadd.f32 %v11981_v39, %v3401_v27  ;;  %v11984_v30 = vld [vmem:[#allocation245_spill] sm:$0xff]  ;;  %v11985_v12 = vld [vmem:[#allocation246_spill] sm:$0xff]  ;;  %v4875_v17 = vpop.eup %4874  ;;  %v11986_v15 = vld [vmem:[#allocation115_spill] sm:$0xff]  ;;  %v8663_v20 = vmul.f32 0.0, %v4863_v22 }
 0x349   : > { %4890 = vpow2.f32 %v11982_v6  ;;  %11983 = vst [vmem:[#allocation114_spill] sm:$0xff] %v8658_v29  ;;  %v3265_v13 = vadd.f32 %v11984_v30, %v3264_v61  ;;  %v3334_v26 = vadd.f32 %v11985_v12, %v3333_v32  ;;  %v11988_v59 = vld [vmem:[#allocation248_spill] sm:$0xff]  ;;  %v11989_v34 = vld [vmem:[#allocation247_spill] sm:$0xff]  ;;  %v11990_v19 = vld [vmem:[#allocation117_spill] sm:$0xff]  ;;  %v8668_v27 = vmul.f32 0.0, %v4865_v11  ;;  %v4877_v61 = vpop.eup %4876 }
 0x34a   : > { %4892 = vpow2.f32 %v11986_v15  ;;  %11987 = vst [vmem:[#allocation115_spill] sm:$0xff] %v8663_v20  ;;  %v3197_v50 = vadd.f32 %v11988_v59, %v3196_v53  ;;  %v3403_v3 = vadd.f32 %v11989_v34, %v3402_v0  ;;  %v11992_v6 = vld [vmem:[#allocation249_spill] sm:$0xff]  ;;  %v11993_v39 = vld [vmem:[#allocation250_spill] sm:$0xff]  ;;  %v11994_v30 = vld [vmem:[#allocation119_spill] sm:$0xff]  ;;  %v8673_v32 = vmul.f32 0.0, %v4867_v62 }
 0x34b   : > { %4894 = vpow2.f32 %v11990_v19  ;;  %11991 = vst [vmem:[#allocation117_spill] sm:$0xff] %v8668_v27  ;;  %v3266_v52 = vadd.f32 %v11992_v6, %v3265_v13  ;;  %v3335_v29 = vadd.f32 %v11993_v39, %v3334_v26  ;;  %v11996_v15 = vld [vmem:[#allocation252_spill] sm:$0xff]  ;;  %v11997_v12 = vld [vmem:[#allocation251_spill] sm:$0xff]  ;;  %v8678_v0 = vmul.f32 0.0, %v4869_v8  ;;  %v12000_v11 = vld [vmem:[#allocation253_spill] sm:$0xff] }
 0x34c   : > { %4896 = vpow2.f32 %v11994_v30  ;;  %11995 = vst [vmem:[#allocation119_spill] sm:$0xff] %v8673_v32  ;;  %v3198_v22 = vadd.f32 %v11996_v15, %v3197_v50  ;;  %v3404_v20 = vadd.f32 %v11997_v12, %v3403_v3  ;;  %v11998_v59 = vld [vmem:[#allocation116_spill] sm:$0xff]  ;;  %v12001_v34 = vld [vmem:[#allocation254_spill] sm:$0xff]  ;;  %v8683_v39 = vmul.f32 0.0, %v4871_v58  ;;  %v12006_v3 = vld [vmem:[#allocation121_spill] sm:$0xff] }
 0x34d   : > { %v4879_v53 = vpop.eup %4878  ;;  %4898 = vpow2.f32 %v11998_v59  ;;  %11999 = vst [vmem:[#allocation116_spill] sm:$0xff] %v8678_v0  ;;  %v3267_v19 = vadd.f32 %v12000_v11, %v3266_v52  ;;  %v3336_v13 = vadd.f32 %v12001_v34, %v3335_v29  ;;  %v12002_v26 = vld [vmem:[#allocation118_spill] sm:$0xff]  ;;  %v12004_v62 = vld [vmem:[#allocation196_spill] sm:$0xff]  ;;  %v8688_v12 = vmul.f32 0.0, %v4873_v63  ;;  %v12012_v58 = vld [vmem:[#allocation199_spill] sm:$0xff] }
 0x34e   : > { %v4881_v6 = vpop.eup %4880  ;;  %4900 = vpow2.f32 %v12002_v26  ;;  %12003 = vst [vmem:[#allocation118_spill] sm:$0xff] %v8683_v39  ;;  %v3199_v30 = vadd.f32 %v3198_v22, %v12004_v62  ;;  %v12005_v32 = vld [vmem:[#allocation20_spill] sm:$0xff]  ;;  %v12008_v8 = vld [vmem:[#allocation198_spill] sm:$0xff]  ;;  %v8693_v34 = vmul.f32 0.0, %v4875_v17  ;;  %v12013_v39 = vld [vmem:[#allocation197_spill] sm:$0xff] }
 0x34f   : > { %v3405_v50 = vadd.f32 %v12005_v32, %v3404_v20  ;;  %v4883_v15 = vpop.eup %4882  ;;  %4902 = vpow2.f32 %v12006_v3  ;;  %12007 = vst [vmem:[#allocation121_spill] sm:$0xff] %v8688_v12  ;;  %v3268_v59 = vadd.f32 %v3267_v19, %v12008_v8  ;;  %v12009_v0 = vld [vmem:[#allocation200_spill] sm:$0xff]  ;;  %v12010_v29 = vld [vmem:[#allocation122_spill] sm:$0xff]  ;;  %v12014_v20 = vld [vmem:[#allocation123_spill] sm:$0xff]  ;;  %v8698_v32 = vmul.f32 0.0, %v4877_v61 }
 0x350   : > { %v3337_v52 = vadd.f32 %v3336_v13, %v12009_v0  ;;  %v4885_v11 = vpop.eup %4884  ;;  %4904 = vpow2.f32 %v12010_v29  ;;  %12011 = vst [vmem:[#allocation122_spill] sm:$0xff] %v8693_v34  ;;  %v3200_v26 = vadd.f32 %v3199_v30, %v12012_v58  ;;  %v12016_v63 = vld [vmem:[#allocation201_spill] sm:$0xff]  ;;  %v12017_v12 = vld [vmem:[#allocation202_spill] sm:$0xff]  ;;  %v12018_v13 = vld [vmem:[#allocation124_spill] sm:$0xff]  ;;  %v8703_v0 = vmul.f32 0.0, %v4879_v53 }
 0x351   : > { %v3406_v22 = vadd.f32 %v3405_v50, %v12013_v39  ;;  %v4887_v62 = vpop.eup %4886  ;;  %4906 = vpow2.f32 %v12014_v20  ;;  %12015 = vst [vmem:[#allocation123_spill] sm:$0xff] %v8698_v32  ;;  %v3269_v3 = vadd.f32 %v3268_v59, %v12016_v63  ;;  %v12020_v17 = vld [vmem:[#allocation204_spill] sm:$0xff]  ;;  %v12021_v34 = vld [vmem:[#allocation203_spill] sm:$0xff]  ;;  %v12022_v50 = vld [vmem:[#allocation126_spill] sm:$0xff]  ;;  %v8708_v39 = vmul.f32 0.0, %v4881_v6 }
 0x352   : > { %v3338_v19 = vadd.f32 %v3337_v52, %v12017_v12  ;;  %v4889_v8 = vpop.eup %4888  ;;  %4908 = vpow2.f32 %v12018_v13  ;;  %12019 = vst [vmem:[#allocation124_spill] sm:$0xff] %v8703_v0  ;;  %v3201_v29 = vadd.f32 %v3200_v26, %v12020_v17  ;;  %v12024_v61 = vld [vmem:[#allocation206_spill] sm:$0xff]  ;;  %v12025_v32 = vld [vmem:[#allocation208_spill] sm:$0xff]  ;;  %v8713_v12 = vmul.f32 0.0, %v4883_v15  ;;  %v12028_v53 = vld [vmem:[#allocation207_spill] sm:$0xff] }
 0x353   : > { %v3407_v30 = vadd.f32 %v3406_v22, %v12021_v34  ;;  %v4891_v58 = vpop.eup %4890  ;;  %4910 = vpow2.f32 %v12022_v50  ;;  %12023 = vst [vmem:[#allocation126_spill] sm:$0xff] %v8708_v39  ;;  %v3270_v20 = vadd.f32 %v3269_v3, %v12024_v61  ;;  %v12026_v52 = vld [vmem:[#allocation128_spill] sm:$0xff]  ;;  %v12029_v0 = vld [vmem:[#allocation205_spill] sm:$0xff]  ;;  %v8718_v34 = vmul.f32 0.0, %v4885_v11  ;;  %v12033_v39 = vld [vmem:[#allocation210_spill] sm:$0xff] }
 0x354   : > { %v3339_v59 = vadd.f32 %v3338_v19, %v12025_v32  ;;  %v4893_v63 = vpop.eup %4892  ;;  %4912 = vpow2.f32 %v12026_v52  ;;  %12027 = vst [vmem:[#allocation128_spill] sm:$0xff] %v8713_v12  ;;  %v3202_v13 = vadd.f32 %v3201_v29, %v12028_v53  ;;  %v12030_v22 = vld [vmem:[#allocation125_spill] sm:$0xff]  ;;  %v12034_v19 = vld [vmem:[#allocation127_spill] sm:$0xff]  ;;  %v8723_v32 = vmul.f32 0.0, %v4887_v62  ;;  %v12036_v15 = vld [vmem:[#allocation212_spill] sm:$0xff] }
 0x355   : > { %v3408_v26 = vadd.f32 %v3407_v30, %v12029_v0  ;;  %v4895_v17 = vpop.eup %4894  ;;  %4914 = vpow2.f32 %v12030_v22  ;;  %12031 = vst [vmem:[#allocation125_spill] sm:$0xff] %v8718_v34  ;;  %v12032_v6 = vld [vmem:[#allocation209_spill] sm:$0xff]  ;;  %v12037_v12 = vld [vmem:[#allocation211_spill] sm:$0xff]  ;;  %v8728_v22 = vmul.f32 0.0, %v4889_v8  ;;  %v12040_v11 = vld [vmem:[#allocation214_spill] sm:$0xff]  ;;  %v8733_v62 = vmul.f32 0.0, %v4891_v58 }
 0x356   : > { %v3271_v50 = vadd.f32 %v3270_v20, %v12032_v6  ;;  %v3340_v3 = vadd.f32 %v3339_v59, %v12033_v39  ;;  %v4897_v61 = vpop.eup %4896  ;;  %4916 = vpow2.f32 %v12034_v19  ;;  %12035 = vst [vmem:[#allocation127_spill] sm:$0xff] %v8723_v32  ;;  %v3203_v52 = vadd.f32 %v3202_v13, %v12036_v15  ;;  %v12038_v53 = vld [vmem:[#allocation129_spill] sm:$0xff]  ;;  %v12041_v20 = vld [vmem:[#allocation216_spill] sm:$0xff]  ;;  %v12042_v39 = vld [vmem:[#allocation130_spill] sm:$0xff] }
 0x357   : > { %v3409_v29 = vadd.f32 %v3408_v26, %v12037_v12  ;;  %v4899_v30 = vpop.eup %4898  ;;  %4918 = vpow2.f32 %v12038_v53  ;;  %12039 = vst [vmem:[#allocation129_spill] sm:$0xff] %v8728_v22  ;;  %12043 = vst [vmem:[#allocation130_spill] sm:$0xff] %v8733_v62  ;;  %v12044_v19 = vld [vmem:[#allocation215_spill] sm:$0xff]  ;;  %v12045_v15 = vld [vmem:[#allocation213_spill] sm:$0xff]  ;;  %v8738_v53 = vmul.f32 0.0, %v4893_v63  ;;  %v8756_v63 = vmul.f32 0.0, %v4897_v61 }
 0x358   : > { %v3272_v0 = vadd.f32 %v3271_v50, %v12040_v11  ;;  %v3341_v6 = vadd.f32 %v3340_v3, %v12041_v20  ;;  %v4901_v59 = vpop.eup %4900  ;;  %4920 = vpow2.f32 %v12042_v39  ;;  %v3204_v13 = vadd.f32 %v3203_v52, %v12044_v19  ;;  %v12046_v32 = vld [vmem:[#allocation131_spill] sm:$0xff]  ;;  %v12048_v8 = vld [vmem:[#allocation217_spill] sm:$0xff]  ;;  %v12049_v50 = vld [vmem:[#allocation218_spill] sm:$0xff] }
 0x359   : > { %v3410_v26 = vadd.f32 %v3409_v29, %v12045_v15  ;;  %v4903_v12 = vpop.eup %4902  ;;  %4922 = vpow2.f32 %v12046_v32  ;;  %12047 = vst [vmem:[#allocation131_spill] sm:$0xff] %v8738_v53  ;;  %v12050_v20 = vld [vmem:[#allocation132_spill] sm:$0xff]  ;;  %v8744_v39 = vmul.f32 0.0, %v4895_v17  ;;  %v12053_v52 = vld [vmem:[#allocation219_spill] sm:$0xff]  ;;  %v12061_v15 = vld [vmem:[#allocation221_spill] sm:$0xff] }
 0x35a   : > { %v3273_v22 = vadd.f32 %v3272_v0, %v12048_v8  ;;  %v3342_v11 = vadd.f32 %v3341_v6, %v12049_v50  ;;  %v4905_v3 = vpop.eup %4904  ;;  %4924 = vpow2.f32 %v12050_v20  ;;  %v12052_v58 = vld [vmem:[#allocation220_spill] sm:$0xff]  ;;  %v12054_v0 = vld [vmem:[#allocation134_spill] sm:$0xff]  ;;  %v12062_v34 = vld [vmem:[#allocation133_spill] sm:$0xff] }
 0x35b   : > { %12051 = vst [vmem:[#allocation132_spill] sm:$0xff] %v8744_v39  ;;  %v3205_v62 = vadd.f32 %v3204_v13, %v12052_v58  ;;  %v3411_v19 = vadd.f32 %v3410_v26, %v12053_v52  ;;  %v4907_v32 = vpop.eup %4906  ;;  %4926 = vpow2.f32 %v12054_v0  ;;  %12055 = vst [vmem:[#allocation134_spill] sm:$0xff] %v8756_v63  ;;  %v12056_v6 = vld [vmem:[#allocation222_spill] sm:$0xff]  ;;  %v12057_v17 = vld [vmem:[#allocation224_spill] sm:$0xff]  ;;  %v8761_v26 = vmul.f32 0.0, %v4899_v30 }
 0x35c   : > { %v3274_v29 = vadd.f32 %v3273_v22, %v12056_v6  ;;  %v3343_v20 = vadd.f32 %v3342_v11, %v12057_v17  ;;  %v4909_v50 = vpop.eup %4908  ;;  %v12058_v13 = vld [vmem:[#allocation136_spill] sm:$0xff]  ;;  %v12060_v58 = vld [vmem:[#allocation223_spill] sm:$0xff]  ;;  %v8767_v0 = vmul.f32 0.0, %v4901_v59  ;;  %v12064_v61 = vld [vmem:[#allocation225_spill] sm:$0xff] }
 0x35d   : > { %4928 = vpow2.f32 %v12058_v13  ;;  %12059 = vst [vmem:[#allocation136_spill] sm:$0xff] %v8761_v26  ;;  %v3206_v52 = vadd.f32 %v3205_v62, %v12060_v58  ;;  %v3412_v8 = vadd.f32 %v3411_v19, %v12061_v15  ;;  %v4529_v39 = vld [vmem:[%s8753_s16 + $0x4] ss:$16 sps:$4 sm:$0xff]   ;;  %v4911_v53 = vpop.eup %4910  ;;  %v12066_v17 = vld [vmem:[#allocation135_spill] sm:$0xff]  ;;  %v8772_v13 = vmul.f32 0.0, %v4903_v12  ;;  %v12068_v30 = vld [vmem:[#allocation229_spill] sm:$0xff] }
 0x35e   : > { %4930 = vpow2.f32 %v12062_v34  ;;  %12063 = vst [vmem:[#allocation133_spill] sm:$0xff] %v8767_v0  ;;  %v3275_v63 = vadd.f32 %v3274_v29, %v12064_v61  ;;  %v12065_v22 = vld [vmem:[#allocation226_spill] sm:$0xff]  ;;  %v4913_v11 = vpop.eup %4912  ;;  %v12069_v62 = vld [vmem:[#allocation228_spill] sm:$0xff]  ;;  %3724 = vmatprep.mubr.bf16.mxu0 %v4529_v39  ;;  %3810 = vmatprep.mubr.bf16.mxu1 %v4529_v39  ;;  %v12070_v15 = vld [vmem:[#allocation137_spill] sm:$0xff]  ;;  %v8777_v34 = vmul.f32 0.0, %v4905_v3  ;;  %v8782_v12 = vmul.f32 0.0, %v4907_v32 }
 0x35f   : > { %v3344_v6 = vadd.f32 %v3343_v20, %v12065_v22  ;;  %4932 = vpow2.f32 %v12066_v17  ;;  %12067 = vst [vmem:[#allocation135_spill] sm:$0xff] %v8772_v13  ;;  %v3207_v26 = vadd.f32 %v3206_v52, %v12068_v30  ;;  %v3413_v58 = vadd.f32 %v3412_v8, %v12069_v62  ;;  %v4915_v19 = vpop.eup %4914  ;;  %v12072_v59 = vld [vmem:[#allocation22_spill] sm:$0xff]  ;;  %v12073_v61 = vld [vmem:[#allocation67_spill] sm:$0xff]  ;;  %v12076_v17 = vld [vmem:[#allocation25_spill] sm:$0xff] }
 0x360   : > { %4934 = vpow2.f32 %v12070_v15  ;;  %12071 = vst [vmem:[#allocation137_spill] sm:$0xff] %v8777_v34  ;;  %v3276_v29 = vadd.f32 %v3275_v63, %v12072_v59  ;;  %v4917_v22 = vpop.eup %4916  ;;  %v12074_v0 = vld [vmem:[#allocation138_spill] sm:$0xff]  ;;  %v12077_v30 = vld [vmem:[#allocation24_spill] sm:$0xff]  ;;  %v12078_v39 = vld [vmem:[#allocation139_spill] sm:$0xff]  ;;  %v8787_v13 = vmul.f32 0.0, %v4909_v50 }
 0x361   : > { %v3345_v20 = vadd.f32 %v3344_v6, %v12073_v61  ;;  %4936 = vpow2.f32 %v12074_v0  ;;  %12075 = vst [vmem:[#allocation138_spill] sm:$0xff] %v8782_v12  ;;  %v3208_v52 = vadd.f32 %v3207_v26, %v12076_v17  ;;  %v3414_v8 = vadd.f32 %v3413_v58, %v12077_v30  ;;  %v4919_v62 = vpop.eup %4918  ;;  %v12080_v15 = vld [vmem:[#allocation69_spill] sm:$0xff]  ;;  %v12081_v34 = vld [vmem:[#allocation27_spill] sm:$0xff]  ;;  %v12082_v6 = vld [vmem:[#allocation140_spill] sm:$0xff] }
 0x362   : > { %4938 = vpow2.f32 %v12078_v39  ;;  %12079 = vst [vmem:[#allocation139_spill] sm:$0xff] %v8787_v13  ;;  %v3277_v3 = vadd.f32 %v3276_v29, %v12080_v15  ;;  %v4921_v59 = vpop.eup %4920  ;;  %v8792_v61 = vmul.f32 0.0, %v4911_v53  ;;  %v12084_v32 = vld [vmem:[#allocation31_spill] sm:$0xff]  ;;  %v12085_v12 = vld [vmem:[#allocation29_spill] sm:$0xff]  ;;  %v12086_v58 = vld [vmem:[#allocation142_spill] sm:$0xff]  ;;  %v8797_v30 = vmul.f32 0.0, %v4913_v11 }
 0x363   : > { %v3346_v63 = vadd.f32 %v3345_v20, %v12081_v34  ;;  %4940 = vpow2.f32 %v12082_v6  ;;  %v3209_v0 = vadd.f32 %v3208_v52, %v12084_v32  ;;  %v3415_v26 = vadd.f32 %v3414_v8, %v12085_v12  ;;  %v4923_v17 = vpop.eup %4922  ;;  %v12088_v50 = vld [vmem:[#allocation28_spill] sm:$0xff]  ;;  %v12089_v13 = vld [vmem:[#allocation30_spill] sm:$0xff]  ;;  %v12092_v8 = vld [vmem:[#allocation141_spill] sm:$0xff] }
 0x364   : > { %12083 = vst [vmem:[#allocation140_spill] sm:$0xff] %v8792_v61  ;;  %4942 = vpow2.f32 %v12086_v58  ;;  %12087 = vst [vmem:[#allocation142_spill] sm:$0xff] %v8797_v30  ;;  %v3278_v39 = vadd.f32 %v3277_v3, %v12088_v50  ;;  %v4925_v15 = vpop.eup %4924  ;;  %v12090_v20 = vld [vmem:[#allocation144_spill] sm:$0xff]  ;;  %v8802_v34 = vmul.f32 0.0, %v4915_v19  ;;  %v8807_v32 = vmul.f32 0.0, %v4917_v22  ;;  %v12094_v11 = vld [vmem:[#allocation34_spill] sm:$0xff] }
 0x365   : > { %v3347_v29 = vadd.f32 %v3346_v63, %v12089_v13  ;;  %4944 = vpow2.f32 %v12090_v20  ;;  %v3210_v53 = vadd.f32 %v3209_v0, %v8350_v47  ;;  %v3416_v52 = vadd.f32 %v3415_v26, %v8347_v43  ;;  %v4927_v6 = vpop.eup %4926  ;;  %v12095_v63 = vld [vmem:[#allocation143_spill] sm:$0xff]  ;;  %v12096_v20 = vld [vmem:[#allocation70_spill] sm:$0xff]  ;;  %v12097_v26 = vld [vmem:[#allocation145_spill] sm:$0xff] }
 0x366   : > { %12091 = vst [vmem:[#allocation144_spill] sm:$0xff] %v8802_v34  ;;  %4946 = vpow2.f32 %v12092_v8  ;;  %12093 = vst [vmem:[#allocation141_spill] sm:$0xff] %v8807_v32  ;;  %v3279_v58 = vadd.f32 %v3278_v39, %v12094_v11  ;;  %v8812_v13 = vmul.f32 0.0, %v4919_v62  ;;  %v8817_v43 = vmul.f32 0.0, %v4921_v59  ;;  %v12194_v11 = vld [vmem:[#allocation104_spill] sm:$0xff]  ;;  %v12198_v12 = vld [vmem:[#allocation105_spill] sm:$0xff] }
 0x367   : > { %v3348_v3 = vadd.f32 %v3347_v29, %v8359_v37  ;;  %v4929_v50 = vpop.eup %4928  ;;  %4948 = vpow2.f32 %v12095_v63  ;;  %v3211_v19 = vadd.f32 %v3210_v53, %v8365_v2  ;;  %v3417_v0 = vadd.f32 %v3416_v52, %v12096_v20  ;;  %v12099_v29 = vld [vmem:[#allocation146_spill] sm:$0xff]  ;;  %v12102_v52 = vld [vmem:[#allocation147_spill] sm:$0xff] }
 0x368   : > { %v4931_v47 = vpop.eup %4930  ;;  %4950 = vpow2.f32 %v12097_v26  ;;  %12098 = vst [vmem:[#allocation143_spill] sm:$0xff] %v8817_v43  ;;  %v3280_v22 = vadd.f32 %v3279_v58, %v8371_v41  ;;  %v8822_v37 = vmul.f32 0.0, %v4923_v17  ;;  %v12101_v63 = vld [vmem:[#allocation38_spill] sm:$0xff]  ;;  %v8827_v20 = vmul.f32 0.0, %v4925_v15  ;;  %v12104_v26 = vld [vmem:[#allocation73_spill] sm:$0xff] }
 0x369   : > { %v3349_v39 = vadd.f32 %v3348_v3, %v8374_v33  ;;  %v4933_v8 = vpop.eup %4932  ;;  %4952 = vpow2.f32 %v12099_v29  ;;  %v3212_v62 = vadd.f32 %v3211_v19, %v8383_v57  ;;  %v3418_v53 = vadd.f32 %v3417_v0, %v12101_v63  ;;  %v12105_v3 = vld [vmem:[#allocation148_spill] sm:$0xff]  ;;  %v12107_v0 = vld [vmem:[#allocation150_spill] sm:$0xff]  ;;  %v12109_v15 = vld [vmem:[#allocation45_spill] sm:$0xff] }
 0x36a   : > { %12100 = vst [vmem:[#allocation145_spill] sm:$0xff] %v8822_v37  ;;  %v4935_v2 = vpop.eup %4934  ;;  %4954 = vpow2.f32 %v12102_v52  ;;  %12103 = vst [vmem:[#allocation146_spill] sm:$0xff] %v8827_v20  ;;  %v3281_v59 = vadd.f32 %v3280_v22, %v8386_v9  ;;  %v8832_v33 = vmul.f32 0.0, %v4927_v6  ;;  %v8837_v57 = vmul.f32 0.0, %v4929_v50  ;;  %v12190_v9 = vld [vmem:[#allocation103_spill] sm:$0xff] }
 0x36b   : > { %v3350_v58 = vadd.f32 %v3349_v39, %v12104_v26  ;;  %v4937_v41 = vpop.eup %4936  ;;  %4956 = vpow2.f32 %v12105_v3  ;;  %v3213_v17 = vadd.f32 %v3212_v62, %v8398_v10  ;;  %v3419_v19 = vadd.f32 %v3418_v53, %v8395_v36  ;;  %v12110_v39 = vld [vmem:[#allocation152_spill] sm:$0xff]  ;;  %v12112_v3 = vld [vmem:[#allocation47_spill] sm:$0xff]  ;;  %v12113_v53 = vld [vmem:[#allocation149_spill] sm:$0xff] }
 0x36c   : > { %12106 = vst [vmem:[#allocation147_spill] sm:$0xff] %v8832_v33  ;;  %v4939_v29 = vpop.eup %4938  ;;  %4958 = vpow2.f32 %v12107_v0  ;;  %12108 = vst [vmem:[#allocation148_spill] sm:$0xff] %v8837_v57  ;;  %v3282_v52 = vadd.f32 %v3281_v59, %v12109_v15  ;;  %v8842_v26 = vmul.f32 0.0, %v4931_v47  ;;  %v8847_v36 = vmul.f32 0.0, %v4933_v8  ;;  %v12186_v15 = vld [vmem:[#allocation32_spill] sm:$0xff] }
 0x36d   : > { %v3351_v22 = vadd.f32 %v3350_v58, %v8407_v28  ;;  %v4941_v63 = vpop.eup %4940  ;;  %4960 = vpow2.f32 %v12110_v39  ;;  %v3214_v6 = vadd.f32 %v3213_v17, %v8413_v16  ;;  %v3420_v62 = vadd.f32 %v3419_v19, %v12112_v3  ;;  %v12115_v58 = vld [vmem:[#allocation151_spill] sm:$0xff]  ;;  %v12117_v39 = vld [vmem:[#allocation49_spill] sm:$0xff] }
 0x36e   : > { %12111 = vst [vmem:[#allocation150_spill] sm:$0xff] %v8842_v26  ;;  %v4943_v10 = vpop.eup %4942  ;;  %4962 = vpow2.f32 %v12113_v53  ;;  %12114 = vst [vmem:[#allocation152_spill] sm:$0xff] %v8847_v36  ;;  %v3283_v50 = vadd.f32 %v3282_v52, %v8419_v49  ;;  %v8852_v28 = vmul.f32 0.0, %v4935_v2  ;;  %v12118_v19 = vld [vmem:[#allocation153_spill] sm:$0xff]  ;;  %v8857_v3 = vmul.f32 0.0, %v4937_v41  ;;  %v12120_v53 = vld [vmem:[#allocation51_spill] sm:$0xff] }
 0x36f   : > { %v3352_v59 = vadd.f32 %v3351_v22, %v8422_v24  ;;  %v4945_v0 = vpop.eup %4944  ;;  %4964 = vpow2.f32 %v12115_v58  ;;  %v3215_v47 = vadd.f32 %v3214_v6, %v8431_v7  ;;  %v3421_v17 = vadd.f32 %v3420_v62, %v12117_v39  ;;  %v12121_v22 = vld [vmem:[#allocation154_spill] sm:$0xff]  ;;  %v12122_v58 = vld [vmem:[#allocation53_spill] sm:$0xff]  ;;  %v12123_v62 = vld [vmem:[#allocation155_spill] sm:$0xff] }
 0x370   : > { %12116 = vst [vmem:[#allocation149_spill] sm:$0xff] %v8852_v28  ;;  %v4947_v16 = vpop.eup %4946  ;;  %4966 = vpow2.f32 %v12118_v19  ;;  %12119 = vst [vmem:[#allocation151_spill] sm:$0xff] %v8857_v3  ;;  %v3284_v8 = vadd.f32 %v3283_v50, %v8434_v54  ;;  %v8862_v24 = vmul.f32 0.0, %v4939_v29  ;;  %v8867_v39 = vmul.f32 0.0, %v4941_v63  ;;  %v12125_v19 = vld [vmem:[#allocation52_spill] sm:$0xff]  ;;  %v12130_v63 = vld [vmem:[#allocation57_spill] sm:$0xff] }
 0x371   : > { %v3353_v52 = vadd.f32 %v3352_v59, %v12120_v53  ;;  %v4949_v49 = vpop.eup %4948  ;;  %4968 = vpow2.f32 %v12121_v22  ;;  %v3216_v2 = vadd.f32 %v3215_v47, %v8446_v1  ;;  %v3422_v6 = vadd.f32 %v3421_v17, %v12122_v58  ;;  %v12126_v59 = vld [vmem:[#allocation156_spill] sm:$0xff]  ;;  %v12128_v17 = vld [vmem:[#allocation158_spill] sm:$0xff] }
 0x372   : > { %v4951_v7 = vpop.eup %4950  ;;  %4970 = vpow2.f32 %v12123_v62  ;;  %12124 = vst [vmem:[#allocation153_spill] sm:$0xff] %v8867_v39  ;;  %v3285_v41 = vadd.f32 %v3284_v8, %v8449_v60  ;;  %v8872_v53 = vmul.f32 0.0, %v4943_v10  ;;  %v8877_v1 = vmul.f32 0.0, %v4945_v0  ;;  %v12182_v60 = vld [vmem:[#allocation99_spill] sm:$0xff] }
 0x373   : > { %v3354_v50 = vadd.f32 %v3353_v52, %v12125_v19  ;;  %v4953_v54 = vpop.eup %4952  ;;  %4972 = vpow2.f32 %v12126_v59  ;;  %v3217_v29 = vadd.f32 %v3216_v2, %v8461_v45  ;;  %v3423_v47 = vadd.f32 %v3422_v6, %v8458_v42  ;;  %v12131_v52 = vld [vmem:[#allocation160_spill] sm:$0xff]  ;;  %v12133_v59 = vld [vmem:[#allocation59_spill] sm:$0xff]  ;;  %v12134_v6 = vld [vmem:[#allocation157_spill] sm:$0xff] }
 0x374   : > { %12127 = vst [vmem:[#allocation154_spill] sm:$0xff] %v8872_v53  ;;  %v4955_v22 = vpop.eup %4954  ;;  %4974 = vpow2.f32 %v12128_v17  ;;  %12129 = vst [vmem:[#allocation155_spill] sm:$0xff] %v8877_v1  ;;  %v3286_v62 = vadd.f32 %v3285_v41, %v12130_v63  ;;  %v8882_v19 = vmul.f32 0.0, %v4947_v16  ;;  %v8887_v42 = vmul.f32 0.0, %v4949_v49  ;;  %v12178_v63 = vld [vmem:[#allocation98_spill] sm:$0xff] }
 0x375   : > { %v3355_v8 = vadd.f32 %v3354_v50, %v8468_v21  ;;  %v4957_v58 = vpop.eup %4956  ;;  %4976 = vpow2.f32 %v12131_v52  ;;  %v3218_v10 = vadd.f32 %v3217_v29, %v8475_v48  ;;  %v3424_v2 = vadd.f32 %v3423_v47, %v12133_v59  ;;  %v12136_v50 = vld [vmem:[#allocation159_spill] sm:$0xff]  ;;  %v12138_v52 = vld [vmem:[#allocation60_spill] sm:$0xff]  ;;  %v12139_v47 = vld [vmem:[#allocation161_spill] sm:$0xff] }
 0x376   : > { %12132 = vst [vmem:[#allocation156_spill] sm:$0xff] %v8882_v19  ;;  %v4959_v45 = vpop.eup %4958  ;;  %4978 = vpow2.f32 %v12134_v6  ;;  %12135 = vst [vmem:[#allocation158_spill] sm:$0xff] %v8887_v42  ;;  %v3287_v0 = vadd.f32 %v3286_v62, %v8478_v25  ;;  %v8892_v21 = vmul.f32 0.0, %v4951_v7  ;;  %v8897_v59 = vmul.f32 0.0, %v4953_v54  ;;  %v12141_v6 = vld [vmem:[#allocation64_spill] sm:$0xff]  ;;  %v12146_v54 = vld [vmem:[#allocation71_spill] sm:$0xff] }
 0x377   : > { %v3356_v41 = vadd.f32 %v3355_v8, %v8481_v5  ;;  %v4961_v17 = vpop.eup %4960  ;;  %4980 = vpow2.f32 %v12136_v50  ;;  %v3219_v16 = vadd.f32 %v3218_v10, %v8488_v31  ;;  %v3425_v29 = vadd.f32 %v3424_v2, %v12138_v52  ;;  %v12142_v8 = vld [vmem:[#allocation162_spill] sm:$0xff]  ;;  %v12144_v2 = vld [vmem:[#allocation163_spill] sm:$0xff] }
 0x378   : > { %12137 = vst [vmem:[#allocation160_spill] sm:$0xff] %v8892_v21  ;;  %v4963_v48 = vpop.eup %4962  ;;  %4982 = vpow2.f32 %v12139_v47  ;;  %12140 = vst [vmem:[#allocation157_spill] sm:$0xff] %v8897_v59  ;;  %v3288_v49 = vadd.f32 %v3287_v0, %v8491_v18  ;;  %v8902_v5 = vmul.f32 0.0, %v4955_v22  ;;  %v8907_v31 = vmul.f32 0.0, %v4957_v58  ;;  %v12174_v52 = vld [vmem:[#allocation94_spill] sm:$0xff] }
 0x379   : > { %v3357_v62 = vadd.f32 %v3356_v41, %v12141_v6  ;;  %v4965_v25 = vpop.eup %4964  ;;  %4984 = vpow2.f32 %v12142_v8  ;;  %v3220_v7 = vadd.f32 %v3219_v16, %v8501_v4  ;;  %v3426_v10 = vadd.f32 %v3425_v29, %v8498_v35  ;;  %v12147_v41 = vld [vmem:[#allocation164_spill] sm:$0xff]  ;;  %v12149_v8 = vld [vmem:[#allocation82_spill] sm:$0xff] }
 0x37a   : > { %12143 = vst [vmem:[#allocation159_spill] sm:$0xff] %v8902_v5  ;;  %v4967_v50 = vpop.eup %4966  ;;  %4986 = vpow2.f32 %v12144_v2  ;;  %12145 = vst [vmem:[#allocation161_spill] sm:$0xff] %v8907_v31  ;;  %v3289_v47 = vadd.f32 %v3288_v49, %v12146_v54  ;;  %v8912_v6 = vmul.f32 0.0, %v4959_v45  ;;  %v12150_v29 = vld [vmem:[#allocation166_spill] sm:$0xff]  ;;  %v8917_v35 = vmul.f32 0.0, %v4961_v17  ;;  %v12157_v17 = vld [vmem:[#allocation87_spill] sm:$0xff] }
 0x37b   : > { %v3358_v0 = vadd.f32 %v3357_v62, %v8508_v38  ;;  %v4969_v18 = vpop.eup %4968  ;;  %4988 = vpow2.f32 %v12147_v41  ;;  %v3221_v22 = vadd.f32 %v3220_v7, %v8515_v14  ;;  %v3427_v16 = vadd.f32 %v3426_v10, %v12149_v8  ;;  %v12152_v62 = vld [vmem:[#allocation168_spill] sm:$0xff]  ;;  %v12154_v41 = vld [vmem:[#allocation83_spill] sm:$0xff]  ;;  %v12155_v10 = vld [vmem:[#allocation165_spill] sm:$0xff] }
 0x37c   : > { %12148 = vst [vmem:[#allocation162_spill] sm:$0xff] %v8912_v6  ;;  %v4971_v4 = vpop.eup %4970  ;;  %4990 = vpow2.f32 %v12150_v29  ;;  %12151 = vst [vmem:[#allocation163_spill] sm:$0xff] %v8917_v35  ;;  %v3290_v58 = vadd.f32 %v3289_v47, %v8518_v44  ;;  %v8922_v38 = vmul.f32 0.0, %v4963_v48  ;;  %v8927_v8 = vmul.f32 0.0, %v4965_v25  ;;  %v12158_v54 = vld [vmem:[#allocation84_spill] sm:$0xff]  ;;  %v12164_v25 = vld [vmem:[#allocation89_spill] sm:$0xff] }
 0x37d   : > { %v3359_v49 = vadd.f32 %v3358_v0, %v8521_v46  ;;  %v4973_v2 = vpop.eup %4972  ;;  %4992 = vpow2.f32 %v12152_v62  ;;  %v3222_v45 = vadd.f32 %v3221_v22, %v8528_v56  ;;  %v3428_v7 = vadd.f32 %v3427_v16, %v12154_v41  ;;  %v12159_v0 = vld [vmem:[#allocation167_spill] sm:$0xff]  ;;  %v12161_v62 = vld [vmem:[#allocation86_spill] sm:$0xff]  ;;  %v12162_v16 = vld [vmem:[#allocation169_spill] sm:$0xff] }
 0x37e   : > { %12153 = vst [vmem:[#allocation164_spill] sm:$0xff] %v8922_v38  ;;  %v4975_v14 = vpop.eup %4974  ;;  %4994 = vpow2.f32 %v12155_v10  ;;  %12156 = vst [vmem:[#allocation166_spill] sm:$0xff] %v8927_v8  ;;  %v3291_v29 = vadd.f32 %v3290_v58, %v12157_v17  ;;  %v8932_v46 = vmul.f32 0.0, %v4967_v50  ;;  %v8937_v41 = vmul.f32 0.0, %v4969_v18 }
 0x37f   : > { %v3360_v47 = vadd.f32 %v3359_v49, %v12158_v54  ;;  %v4977_v44 = vpop.eup %4976  ;;  %4996 = vpow2.f32 %v12159_v0  ;;  %v3223_v48 = vadd.f32 %v3222_v45, %v8541_v55  ;;  %v3429_v22 = vadd.f32 %v3428_v7, %v12161_v62  ;;  %v12165_v49 = vld [vmem:[#allocation170_spill] sm:$0xff]  ;;  %v12167_v0 = vld [vmem:[#allocation91_spill] sm:$0xff] }
 0x380   : > { %12160 = vst [vmem:[#allocation168_spill] sm:$0xff] %v8932_v46  ;;  %v4979_v56 = vpop.eup %4978  ;;  %4998 = vpow2.f32 %v12162_v16  ;;  %12163 = vst [vmem:[#allocation165_spill] sm:$0xff] %v8937_v41  ;;  %v3292_v10 = vadd.f32 %v3291_v29, %v12164_v25  ;;  %v8942_v54 = vmul.f32 0.0, %v4971_v4  ;;  %v12168_v7 = vld [vmem:[#allocation171_spill] sm:$0xff]  ;;  %v8947_v62 = vmul.f32 0.0, %v4973_v2  ;;  %v12170_v16 = vld [vmem:[#allocation92_spill] sm:$0xff] }
 0x381   : > { %v3361_v58 = vadd.f32 %v3360_v47, %v8548_v40  ;;  %v4981_v17 = vpop.eup %4980  ;;  %5000 = vpow2.f32 %v12165_v49  ;;  %v3224_v50 = vadd.f32 %v3223_v48, %v8555_v51  ;;  %v3430_v45 = vadd.f32 %v3429_v22, %v12167_v0  ;;  %v12171_v47 = vld [vmem:[#allocation172_spill] sm:$0xff]  ;;  %v12175_v22 = vld [vmem:[#allocation174_spill] sm:$0xff]  ;;  %v12177_v2 = vld [vmem:[#allocation97_spill] sm:$0xff] }
 0x382   : > { %12166 = vst [vmem:[#allocation167_spill] sm:$0xff] %v8942_v54  ;;  %v4983_v55 = vpop.eup %4982  ;;  %5002 = vpow2.f32 %v12168_v7  ;;  %12169 = vst [vmem:[#allocation169_spill] sm:$0xff] %v8947_v62  ;;  %v3293_v18 = vadd.f32 %v3292_v10, %v8558_v23  ;;  %v8952_v40 = vmul.f32 0.0, %v4975_v14  ;;  %v12173_v4 = vld [vmem:[#allocation96_spill] sm:$0xff]  ;;  %v8957_v0 = vmul.f32 0.0, %v4977_v44  ;;  %v12181_v14 = vld [vmem:[#allocation26_spill] sm:$0xff] }
 0x383   : > { %v3362_v29 = vadd.f32 %v3361_v58, %v12170_v16  ;;  %v4985_v25 = vpop.eup %4984  ;;  %5004 = vpow2.f32 %v12171_v47  ;;  %v3225_v49 = vadd.f32 %v3224_v50, %v12173_v4  ;;  %v3431_v48 = vadd.f32 %v3430_v45, %v12174_v52  ;;  %v12179_v58 = vld [vmem:[#allocation176_spill] sm:$0xff]  ;;  %v12183_v45 = vld [vmem:[#allocation173_spill] sm:$0xff] }
 0x384   : > { %12172 = vst [vmem:[#allocation170_spill] sm:$0xff] %v8952_v40  ;;  %v4987_v51 = vpop.eup %4986  ;;  %5006 = vpow2.f32 %v12175_v22  ;;  %12176 = vst [vmem:[#allocation171_spill] sm:$0xff] %v8957_v0  ;;  %v3294_v7 = vadd.f32 %v3293_v18, %v12177_v2  ;;  %v8962_v16 = vmul.f32 0.0, %v4979_v56  ;;  %v8967_v52 = vmul.f32 0.0, %v4981_v17  ;;  %v12185_v44 = vld [vmem:[#allocation101_spill] sm:$0xff]  ;;  %v12189_v56 = vld [vmem:[#allocation100_spill] sm:$0xff] }
 0x385   : > { %v3363_v10 = vadd.f32 %v3362_v29, %v12178_v63  ;;  %v4989_v23 = vpop.eup %4988  ;;  %5008 = vpow2.f32 %v12179_v58  ;;  %v3226_v47 = vadd.f32 %v3225_v49, %v12181_v14  ;;  %v3432_v50 = vadd.f32 %v3431_v48, %v12182_v60  ;;  %v12187_v29 = vld [vmem:[#allocation175_spill] sm:$0xff]  ;;  %v12191_v48 = vld [vmem:[#allocation177_spill] sm:$0xff]  ;;  %v12193_v17 = vld [vmem:[#allocation102_spill] sm:$0xff] }
 0x386   : > { %12180 = vst [vmem:[#allocation172_spill] sm:$0xff] %v8962_v16  ;;  %v4991_v4 = vpop.eup %4990  ;;  %5010 = vpow2.f32 %v12183_v45  ;;  %12184 = vst [vmem:[#allocation174_spill] sm:$0xff] %v8967_v52  ;;  %v3295_v22 = vadd.f32 %v3294_v7, %v12185_v44  ;;  %v8972_v63 = vmul.f32 0.0, %v4983_v55  ;;  %v8977_v60 = vmul.f32 0.0, %v4985_v25  ;;  %v12197_v55 = vld [vmem:[#allocation255_spill] sm:$0xff]  ;;  %v12201_v25 = vld [vmem:[#allocation256_spill] sm:$0xff] }
 0x387   : > { %v3364_v18 = vadd.f32 %v3363_v10, %v12186_v15  ;;  %v4993_v2 = vpop.eup %4992  ;;  %5012 = vpow2.f32 %v12187_v29  ;;  %v3227_v58 = vadd.f32 %v3226_v47, %v12189_v56  ;;  %v3433_v49 = vadd.f32 %v3432_v50, %v12190_v9  ;;  %v12195_v10 = vld [vmem:[#allocation178_spill] sm:$0xff]  ;;  %v12199_v50 = vld [vmem:[#allocation179_spill] sm:$0xff] }
 0x388   : > { %12188 = vst [vmem:[#allocation176_spill] sm:$0xff] %v8972_v63  ;;  %v4995_v14 = vpop.eup %4994  ;;  %5014 = vpow2.f32 %v12191_v48  ;;  %12192 = vst [vmem:[#allocation173_spill] sm:$0xff] %v8977_v60  ;;  %v3296_v45 = vadd.f32 %v3295_v22, %v12193_v17  ;;  %v8982_v15 = vmul.f32 0.0, %v4987_v51  ;;  %v8987_v9 = vmul.f32 0.0, %v4989_v23  ;;  %v12202_v60 = vld [vmem:[#allocation106_spill] sm:$0xff]  ;;  %v12209_v23 = vld [vmem:[#allocation259_spill] sm:$0xff] }
 0x389   : > { %v3365_v7 = vadd.f32 %v3364_v18, %v12194_v11  ;;  %v4997_v44 = vpop.eup %4996  ;;  %5016 = vpow2.f32 %v12195_v10  ;;  %v3228_v29 = vadd.f32 %v3227_v58, %v12197_v55  ;;  %v3434_v47 = vadd.f32 %v3433_v49, %v12198_v12  ;;  %v12205_v51 = vld [vmem:[#allocation258_spill] sm:$0xff]  ;;  %v12207_v49 = vld [vmem:[#allocation180_spill] sm:$0xff] }
 0x38a   : > { %12196 = vst [vmem:[#allocation175_spill] sm:$0xff] %v8982_v15  ;;  %v4999_v56 = vpop.eup %4998  ;;  %5018 = vpow2.f32 %v12199_v50  ;;  %12200 = vst [vmem:[#allocation177_spill] sm:$0xff] %v8987_v9  ;;  %v3297_v48 = vadd.f32 %v3296_v45, %v12201_v25  ;;  %v8991_v18 = vmul.f32 0.0, %v4991_v4  ;;  %v8993_v11 = vmul.f32 0.0, %v4993_v2  ;;  %v12206_v15 = vld [vmem:[#allocation257_spill] sm:$0xff]  ;;  %v12210_v9 = vld [vmem:[#allocation107_spill] sm:$0xff] }
 0x38b   : > { %v3366_v22 = vadd.f32 %v3365_v7, %v12202_v60  ;;  %v5001_v17 = vpop.eup %5000  ;;  %v3229_v10 = vadd.f32 %v3228_v29, %v12205_v51  ;;  %v3435_v58 = vadd.f32 %v3434_v47, %v12206_v15  ;;  %5020 = vpow2.f32 %v12207_v49  ;;  %v12213_v2 = vld [vmem:[#allocation111_spill] sm:$0xff]  ;;  %v12215_v47 = vld [vmem:[#allocation182_spill] sm:$0xff] }
 0x38c   : > { %12203 = vst [vmem:[#allocation178_spill] sm:$0xff] %v8991_v18  ;;  %12204 = vst [vmem:[#allocation179_spill] sm:$0xff] %v8993_v11  ;;  %v5003_v55 = vpop.eup %5002  ;;  %v8998_v12 = vmul.f32 0.0, %v4995_v14  ;;  %v3298_v50 = vadd.f32 %v3297_v48, %v12209_v23  ;;  %v9002_v7 = vmul.f32 0.0, %v4997_v44  ;;  %v9004_v4 = vmul.f32 0.0, %v4999_v56  ;;  %v12214_v11 = vld [vmem:[#allocation109_spill] sm:$0xff] }
 0x38d   : > { %v3367_v45 = vadd.f32 %v3366_v22, %v12210_v9  ;;  %v5005_v25 = vpop.eup %5004  ;;  %v3230_v60 = vadd.f32 %v3229_v10, %v12213_v2  ;;  %v3436_v29 = vadd.f32 %v3435_v58, %v12214_v11  ;;  %5022 = vpow2.f32 %v12215_v47  ;;  %v12217_v14 = vld [vmem:[#allocation108_spill] sm:$0xff]  ;;  %v12221_v56 = vld [vmem:[#allocation114_spill] sm:$0xff]  ;;  %v12223_v58 = vld [vmem:[#allocation181_spill] sm:$0xff] }
 0x38e   : > { %12208 = vst [vmem:[#allocation180_spill] sm:$0xff] %v8998_v12  ;;  %12211 = vst [vmem:[#allocation260_spill] sm:$0xff] %v9002_v7  ;;  %v5007_v51 = vpop.eup %5006  ;;  %v9009_v15 = vmul.f32 0.0, %v5001_v17  ;;  %v3299_v49 = vadd.f32 %v3298_v50, %v12217_v14  ;;  %v12218_v12 = vld [vmem:[#allocation110_spill] sm:$0xff]  ;;  %v12219_v22 = vld [vmem:[#allocation184_spill] sm:$0xff]  ;;  %v9014_v44 = vmul.f32 0.0, %v5003_v55 }
 0x38f   : > { %12212 = vst [vmem:[#allocation261_spill] sm:$0xff] %v9004_v4  ;;  %v3368_v48 = vadd.f32 %v3367_v45, %v12218_v12  ;;  %v5009_v23 = vpop.eup %5008  ;;  %5024 = vpow2.f32 %v12219_v22  ;;  %v3231_v9 = vadd.f32 %v3230_v60, %v12221_v56  ;;  %v12222_v4 = vld [vmem:[#allocation113_spill] sm:$0xff]  ;;  %v9019_v11 = vmul.f32 0.0, %v5005_v25  ;;  %v12225_v17 = vld [vmem:[#allocation115_spill] sm:$0xff]  ;;  %v12228_v55 = vld [vmem:[#allocation116_spill] sm:$0xff] }
 0x390   : > { %12216 = vst [vmem:[#allocation182_spill] sm:$0xff] %v9009_v15  ;;  %12220 = vst [vmem:[#allocation184_spill] sm:$0xff] %v9014_v44  ;;  %v3437_v10 = vadd.f32 %v3436_v29, %v12222_v4  ;;  %v5011_v2 = vpop.eup %5010  ;;  %5026 = vpow2.f32 %v12223_v58  ;;  %v3300_v47 = vadd.f32 %v3299_v49, %v12225_v17  ;;  %v12226_v45 = vld [vmem:[#allocation183_spill] sm:$0xff]  ;;  %v9024_v12 = vmul.f32 0.0, %v5007_v51  ;;  %v12230_v29 = vld [vmem:[#allocation185_spill] sm:$0xff] }
 0x391   : > { %12224 = vst [vmem:[#allocation181_spill] sm:$0xff] %v9019_v11  ;;  %v3369_v50 = vadd.f32 %v3368_v48, %v8668_v27  ;;  %v5013_v14 = vpop.eup %5012  ;;  %5028 = vpow2.f32 %v12226_v45  ;;  %v3232_v22 = vadd.f32 %v3231_v9, %v12228_v55  ;;  %v12229_v44 = vld [vmem:[#allocation119_spill] sm:$0xff]  ;;  %v9029_v4 = vmul.f32 0.0, %v5009_v23  ;;  %v12232_v25 = vld [vmem:[#allocation118_spill] sm:$0xff]  ;;  %v12233_v11 = vld [vmem:[#allocation121_spill] sm:$0xff] }
 0x392   : > { %12227 = vst [vmem:[#allocation183_spill] sm:$0xff] %v9024_v12  ;;  %v3438_v60 = vadd.f32 %v3437_v10, %v12229_v44  ;;  %v5015_v56 = vpop.eup %5014  ;;  %5030 = vpow2.f32 %v12230_v29  ;;  %v3301_v58 = vadd.f32 %v3300_v47, %v12232_v25  ;;  %v12234_v48 = vld [vmem:[#allocation186_spill] sm:$0xff]  ;;  %v9034_v27 = vmul.f32 0.0, %v5011_v2  ;;  %v12236_v51 = vld [vmem:[#allocation123_spill] sm:$0xff]  ;;  %v12240_v23 = vld [vmem:[#allocation124_spill] sm:$0xff] }
 0x393   : > { %12231 = vst [vmem:[#allocation185_spill] sm:$0xff] %v9029_v4  ;;  %v3370_v49 = vadd.f32 %v3369_v50, %v12233_v11  ;;  %v5017_v17 = vpop.eup %5016  ;;  %5032 = vpow2.f32 %v12234_v48  ;;  %v3233_v45 = vadd.f32 %v3232_v22, %v12236_v51  ;;  %v12237_v12 = vld [vmem:[#allocation122_spill] sm:$0xff]  ;;  %v12238_v10 = vld [vmem:[#allocation187_spill] sm:$0xff]  ;;  %v9039_v44 = vmul.f32 0.0, %v5013_v14  ;;  %v12242_v25 = vld [vmem:[#allocation188_spill] sm:$0xff] }
 0x394   : > { %12235 = vst [vmem:[#allocation186_spill] sm:$0xff] %v9034_v27  ;;  %v3439_v9 = vadd.f32 %v3438_v60, %v12237_v12  ;;  %v5019_v55 = vpop.eup %5018  ;;  %5034 = vpow2.f32 %v12238_v10  ;;  %v3302_v29 = vadd.f32 %v3301_v58, %v12240_v23  ;;  %v12241_v4 = vld [vmem:[#allocation126_spill] sm:$0xff]  ;;  %v9044_v50 = vmul.f32 0.0, %v5015_v56  ;;  %v12244_v48 = vld [vmem:[#allocation125_spill] sm:$0xff]  ;;  %v12245_v11 = vld [vmem:[#allocation128_spill] sm:$0xff] }
 0x395   : > { %12239 = vst [vmem:[#allocation187_spill] sm:$0xff] %v9039_v44  ;;  %v3371_v47 = vadd.f32 %v3370_v49, %v12241_v4  ;;  %5036 = vpow2.f32 %v12242_v25  ;;  %v3234_v2 = vadd.f32 %v3233_v45, %v12244_v48  ;;  %v5021_v22 = vpop.eup %5020  ;;  %v12246_v51 = vld [vmem:[#allocation190_spill] sm:$0xff]  ;;  %v9049_v60 = vmul.f32 0.0, %v5017_v17  ;;  %v12248_v10 = vld [vmem:[#allocation127_spill] sm:$0xff]  ;;  %v12249_v12 = vld [vmem:[#allocation129_spill] sm:$0xff] }
 0x396   : > { %12243 = vst [vmem:[#allocation188_spill] sm:$0xff] %v9044_v50  ;;  %v3440_v27 = vadd.f32 %v3439_v9, %v12245_v11  ;;  %5038 = vpow2.f32 %v12246_v51  ;;  %v3303_v14 = vadd.f32 %v3302_v29, %v12248_v10  ;;  %v12250_v58 = vld [vmem:[#allocation192_spill] sm:$0xff]  ;;  %v9054_v49 = vmul.f32 0.0, %v5019_v55  ;;  %v12252_v25 = vld [vmem:[#allocation131_spill] sm:$0xff]  ;;  %v12253_v4 = vld [vmem:[#allocation130_spill] sm:$0xff] }
 0x397   : > { %12247 = vst [vmem:[#allocation190_spill] sm:$0xff] %v9049_v60  ;;  %v3372_v44 = vadd.f32 %v3371_v47, %v12249_v12  ;;  %5040 = vpow2.f32 %v12250_v58  ;;  %v3235_v56 = vadd.f32 %v3234_v2, %v12252_v25  ;;  %v5023_v45 = vpop.eup %5022  ;;  %v12254_v48 = vld [vmem:[#allocation189_spill] sm:$0xff]  ;;  %v12255_v9 = vld [vmem:[#allocation132_spill] sm:$0xff]  ;;  %v12256_v51 = vld [vmem:[#allocation134_spill] sm:$0xff]  ;;  %v9063_v47 = vmul.f32 0.0, %v5021_v22 }
 0x398   : > { %12251 = vst [vmem:[#allocation192_spill] sm:$0xff] %v9054_v49  ;;  %v3441_v23 = vadd.f32 %v3440_v27, %v12253_v4  ;;  %5042 = vpow2.f32 %v12254_v48  ;;  %v3304_v11 = vadd.f32 %v3303_v14, %v12255_v9  ;;  %v12257_v60 = vld [vmem:[#allocation12_spill] sm:$0xff]  ;;  %v12258_v50 = vld [vmem:[#allocation18_spill] sm:$0xff]  ;;  %v12260_v58 = vld [vmem:[#allocation133_spill] sm:$0xff] }
 0x399   : > { %v3373_v17 = vadd.f32 %v3372_v44, %v12256_v51  ;;  %v3545_v29 = vpack.c.bf16 %v12258_v50, %v12257_v60  ;;  %v5025_v10 = vpop.eup %5024  ;;  %12259 = vst [vmem:[#allocation189_spill] sm:$0xff] %v9063_v47  ;;  %v3236_v55 = vadd.f32 %v3235_v56, %v12260_v58  ;;  %v12261_v12 = vld [vmem:[#allocation136_spill] sm:$0xff]  ;;  %v12263_v25 = vld [vmem:[#allocation21_spill] sm:$0xff]  ;;  %v12264_v15 = vld [vmem:[#allocation191_spill] sm:$0xff]  ;;  %v9074_v47 = vmul.f32 0.0, %v5023_v45 }
 0x39a   : > { %v3442_v49 = vadd.f32 %v3441_v23, %v12261_v12  ;;  %v12262_v2 = vld [vmem:[#allocation16_spill] sm:$0xff]  ;;  %v5027_v4 = vpop.eup %5026  ;;  %5044 = vpow2.f32 %v12264_v15  ;;  %v12265_v48 = vld [vmem:[#allocation135_spill] sm:$0xff]  ;;  %v12266_v9 = vld [vmem:[#allocation137_spill] sm:$0xff] }
 0x39b   : > { %v3547_v27 = vpack.c.bf16 %v12263_v25, %v12262_v2  ;;  %v3305_v14 = vadd.f32 %v3304_v11, %v12265_v48  ;;  %v3374_v44 = vadd.f32 %v3373_v17, %v12266_v9  ;;  %3692 = vmatprep.subr.bf16.mxu0 %v3545_v29  ;;  %v12267_v51 = vld [vmem:[#allocation15_spill] sm:$0xff]  ;;  %v12268_v50 = vld [vmem:[#allocation17_spill] sm:$0xff]  ;;  %v5029_v22 = vpop.eup %5028  ;;  %12269 = vst [vmem:[#allocation12_spill] sm:$0xff] %v9074_v47  ;;  %v12271_v23 = vld [vmem:[#allocation138_spill] sm:$0xff] }
 0x39c   : > { %v3544_v60 = vpack.c.bf16 %v12268_v50, %v12267_v51  ;;  %v12270_v56 = vld [vmem:[#allocation139_spill] sm:$0xff]  ;;  %v3443_v12 = vadd.f32 %v3442_v49, %v12271_v23  ;;  %v12272_v25 = vld [vmem:[#allocation14_spill] sm:$0xff]  ;;  %v5031_v15 = vpop.eup %5030  ;;  %v12274_v18 = vld [vmem:[#allocation193_spill] sm:$0xff] }
 0x39d   : > { %v3237_v58 = vadd.f32 %v3236_v55, %v12270_v56  ;;  %3778 = vmatprep.subr.bf16.mxu1 %v3547_v27  ;;  %v12273_v2 = vld [vmem:[#allocation19_spill] sm:$0xff]  ;;  %5046 = vpow2.f32 %v12274_v18  ;;  %v3306_v11 = vadd.f32 %v3305_v14, %v8792_v61  ;;  %v3375_v17 = vadd.f32 %v3374_v44, %v8797_v30  ;;  %v12276_v45 = vld [vmem:[#allocation233_spill] sm:$0xff]  ;;  %v5033_v50 = vpop.eup %5032  ;;  %v12280_v14 = vld [vmem:[#allocation194_spill] sm:$0xff] }
 0x39e   : > { %v3546_v7 = vpack.c.bf16 %v12273_v2, %v12272_v25  ;;  %3693 = vmatpush1.bf16.msra.mxu0 %v3544_v60  ;;  %v12275_v51 = vld [vmem:[#allocation227_spill] sm:$0xff]  ;;  %v9085_v55 = vmul.f32 0.0, %v5025_v10  ;;  %v3444_v27 = vadd.f32 %v3443_v12, %v8802_v34  ;;  %v12278_v25 = vld [vmem:[#allocation232_spill] sm:$0xff]  ;;  %v5035_v56 = vpop.eup %5034  ;;  %5048 = vpow2.f32 %v12280_v14  ;;  %v12516_v61 = vld [vmem:[#allocation65_spill] sm:$0xff] }
 0x39f   : > { %v3549_v29 = vpack.c.bf16 %v12276_v45, %v12275_v51  ;;  %v3238_v49 = vadd.f32 %v3237_v58, %v8807_v32  ;;  %v12279_v2 = vld [vmem:[#allocation239_spill] sm:$0xff]  ;;  %v3307_v44 = vadd.f32 %v3306_v11, %v8812_v13  ;;  %v3376_v60 = vadd.f32 %v3375_v17, %v8817_v43  ;;  %v5037_v30 = vpop.eup %5036 }
 0x3a0   : > { %12277 = vst [vmem:[#allocation18_spill] sm:$0xff] %v9085_v55  ;;  %3779 = vmatpush1.bf16.msra.mxu1 %v3546_v7  ;;  %v3551_v18 = vpack.c.bf16 %v12279_v2, %v12278_v25  ;;  %v12281_v51 = vld [vmem:[#allocation23_spill] sm:$0xff]  ;;  %v9097_v58 = vmul.f32 0.0, %v5027_v4  ;;  %v3445_v7 = vadd.f32 %v3444_v27, %v8822_v37  ;;  %v12284_v25 = vld [vmem:[#allocation230_spill] sm:$0xff]  ;;  %v5039_v11 = vpop.eup %5038  ;;  %v9119_v37 = vmul.f32 0.0, %v5031_v15 }
 0x3a1   : > { %3694 = vmatprep.subr.bf16.mxu0 %v3549_v29  ;;  %v12282_v45 = vld [vmem:[#allocation231_spill] sm:$0xff]  ;;  %v3239_v12 = vadd.f32 %v3238_v49, %v8827_v20  ;;  %v12285_v2 = vld [vmem:[#allocation238_spill] sm:$0xff]  ;;  %v3308_v29 = vadd.f32 %v3307_v44, %v8832_v33  ;;  %v3377_v4 = vadd.f32 %v3376_v60, %v8837_v57  ;;  %v12287_v49 = vld [vmem:[#allocation241_spill] sm:$0xff] }
 0x3a2   : > { %v3548_v10 = vpack.c.bf16 %v12282_v45, %v12281_v51  ;;  %12283 = vst [vmem:[#allocation16_spill] sm:$0xff] %v9097_v58  ;;  %3780 = vmatprep.subr.bf16.mxu1 %v3551_v18  ;;  %v3550_v14 = vpack.c.bf16 %v12285_v2, %v12284_v25  ;;  %v12286_v17 = vld [vmem:[#allocation195_spill] sm:$0xff]  ;;  %v12288_v51 = vld [vmem:[#allocation245_spill] sm:$0xff]  ;;  %v5041_v18 = vpop.eup %5040  ;;  %v9113_v45 = vmul.f32 0.0, %v5029_v22  ;;  %v3446_v2 = vadd.f32 %v3445_v7, %v8842_v26  ;;  %v12295_v7 = vld [vmem:[#allocation242_spill] sm:$0xff] }
 0x3a3   : > { %5050 = vpow2.f32 %v12286_v17  ;;  %v3553_v27 = vpack.c.bf16 %v12288_v51, %v12287_v49  ;;  %v3240_v25 = vadd.f32 %v3239_v12, %v8847_v36  ;;  %v12290_v20 = vld [vmem:[#allocation243_spill] sm:$0xff]  ;;  %v5043_v17 = vpop.eup %5042  ;;  %12292 = vst [vmem:[#allocation191_spill] sm:$0xff] %v9119_v37  ;;  %v3309_v44 = vadd.f32 %v3308_v29, %v8852_v28  ;;  %v12294_v49 = vld [vmem:[#allocation244_spill] sm:$0xff]  ;;  %v12506_v28 = vld [vmem:[#allocation58_spill] sm:$0xff] }
 0x3a4   : > { %3695 = vmatpush1.bf16.msra.mxu0 %v3548_v10  ;;  %12289 = vst [vmem:[#allocation21_spill] sm:$0xff] %v9113_v45  ;;  %3781 = vmatpush1.bf16.msra.mxu1 %v3550_v14  ;;  %v12291_v43 = vld [vmem:[#allocation247_spill] sm:$0xff]  ;;  %v3378_v60 = vadd.f32 %v3377_v4, %v8857_v3  ;;  %v12293_v10 = vld [vmem:[#allocation240_spill] sm:$0xff]  ;;  %v3447_v12 = vadd.f32 %v3446_v2, %v8862_v24  ;;  %v12296_v14 = vld [vmem:[#allocation246_spill] sm:$0xff]  ;;  %v9131_v36 = vpop.eup %5044  ;;  %v9133_v29 = vmul.f32 0.0, %v5033_v50  ;;  %v9139_v2 = vmul.f32 0.0, %v5035_v56 }
 0x3a5   : > { %v3555_v32 = vpack.c.bf16 %v12291_v43, %v12290_v20  ;;  %3696 = vmatprep.subr.bf16.mxu0 %v3553_v27  ;;  %v3552_v22 = vpack.c.bf16 %v12294_v49, %v12293_v10  ;;  %v3241_v51 = vadd.f32 %v3240_v25, %v8867_v39  ;;  %v3554_v57 = vpack.c.bf16 %v12296_v14, %v12295_v7  ;;  %v12297_v43 = vld [vmem:[#allocation249_spill] sm:$0xff]  ;;  %v12300_v10 = vld [vmem:[#allocation251_spill] sm:$0xff]  ;;  %v12301_v25 = vld [vmem:[#allocation20_spill] sm:$0xff] }
 0x3a6   : > { %v12298_v20 = vld [vmem:[#allocation253_spill] sm:$0xff]  ;;  %12299 = vst [vmem:[#allocation135_spill] sm:$0xff] %v9133_v29  ;;  %v3310_v4 = vadd.f32 %v3309_v44, %v8872_v53  ;;  %v3379_v27 = vadd.f32 %v3378_v60, %v8877_v1  ;;  %v3559_v49 = vpack.c.bf16 %v12301_v25, %v12300_v10  ;;  %12302 = vst [vmem:[#allocation137_spill] sm:$0xff] %v9139_v2  ;;  %v12306_v56 = vld [vmem:[#allocation252_spill] sm:$0xff] }
 0x3a7   : > { %3782 = vmatprep.subr.bf16.mxu1 %v3555_v32  ;;  %v3557_v15 = vpack.c.bf16 %v12298_v20, %v12297_v43  ;;  %v9141_v32 = vmul.f32 0.0, %v5037_v30  ;;  %v3242_v7 = vadd.f32 %v3241_v51, %v8887_v42  ;;  %v3448_v14 = vadd.f32 %v3447_v12, %v8882_v19  ;;  %v9145_v50 = vpop.eup %5046  ;;  %v12307_v10 = vld [vmem:[#allocation250_spill] sm:$0xff]  ;;  %v12310_v25 = vld [vmem:[#allocation201_spill] sm:$0xff]  ;;  %v12365_v42 = vld [vmem:[#allocation68_spill] sm:$0xff] }
 0x3a8   : > { %3697 = vmatpush1.bf16.msra.mxu0 %v3552_v22  ;;  %3783 = vmatpush1.bf16.msra.mxu1 %v3554_v57  ;;  %v9147_v43 = vmul.f32 0.0, %v5039_v11  ;;  %v3311_v44 = vadd.f32 %v3310_v4, %v8892_v21  ;;  %v3380_v60 = vadd.f32 %v3379_v27, %v8897_v59  ;;  %v12305_v22 = vld [vmem:[#allocation248_spill] sm:$0xff]  ;;  %v12308_v12 = vld [vmem:[#allocation254_spill] sm:$0xff]  ;;  %v9159_v11 = vpop.eup %5048  ;;  %v12312_v59 = vld [vmem:[#allocation203_spill] sm:$0xff] }
 0x3a9   : > { %12303 = vst [vmem:[#allocation15_spill] sm:$0xff] %v9141_v32  ;;  %3698 = vmatprep.subr.bf16.mxu0 %v3557_v15  ;;  %3784 = vmatprep.subr.bf16.mxu1 %v3559_v49  ;;  %v3556_v20 = vpack.c.bf16 %v12306_v56, %v12305_v22  ;;  %v3243_v30 = vadd.f32 %v3242_v7, %v8907_v31  ;;  %v12309_v15 = vld [vmem:[#allocation198_spill] sm:$0xff]  ;;  %v12311_v49 = vld [vmem:[#allocation197_spill] sm:$0xff]  ;;  %v12313_v56 = vld [vmem:[#allocation196_spill] sm:$0xff] }
 0x3aa   : > { %12304 = vst [vmem:[#allocation17_spill] sm:$0xff] %v9147_v43  ;;  %v3449_v51 = vadd.f32 %v3448_v14, %v8902_v5  ;;  %v3558_v57 = vpack.c.bf16 %v12308_v12, %v12307_v10  ;;  %v3561_v1 = vpack.c.bf16 %v12310_v25, %v12309_v15  ;;  %v3312_v4 = vadd.f32 %v3311_v44, %v8912_v6  ;;  %v12314_v7 = vld [vmem:[#allocation199_spill] sm:$0xff]  ;;  %v12316_v15 = vld [vmem:[#allocation200_spill] sm:$0xff]  ;;  %v12317_v25 = vld [vmem:[#allocation202_spill] sm:$0xff] }
 0x3ab   : > { %v3381_v27 = vadd.f32 %v3380_v60, %v8917_v35  ;;  %v3563_v22 = vpack.c.bf16 %v12312_v59, %v12311_v49  ;;  %v3560_v31 = vpack.c.bf16 %v12314_v7, %v12313_v56  ;;  %v9167_v14 = vmul.f32 0.0, %v5041_v18  ;;  %v12319_v49 = vld [vmem:[#allocation209_spill] sm:$0xff]  ;;  %v12321_v7 = vld [vmem:[#allocation211_spill] sm:$0xff]  ;;  %v12371_v39 = vld [vmem:[#allocation30_spill] sm:$0xff] }
 0x3ac   : > { %3699 = vmatpush1.bf16.msra.mxu0 %v3556_v20  ;;  %v3244_v10 = vadd.f32 %v3243_v30, %v8927_v8  ;;  %v3450_v12 = vadd.f32 %v3449_v51, %v8922_v38  ;;  %3785 = vmatpush1.bf16.msra.mxu1 %v3558_v57  ;;  %v3562_v44 = vpack.c.bf16 %v12317_v25, %v12316_v15  ;;  %v12318_v20 = vld [vmem:[#allocation206_spill] sm:$0xff]  ;;  %v12320_v56 = vld [vmem:[#allocation205_spill] sm:$0xff]  ;;  %v12322_v57 = vld [vmem:[#allocation204_spill] sm:$0xff] }
 0x3ad   : > { %12315 = vst [vmem:[#allocation138_spill] sm:$0xff] %v9167_v14  ;;  %3700 = vmatprep.subr.bf16.mxu0 %v3561_v1  ;;  %v9173_v6 = vpop.eup %5050  ;;  %v3313_v60 = vadd.f32 %v3312_v4, %v8932_v46  ;;  %v3382_v59 = vadd.f32 %v3381_v27, %v8937_v41  ;;  %3786 = vmatprep.subr.bf16.mxu1 %v3563_v22  ;;  %v12323_v35 = vld [vmem:[#allocation207_spill] sm:$0xff]  ;;  %v12324_v25 = vld [vmem:[#allocation208_spill] sm:$0xff]  ;;  %v12325_v8 = vld [vmem:[#allocation210_spill] sm:$0xff] }
 0x3ae   : > { %v3565_v18 = vpack.c.bf16 %v12319_v49, %v12318_v20  ;;  %v3567_v30 = vpack.c.bf16 %v12321_v7, %v12320_v56  ;;  %v3245_v51 = vadd.f32 %v3244_v10, %v8947_v62  ;;  %v3451_v1 = vadd.f32 %v3450_v12, %v8942_v54  ;;  %v12326_v22 = vld [vmem:[#allocation214_spill] sm:$0xff]  ;;  %v12327_v20 = vld [vmem:[#allocation217_spill] sm:$0xff]  ;;  %v12329_v56 = vld [vmem:[#allocation219_spill] sm:$0xff] }
 0x3af   : > { %v3564_v15 = vpack.c.bf16 %v12323_v35, %v12322_v57  ;;  %v3566_v38 = vpack.c.bf16 %v12325_v8, %v12324_v25  ;;  %v3314_v4 = vadd.f32 %v3313_v60, %v8952_v40  ;;  %v3383_v27 = vadd.f32 %v3382_v59, %v8957_v0  ;;  %v12328_v41 = vld [vmem:[#allocation213_spill] sm:$0xff]  ;;  %v12331_v8 = vld [vmem:[#allocation212_spill] sm:$0xff]  ;;  %v12332_v57 = vld [vmem:[#allocation215_spill] sm:$0xff] }
 0x3b0   : > { %3701 = vmatpush1.bf16.msra.mxu0 %v3560_v31  ;;  %v3569_v49 = vpack.c.bf16 %v12327_v20, %v12326_v22  ;;  %v3571_v7 = vpack.c.bf16 %v12329_v56, %v12328_v41  ;;  %v9193_v10 = vmul.f32 0.0, %v5043_v17  ;;  %v3246_v12 = vadd.f32 %v3245_v51, %v8967_v52  ;;  %3787 = vmatpush1.bf16.msra.mxu1 %v3562_v44  ;;  %v12333_v31 = vld [vmem:[#allocation173_spill] sm:$0xff]  ;;  %v12334_v22 = vld [vmem:[#allocation216_spill] sm:$0xff]  ;;  %v12335_v20 = vld [vmem:[#allocation218_spill] sm:$0xff] }
 0x3b1   : > { %v3452_v35 = vadd.f32 %v3451_v1, %v8962_v16  ;;  %3702 = vmatprep.subr.bf16.mxu0 %v3565_v18  ;;  %v3568_v60 = vpack.c.bf16 %v12332_v57, %v12331_v8  ;;  %v3315_v59 = vadd.f32 %v3314_v4, %v8972_v63  ;;  %v3384_v25 = vadd.f32 %v3383_v27, %v12333_v31  ;;  %v12336_v41 = vld [vmem:[#allocation222_spill] sm:$0xff]  ;;  %v12337_v17 = vld [vmem:[#allocation225_spill] sm:$0xff]  ;;  %v12339_v52 = vld [vmem:[#allocation175_spill] sm:$0xff] }
 0x3b2   : > { %12330 = vst [vmem:[#allocation14_spill] sm:$0xff] %v9193_v10  ;;  %3788 = vmatprep.subr.bf16.mxu1 %v3567_v30  ;;  %v3570_v0 = vpack.c.bf16 %v12335_v20, %v12334_v22  ;;  %v3573_v56 = vpack.c.bf16 %v12337_v17, %v12336_v41  ;;  %v12338_v62 = vld [vmem:[#allocation177_spill] sm:$0xff]  ;;  %v12341_v18 = vld [vmem:[#allocation228_spill] sm:$0xff]  ;;  %v12343_v8 = vld [vmem:[#allocation223_spill] sm:$0xff] }
 0x3b3   : > { %v3247_v51 = vadd.f32 %v3246_v12, %v12338_v62  ;;  %v3453_v1 = vadd.f32 %v3452_v35, %v12339_v52  ;;  %v12340_v44 = vld [vmem:[#allocation221_spill] sm:$0xff]  ;;  %v12342_v40 = vld [vmem:[#allocation220_spill] sm:$0xff]  ;;  %v12344_v4 = vld [vmem:[#allocation178_spill] sm:$0xff]  ;;  %v9218_v12 = vmul.f32 0.0, %v9131_v36 }
 0x3b4   : > { %v3575_v16 = vpack.c.bf16 %v12341_v18, %v12340_v44  ;;  %v3572_v57 = vpack.c.bf16 %v12343_v8, %v12342_v40  ;;  %v3316_v63 = vadd.f32 %v3315_v59, %v12344_v4  ;;  %v12345_v27 = vld [vmem:[#allocation179_spill] sm:$0xff]  ;;  %3703 = vmatpush1.bf16.msra.mxu0 %v3564_v15  ;;  %v12346_v31 = vld [vmem:[#allocation224_spill] sm:$0xff]  ;;  %v12347_v22 = vld [vmem:[#allocation226_spill] sm:$0xff]  ;;  %3789 = vmatpush1.bf16.msra.mxu1 %v3566_v38 }
 0x3b5   : > { %v3385_v30 = vadd.f32 %v3384_v25, %v12345_v27  ;;  %v3574_v20 = vpack.c.bf16 %v12347_v22, %v12346_v31  ;;  %v12348_v54 = vld [vmem:[#allocation22_spill] sm:$0xff]  ;;  %v12349_v41 = vld [vmem:[#allocation69_spill] sm:$0xff]  ;;  %12350 = vst [vmem:[#allocation19_spill] sm:$0xff] %v9218_v12  ;;  %v12351_v35 = vld [vmem:[#allocation260_spill] sm:$0xff]  ;;  %3704 = vmatprep.subr.bf16.mxu0 %v3569_v49  ;;  %3790 = vmatprep.subr.bf16.mxu1 %v3571_v7 }
 0x3b6   : > { %v3577_v17 = vpack.c.bf16 %v12349_v41, %v12348_v54  ;;  %v3248_v62 = vadd.f32 %v3247_v51, %v12351_v35  ;;  %v12352_v44 = vld [vmem:[#allocation180_spill] sm:$0xff]  ;;  %v12354_v59 = vld [vmem:[#allocation29_spill] sm:$0xff]  ;;  %v12356_v27 = vld [vmem:[#allocation182_spill] sm:$0xff] }
 0x3b7   : > { %v3454_v18 = vadd.f32 %v3453_v1, %v12352_v44  ;;  %v12353_v40 = vld [vmem:[#allocation24_spill] sm:$0xff]  ;;  %v12355_v25 = vld [vmem:[#allocation261_spill] sm:$0xff]  ;;  %v3386_v4 = vadd.f32 %v3385_v30, %v12356_v27  ;;  %v12359_v41 = vld [vmem:[#allocation67_spill] sm:$0xff] }
 0x3b8   : > { %v3579_v8 = vpack.c.bf16 %v12354_v59, %v12353_v40  ;;  %v3317_v15 = vadd.f32 %v3316_v63, %v12355_v25  ;;  %v12357_v31 = vld [vmem:[#allocation229_spill] sm:$0xff]  ;;  %v12360_v36 = vld [vmem:[#allocation27_spill] sm:$0xff]  ;;  %v12362_v35 = vld [vmem:[#allocation184_spill] sm:$0xff]  ;;  %3705 = vmatpush1.bf16.msra.mxu0 %v3568_v60  ;;  %3791 = vmatpush1.bf16.msra.mxu1 %v3570_v0 }
 0x3b9   : > { %v12358_v22 = vld [vmem:[#allocation25_spill] sm:$0xff]  ;;  %v3578_v52 = vpack.c.bf16 %v12360_v36, %v12359_v41  ;;  %v3455_v1 = vadd.f32 %v3454_v18, %v12362_v35  ;;  %v12363_v38 = vld [vmem:[#allocation28_spill] sm:$0xff]  ;;  %v12364_v49 = vld [vmem:[#allocation34_spill] sm:$0xff]  ;;  %3706 = vmatprep.subr.bf16.mxu0 %v3573_v56  ;;  %3792 = vmatprep.subr.bf16.mxu1 %v3575_v16 }
 0x3ba   : > { %v3576_v54 = vpack.c.bf16 %v12358_v22, %v12357_v31  ;;  %v12361_v46 = vld [vmem:[#allocation181_spill] sm:$0xff]  ;;  %v3581_v44 = vpack.c.bf16 %v12364_v49, %v12363_v38  ;;  %v12366_v40 = vld [vmem:[#allocation70_spill] sm:$0xff]  ;;  %v12367_v63 = vld [vmem:[#allocation183_spill] sm:$0xff] }
 0x3bb   : > { %v3249_v51 = vadd.f32 %v3248_v62, %v12361_v46  ;;  %v3583_v59 = vpack.c.bf16 %v12366_v40, %v12365_v42  ;;  %v3318_v25 = vadd.f32 %v3317_v15, %v12367_v63  ;;  %v12368_v30 = vld [vmem:[#allocation185_spill] sm:$0xff]  ;;  %v12369_v27 = vld [vmem:[#allocation31_spill] sm:$0xff]  ;;  %v9243_v62 = vmul.f32 0.0, %v9145_v50  ;;  %v12375_v38 = vld [vmem:[#allocation186_spill] sm:$0xff] }
 0x3bc   : > { %v3387_v7 = vadd.f32 %v3386_v4, %v12368_v30  ;;  %v12370_v31 = vld [vmem:[#allocation33_spill] sm:$0xff]  ;;  %v12372_v41 = vld [vmem:[#allocation35_spill] sm:$0xff]  ;;  %v3456_v49 = vadd.f32 %v3455_v1, %v12375_v38  ;;  %v12378_v4 = vld [vmem:[#allocation188_spill] sm:$0xff]  ;;  %3707 = vmatpush1.bf16.msra.mxu0 %v3572_v57  ;;  %3793 = vmatpush1.bf16.msra.mxu1 %v3574_v20 }
 0x3bd   : > { %v3580_v22 = vpack.c.bf16 %v12370_v31, %v12369_v27  ;;  %v3582_v36 = vpack.c.bf16 %v12372_v41, %v12371_v39  ;;  %12373 = vst [vmem:[#allocation193_spill] sm:$0xff] %v9243_v62  ;;  %v12374_v18 = vld [vmem:[#allocation187_spill] sm:$0xff]  ;;  %v12377_v15 = vld [vmem:[#allocation41_spill] sm:$0xff]  ;;  %v3319_v60 = vadd.f32 %v3318_v25, %v12378_v4  ;;  %v12379_v30 = vld [vmem:[#allocation190_spill] sm:$0xff]  ;;  %3708 = vmatprep.subr.bf16.mxu0 %v3577_v17 }
 0x3be   : > { %v3250_v46 = vadd.f32 %v3249_v51, %v12374_v18  ;;  %v12376_v42 = vld [vmem:[#allocation39_spill] sm:$0xff]  ;;  %v3388_v63 = vadd.f32 %v3387_v7, %v12379_v30  ;;  %v12380_v27 = vld [vmem:[#allocation38_spill] sm:$0xff]  ;;  %v12382_v41 = vld [vmem:[#allocation37_spill] sm:$0xff]  ;;  %3794 = vmatprep.subr.bf16.mxu1 %v3579_v8 }
 0x3bf   : > { %v3585_v40 = vpack.c.bf16 %v12377_v15, %v12376_v42  ;;  %v12381_v31 = vld [vmem:[#allocation42_spill] sm:$0xff]  ;;  %v12383_v50 = vld [vmem:[#allocation40_spill] sm:$0xff]  ;;  %v12384_v5 = vld [vmem:[#allocation189_spill] sm:$0xff]  ;;  %v3320_v25 = vadd.f32 %v3319_v60, %v9074_v47 }
 0x3c0   : > { %v3587_v39 = vpack.c.bf16 %v12381_v31, %v12380_v27  ;;  %v3251_v51 = vadd.f32 %v3250_v46, %v12384_v5  ;;  %v12385_v18 = vld [vmem:[#allocation192_spill] sm:$0xff]  ;;  %v12387_v56 = vld [vmem:[#allocation73_spill] sm:$0xff]  ;;  %v12389_v42 = vld [vmem:[#allocation46_spill] sm:$0xff]  ;;  %v3389_v16 = vadd.f32 %v3388_v63, %v9085_v55  ;;  %v9268_v46 = vmul.f32 0.0, %v9159_v11  ;;  %3709 = vmatpush1.bf16.msra.mxu0 %v3576_v54  ;;  %3795 = vmatpush1.bf16.msra.mxu1 %v3578_v52 }
 0x3c1   : > { %v3457_v1 = vadd.f32 %v3456_v49, %v12385_v18  ;;  %v12386_v0 = vld [vmem:[#allocation36_spill] sm:$0xff]  ;;  %v12388_v19 = vld [vmem:[#allocation45_spill] sm:$0xff]  ;;  %v12390_v7 = vld [vmem:[#allocation47_spill] sm:$0xff]  ;;  %v3321_v57 = vadd.f32 %v3320_v25, %v9119_v37  ;;  %3710 = vmatprep.subr.bf16.mxu0 %v3581_v44  ;;  %3796 = vmatprep.subr.bf16.mxu1 %v3583_v59 }
 0x3c2   : > { %v12391_v27 = vld [vmem:[#allocation49_spill] sm:$0xff]  ;;  %v12392_v30 = vld [vmem:[#allocation43_spill] sm:$0xff]  ;;  %v12393_v35 = vld [vmem:[#allocation44_spill] sm:$0xff]  ;;  %12394 = vst [vmem:[#allocation227_spill] sm:$0xff] %v9268_v46  ;;  %v3252_v49 = vadd.f32 %v3251_v51, %v9113_v45  ;;  %v3390_v63 = vadd.f32 %v3389_v16, %v9133_v29 }
 0x3c3   : > { %v3458_v38 = vadd.f32 %v3457_v1, %v9097_v58  ;;  %v12395_v15 = vld [vmem:[#allocation74_spill] sm:$0xff]  ;;  %v12396_v60 = vld [vmem:[#allocation48_spill] sm:$0xff]  ;;  %v12397_v31 = vld [vmem:[#allocation77_spill] sm:$0xff]  ;;  %v3322_v25 = vadd.f32 %v3321_v57, %v9147_v43  ;;  %v12442_v43 = vpack.c.bf16 %v12389_v42, %v12388_v19 }
 0x3c4   : > { %v12398_v55 = vld [vmem:[#allocation79_spill] sm:$0xff]  ;;  %v12399_v47 = vld [vmem:[#allocation53_spill] sm:$0xff]  ;;  %v12400_v11 = vld [vmem:[#allocation54_spill] sm:$0xff]  ;;  %v3253_v51 = vadd.f32 %v3252_v49, %v9141_v32  ;;  %v3391_v8 = vadd.f32 %v3390_v63, %v9167_v14  ;;  %v9293_v49 = vmul.f32 0.0, %v9173_v6  ;;  %3711 = vmatpush1.bf16.msra.mxu0 %v3580_v22  ;;  %3797 = vmatpush1.bf16.msra.mxu1 %v3582_v36 }
 0x3c5   : > { %v3459_v1 = vadd.f32 %v3458_v38, %v9139_v2  ;;  %v12401_v20 = vld [vmem:[#allocation50_spill] sm:$0xff]  ;;  %v12402_v17 = vld [vmem:[#allocation55_spill] sm:$0xff]  ;;  %v12404_v5 = vld [vmem:[#allocation52_spill] sm:$0xff]  ;;  %v3323_v54 = vadd.f32 %v3322_v25, %v9243_v62  ;;  %3712 = vmatprep.subr.bf16.mxu0 %v3585_v40  ;;  %3798 = vmatprep.subr.bf16.mxu1 %v3587_v39  ;;  %v12462_v53 = vpack.c.bf16 %v12398_v55, %v12397_v31 }
 0x3c6   : > { %v12403_v58 = vld [vmem:[#allocation51_spill] sm:$0xff]  ;;  %v12405_v16 = vld [vmem:[#allocation57_spill] sm:$0xff]  ;;  %v12408_v18 = vld [vmem:[#allocation60_spill] sm:$0xff]  ;;  %12409 = vst [vmem:[#allocation233_spill] sm:$0xff] %v9293_v49  ;;  %v3254_v38 = vadd.f32 %v3253_v51, %v9218_v12  ;;  %v3392_v63 = vadd.f32 %v3391_v8, %v9268_v46 }
 0x3c7   : > { %v12406_v4 = vld [vmem:[#allocation61_spill] sm:$0xff]  ;;  %v12407_v37 = vld [vmem:[#allocation59_spill] sm:$0xff]  ;;  %v3460_v45 = vadd.f32 %v3459_v1, %v9193_v10  ;;  %v12411_v57 = vld [vmem:[#allocation78_spill] sm:$0xff]  ;;  %v3324_v21 = vrot.slane %v3323_v54, 4  ;;  %v12483_v40 = vpack.c.bf16 %v12404_v5, %v12403_v58 }
 0x3c8   : > { %v3255_v3 = vrot.slane %v3254_v38, 4  ;;  %v3393_v25 = vrot.slane %v3392_v63, 4  ;;  %v12426_v44 = vld [vmem:[#allocation91_spill] sm:$0xff]  ;;  %v12427_v1 = vld [vmem:[#allocation94_spill] sm:$0xff]  ;;  %v12429_v10 = vld [vmem:[#allocation85_spill] sm:$0xff] }
 0x3c9   : > { %v3461_v51 = vadd.f32 %v3460_v45, %v9293_v49  ;;  %v3325_v32 = vadd.f32 %v3324_v21, %v3323_v54  ;;  %v12428_v22 = vld [vmem:[#allocation75_spill] sm:$0xff]  ;;  %v12430_v46 = vld [vmem:[#allocation81_spill] sm:$0xff]  ;;  %v12431_v8 = vld [vmem:[#allocation84_spill] sm:$0xff]  ;;  %v12436_v21 = vpack.c.bf16 %v12383_v50, %v12382_v41 }
 0x3ca   : > { %v3256_v14 = vadd.f32 %v3255_v3, %v3254_v38  ;;  %v3394_v12 = vadd.f32 %v3393_v25, %v3392_v63  ;;  %v12433_v36 = vld [vmem:[#allocation101_spill] sm:$0xff]  ;;  %v12438_v54 = vld [vmem:[#allocation95_spill] sm:$0xff]  ;;  %v12453_v52 = vld [vmem:[#allocation108_spill] sm:$0xff] }
 0x3cb   : > { %v3462_v2 = vrot.slane %v3461_v51, 4  ;;  %v3326_v45 = vrot.slane %v3325_v32, 2  ;;  %3713 = vmatpush1.bf16.msra.mxu0 %v12436_v21  ;;  %v12437_v39 = vld [vmem:[#allocation89_spill] sm:$0xff]  ;;  %v12449_v59 = vld [vmem:[#allocation255_spill] sm:$0xff]  ;;  %v12469_v25 = vld [vmem:[#allocation116_spill] sm:$0xff] }
 0x3cc   : > { %v3257_v29 = vrot.slane %v3256_v14, 2  ;;  %v3395_v49 = vrot.slane %v3394_v12, 2  ;;  %3714 = vmatprep.subr.bf16.mxu0 %v12442_v43  ;;  %v12445_v50 = vld [vmem:[#allocation105_spill] sm:$0xff]  ;;  %v12452_v42 = vld [vmem:[#allocation259_spill] sm:$0xff]  ;;  %v12475_v41 = vld [vmem:[#allocation130_spill] sm:$0xff] }
 0x3cd   : > { %v3463_v3 = vadd.f32 %v3462_v2, %v3461_v51  ;;  %v12441_v51 = vpack.c.bf16 %v12387_v56, %v12386_v0  ;;  %v12446_v21 = vld [vmem:[#allocation257_spill] sm:$0xff]  ;;  %v3327_v63 = vadd.f32 %v3326_v45, %v3325_v32  ;;  %v12473_v31 = vld [vmem:[#allocation127_spill] sm:$0xff]  ;;  %v12489_v0 = vpack.c.bf16 %v12408_v18, %v12407_v37  ;;  %v12495_v18 = vld [vmem:[#allocation56_spill] sm:$0xff] }
 0x3ce   : > { %v3258_v6 = vadd.f32 %v3257_v29, %v3256_v14  ;;  %v3396_v38 = vadd.f32 %v3395_v49, %v3394_v12  ;;  %v12447_v29 = vpack.c.bf16 %v12391_v27, %v12390_v7  ;;  %v12448_v14 = vld [vmem:[#allocation100_spill] sm:$0xff]  ;;  %v12456_v7 = vpack.c.bf16 %v12393_v35, %v12392_v30  ;;  %v12458_v49 = vld [vmem:[#allocation111_spill] sm:$0xff]  ;;  %v12586_v58 = vld [vmem:[#allocation90_spill] sm:$0xff] }
 0x3cf   : > { %v3464_v2 = vrot.slane %v3463_v3, 2  ;;  %3799 = vmatpush1.bf16.msra.mxu1 %v12441_v51  ;;  %v12451_v51 = vld [vmem:[#allocation106_spill] sm:$0xff]  ;;  %v3328_v32 = vrot.slane %v3327_v63, 1  ;;  %v12465_v30 = vld [vmem:[#allocation119_spill] sm:$0xff]  ;;  %v12474_v35 = vld [vmem:[#allocation128_spill] sm:$0xff] }
 0x3d0   : > { %3800 = vmatprep.subr.bf16.mxu1 %v12447_v29  ;;  %v3259_v19 = vrot.slane %v3258_v6, 1  ;;  %v3397_v12 = vrot.slane %v3396_v38, 1  ;;  %3715 = vmatpush1.bf16.msra.mxu0 %v12456_v7  ;;  %v12466_v7 = vld [vmem:[#allocation122_spill] sm:$0xff]  ;;  %v12476_v62 = vld [vmem:[#allocation123_spill] sm:$0xff] }
 0x3d1   : > { %v3465_v43 = vadd.f32 %v3464_v2, %v3463_v3  ;;  %v12461_v2 = vpack.c.bf16 %v12396_v60, %v12395_v15  ;;  %3716 = vmatprep.subr.bf16.mxu0 %v12462_v53  ;;  %v3329_v45 = vadd.f32 %v3328_v32, %v3327_v63  ;;  %v12470_v60 = vld [vmem:[#allocation117_spill] sm:$0xff]  ;;  %v12472_v53 = vld [vmem:[#allocation124_spill] sm:$0xff]  ;;  %v12505_v33 = vld [vmem:[#allocation63_spill] sm:$0xff] }
 0x3d2   : > { %v3260_v56 = vadd.f32 %v3259_v19, %v3258_v6  ;;  %v3398_v27 = vadd.f32 %v3397_v12, %v3396_v38  ;;  %v12467_v6 = vpack.c.bf16 %v12400_v11, %v12399_v47  ;;  %v12468_v19 = vld [vmem:[#allocation114_spill] sm:$0xff]  ;;  %v12477_v63 = vld [vmem:[#allocation125_spill] sm:$0xff]  ;;  %v12478_v47 = vpack.c.bf16 %v12402_v17, %v12401_v20  ;;  %v12481_v15 = vld [vmem:[#allocation132_spill] sm:$0xff] }
 0x3d3   : > { %v3466_v3 = vrot.slane %v3465_v43, 1  ;;  %3801 = vmatpush1.bf16.msra.mxu1 %v12461_v2  ;;  %v12471_v2 = vld [vmem:[#allocation121_spill] sm:$0xff]  ;;  %v12479_v11 = vld [vmem:[#allocation126_spill] sm:$0xff]  ;;  %v12485_v20 = vld [vmem:[#allocation131_spill] sm:$0xff]  ;;  %v12507_v37 = vpack.c.bf16 %v12505_v33, %v12506_v28 }
 0x3d4   : > { %3802 = vmatprep.subr.bf16.mxu1 %v12467_v6  ;;  %v3472_v32 = vcombine.low %v3260_v56, %v3329_v45  ;;  %3717 = vmatpush1.bf16.msra.mxu0 %v12478_v47  ;;  %v12480_v12 = vld [vmem:[#allocation129_spill] sm:$0xff]  ;;  %v12484_v56 = vpack.c.bf16 %v12406_v4, %v12405_v16  ;;  %v12487_v47 = vld [vmem:[#allocation134_spill] sm:$0xff]  ;;  %v12488_v38 = vld [vmem:[#allocation11_spill] sm:$0xff] }
 0x3d5   : > { %v3467_v55 = vadd.f32 %v3466_v3, %v3465_v43  ;;  %v12482_v3 = vld [vmem:[#allocation136_spill] sm:$0xff]  ;;  %v12486_v17 = vld [vmem:[#allocation133_spill] sm:$0xff]  ;;  %v12508_v26 = vld [vmem:[#allocation71_spill] sm:$0xff] }
 0x3d6   : > { %3718 = vmatprep.subr.bf16.mxu0 %v12484_v56  ;;  %v3480_v43 = vrot.slane %v3472_v32, %v12488_v38  ;;  %v12521_v33 = vld [vmem:[#allocation167_spill] sm:$0xff]  ;;  %v12523_v56 = vld [vmem:[#allocation166_spill] sm:$0xff]  ;;  %v12543_v4 = vld [vmem:[#allocation112_spill] sm:$0xff] }
 0x3d7   : > { %v3473_v29 = vcombine.low %v3398_v27, %v3467_v55  ;;  %3803 = vmatpush1.bf16.msra.mxu1 %v12483_v40  ;;  %v12515_v27 = vld [vmem:[#allocation82_spill] sm:$0xff]  ;;  %v12569_v16 = vld [vmem:[#allocation21_spill] sm:$0xff] }
 0x3d8   : > { %3804 = vmatprep.subr.bf16.mxu1 %v12489_v0  ;;  %v12496_v0 = vpack.c.bf16 %v12411_v57, %v12495_v18  ;;  %v12509_v57 = vld [vmem:[#allocation62_spill] sm:$0xff] }
 0x3d9   : > { %v3487_v55 = vrot.slane %v3473_v29, %v12488_v38  ;;  %v12510_v18 = vpack.c.bf16 %v12508_v26, %v12509_v57  ;;  %v12517_v29 = vpack.c.bf16 %v12515_v27, %v12516_v61  ;;  %v12532_v45 = vld [vmem:[#allocation66_spill] sm:$0xff] }
 0x3da   : > { %3719 = vmatpush1.bf16.msra.mxu0 %v12496_v0  ;;  %v12551_v6 = vld [vmem:[#allocation182_spill] sm:$0xff]  ;;  %v12572_v0 = vld [vmem:[#allocation17_spill] sm:$0xff] }
 0x3db   : > { %v3488_v32 = vcombine.low %v3480_v43, %v3487_v55  ;;  %3805 = vmatpush1.bf16.msra.mxu1 %v12507_v37  ;;  %3720 = vmatprep.subr.bf16.mxu0 %v12510_v18  ;;  %v12533_v43 = vld [vmem:[#allocation80_spill] sm:$0xff]  ;;  %v12554_v40 = vld [vmem:[#allocation86_spill] sm:$0xff]  ;;  %v12576_v37 = vld [vmem:[#allocation233_spill] sm:$0xff] }
 0x3dc   : > { %3806 = vmatprep.subr.bf16.mxu1 %v12517_v29  ;;  %v12534_v28 = vpack.c.bf16 %v12532_v45, %v12533_v43  ;;  %v12544_v55 = vld [vmem:[#allocation72_spill] sm:$0xff]  ;;  %v12547_v45 = vld [vmem:[#allocation87_spill] sm:$0xff]  ;;  %v12570_v27 = vld [vmem:[#allocation18_spill] sm:$0xff] }
 0x3dd   : > { %v3495_v5 = vrot.slane %v3488_v32, %v12488_v38  ;;  %v12545_v29 = vld [vmem:[#allocation64_spill] sm:$0xff]  ;;  %v12555_v32 = vld [vmem:[#allocation83_spill] sm:$0xff]  ;;  %v12575_v26 = vld [vmem:[#allocation14_spill] sm:$0xff] }
 0x3de   : > { %3721 = vmatpush1.bf16.msra.mxu0 %v12534_v28  ;;  %v12546_v34 = vpack.c.bf16 %v12544_v55, %v12545_v29  ;;  %v12548_v43 = vld [vmem:[#allocation76_spill] sm:$0xff]  ;;  %v12556_v18 = vpack.c.bf16 %v12554_v40, %v12555_v32  ;;  %v12568_v32 = vld [vmem:[#allocation189_spill] sm:$0xff]  ;;  %v12574_v29 = vpack.c.bf16 %v12429_v10, %v12428_v22  ;;  %v12580_v38 = vld [vmem:[#allocation227_spill] sm:$0xff]  ;;  %v12583_v10 = vpack.c.bf16 %v12427_v1, %v12426_v44 }
 0x3df   : > { %v3497_v61 = vadd.f32 %v3495_v5, %v12543_v4  ;;  %v12549_v28 = vpack.c.bf16 %v12547_v45, %v12548_v43  ;;  %v4527_v57 = vld [vmem:[%s8753_s16] ss:$16 sps:$4 sm:$0xff]   ;;  %v12571_v5 = vld [vmem:[#allocation135_spill] sm:$0xff]  ;;  %v12573_v55 = vld [vmem:[#allocation193_spill] sm:$0xff]  ;;  %v12581_v4 = vpack.c.bf16 %v12431_v8, %v12430_v46  ;;  %v12582_v45 = vpack.c.bf16 %v12438_v54, %v12437_v39 }
 0x3e0   : > { %3807 = vmatpush1.bf16.msra.mxu1 %v12546_v34  ;;  %v12584_v22 = vld [vmem:[#allocation88_spill] sm:$0xff]  ;;  %v4532_v34 = vld [vmem:[%s8753_s16 + $0xc] ss:$16 sps:$4 sm:$0xff]   ;;  %v12594_v44 = vld [vmem:[#allocation26_spill] sm:$0xff] }
 0x3e1   : > { %3722 = vmatprep.subr.bf16.mxu0 %v12549_v28  ;;  %3808 = vmatprep.subr.bf16.mxu1 %v12556_v18  ;;  %3502 = vst.msk [vmem:[#allocation3] sm:$0xf] %vm5879_vm2, %v3497_v61  ;;  %v12578_v28 = vld [vmem:[#allocation19_spill] sm:$0xff]  ;;  %v12579_v18 = vld [vmem:[#allocation138_spill] sm:$0xff]  ;;  %v12587_v43 = vld [vmem:[#allocation92_spill] sm:$0xff] }
 0x3e2   : > { %3723 = vmatpush1.bf16.msra.mxu0 %v12574_v29  ;;  %v12585_v29 = vld [vmem:[#allocation93_spill] sm:$0xff]  ;;  %v3610_v40 = vpack.c.bf16 %v12587_v43, %v12586_v58  ;;  %v12590_v39 = vld [vmem:[#allocation103_spill] sm:$0xff]  ;;  %v12593_v1 = vld [vmem:[#allocation96_spill] sm:$0xff] }
 0x3e3   : > { %3735 = vmatprep.subr.bf16.mxu0 %v12582_v45  ;;  %v3608_v61 = vpack.c.bf16 %v12585_v29, %v12584_v22  ;;  %v12588_v46 = vld [vmem:[#allocation97_spill] sm:$0xff]  ;;  %v12591_v54 = vld [vmem:[#allocation99_spill] sm:$0xff]  ;;  %v3612_v45 = vpack.c.bf16 %v12594_v44, %v12593_v1  ;;  %v12596_v22 = vld [vmem:[#allocation98_spill] sm:$0xff] }
 0x3e4   : > { %3809 = vmatpush1.bf16.msra.mxu1 %v12581_v4  ;;  %v12589_v8 = vpack.c.bf16 %v12433_v36, %v12588_v46  ;;  %v12592_v4 = vpack.c.bf16 %v12590_v39, %v12591_v54  ;;  %v12599_v43 = vld [vmem:[#allocation102_spill] sm:$0xff]  ;;  %v12601_v36 = vpack.c.bf16 %v12446_v21, %v12445_v50  ;;  %v12603_v29 = vld [vmem:[#allocation104_spill] sm:$0xff]  ;;  %v12605_v46 = vpack.c.bf16 %v12453_v52, %v12452_v42  ;;  %v12607_v39 = vld [vmem:[#allocation109_spill] sm:$0xff] }
 0x3e5   : > { %3821 = vmatprep.subr.bf16.mxu1 %v12583_v10  ;;  %3725 = vmatmul.mubr.bf16.vlgmr.msra.gmra.mrb[128].mxu0 %v4527_v57  ;;  %v12595_v10 = vld [vmem:[#allocation32_spill] sm:$0xff]  ;;  %v12611_v21 = vld [vmem:[#allocation110_spill] sm:$0xff]  ;;  %v12612_v1 = vld [vmem:[#allocation107_spill] sm:$0xff]  ;;  %v12617_v52 = vpack.c.bf16 %v12466_v7, %v12465_v30  ;;  %v12618_v42 = vpack.c.bf16 %v12469_v25, %v12468_v19  ;;  %v12622_v30 = vpack.c.bf16 %v12477_v63, %v12476_v62 }
 0x3e6   : > { %3736 = vmatpush1.bf16.msra.mxu0 %v3608_v61  ;;  %3767 = vmatprep.mubr.bf16.mxu0 %v4532_v34  ;;  %v12597_v58 = vpack.c.bf16 %v12595_v10, %v12596_v22  ;;  %v12602_v61 = vpack.c.bf16 %v12449_v59, %v12448_v14  ;;  %v12613_v59 = vpack.c.bf16 %v12611_v21, %v12612_v1  ;;  %v12614_v14 = vld [vmem:[#allocation118_spill] sm:$0xff]  ;;  %v12615_v44 = vld [vmem:[#allocation115_spill] sm:$0xff]  ;;  %v12662_v1 = vld [vmem:[#allocation168_spill] sm:$0xff] }
 0x3e7   : > { %3811 = vmatmul.mubr.bf16.vlgmr.msra.gmra.mrb[128].mxu1 %v4527_v57  ;;  %3737 = vmatprep.subr.bf16.mxu0 %v12589_v8  ;;  %v12598_v57 = vld [vmem:[#allocation256_spill] sm:$0xff]  ;;  %v12606_v8 = vld [vmem:[#allocation113_spill] sm:$0xff]  ;;  %v12621_v10 = vpack.c.bf16 %v12475_v41, %v12474_v35  ;;  %v12623_v25 = vpack.c.bf16 %v12480_v12, %v12479_v11  ;;  %v12624_v7 = vpack.c.bf16 %v12265_v48, %v12481_v15  ;;  %v12636_v63 = vld [vmem:[#allocation143_spill] sm:$0xff] }
 0x3e8   : > { %3822 = vmatpush1.bf16.msra.mxu1 %v3610_v40  ;;  %3853 = vmatprep.mubr.bf16.mxu1 %v4532_v34  ;;  %v12600_v40 = vpack.c.bf16 %v12598_v57, %v12599_v43  ;;  %v12604_v34 = vpack.c.bf16 %v12451_v51, %v12603_v29  ;;  %v12608_v54 = vpack.c.bf16 %v12606_v8, %v12607_v39  ;;  %v12628_v35 = vld [vmem:[#allocation140_spill] sm:$0xff]  ;;  %v12633_v15 = vld [vmem:[#allocation141_spill] sm:$0xff]  ;;  %v12637_v11 = vld [vmem:[#allocation142_spill] sm:$0xff] }
 0x3e9   : > { %3823 = vmatprep.subr.bf16.mxu1 %v12592_v4  ;;  %v12609_v4 = vld [vmem:[#allocation258_spill] sm:$0xff]  ;;  %v12616_v51 = vpack.c.bf16 %v12614_v14, %v12615_v44  ;;  %v12625_v19 = vpack.c.bf16 %v12271_v23, %v12482_v3  ;;  %v12626_v41 = vpack.c.bf16 %v12486_v17, %v12485_v20  ;;  %v12627_v62 = vpack.c.bf16 %v12266_v9, %v12487_v47  ;;  %v12639_v3 = vld [vmem:[#allocation149_spill] sm:$0xff]  ;;  %v12640_v20 = vld [vmem:[#allocation147_spill] sm:$0xff] }
 0x3ea   : > { %3738 = vmatpush1.bf16.msra.mxu0 %v3612_v45  ;;  %v12610_v50 = vpack.c.bf16 %v12458_v49, %v12609_v4  ;;  %v12619_v49 = vpack.c.bf16 %v12471_v2, %v12470_v60  ;;  %v12620_v45 = vpack.c.bf16 %v12473_v31, %v12472_v53  ;;  %v12629_v60 = vpack.c.bf16 %v8812_v13, %v12628_v35  ;;  %v12630_v2 = vld [vmem:[#allocation145_spill] sm:$0xff]  ;;  %v12631_v53 = vld [vmem:[#allocation144_spill] sm:$0xff]  ;;  %v12634_v31 = vld [vmem:[#allocation139_spill] sm:$0xff] }
 0x3eb   : > { %3739 = vmatprep.subr.bf16.mxu0 %v12600_v40  ;;  %v12632_v48 = vpack.c.bf16 %v12630_v2, %v12631_v53  ;;  %v12635_v23 = vpack.c.bf16 %v12633_v15, %v12634_v31  ;;  %v12638_v12 = vpack.c.bf16 %v12636_v63, %v12637_v11  ;;  %v12641_v9 = vpack.c.bf16 %v12639_v3, %v12640_v20  ;;  %v12642_v17 = vld [vmem:[#allocation150_spill] sm:$0xff]  ;;  %v12644_v47 = vld [vmem:[#allocation152_spill] sm:$0xff]  ;;  %v12647_v57 = vld [vmem:[#allocation151_spill] sm:$0xff] }
 0x3ec   : > { %3824 = vmatpush1.bf16.msra.mxu1 %v12597_v58  ;;  %v12643_v13 = vpack.c.bf16 %v8862_v24, %v12642_v17  ;;  %v12645_v22 = vld [vmem:[#allocation146_spill] sm:$0xff]  ;;  %v12648_v43 = vld [vmem:[#allocation148_spill] sm:$0xff]  ;;  %v12659_v4 = vld [vmem:[#allocation157_spill] sm:$0xff] }
 0x3ed   : > { %3825 = vmatprep.subr.bf16.mxu1 %v12601_v36  ;;  %v12646_v58 = vpack.c.bf16 %v12644_v47, %v12645_v22  ;;  %v12649_v40 = vpack.c.bf16 %v12647_v57, %v12648_v43  ;;  %v12650_v36 = vld [vmem:[#allocation160_spill] sm:$0xff]  ;;  %v12656_v39 = vld [vmem:[#allocation158_spill] sm:$0xff]  ;;  %v12681_v2 = vld [vmem:[#allocation173_spill] sm:$0xff] }
 0x3ee   : > { %3740 = vmatpush1.bf16.msra.mxu0 %v12602_v61  ;;  %v12651_v61 = vld [vmem:[#allocation154_spill] sm:$0xff]  ;;  %v12665_v44 = vld [vmem:[#allocation164_spill] sm:$0xff]  ;;  %v12682_v53 = vld [vmem:[#allocation171_spill] sm:$0xff] }
 0x3ef   : > { %3741 = vmatprep.subr.bf16.mxu0 %v12605_v46  ;;  %v12652_v29 = vpack.c.bf16 %v12650_v36, %v12651_v61  ;;  %v12654_v46 = vld [vmem:[#allocation156_spill] sm:$0xff]  ;;  %v12678_v35 = vld [vmem:[#allocation174_spill] sm:$0xff]  ;;  %v12691_v3 = vld [vmem:[#allocation177_spill] sm:$0xff] }
 0x3f0   : > { %3826 = vmatpush1.bf16.msra.mxu1 %v12604_v34  ;;  %v12653_v34 = vld [vmem:[#allocation159_spill] sm:$0xff]  ;;  %v12685_v15 = vld [vmem:[#allocation178_spill] sm:$0xff]  ;;  %v12688_v63 = vld [vmem:[#allocation180_spill] sm:$0xff] }
 0x3f1   : > { %3827 = vmatprep.subr.bf16.mxu1 %v12608_v54  ;;  %v12655_v8 = vpack.c.bf16 %v12653_v34, %v12654_v46  ;;  %v12657_v54 = vld [vmem:[#allocation153_spill] sm:$0xff]  ;;  %v12696_v47 = vld [vmem:[#allocation183_spill] sm:$0xff]  ;;  %v12699_v57 = vld [vmem:[#allocation186_spill] sm:$0xff] }
 0x3f2   : > { %3742 = vmatpush1.bf16.msra.mxu0 %v12610_v50  ;;  %v12658_v24 = vpack.c.bf16 %v12656_v39, %v12657_v54  ;;  %v12660_v50 = vld [vmem:[#allocation155_spill] sm:$0xff]  ;;  %v12702_v36 = vld [vmem:[#allocation181_spill] sm:$0xff] }
 0x3f3   : > { %3743 = vmatprep.subr.bf16.mxu0 %v12616_v51  ;;  %v12661_v21 = vpack.c.bf16 %v12659_v4, %v12660_v50  ;;  %v12666_v51 = vpack.c.bf16 %v12521_v33, %v12665_v44  ;;  %v12707_v46 = vld [vmem:[#allocation191_spill] sm:$0xff]  ;;  %v12710_v54 = vld [vmem:[#allocation137_spill] sm:$0xff]  ;;  %v9692_v50 = vld [vmem:[%s390_s8] sm:$0xff]  ;;  %v12714_v44 = vpack.c.bf16 %v12571_v5, %v12570_v27  ;;  %v12719_v5 = vpack.c.bf16 %v12580_v38, %v12579_v18 }
 0x3f4   : > { %3828 = vmatpush1.bf16.msra.mxu1 %v12613_v59  ;;  %v12663_v59 = vld [vmem:[#allocation162_spill] sm:$0xff]  ;;  %v12722_v18 = vld [vmem:[#allocation13_spill] sm:$0xff] }
 0x3f5   : > { %3829 = vmatprep.subr.bf16.mxu1 %v12617_v52  ;;  %v12664_v14 = vpack.c.bf16 %v12662_v1, %v12663_v59  ;;  %v12667_v52 = vld [vmem:[#allocation161_spill] sm:$0xff]  ;;  %v9696_v1 = vld [vmem:[%s390_s8 + $0x8] sm:$0xff]  ;;  %v12721_v38 = vld [vmem:[#allocation234_spill] sm:$0xff] }
 0x3f6   : > { %3744 = vmatpush1.bf16.msra.mxu0 %v12618_v42  ;;  %v12668_v42 = vpack.c.bf16 %v12523_v56, %v12667_v52  ;;  %v12683_v56 = vpack.c.bf16 %v12681_v2, %v12682_v53  ;;  %v9698_v59 = vld [vmem:[%s390_s8 + $0x18] sm:$0xff] }
 0x3f7   : > { %3745 = vmatprep.subr.bf16.mxu0 %v12620_v45  ;;  %v12670_v45 = vld [vmem:[#allocation163_spill] sm:$0xff] }
 0x3f8   : > { %3830 = vmatpush1.bf16.msra.mxu1 %v12619_v49  ;;  %v12669_v49 = vld [vmem:[#allocation165_spill] sm:$0xff] }
 0x3f9   : > { %3831 = vmatprep.subr.bf16.mxu1 %v12621_v10  ;;  %v12671_v10 = vpack.c.bf16 %v12669_v49, %v12670_v45  ;;  %v12717_v49 = vld [vmem:[#allocation15_spill] sm:$0xff]  ;;  %v3515_v45 = vrot.slane %v12722_v18, %v12721_v38 }
 0x3fa   : > { %3746 = vmatpush1.bf16.msra.mxu0 %v12622_v30  ;;  %v12672_v30 = vld [vmem:[#allocation176_spill] sm:$0xff]  ;;  %v12718_v27 = vpack.c.bf16 %v12578_v28, %v12717_v49  ;;  %v4537_v28 = vld [vmem:[%s9106_s27] sm:$0xff]  }
 0x3fb   : > { %3747 = vmatprep.subr.bf16.mxu0 %v12624_v7 }
 0x3fc   : > { %3832 = vmatpush1.bf16.msra.mxu1 %v12623_v25  ;;  %v12673_v25 = vld [vmem:[#allocation170_spill] sm:$0xff] }
 0x3fd   : > { %3833 = vmatprep.subr.bf16.mxu1 %v12625_v19  ;;  %v12674_v7 = vpack.c.bf16 %v12672_v30, %v12673_v25  ;;  %v12675_v19 = vld [vmem:[#allocation175_spill] sm:$0xff] }
 0x3fe   : > { %3748 = vmatpush1.bf16.msra.mxu0 %v12626_v41  ;;  %v12676_v41 = vld [vmem:[#allocation172_spill] sm:$0xff]  ;;  %v12724_v25 = vld [vmem:[#allocation235_spill] sm:$0xff] }
 0x3ff   : > { %3749 = vmatprep.subr.bf16.mxu0 %v12629_v60  ;;  %v12679_v60 = vld [vmem:[#allocation169_spill] sm:$0xff] }
 0x400   : > { %3834 = vmatpush1.bf16.msra.mxu1 %v12627_v62  ;;  %v12677_v62 = vpack.c.bf16 %v12675_v19, %v12676_v41  ;;  %v12680_v33 = vpack.c.bf16 %v12678_v35, %v12679_v60  ;;  %v12725_v19 = vld [vmem:[#allocation237_spill] sm:$0xff]  ;;  %v4072_v35 = vunpack.c.l.bf16 %v9692_v50  ;;  %v3532_v60 = vmul.f32 0.0, %v3515_v45 }
 0x401   : > { %3835 = vmatprep.subr.bf16.mxu1 %v12632_v48  ;;  %v12684_v48 = vld [vmem:[#allocation261_spill] sm:$0xff]  ;;  %v3527_v41 = vrot.slane %v12722_v18, %v12725_v19 }
 0x402   : > { %3750 = vmatpush1.bf16.msra.mxu0 %v12635_v23  ;;  %v12686_v31 = vpack.c.bf16 %v12684_v48, %v12685_v15  ;;  %v12687_v23 = vld [vmem:[#allocation184_spill] sm:$0xff] }
 0x403   : > { %3751 = vmatprep.subr.bf16.mxu0 %v12641_v9  ;;  %v12689_v11 = vpack.c.bf16 %v12687_v23, %v12688_v63  ;;  %v12693_v9 = vld [vmem:[#allocation179_spill] sm:$0xff]  ;;  %v3535_v15 = vmul.f32 0.0, %v3527_v41  ;;  %v4046_v63 = vstv %s3884_s18 }
 0x404   : > { %3836 = vmatpush1.bf16.msra.mxu1 %v12638_v12  ;;  %v12690_v12 = vld [vmem:[#allocation260_spill] sm:$0xff]  ;;  %v12694_v17 = vpack.c.bf16 %v12551_v6, %v12693_v9  ;;  %v12704_v6 = vld [vmem:[#allocation190_spill] sm:$0xff] }
 0x405   : > { %3837 = vmatprep.subr.bf16.mxu1 %v12643_v13  ;;  %v12692_v20 = vpack.c.bf16 %v12690_v12, %v12691_v3  ;;  %v12695_v13 = vld [vmem:[#allocation188_spill] sm:$0xff]  ;;  %v9745_v12 = vmul.f32 2.0, %v4072_v35 }
 0x406   : > { %3752 = vmatpush1.bf16.msra.mxu0 %v12646_v58  ;;  %v12697_v22 = vpack.c.bf16 %v12695_v13, %v12696_v47  ;;  %v12698_v58 = vld [vmem:[#allocation192_spill] sm:$0xff]  ;;  %v4073_v13 = vunpack.c.h.bf16 %v9692_v50  ;;  %v4075_v47 = vunpack.c.h.bf16 %v9696_v1 }
 0x407   : > { %3753 = vmatprep.subr.bf16.mxu0 %v12652_v29  ;;  %v12700_v43 = vpack.c.bf16 %v12698_v58, %v12699_v57  ;;  %v12705_v29 = vld [vmem:[#allocation185_spill] sm:$0xff] }
 0x408   : > { %3838 = vmatpush1.bf16.msra.mxu1 %v12649_v40  ;;  %v12701_v40 = vld [vmem:[#allocation187_spill] sm:$0xff]  ;;  %v12706_v34 = vpack.c.bf16 %v12704_v6, %v12705_v29 }
 0x409   : > { %3839 = vmatprep.subr.bf16.mxu1 %v12655_v8  ;;  %v12703_v61 = vpack.c.bf16 %v12701_v40, %v12702_v36  ;;  %v12708_v8 = vld [vmem:[#allocation12_spill] sm:$0xff]  ;;  %v4078_v36 = vunpack.c.l.bf16 %v9698_v59 }
 0x40a   : > { %3754 = vmatpush1.bf16.msra.mxu0 %v12658_v24  ;;  %v12709_v39 = vpack.c.bf16 %v12707_v46, %v12708_v8  ;;  %v12711_v24 = vld [vmem:[#allocation16_spill] sm:$0xff]  ;;  %v4079_v8 = vunpack.c.h.bf16 %v9698_v59 }
 0x40b   : > { %3755 = vmatprep.subr.bf16.mxu0 %v12664_v14  ;;  %v12712_v4 = vpack.c.bf16 %v12710_v54, %v12711_v24  ;;  %v12713_v14 = vpack.c.bf16 %v12569_v16, %v12568_v32  ;;  %v4402_v16 = vcombine.high %v9696_v1, %v9698_v59  ;;  %v4530_v32 = vld [vmem:[%s8753_s16 + $0x8] ss:$16 sps:$4 sm:$0xff]   ;;  %s4120_s16 = sshll.u32 %s381_s15, 4  ;;  %s9772_s16 = int_to_ptr.vmem [resolvable:$true] %s4120_s16 }
 0x40c   : > { %3840 = vmatpush1.bf16.msra.mxu1 %v12661_v21  ;;  %v9694_v21 = vld [vmem:[%s390_s8 + $0x10] sm:$0xff]  ;;  %s5069_s27 = scalar_lea.vmem %s9772_s16, 1024  ;;  %s5075_s8 = scalar_lea.vmem %s5074_s30, 2048 }
 0x40d   : > { %3841 = vmatprep.subr.bf16.mxu1 %v12666_v51  ;;  %v12715_v51 = vpack.c.bf16 %v12573_v55, %v12572_v0  ;;  %v4400_v52 = vcombine.high %v9692_v50, %v9694_v21  ;;  %v4399_v0 = vcombine.low %v9692_v50, %v9694_v21  ;;  %v12720_v55 = vmov 0   ;;  %p5070_p10 = scmp.ne.s32.totalorder %s9772_s16, %s5069_s27  ;;  %p5076_p0 = scmp.lt.s32.totalorder %s9772_s16, %s5074_s30 }
 0x40e   : > { %3756 = vmatpush1.bf16.msra.mxu0 %v12668_v42  ;;  %v12716_v42 = vpack.c.bf16 %v12576_v37, %v12575_v26  ;;  %v4401_v26 = vcombine.low %v9696_v1, %v9698_v59  ;;  %v3898_v37 = vld [vmem:[#allocation3] sm:$0xf]  ;;  %v4076_v40 = vunpack.c.l.bf16 %v9694_v21  ;;  %v4077_v46 = vunpack.c.h.bf16 %v9694_v21  ;;  %p5077_p1 = scmp.lt.s32.totalorder %s5075_s8, %s5069_s27 }
 0x40f   : > { %3757 = vmatprep.subr.bf16.mxu0 %v12674_v7  ;;  %5052 = vrcp.f32 %v3898_v37  ;;  %v3519_v7 = vrot.slane %v12722_v18, %v12724_v25  ;;  %p5071_p11 = pnand %p5070_p10, %p5236_p4 }
 0x410   : > { %3842 = vmatpush1.bf16.msra.mxu1 %v12671_v10  ;;  %v12723_v10 = vld [vmem:[#allocation236_spill] sm:$0xff]  ;;  %v4084_v21 = vmul.f32 2.0, %v4076_v40  ;;  %p5078_p2 = por %p5077_p1, %p5076_p0 }
 0x411   : > { %3843 = vmatprep.subr.bf16.mxu1 %v12677_v62  ;;  %v3523_v30 = vrot.slane %v12722_v18, %v12723_v10  ;;  %v3533_v2 = vmul.f32 0.0, %v3519_v7  ;;  %p5072_p13 = pneg %p5071_p11 }
 0x412   : > { %3758 = vmatpush1.bf16.msra.mxu0 %v12680_v33 }
 0x413   : > { %3759 = vmatprep.subr.bf16.mxu0 %v12686_v31  ;;  %v3534_v33 = vmul.f32 0.0, %v3523_v30  ;;  %p5079_p3 = pnand %p5078_p2, %p5072_p13 }
 0x414   : > { %3844 = vmatpush1.bf16.msra.mxu1 %v12683_v56 }
 0x415   : > { %3845 = vmatprep.subr.bf16.mxu1 %v12689_v11  ;;  %v9743_v11 = vstv %s4397_s11 }
 0x416   : > { %3760 = vmatpush1.bf16.msra.mxu0 %v12692_v20 }
 0x417   : > { %3761 = vmatprep.subr.bf16.mxu0 %v12697_v22 }
 0x418   : > { %3846 = vmatpush1.bf16.msra.mxu1 %v12694_v17  ;;  %v4074_v17 = vunpack.c.l.bf16 %v9696_v1 }
 0x419   : > { %3847 = vmatprep.subr.bf16.mxu1 %v12700_v43  ;;  %v5053_v62 = vpop.eup %5052 }
 0x41a   : > { %3762 = vmatpush1.bf16.msra.mxu0 %v12703_v61  ;;  %v3904_v53 = vrot.slane %v5053_v62, %v12721_v38  ;;  %v3912_v56 = vrot.slane %v5053_v62, %v12723_v10  ;;  %v3908_v48 = vrot.slane %v5053_v62, %v12724_v25  ;;  %v3916_v23 = vrot.slane %v5053_v62, %v12725_v19 }
 0x41b   : > { %3763 = vmatprep.subr.bf16.mxu0 %v12709_v39 }
 0x41c   : > { %3848 = vmatpush1.bf16.msra.mxu1 %v12706_v34 }
 0x41d   : > { %3849 = vmatprep.subr.bf16.mxu1 %v12712_v4 }
 0x41e   : > { %3764 = vmatpush1.bf16.msra.mxu0 %v12713_v14 }
 0x41f   : > { %3765 = vmatprep.subr.bf16.mxu0 %v12715_v51 }
 0x420   : > { %3850 = vmatpush1.bf16.msra.mxu1 %v12714_v44 }
 0x421   : > { %3851 = vmatprep.subr.bf16.mxu1 %v12716_v42 }
 0x422   : > { %3766 = vmatpush1.bf16.msra.mxu0 %v12718_v27  ;;  %v4083_v27 = vmul.f32 2.0, %v4075_v47 }
 0x423   : > { %3960 = vmatprep.subr.bf16.mxu0 %v4400_v52 }
 0x424   : > { %3852 = vmatpush1.bf16.msra.mxu1 %v12719_v5 }
 0x425   : > { %4003 = vmatprep.subr.bf16.mxu1 %v4402_v16  ;;  %3768 = vmatmul.mubr.bf16.vlgmr.msra.gmra.mrb[128].mxu0 %v4530_v32  ;;  %v4082_v16 = vmul.f32 2.0, %v4074_v17 }
 0x426   : > { %3961 = vmatpush1.bf16.msra.mxu0 %v4399_v0  ;;  %3992 = vmatprep.mubr.bf16.mxu0 %v12720_v55  ;;  %v4086_v0 = vmul.f32 2.0, %v4078_v36 }
 0x427   : > { %3854 = vmatmul.mubr.bf16.vlgmr.msra.gmra.mrb[128].mxu1 %v4530_v32  ;;  %v4081_v32 = vmul.f32 2.0, %v4073_v13 }
 0x428   : > { %4004 = vmatpush1.bf16.msra.mxu1 %v4401_v26  ;;  %4035 = vmatprep.mubr.bf16.mxu1 %v12720_v55  ;;  %v4085_v55 = vmul.f32 2.0, %v4077_v46 }
 0x42d   : > { %4403 = vmatmul.mubr.msk.bf16.vlgmr.msra.gmra.mrb[132].mxu0 %vm3956_vm3, %v4537_v28 }
 0x42f   : > { %4404 = vmatmul.mubr.msk.bf16.vlgmr.msra.gmra.mrb[132].mxu1 %vm3956_vm3, %v4537_v28  ;;  %v4087_v28 = vmul.f32 2.0, %v4079_v8 }
 0x4f8   : > { %v3769_v31 = vpop.f32.mrb[128].mxu0 }
 0x4f9   : > { %v3864_v3 = vadd.f32 %v3769_v31, %v3532_v60  ;;  %v3771_v9 = vpop.f32.mrb[129].mxu0 }
 0x4fa   : > { %v3855_v20 = vpop.f32.mrb[128].mxu1  ;;  %v3865_v58 = vadd.f32 %v3771_v9, %v3533_v2  ;;  %v3773_v43 = vpop.f32.mrb[130].mxu0 }
 0x4fb   : > { %v3866_v22 = vadd.f32 %v3855_v20, %v3534_v33  ;;  %v3857_v57 = vpop.f32.mrb[129].mxu1  ;;  %v3868_v6 = vadd.f32 %v3773_v43, %v3532_v60  ;;  %v3775_v34 = vpop.f32.mrb[131].mxu0  ;;  %v3921_v39 = vmul.f32 %v3904_v53, %v3864_v3 }
 0x4fc   : > { %v3867_v61 = vadd.f32 %v3857_v57, %v3535_v15  ;;  %v3859_v29 = vpop.f32.mrb[130].mxu1  ;;  %v3869_v4 = vadd.f32 %v3775_v34, %v3533_v2  ;;  %v3922_v1 = vmul.f32 %v3908_v48, %v3865_v58 }
 0x4fd   : > { %v3923_v54 = vmul.f32 %v3912_v56, %v3866_v22  ;;  %v3870_v24 = vadd.f32 %v3859_v29, %v3534_v33  ;;  %v3861_v50 = vpop.f32.mrb[131].mxu1  ;;  %v3925_v44 = vmul.f32 %v3904_v53, %v3868_v6  ;;  %v4047_v5 = vmul.f32 %v4046_v63, %v3921_v39 }
 0x4fe   : > { %v3924_v14 = vmul.f32 %v3916_v23, %v3867_v61  ;;  %v3871_v51 = vadd.f32 %v3861_v50, %v3535_v15  ;;  %v3926_v42 = vmul.f32 %v3908_v48, %v3869_v4  ;;  %v4048_v45 = vmul.f32 %v4046_v63, %v3922_v1 }
 0x4ff   : > { %v3927_v52 = vmul.f32 %v3912_v56, %v3870_v24  ;;  %v4049_v26 = vmul.f32 %v4046_v63, %v3923_v54  ;;  %v4051_v30 = vmul.f32 %v4046_v63, %v3925_v44 }
 0x500   : > { %v3928_v49 = vmul.f32 %v3916_v23, %v3871_v51  ;;  %v3994_v59 = vpop.f32.mrb[132].mxu0  ;;  %v4050_v10 = vmul.f32 %v4046_v63, %v3924_v14  ;;  %v4052_v35 = vmul.f32 %v4046_v63, %v3926_v42 }
 0x501   : > { %v4056_v37 = vmul.f32 %v9743_v11, %v3994_v59  ;;  %v3996_v18 = vpop.f32.mrb[133].mxu0  ;;  %v4053_v62 = vmul.f32 %v4046_v63, %v3927_v52 }
 0x502   : > { %v4037_v38 = vpop.f32.mrb[132].mxu1  ;;  %v4057_v7 = vmul.f32 %v9743_v11, %v3996_v18  ;;  %v3998_v41 = vpop.f32.mrb[134].mxu0  ;;  %v4054_v48 = vmul.f32 %v4046_v63, %v3928_v49 }
 0x503   : > { %v4058_v25 = vmul.f32 %v9743_v11, %v4037_v38  ;;  %v4039_v19 = vpop.f32.mrb[133].mxu1  ;;  %v4064_v60 = vadd.f32 %v4056_v37, %v4047_v5  ;;  %v4060_v2 = vmul.f32 %v9743_v11, %v3998_v41  ;;  %v4000_v56 = vpop.f32.mrb[135].mxu0 }
 0x504   : > { %v4059_v33 = vmul.f32 %v9743_v11, %v4039_v19  ;;  %v4041_v53 = vpop.f32.mrb[134].mxu1  ;;  %v4065_v31 = vadd.f32 %v4057_v7, %v4048_v45  ;;  %v4061_v3 = vmul.f32 %v9743_v11, %v4000_v56 }
 0x505   : > { %v4066_v15 = vadd.f32 %v4058_v25, %v4049_v26  ;;  %v4062_v23 = vmul.f32 %v9743_v11, %v4041_v53  ;;  %v4043_v20 = vpop.f32.mrb[135].mxu1  ;;  %v4088_v9 = vadd.f32 %v9745_v12, %v4064_v60  ;;  %v4068_v13 = vadd.f32 %v4060_v2, %v4051_v30 }
 0x506   : > { %v4067_v17 = vadd.f32 %v4059_v33, %v4050_v10  ;;  %v4063_v47 = vmul.f32 %v9743_v11, %v4043_v20  ;;  %v4089_v58 = vadd.f32 %v4081_v32, %v4065_v31  ;;  %v4069_v63 = vadd.f32 %v4061_v3, %v4052_v35 }
 0x507   : > { %v4090_v22 = vadd.f32 %v4082_v16, %v4066_v15  ;;  %v4070_v57 = vadd.f32 %v4062_v23, %v4053_v62  ;;  %4096 = vst [vmem:[%s381_s15] sm:$0xff] %v4088_v9  ;;  %v4092_v40 = vadd.f32 %v4084_v21, %v4068_v13 }
 0x508   : > { %v4091_v43 = vadd.f32 %v4083_v27, %v4067_v17  ;;  %v4071_v36 = vadd.f32 %v4063_v47, %v4054_v48  ;;  %4097 = vst [vmem:[%s381_s15 + $0x8] sm:$0xff] %v4089_v58  ;;  %v4093_v61 = vadd.f32 %v4085_v55, %v4069_v63 }
 0x509   : > { %4098 = vst [vmem:[%s381_s15 + $0x10] sm:$0xff] %v4090_v22  ;;  %v4094_v12 = vadd.f32 %v4086_v0, %v4070_v57  ;;  %4100 = vst [vmem:[%s381_s15 + $0x20] sm:$0xff] %v4092_v40 }
 0x50a   : > { %4099 = vst [vmem:[%s381_s15 + $0x18] sm:$0xff] %v4091_v43  ;;  %v4095_v11 = vadd.f32 %v4087_v28, %v4071_v36  ;;  %4101 = vst [vmem:[%s381_s15 + $0x28] sm:$0xff] %v4093_v61 }
 0x50b   : > { %4102 = vst [vmem:[%s381_s15 + $0x30] sm:$0xff] %v4094_v12 }
 0x50c   : > { %4103 = vst [vmem:[%s381_s15 + $0x38] sm:$0xff] %v4095_v11 }
 0x50d   : > { %5082 = shalt.err (!%p5079_p3)
}
 0x50e   : > { %s5083_s18 = scalar_lea.hbm %s9770_s24, 1024  ;;  %s5087_s13 = scalar_lea.hbm %s9828_s6, 2048 }
 0x50f   : > { %p5084_p5 = scmp.ne.s32.totalorder %s9770_s24, %s5083_s18  ;;  %p5088_p9 = scmp.lt.u32.totalorder %s9770_s24, %s9828_s6 }
 0x510   : > { %p5089_p12 = scmp.lt.u32.totalorder %s5087_s13, %s5083_s18  ;;  %p5091_p11 = scmp.lt.u32.totalorder %s5083_s18, %s9770_s24 }
 0x511   : > { %p5085_p6 = pnand %p5084_p5, %p5236_p4 }
 0x512   : > { %p5090_p10 = por %p5089_p12, %p5088_p9 }
 0x513   : > { %p5086_p7 = pneg %p5085_p6 }
 0x514   : > { %p5092_p13 = por %p5091_p11, %p5090_p10 }
 0x516   : > { %p5093_p0 = pnand %p5092_p13, %p5086_p7 }
 0x518   : > { %5096 = shalt.err (!%p5093_p0)
}
 0x519   : > { %s5159_s17 = smov 512   ;;  %s5160_s19 = smov 32  }
 0x51a   : > { %4427 = dma.vmem_to_hbm [thread:$0]  (%p5236_p4), %s9772_s16, 1024, %s9770_s24, %s9776_s20, %s5159_s17, %s5159_s17, %s5160_s19  }
 0x51b PF: > { %p4439_p1 = scmp.ge.s32.totalorder %s5151_s26, 2  ;;  %s4135_s27 = sand.u32 1, %s5131_s21  }
 0x51c   : > { %s4136_s28 = scalar_lea.sflag [#allocation6], %s4135_s27 }
 0x51d   : > { %p4434_p2 = pnand %p4439_p1, %p5243_p8 }
 0x51f   : > { %5126 = dma.done.wait (!%p4434_p2), %s4136_s28, 1024  }
 0x520   : > { %5128 = vsyncadd (!%p4434_p2), %s4136_s28, 4294966272  ;;  %s20_s26 = sadd.s32 1, %s5151_s26   ;;  %s12726_s21 = smov %s5135_s22 }
 0x521   : > { %p17_p3 = scmp.ge.s32.totalorder %s20_s26, 4   ;;  %s12727_s22 = smov %s5139_s23 }
 0x522   : > { %s12728_s23 = smov %s5249_s10  ;;  %s12729_s24 = smov %s5147_s25 }
 0x523   : > { %s12730_s25 = smov %s12732_s29  ;;  %19 = sbr.rel (!%p17_p3) target bundleno = 5 (0x5), region = 104 }
 0x52a   :  { %4141 = vsyncpa [#allocation6], 1 }
 0x52b   :  { %4143 = vsyncpa [#allocation6 + $0x1], 1 }
 0x52c   :  { %4144 = vsyncpa [#allocation7], 1 }
 0x52d   :  { %4146 = vsyncpa [#allocation7 + $0x1], 1 }

</bundles_post_ra>
